<compile_context>
chip_gen: v5e
topology: v5e:2x2
jax: 0.10.0
libtpu: 0.0.40
codegen_flags: <defaults>
</compile_context>

<pallas_src>
import functools

import jax
import jax.numpy as jnp
from jax.experimental import pallas as pl
from jax.experimental.pallas import tpu as pltpu


# ---------------------------------------------------------------------------
# 3x3 "same" convolution (stride 1).  One fused bf16 im2col matmul per tile.
# Grid: (batch, H/TH).  Epilogues: "none", "relu", "fuse" (out*enc + resid).
# ---------------------------------------------------------------------------
def _conv3x3_kernel(*refs, epilogue):
    if epilogue == "fuse":
        x_ref, w_ref, b_ref, enc_ref, res_ref, o_ref, patch_ref = refs
    else:
        x_ref, w_ref, b_ref, o_ref, patch_ref = refs
        enc_ref = res_ref = None

    _, TH, W, Cout = o_ref.shape
    Cin = x_ref.shape[3]
    ih = pl.program_id(1)
    row0 = pl.multiple_of(ih * TH, TH)

    # im2col: pack the 9 shifted taps into a (TH*W, 9*Cin) patch in VMEM.
    for dh in range(3):
        for dw in range(3):
            t = dh * 3 + dw
            tap = x_ref[0, pl.ds(row0 + dh, TH), pl.ds(dw, W), :]
            patch_ref[:, t * Cin:(t + 1) * Cin] = tap.reshape(TH * W, Cin)

    patch = patch_ref[...].astype(jnp.bfloat16)          # single K=9*Cin matmul
    acc = jnp.dot(patch, w_ref[...], preferred_element_type=jnp.float32)
    out = acc + b_ref[...]
    if epilogue == "relu":
        out = jnp.maximum(out, 0.0)
    out = out.reshape(TH, W, Cout)
    if epilogue == "fuse":                               # enc * conv + residual
        out = out * enc_ref[0] + res_ref[0]
    o_ref[0] = out


def _pick_tile_h(H, B):
    divisors = [t for t in (8, 4, 2, 1) if H % t == 0]
    for t in divisors:                     # largest tile giving >= 8 grid steps
        if B * (H // t) >= 8:
            return t
    return divisors[0]


def conv3x3_same(x_nhwc, w_oihw, b, *, epilogue="none", enc=None, resid=None):
    B, H, W, Cin = x_nhwc.shape
    Cout = w_oihw.shape[0]
    th = _pick_tile_h(H, B)
    nh = H // th

    # TODO(synk): the 1-pixel halo pad stays a glue-side jnp.pad (one extra HBM
    # pass per conv); an Element-indexed overlapping BlockSpec would remove it
    # and also bound per-step VMEM for large H,W on v7x.
    xp = jnp.pad(x_nhwc, ((0, 0), (1, 1), (1, 1), (0, 0)))
    # weights: OIHW -> (kh, kw, ci, o) -> (9*Cin, Cout), bf16 for the MXU.
    w_mat = jnp.transpose(w_oihw, (2, 3, 1, 0)).reshape(9 * Cin, Cout)
    w_mat = w_mat.astype(jnp.bfloat16)
    b2 = b.reshape(1, Cout).astype(jnp.float32)

    in_specs = [
        pl.BlockSpec((1, H + 2, W + 2, Cin), lambda bb, ih: (bb, 0, 0, 0)),
        pl.BlockSpec((9 * Cin, Cout), lambda bb, ih: (0, 0)),
        pl.BlockSpec((1, Cout), lambda bb, ih: (0, 0)),
    ]
    args = [xp, w_mat, b2]
    if epilogue == "fuse":
        assert enc is not None and resid is not None
        assert enc.shape[-1] == Cout and resid.shape[-1] == Cout
        tile = pl.BlockSpec((1, th, W, Cout), lambda bb, ih: (bb, ih, 0, 0))
        in_specs += [tile, tile]
        args += [enc, resid]

    kern = functools.partial(_conv3x3_kernel, epilogue=epilogue)
    return pl.pallas_call(
        kern,
        out_shape=jax.ShapeDtypeStruct((B, H, W, Cout), jnp.float32),
        grid_spec=pltpu.PrefetchScalarGridSpec(
            num_scalar_prefetch=0,
            grid=(B, nh),
            in_specs=in_specs,
            out_specs=pl.BlockSpec((1, th, W, Cout), lambda bb, ih: (bb, ih, 0, 0)),
            scratch_shapes=[pltpu.VMEM((th * W, 9 * Cin), jnp.float32)],
        ),
        compiler_params=pltpu.CompilerParams(
            dimension_semantics=("parallel", "parallel")),
    )(*args)


# ---------------------------------------------------------------------------
# LRTExtract fused with the ResBlock's residual arithmetic: the kernel takes
# one or two inputs (effective input = a +/- b), computes the three GAPs, the
# 1x1 convs, the sigmoids and the rank-1 outer product, and optionally emits
# the combined input so no standalone elementwise XLA pass is needed.
# Output is in the "natural" (h, w, c) order; the PyTorch .view([B,C,H,W])
# re-indexing is applied glue-side.
# ---------------------------------------------------------------------------
def _lrte_kernel(*refs, num_in, subtract, emit_comb):
    pos = 0
    a_ref = refs[pos]; pos += 1
    b_ref = None
    if num_in == 2:
        b_ref = refs[pos]; pos += 1
    wct_ref = refs[pos]; pos += 1
    bc_ref = refs[pos]; pos += 1
    sc_ref = refs[pos]; pos += 1
    nat_ref = refs[pos]; pos += 1
    comb_ref = refs[pos] if emit_comb else None

    x = a_ref[0]                                     # (H, W, F)
    if num_in == 2:
        x = x - b_ref[0] if subtract else x + b_ref[0]
    if emit_comb:
        comb_ref[0] = x                              # fused residual output

    m_hw = jnp.mean(x, axis=2, keepdims=True)        # mean over C   -> (H, W, 1)
    m_h = jnp.mean(m_hw, axis=1, keepdims=True)      # mean over C,W -> (H, 1, 1)
    m_w = jnp.mean(m_hw, axis=0, keepdims=True)      # mean over C,H -> (1, W, 1)
    m_c = jnp.mean(jnp.mean(x, axis=0), axis=0, keepdims=True)      # (1, F)

    w_h = sc_ref[0]
    b_h = sc_ref[1]
    w_w = sc_ref[2]
    b_w = sc_ref[3]

    def sig(z):  # exp on the EUP; approx reciprocal also on the EUP
        return pl.reciprocal(1.0 + jnp.exp(-z), approx=True)

    sig_h = sig(w_h * m_h + b_h)                     # (H, 1, 1)
    sig_w = sig(w_w * m_w + b_w)                     # (1, W, 1)
    c_lin = jnp.dot(m_c, wct_ref[...],
                    preferred_element_type=jnp.float32) + bc_ref[...]
    sig_c = sig(c_lin)[None]                         # (1, 1, F)

    nat_ref[0] = (sig_h * sig_w) * sig_c             # rank-1 reconstruction


def lrt_extract(inputs, lp, *, subtract=False, emit_comb=False):
    B, H, W, F = inputs[0].shape
    wc_t = jnp.transpose(lp["wc"]).astype(jnp.float32)          # (F_in, F_out)
    bc = lp["bc"].reshape(1, F).astype(jnp.float32)
    scal = jnp.stack([lp["wh"], lp["bh"],
                      lp["ww"], lp["bw"]]).astype(jnp.float32)

    blk = pl.BlockSpec((1, H, W, F), lambda b_: (b_, 0, 0, 0))
    in_specs = [blk] * len(inputs) + [
        pl.BlockSpec((F, F), lambda b_: (0, 0)),
        pl.BlockSpec((1, F), lambda b_: (0, 0)),
        pl.BlockSpec(memory_space=pltpu.MemorySpace.SMEM),
    ]
    shp = jax.ShapeDtypeStruct((B, H, W, F), jnp.float32)
    if emit_comb:
        out_shape = (shp, shp)
        out_specs = [blk, blk]
    else:
        out_shape = shp
        out_specs = blk

    kern = functools.partial(_lrte_kernel, num_in=len(inputs),
                             subtract=subtract, emit_comb=emit_comb)
    return pl.pallas_call(
        kern,
        out_shape=out_shape,
        grid_spec=pltpu.PrefetchScalarGridSpec(
            num_scalar_prefetch=0,
            grid=(B,),
            in_specs=in_specs,
            out_specs=out_specs,
        ),
        compiler_params=pltpu.CompilerParams(
            dimension_semantics=("parallel",)),
    )(*inputs, wc_t, bc, scal)


# ---------------------------------------------------------------------------
# conv(cat([cumsum_j xup_j]_r), Wcat) == conv(cat([xup_j]_j), Wcum) with
# Wcum_j = sum_{r >= j} Wcat_r : avoids the O(rank^2) incremental concat and
# the running-sum adds of the PyTorch LRTE() loop.
# ---------------------------------------------------------------------------
def _cumulative_concat_weights(w_oihw, rank):
    Fo, FiR, kh, kw = w_oihw.shape
    Fi = FiR // rank
    w_r = w_oihw.reshape(Fo, rank, Fi, kh, kw)
    w_cum = jnp.flip(jnp.cumsum(jnp.flip(w_r, axis=1), axis=1), axis=1)
    return w_cum.reshape(Fo, FiR, kh, kw)


# ---------------------------------------------------------------------------
# Full LowRankTensor forward
# ---------------------------------------------------------------------------
def low_rank_tensor_forward(x_nchw, params, rank):
    x = jnp.transpose(x_nchw, (0, 2, 3, 1))              # NCHW -> NHWC
    B, H, W, _ = x.shape
    Fn = params["conv2_w"].shape[0]

    # encoding(): same_pad -> conv2 -> relu -> same_pad -> enc
    t = conv3x3_same(x, params["conv2_w"], params["conv2_b"], epilogue="relu")
    enc = conv3x3_same(t, params["enc_w"], params["enc_b"])

    # TODO(synk): the natural (H*W, C) -> .view(B, C, H, W) re-indexing of each
    # LRTExtract output stays an XLA reshape+transpose; doing it in-kernel
    # would need a vectorized gather that Mosaic does not lower cleanly.
    def relayout(nat):
        return jnp.transpose(nat.reshape(B, Fn, H, W), (0, 2, 3, 1))

    lrte = params["lrte"]
    xups = []

    # ResBlock 0
    xup = relayout(lrt_extract([enc], lrte[0]))
    xups.append(xup)
    carry = None
    if rank > 1:
        xdn_nat, xres = lrt_extract([enc, xup], lrte[1],
                                    subtract=True, emit_comb=True)
        carry = (relayout(xdn_nat), xres)

    for r in range(1, rank):
        a, b = carry                                     # block input = a + b
        need_next = r < rank - 1
        res = lrt_extract([a, b], lrte[2 * r], emit_comb=need_next)
        if need_next:
            xup_nat, comb = res
        else:
            xup_nat, comb = res, None
        xup_r = relayout(xup_nat)
        xups.append(xup_r)
        if need_next:
            # The second LRTExtract of the *last* ResBlock is skipped -- its
            # result is discarded by the PyTorch LRTE() loop anyway.
            xdn_nat, xres = lrt_extract([comb, xup_r], lrte[2 * r + 1],
                                        subtract=True, emit_comb=True)
            carry = (relayout(xdn_nat), xres)

    cat = xups[0] if rank == 1 else jnp.concatenate(xups, axis=-1)
    wcum = _cumulative_concat_weights(params["concat_w"], rank)
    # con_cat conv with fused epilogue: conv_out * enc + input
    out = conv3x3_same(cat, wcum, params["concat_b"],
                       epilogue="fuse", enc=enc, resid=x)
    return jnp.transpose(out, (0, 3, 1, 2))              # NHWC -> NCHW


# ---------------------------------------------------------------------------
# Deterministic synthetic parameter init (shapes follow the torch module).
# ---------------------------------------------------------------------------
def init_params(key, filter_num, rank):
    F = filter_num
    keys = jax.random.split(key, 6 + 2 * rank)

    def nrm(k, shape, scale):
        return jax.random.normal(k, shape, jnp.float32) * scale

    p = {
        "conv2_w": nrm(keys[0], (F, F, 3, 3), 1.0 / (F * 9) ** 0.5),
        "conv2_b": nrm(keys[1], (F,), 0.05),
        "enc_w": nrm(keys[2], (F, F, 3, 3), 1.0 / (F * 9) ** 0.5),
        "enc_b": nrm(keys[3], (F,), 0.05),
        "concat_w": nrm(keys[4], (F, F * rank, 3, 3), 1.0 / (F * rank * 9) ** 0.5),
        "concat_b": nrm(keys[5], (F,), 0.05),
    }
    # NOTE: the torch module also builds `self.dec` (Conv2d F->in_channel) but
    # never uses it in forward(); it is intentionally omitted here.
    lrte = []
    for i in range(2 * rank):
        kk = jax.random.split(keys[6 + i], 6)
        lrte.append(dict(
            wh=nrm(kk[0], (), 1.0), bh=nrm(kk[1], (), 0.1),
            ww=nrm(kk[2], (), 1.0), bw=nrm(kk[3], (), 0.1),
            wc=nrm(kk[4], (F, F), 1.0 / F ** 0.5),       # conv_cgap 1x1 (O, I)
            bc=nrm(kk[5], (F,), 0.05),
        ))
    p["lrte"] = lrte
    return p


if __name__ == "__main__":
    # Small shapes: input channels must equal filter_num for the residual add.
    B, FNUM, H, W = 2, 32, 16, 16
    RANK = 2

    key = jax.random.PRNGKey(0)
    kx, kp = jax.random.split(key)
    x_nchw = jax.random.normal(kx, (B, FNUM, H, W), jnp.float32)
    params = init_params(kp, FNUM, RANK)

    fwd = jax.jit(functools.partial(low_rank_tensor_forward, rank=RANK))
    out = fwd(x_nchw, params)
    out = jax.block_until_ready(out)

    assert out.shape == (B, FNUM, H, W), out.shape
    assert bool(jnp.all(jnp.isfinite(out)))
    print("KERNEL_OK")
</pallas_src>

<mosaic_0001>
module attributes {stable_mosaic.version = 11 : i64} {
  func.func @_conv3x3_kernel(%arg0: i32, %arg1: i32, %arg2: memref<1x18x18x32xf32, #tpu.memory_space<vmem>>, %arg3: memref<288x32xbf16, #tpu.memory_space<vmem>>, %arg4: memref<1x32xf32, #tpu.memory_space<vmem>>, %arg5: memref<1x4x16x32xf32, #tpu.memory_space<vmem>>, %arg6: memref<64x288xf32, #tpu.memory_space<vmem>>) attributes {dimension_semantics = [#tpu.dimension_semantics<parallel>, #tpu.dimension_semantics<parallel>], iteration_bounds = array<i64: 2, 4>, scalar_prefetch = 0 : i64, scratch_operands = 1 : i64, tpu.core_type = #tpu.core_type<tc>, window_params = [{transform_indices = @transform_0, window_bounds = array<i64: 1, 18, 18, 32>}, {pipeline_mode = #tpu.pipeline_mode<synchronous>, transform_indices = @transform_1, window_bounds = array<i64: 288, 32>}, {pipeline_mode = #tpu.pipeline_mode<synchronous>, transform_indices = @transform_2, window_bounds = array<i64: 1, 32>}, {transform_indices = @transform_3, window_bounds = array<i64: 1, 4, 16, 32>}]} {
    %c4_i32 = arith.constant 4 : i32
    %0 = arith.muli %arg1, %c4_i32 : i32
    %1 = tpu.assume_multiple %0, 4 : i32
    %c0_i32 = arith.constant 0 : i32
    %2 = arith.addi %1, %c0_i32 : i32
    %c0 = arith.constant 0 : index
    %3 = arith.index_cast %2 : i32 to index
    %c0_0 = arith.constant 0 : index
    %c0_1 = arith.constant 0 : index
    %4 = vector.load %arg2[%c0, %3, %c0_0, %c0_1] : memref<1x18x18x32xf32, #tpu.memory_space<vmem>>, vector<1x4x16x32xf32>
    %5 = vector.shape_cast %4 : vector<1x4x16x32xf32> to vector<4x16x32xf32>
    %6 = vector.shape_cast %5 : vector<4x16x32xf32> to vector<64x32xf32>
    %c0_2 = arith.constant 0 : index
    %c0_3 = arith.constant 0 : index
    %7 = vector.load %arg6[%c0_2, %c0_3] : memref<64x288xf32, #tpu.memory_space<vmem>>, vector<64x32xf32>
    tpu.vector_store %arg6[%c0_2, %c0_3], %6 {strides = array<i32>} : memref<64x288xf32, #tpu.memory_space<vmem>>, vector<64x32xf32>,
    %c0_i32_4 = arith.constant 0 : i32
    %8 = arith.addi %1, %c0_i32_4 : i32
    %c0_5 = arith.constant 0 : index
    %9 = arith.index_cast %8 : i32 to index
    %c1 = arith.constant 1 : index
    %c0_6 = arith.constant 0 : index
    %10 = vector.load %arg2[%c0_5, %9, %c1, %c0_6] : memref<1x18x18x32xf32, #tpu.memory_space<vmem>>, vector<1x4x16x32xf32>
    %11 = vector.shape_cast %10 : vector<1x4x16x32xf32> to vector<4x16x32xf32>
    %12 = vector.shape_cast %11 : vector<4x16x32xf32> to vector<64x32xf32>
    %c0_7 = arith.constant 0 : index
    %c32 = arith.constant 32 : index
    %13 = vector.load %arg6[%c0_7, %c32] : memref<64x288xf32, #tpu.memory_space<vmem>>, vector<64x32xf32>
    tpu.vector_store %arg6[%c0_7, %c32], %12 {strides = array<i32>} : memref<64x288xf32, #tpu.memory_space<vmem>>, vector<64x32xf32>,
    %c0_i32_8 = arith.constant 0 : i32
    %14 = arith.addi %1, %c0_i32_8 : i32
    %c0_9 = arith.constant 0 : index
    %15 = arith.index_cast %14 : i32 to index
    %c2 = arith.constant 2 : index
    %c0_10 = arith.constant 0 : index
    %16 = vector.load %arg2[%c0_9, %15, %c2, %c0_10] : memref<1x18x18x32xf32, #tpu.memory_space<vmem>>, vector<1x4x16x32xf32>
    %17 = vector.shape_cast %16 : vector<1x4x16x32xf32> to vector<4x16x32xf32>
    %18 = vector.shape_cast %17 : vector<4x16x32xf32> to vector<64x32xf32>
    %c0_11 = arith.constant 0 : index
    %c64 = arith.constant 64 : index
    %19 = vector.load %arg6[%c0_11, %c64] : memref<64x288xf32, #tpu.memory_space<vmem>>, vector<64x32xf32>
    tpu.vector_store %arg6[%c0_11, %c64], %18 {strides = array<i32>} : memref<64x288xf32, #tpu.memory_space<vmem>>, vector<64x32xf32>,
    %c1_i32 = arith.constant 1 : i32
    %20 = arith.addi %1, %c1_i32 : i32
    %c0_12 = arith.constant 0 : index
    %21 = arith.index_cast %20 : i32 to index
    %c0_13 = arith.constant 0 : index
    %c0_14 = arith.constant 0 : index
    %22 = vector.load %arg2[%c0_12, %21, %c0_13, %c0_14] : memref<1x18x18x32xf32, #tpu.memory_space<vmem>>, vector<1x4x16x32xf32>
    %23 = vector.shape_cast %22 : vector<1x4x16x32xf32> to vector<4x16x32xf32>
    %24 = vector.shape_cast %23 : vector<4x16x32xf32> to vector<64x32xf32>
    %c0_15 = arith.constant 0 : index
    %c96 = arith.constant 96 : index
    %25 = vector.load %arg6[%c0_15, %c96] : memref<64x288xf32, #tpu.memory_space<vmem>>, vector<64x32xf32>
    tpu.vector_store %arg6[%c0_15, %c96], %24 {strides = array<i32>} : memref<64x288xf32, #tpu.memory_space<vmem>>, vector<64x32xf32>,
    %c1_i32_16 = arith.constant 1 : i32
    %26 = arith.addi %1, %c1_i32_16 : i32
    %c0_17 = arith.constant 0 : index
    %27 = arith.index_cast %26 : i32 to index
    %c1_18 = arith.constant 1 : index
    %c0_19 = arith.constant 0 : index
    %28 = vector.load %arg2[%c0_17, %27, %c1_18, %c0_19] : memref<1x18x18x32xf32, #tpu.memory_space<vmem>>, vector<1x4x16x32xf32>
    %29 = vector.shape_cast %28 : vector<1x4x16x32xf32> to vector<4x16x32xf32>
    %30 = vector.shape_cast %29 : vector<4x16x32xf32> to vector<64x32xf32>
    %c0_20 = arith.constant 0 : index
    %c128 = arith.constant 128 : index
    %31 = vector.load %arg6[%c0_20, %c128] : memref<64x288xf32, #tpu.memory_space<vmem>>, vector<64x32xf32>
    tpu.vector_store %arg6[%c0_20, %c128], %30 {strides = array<i32>} : memref<64x288xf32, #tpu.memory_space<vmem>>, vector<64x32xf32>,
    %c1_i32_21 = arith.constant 1 : i32
    %32 = arith.addi %1, %c1_i32_21 : i32
    %c0_22 = arith.constant 0 : index
    %33 = arith.index_cast %32 : i32 to index
    %c2_23 = arith.constant 2 : index
    %c0_24 = arith.constant 0 : index
    %34 = vector.load %arg2[%c0_22, %33, %c2_23, %c0_24] : memref<1x18x18x32xf32, #tpu.memory_space<vmem>>, vector<1x4x16x32xf32>
    %35 = vector.shape_cast %34 : vector<1x4x16x32xf32> to vector<4x16x32xf32>
    %36 = vector.shape_cast %35 : vector<4x16x32xf32> to vector<64x32xf32>
    %c0_25 = arith.constant 0 : index
    %c160 = arith.constant 160 : index
    %37 = vector.load %arg6[%c0_25, %c160] : memref<64x288xf32, #tpu.memory_space<vmem>>, vector<64x32xf32>
    tpu.vector_store %arg6[%c0_25, %c160], %36 {strides = array<i32>} : memref<64x288xf32, #tpu.memory_space<vmem>>, vector<64x32xf32>,
    %c2_i32 = arith.constant 2 : i32
    %38 = arith.addi %1, %c2_i32 : i32
    %c0_26 = arith.constant 0 : index
    %39 = arith.index_cast %38 : i32 to index
    %c0_27 = arith.constant 0 : index
    %c0_28 = arith.constant 0 : index
    %40 = vector.load %arg2[%c0_26, %39, %c0_27, %c0_28] : memref<1x18x18x32xf32, #tpu.memory_space<vmem>>, vector<1x4x16x32xf32>
    %41 = vector.shape_cast %40 : vector<1x4x16x32xf32> to vector<4x16x32xf32>
    %42 = vector.shape_cast %41 : vector<4x16x32xf32> to vector<64x32xf32>
    %c0_29 = arith.constant 0 : index
    %c192 = arith.constant 192 : index
    %43 = vector.load %arg6[%c0_29, %c192] : memref<64x288xf32, #tpu.memory_space<vmem>>, vector<64x32xf32>
    tpu.vector_store %arg6[%c0_29, %c192], %42 {strides = array<i32>} : memref<64x288xf32, #tpu.memory_space<vmem>>, vector<64x32xf32>,
    %c2_i32_30 = arith.constant 2 : i32
    %44 = arith.addi %1, %c2_i32_30 : i32
    %c0_31 = arith.constant 0 : index
    %45 = arith.index_cast %44 : i32 to index
    %c1_32 = arith.constant 1 : index
    %c0_33 = arith.constant 0 : index
    %46 = vector.load %arg2[%c0_31, %45, %c1_32, %c0_33] : memref<1x18x18x32xf32, #tpu.memory_space<vmem>>, vector<1x4x16x32xf32>
    %47 = vector.shape_cast %46 : vector<1x4x16x32xf32> to vector<4x16x32xf32>
    %48 = vector.shape_cast %47 : vector<4x16x32xf32> to vector<64x32xf32>
    %c0_34 = arith.constant 0 : index
    %c224 = arith.constant 224 : index
    %49 = vector.load %arg6[%c0_34, %c224] : memref<64x288xf32, #tpu.memory_space<vmem>>, vector<64x32xf32>
    tpu.vector_store %arg6[%c0_34, %c224], %48 {strides = array<i32>} : memref<64x288xf32, #tpu.memory_space<vmem>>, vector<64x32xf32>,
    %c2_i32_35 = arith.constant 2 : i32
    %50 = arith.addi %1, %c2_i32_35 : i32
    %c0_36 = arith.constant 0 : index
    %51 = arith.index_cast %50 : i32 to index
    %c2_37 = arith.constant 2 : index
    %c0_38 = arith.constant 0 : index
    %52 = vector.load %arg2[%c0_36, %51, %c2_37, %c0_38] : memref<1x18x18x32xf32, #tpu.memory_space<vmem>>, vector<1x4x16x32xf32>
    %53 = vector.shape_cast %52 : vector<1x4x16x32xf32> to vector<4x16x32xf32>
    %54 = vector.shape_cast %53 : vector<4x16x32xf32> to vector<64x32xf32>
    %c0_39 = arith.constant 0 : index
    %c256 = arith.constant 256 : index
    %55 = vector.load %arg6[%c0_39, %c256] : memref<64x288xf32, #tpu.memory_space<vmem>>, vector<64x32xf32>
    tpu.vector_store %arg6[%c0_39, %c256], %54 {strides = array<i32>} : memref<64x288xf32, #tpu.memory_space<vmem>>, vector<64x32xf32>,
    %c0_40 = arith.constant 0 : index
    %c0_41 = arith.constant 0 : index
    %56 = vector.load %arg6[%c0_40, %c0_41] : memref<64x288xf32, #tpu.memory_space<vmem>>, vector<64x288xf32>
    %57 = arith.truncf %56 : vector<64x288xf32> to vector<64x288xbf16>
    %c0_42 = arith.constant 0 : index
    %c0_43 = arith.constant 0 : index
    %58 = vector.load %arg3[%c0_42, %c0_43] : memref<288x32xbf16, #tpu.memory_space<vmem>>, vector<288x32xbf16>
    %cst = arith.constant dense<0.000000e+00> : vector<64x32xf32>
    %59 = tpu.matmul %57, %58, %cst {dimension_numbers = #tpu.dot_dimension_numbers<[1], [0], [0], [1], [0, 0, 1, 1], [], []>} : vector<64x288xbf16>, vector<288x32xbf16>, vector<64x32xf32> -> vector<64x32xf32>
    %c0_44 = arith.constant 0 : index
    %c0_45 = arith.constant 0 : index
    %60 = vector.load %arg4[%c0_44, %c0_45] : memref<1x32xf32, #tpu.memory_space<vmem>>, vector<1x32xf32>
    %61 = vector.broadcast %60 : vector<1x32xf32> to vector<64x32xf32>
    %62 = arith.addf %59, %61 : vector<64x32xf32>
    %cst_46 = arith.constant 0.000000e+00 : f32
    %63 = vector.broadcast %cst_46 : f32 to vector<64x32xf32>
    %64 = arith.maximumf %62, %63 : vector<64x32xf32>
    %65 = vector.shape_cast %64 : vector<64x32xf32> to vector<4x16x32xf32>
    %c0_47 = arith.constant 0 : index
    %c0_48 = arith.constant 0 : index
    %c0_49 = arith.constant 0 : index
    %c0_50 = arith.constant 0 : index
    %66 = vector.load %arg5[%c0_47, %c0_48, %c0_49, %c0_50] : memref<1x4x16x32xf32, #tpu.memory_space<vmem>>, vector<1x4x16x32xf32>
    %67 = vector.shape_cast %66 : vector<1x4x16x32xf32> to vector<4x16x32xf32>
    %68 = vector.shape_cast %65 : vector<4x16x32xf32> to vector<1x4x16x32xf32>
    tpu.vector_store %arg5[%c0_47, %c0_48, %c0_49, %c0_50], %68 {strides = array<i32>} : memref<1x4x16x32xf32, #tpu.memory_space<vmem>>, vector<1x4x16x32xf32>,
    return
  }
  func.func @transform_0(%arg0: i32, %arg1: i32) -> (i32, i32, i32, i32) {
    %c0_i32 = arith.constant 0 : i32
    %c0_i32_0 = arith.constant 0 : i32
    %c0_i32_1 = arith.constant 0 : i32
    %c0_i32_2 = arith.constant 0 : i32
    return %arg0, %c0_i32, %c0_i32_0, %c0_i32_1 : i32, i32, i32, i32
  }
  func.func @transform_1(%arg0: i32, %arg1: i32) -> (i32, i32) {
    %c0_i32 = arith.constant 0 : i32
    %c0_i32_0 = arith.constant 0 : i32
    %c0_i32_1 = arith.constant 0 : i32
    return %c0_i32, %c0_i32_0 : i32, i32
  }
  func.func @transform_2(%arg0: i32, %arg1: i32) -> (i32, i32) {
    %c0_i32 = arith.constant 0 : i32
    %c0_i32_0 = arith.constant 0 : i32
    %c0_i32_1 = arith.constant 0 : i32
    return %c0_i32, %c0_i32_0 : i32, i32
  }
  func.func @transform_3(%arg0: i32, %arg1: i32) -> (i32, i32, i32, i32) {
    %c0_i32 = arith.constant 0 : i32
    %c0_i32_0 = arith.constant 0 : i32
    %c0_i32_1 = arith.constant 0 : i32
    return %arg0, %arg1, %c0_i32, %c0_i32_0 : i32, i32, i32, i32
  }
}

module attributes {stable_mosaic.version = 11 : i64} {
  func.func @_conv3x3_kernel(%arg0: i32, %arg1: i32, %arg2: memref<1x18x18x32xf32, #tpu.memory_space<vmem>>, %arg3: memref<288x32xbf16, #tpu.memory_space<vmem>>, %arg4: memref<1x32xf32, #tpu.memory_space<vmem>>, %arg5: memref<1x4x16x32xf32, #tpu.memory_space<vmem>>, %arg6: memref<64x288xf32, #tpu.memory_space<vmem>>) attributes {dimension_semantics = [#tpu.dimension_semantics<parallel>, #tpu.dimension_semantics<parallel>], iteration_bounds = array<i64: 2, 4>, scalar_prefetch = 0 : i64, scratch_operands = 1 : i64, tpu.core_type = #tpu.core_type<tc>, window_params = [{transform_indices = @transform_0, window_bounds = array<i64: 1, 18, 18, 32>}, {pipeline_mode = #tpu.pipeline_mode<synchronous>, transform_indices = @transform_1, window_bounds = array<i64: 288, 32>}, {pipeline_mode = #tpu.pipeline_mode<synchronous>, transform_indices = @transform_2, window_bounds = array<i64: 1, 32>}, {transform_indices = @transform_3, window_bounds = array<i64: 1, 4, 16, 32>}]} {
    %c4_i32 = arith.constant 4 : i32
    %0 = arith.muli %arg1, %c4_i32 : i32
    %1 = tpu.assume_multiple %0, 4 : i32
    %c0_i32 = arith.constant 0 : i32
    %2 = arith.addi %1, %c0_i32 : i32
    %c0 = arith.constant 0 : index
    %3 = arith.index_cast %2 : i32 to index
    %c0_0 = arith.constant 0 : index
    %c0_1 = arith.constant 0 : index
    %4 = vector.load %arg2[%c0, %3, %c0_0, %c0_1] : memref<1x18x18x32xf32, #tpu.memory_space<vmem>>, vector<1x4x16x32xf32>
    %5 = vector.shape_cast %4 : vector<1x4x16x32xf32> to vector<4x16x32xf32>
    %6 = vector.shape_cast %5 : vector<4x16x32xf32> to vector<64x32xf32>
    %c0_2 = arith.constant 0 : index
    %c0_3 = arith.constant 0 : index
    %7 = vector.load %arg6[%c0_2, %c0_3] : memref<64x288xf32, #tpu.memory_space<vmem>>, vector<64x32xf32>
    tpu.vector_store %arg6[%c0_2, %c0_3], %6 {strides = array<i32>} : memref<64x288xf32, #tpu.memory_space<vmem>>, vector<64x32xf32>,
    %c0_i32_4 = arith.constant 0 : i32
    %8 = arith.addi %1, %c0_i32_4 : i32
    %c0_5 = arith.constant 0 : index
    %9 = arith.index_cast %8 : i32 to index
    %c1 = arith.constant 1 : index
    %c0_6 = arith.constant 0 : index
    %10 = vector.load %arg2[%c0_5, %9, %c1, %c0_6] : memref<1x18x18x32xf32, #tpu.memory_space<vmem>>, vector<1x4x16x32xf32>
    %11 = vector.shape_cast %10 : vector<1x4x16x32xf32> to vector<4x16x32xf32>
    %12 = vector.shape_cast %11 : vector<4x16x32xf32> to vector<64x32xf32>
    %c0_7 = arith.constant 0 : index
    %c32 = arith.constant 32 : index
    %13 = vector.load %arg6[%c0_7, %c32] : memref<64x288xf32, #tpu.memory_space<vmem>>, vector<64x32xf32>
    tpu.vector_store %arg6[%c0_7, %c32], %12 {strides = array<i32>} : memref<64x288xf32, #tpu.memory_space<vmem>>, vector<64x32xf32>,
    %c0_i32_8 = arith.constant 0 : i32
    %14 = arith.addi %1, %c0_i32_8 : i32
    %c0_9 = arith.constant 0 : index
    %15 = arith.index_cast %14 : i32 to index
    %c2 = arith.constant 2 : index
    %c0_10 = arith.constant 0 : index
    %16 = vector.load %arg2[%c0_9, %15, %c2, %c0_10] : memref<1x18x18x32xf32, #tpu.memory_space<vmem>>, vector<1x4x16x32xf32>
    %17 = vector.shape_cast %16 : vector<1x4x16x32xf32> to vector<4x16x32xf32>
    %18 = vector.shape_cast %17 : vector<4x16x32xf32> to vector<64x32xf32>
    %c0_11 = arith.constant 0 : index
    %c64 = arith.constant 64 : index
    %19 = vector.load %arg6[%c0_11, %c64] : memref<64x288xf32, #tpu.memory_space<vmem>>, vector<64x32xf32>
    tpu.vector_store %arg6[%c0_11, %c64], %18 {strides = array<i32>} : memref<64x288xf32, #tpu.memory_space<vmem>>, vector<64x32xf32>,
    %c1_i32 = arith.constant 1 : i32
    %20 = arith.addi %1, %c1_i32 : i32
    %c0_12 = arith.constant 0 : index
    %21 = arith.index_cast %20 : i32 to index
    %c0_13 = arith.constant 0 : index
    %c0_14 = arith.constant 0 : index
    %22 = vector.load %arg2[%c0_12, %21, %c0_13, %c0_14] : memref<1x18x18x32xf32, #tpu.memory_space<vmem>>, vector<1x4x16x32xf32>
    %23 = vector.shape_cast %22 : vector<1x4x16x32xf32> to vector<4x16x32xf32>
    %24 = vector.shape_cast %23 : vector<4x16x32xf32> to vector<64x32xf32>
    %c0_15 = arith.constant 0 : index
    %c96 = arith.constant 96 : index
    %25 = vector.load %arg6[%c0_15, %c96] : memref<64x288xf32, #tpu.memory_space<vmem>>, vector<64x32xf32>
    tpu.vector_store %arg6[%c0_15, %c96], %24 {strides = array<i32>} : memref<64x288xf32, #tpu.memory_space<vmem>>, vector<64x32xf32>,
    %c1_i32_16 = arith.constant 1 : i32
    %26 = arith.addi %1, %c1_i32_16 : i32
    %c0_17 = arith.constant 0 : index
    %27 = arith.index_cast %26 : i32 to index
    %c1_18 = arith.constant 1 : index
    %c0_19 = arith.constant 0 : index
    %28 = vector.load %arg2[%c0_17, %27, %c1_18, %c0_19] : memref<1x18x18x32xf32, #tpu.memory_space<vmem>>, vector<1x4x16x32xf32>
    %29 = vector.shape_cast %28 : vector<1x4x16x32xf32> to vector<4x16x32xf32>
    %30 = vector.shape_cast %29 : vector<4x16x32xf32> to vector<64x32xf32>
    %c0_20 = arith.constant 0 : index
    %c128 = arith.constant 128 : index
    %31 = vector.load %arg6[%c0_20, %c128] : memref<64x288xf32, #tpu.memory_space<vmem>>, vector<64x32xf32>
    tpu.vector_store %arg6[%c0_20, %c128], %30 {strides = array<i32>} : memref<64x288xf32, #tpu.memory_space<vmem>>, vector<64x32xf32>,
    %c1_i32_21 = arith.constant 1 : i32
    %32 = arith.addi %1, %c1_i32_21 : i32
    %c0_22 = arith.constant 0 : index
    %33 = arith.index_cast %32 : i32 to index
    %c2_23 = arith.constant 2 : index
    %c0_24 = arith.constant 0 : index
    %34 = vector.load %arg2[%c0_22, %33, %c2_23, %c0_24] : memref<1x18x18x32xf32, #tpu.memory_space<vmem>>, vector<1x4x16x32xf32>
    %35 = vector.shape_cast %34 : vector<1x4x16x32xf32> to vector<4x16x32xf32>
    %36 = vector.shape_cast %35 : vector<4x16x32xf32> to vector<64x32xf32>
    %c0_25 = arith.constant 0 : index
    %c160 = arith.constant 160 : index
    %37 = vector.load %arg6[%c0_25, %c160] : memref<64x288xf32, #tpu.memory_space<vmem>>, vector<64x32xf32>
    tpu.vector_store %arg6[%c0_25, %c160], %36 {strides = array<i32>} : memref<64x288xf32, #tpu.memory_space<vmem>>, vector<64x32xf32>,
    %c2_i32 = arith.constant 2 : i32
    %38 = arith.addi %1, %c2_i32 : i32
    %c0_26 = arith.constant 0 : index
    %39 = arith.index_cast %38 : i32 to index
    %c0_27 = arith.constant 0 : index
    %c0_28 = arith.constant 0 : index
    %40 = vector.load %arg2[%c0_26, %39, %c0_27, %c0_28] : memref<1x18x18x32xf32, #tpu.memory_space<vmem>>, vector<1x4x16x32xf32>
    %41 = vector.shape_cast %40 : vector<1x4x16x32xf32> to vector<4x16x32xf32>
    %42 = vector.shape_cast %41 : vector<4x16x32xf32> to vector<64x32xf32>
    %c0_29 = arith.constant 0 : index
    %c192 = arith.constant 192 : index
    %43 = vector.load %arg6[%c0_29, %c192] : memref<64x288xf32, #tpu.memory_space<vmem>>, vector<64x32xf32>
    tpu.vector_store %arg6[%c0_29, %c192], %42 {strides = array<i32>} : memref<64x288xf32, #tpu.memory_space<vmem>>, vector<64x32xf32>,
    %c2_i32_30 = arith.constant 2 : i32
    %44 = arith.addi %1, %c2_i32_30 : i32
    %c0_31 = arith.constant 0 : index
    %45 = arith.index_cast %44 : i32 to index
    %c1_32 = arith.constant 1 : index
    %c0_33 = arith.constant 0 : index
    %46 = vector.load %arg2[%c0_31, %45, %c1_32, %c0_33] : memref<1x18x18x32xf32, #tpu.memory_space<vmem>>, vector<1x4x16x32xf32>
    %47 = vector.shape_cast %46 : vector<1x4x16x32xf32> to vector<4x16x32xf32>
    %48 = vector.shape_cast %47 : vector<4x16x32xf32> to vector<64x32xf32>
    %c0_34 = arith.constant 0 : index
    %c224 = arith.constant 224 : index
    %49 = vector.load %arg6[%c0_34, %c224] : memref<64x288xf32, #tpu.memory_space<vmem>>, vector<64x32xf32>
    tpu.vector_store %arg6[%c0_34, %c224], %48 {strides = array<i32>} : memref<64x288xf32, #tpu.memory_space<vmem>>, vector<64x32xf32>,
    %c2_i32_35 = arith.constant 2 : i32
    %50 = arith.addi %1, %c2_i32_35 : i32
    %c0_36 = arith.constant 0 : index
    %51 = arith.index_cast %50 : i32 to index
    %c2_37 = arith.constant 2 : index
    %c0_38 = arith.constant 0 : index
    %52 = vector.load %arg2[%c0_36, %51, %c2_37, %c0_38] : memref<1x18x18x32xf32, #tpu.memory_space<vmem>>, vector<1x4x16x32xf32>
    %53 = vector.shape_cast %52 : vector<1x4x16x32xf32> to vector<4x16x32xf32>
    %54 = vector.shape_cast %53 : vector<4x16x32xf32> to vector<64x32xf32>
    %c0_39 = arith.constant 0 : index
    %c256 = arith.constant 256 : index
    %55 = vector.load %arg6[%c0_39, %c256] : memref<64x288xf32, #tpu.memory_space<vmem>>, vector<64x32xf32>
    tpu.vector_store %arg6[%c0_39, %c256], %54 {strides = array<i32>} : memref<64x288xf32, #tpu.memory_space<vmem>>, vector<64x32xf32>,
    %c0_40 = arith.constant 0 : index
    %c0_41 = arith.constant 0 : index
    %56 = vector.load %arg6[%c0_40, %c0_41] : memref<64x288xf32, #tpu.memory_space<vmem>>, vector<64x288xf32>
    %57 = arith.truncf %56 : vector<64x288xf32> to vector<64x288xbf16>
    %c0_42 = arith.constant 0 : index
    %c0_43 = arith.constant 0 : index
    %58 = vector.load %arg3[%c0_42, %c0_43] : memref<288x32xbf16, #tpu.memory_space<vmem>>, vector<288x32xbf16>
    %cst = arith.constant dense<0.000000e+00> : vector<64x32xf32>
    %59 = tpu.matmul %57, %58, %cst {dimension_numbers = #tpu.dot_dimension_numbers<[1], [0], [0], [1], [0, 0, 1, 1], [], []>} : vector<64x288xbf16>, vector<288x32xbf16>, vector<64x32xf32> -> vector<64x32xf32>
    %c0_44 = arith.constant 0 : index
    %c0_45 = arith.constant 0 : index
    %60 = vector.load %arg4[%c0_44, %c0_45] : memref<1x32xf32, #tpu.memory_space<vmem>>, vector<1x32xf32>
    %61 = vector.broadcast %60 : vector<1x32xf32> to vector<64x32xf32>
    %62 = arith.addf %59, %61 : vector<64x32xf32>
    %63 = vector.shape_cast %62 : vector<64x32xf32> to vector<4x16x32xf32>
    %c0_46 = arith.constant 0 : index
    %c0_47 = arith.constant 0 : index
    %c0_48 = arith.constant 0 : index
    %c0_49 = arith.constant 0 : index
    %64 = vector.load %arg5[%c0_46, %c0_47, %c0_48, %c0_49] : memref<1x4x16x32xf32, #tpu.memory_space<vmem>>, vector<1x4x16x32xf32>
    %65 = vector.shape_cast %64 : vector<1x4x16x32xf32> to vector<4x16x32xf32>
    %66 = vector.shape_cast %63 : vector<4x16x32xf32> to vector<1x4x16x32xf32>
    tpu.vector_store %arg5[%c0_46, %c0_47, %c0_48, %c0_49], %66 {strides = array<i32>} : memref<1x4x16x32xf32, #tpu.memory_space<vmem>>, vector<1x4x16x32xf32>,
    return
  }
  func.func @transform_0(%arg0: i32, %arg1: i32) -> (i32, i32, i32, i32) {
    %c0_i32 = arith.constant 0 : i32
    %c0_i32_0 = arith.constant 0 : i32
    %c0_i32_1 = arith.constant 0 : i32
    %c0_i32_2 = arith.constant 0 : i32
    return %arg0, %c0_i32, %c0_i32_0, %c0_i32_1 : i32, i32, i32, i32
  }
  func.func @transform_1(%arg0: i32, %arg1: i32) -> (i32, i32) {
    %c0_i32 = arith.constant 0 : i32
    %c0_i32_0 = arith.constant 0 : i32
    %c0_i32_1 = arith.constant 0 : i32
    return %c0_i32, %c0_i32_0 : i32, i32
  }
  func.func @transform_2(%arg0: i32, %arg1: i32) -> (i32, i32) {
    %c0_i32 = arith.constant 0 : i32
    %c0_i32_0 = arith.constant 0 : i32
    %c0_i32_1 = arith.constant 0 : i32
    return %c0_i32, %c0_i32_0 : i32, i32
  }
  func.func @transform_3(%arg0: i32, %arg1: i32) -> (i32, i32, i32, i32) {
    %c0_i32 = arith.constant 0 : i32
    %c0_i32_0 = arith.constant 0 : i32
    %c0_i32_1 = arith.constant 0 : i32
    return %arg0, %arg1, %c0_i32, %c0_i32_0 : i32, i32, i32, i32
  }
}

module attributes {stable_mosaic.version = 11 : i64} {
  func.func @_lrte_kernel(%arg0: i32, %arg1: memref<1x16x16x32xf32, #tpu.memory_space<vmem>>, %arg2: memref<32x32xf32, #tpu.memory_space<vmem>>, %arg3: memref<1x32xf32, #tpu.memory_space<vmem>>, %arg4: memref<4xf32, #tpu.memory_space<smem>>, %arg5: memref<1x16x16x32xf32, #tpu.memory_space<vmem>>) attributes {dimension_semantics = [#tpu.dimension_semantics<parallel>], iteration_bounds = array<i64: 2>, scalar_prefetch = 0 : i64, scratch_operands = 0 : i64, tpu.core_type = #tpu.core_type<tc>, window_params = [{transform_indices = @transform_0, window_bounds = array<i64: 1, 16, 16, 32>}, {pipeline_mode = #tpu.pipeline_mode<synchronous>, transform_indices = @transform_1, window_bounds = array<i64: 32, 32>}, {pipeline_mode = #tpu.pipeline_mode<synchronous>, transform_indices = @transform_2, window_bounds = array<i64: 1, 32>}, {transform_indices = @transform_3, window_bounds = array<i64: 4>}, {transform_indices = @transform_4, window_bounds = array<i64: 1, 16, 16, 32>}]} {
    %c0 = arith.constant 0 : index
    %c0_0 = arith.constant 0 : index
    %c0_1 = arith.constant 0 : index
    %c0_2 = arith.constant 0 : index
    %0 = vector.load %arg1[%c0, %c0_0, %c0_1, %c0_2] : memref<1x16x16x32xf32, #tpu.memory_space<vmem>>, vector<1x16x16x32xf32>
    %1 = vector.shape_cast %0 : vector<1x16x16x32xf32> to vector<16x16x32xf32>
    %cst = arith.constant dense<0.000000e+00> : vector<16x16xf32>
    %2 = vector.multi_reduction <add>, %1, %cst [2] : vector<16x16x32xf32> to vector<16x16xf32>
    %3 = vector.shape_cast %2 : vector<16x16xf32> to vector<16x16x1xf32>
    %cst_3 = arith.constant 3.200000e+01 : f32
    %4 = vector.broadcast %cst_3 : f32 to vector<16x16x1xf32>
    %5 = arith.divf %3, %4 : vector<16x16x1xf32>
    %cst_4 = arith.constant dense<0.000000e+00> : vector<16x1xf32>
    %6 = vector.multi_reduction <add>, %5, %cst_4 [1] : vector<16x16x1xf32> to vector<16x1xf32>
    %7 = vector.shape_cast %6 : vector<16x1xf32> to vector<16x1x1xf32>
    %cst_5 = arith.constant 1.600000e+01 : f32
    %8 = vector.broadcast %cst_5 : f32 to vector<16x1x1xf32>
    %9 = arith.divf %7, %8 : vector<16x1x1xf32>
    %cst_6 = arith.constant dense<0.000000e+00> : vector<16x1xf32>
    %10 = vector.multi_reduction <add>, %5, %cst_6 [0] : vector<16x16x1xf32> to vector<16x1xf32>
    %11 = vector.shape_cast %10 : vector<16x1xf32> to vector<1x16x1xf32>
    %cst_7 = arith.constant 1.600000e+01 : f32
    %12 = vector.broadcast %cst_7 : f32 to vector<1x16x1xf32>
    %13 = arith.divf %11, %12 : vector<1x16x1xf32>
    %cst_8 = arith.constant dense<0.000000e+00> : vector<16x32xf32>
    %14 = vector.multi_reduction <add>, %1, %cst_8 [0] : vector<16x16x32xf32> to vector<16x32xf32>
    %cst_9 = arith.constant 1.600000e+01 : f32
    %15 = vector.broadcast %cst_9 : f32 to vector<16x32xf32>
    %16 = arith.divf %14, %15 : vector<16x32xf32>
    %cst_10 = arith.constant dense<0.000000e+00> : vector<32xf32>
    %17 = vector.multi_reduction <add>, %16, %cst_10 [0] : vector<16x32xf32> to vector<32xf32>
    %18 = vector.shape_cast %17 : vector<32xf32> to vector<1x32xf32>
    %cst_11 = arith.constant 1.600000e+01 : f32
    %19 = vector.broadcast %cst_11 : f32 to vector<1x32xf32>
    %20 = arith.divf %18, %19 : vector<1x32xf32>
    %c0_12 = arith.constant 0 : index
    %21 = memref.load %arg4[%c0_12] : memref<4xf32, #tpu.memory_space<smem>>
    %c1 = arith.constant 1 : index
    %22 = memref.load %arg4[%c1] : memref<4xf32, #tpu.memory_space<smem>>
    %c2 = arith.constant 2 : index
    %23 = memref.load %arg4[%c2] : memref<4xf32, #tpu.memory_space<smem>>
    %c3 = arith.constant 3 : index
    %24 = memref.load %arg4[%c3] : memref<4xf32, #tpu.memory_space<smem>>
    %25 = vector.broadcast %21 : f32 to vector<16x1x1xf32>
    %26 = arith.mulf %25, %9 : vector<16x1x1xf32>
    %27 = vector.broadcast %22 : f32 to vector<16x1x1xf32>
    %28 = arith.addf %26, %27 : vector<16x1x1xf32>
    %cst_13 = arith.constant 0.000000e+00 : f32
    %29 = vector.broadcast %cst_13 : f32 to vector<16x1x1xf32>
    %30 = arith.subf %29, %28 : vector<16x1x1xf32>
    %31 = math.exp %30 : vector<16x1x1xf32>
    %cst_14 = arith.constant 1.000000e+00 : f32
    %32 = vector.broadcast %cst_14 : f32 to vector<16x1x1xf32>
    %33 = arith.addf %32, %31 : vector<16x1x1xf32>
    %34 = tpu.reciprocal %33 {approx = true} : vector<16x1x1xf32> -> vector<16x1x1xf32>
    %35 = vector.broadcast %23 : f32 to vector<1x16x1xf32>
    %36 = arith.mulf %35, %13 : vector<1x16x1xf32>
    %37 = vector.broadcast %24 : f32 to vector<1x16x1xf32>
    %38 = arith.addf %36, %37 : vector<1x16x1xf32>
    %cst_15 = arith.constant 0.000000e+00 : f32
    %39 = vector.broadcast %cst_15 : f32 to vector<1x16x1xf32>
    %40 = arith.subf %39, %38 : vector<1x16x1xf32>
    %41 = math.exp %40 : vector<1x16x1xf32>
    %cst_16 = arith.constant 1.000000e+00 : f32
    %42 = vector.broadcast %cst_16 : f32 to vector<1x16x1xf32>
    %43 = arith.addf %42, %41 : vector<1x16x1xf32>
    %44 = tpu.reciprocal %43 {approx = true} : vector<1x16x1xf32> -> vector<1x16x1xf32>
    %c0_17 = arith.constant 0 : index
    %c0_18 = arith.constant 0 : index
    %45 = vector.load %arg2[%c0_17, %c0_18] : memref<32x32xf32, #tpu.memory_space<vmem>>, vector<32x32xf32>
    %cst_19 = arith.constant dense<0.000000e+00> : vector<1x32xf32>
    %46 = tpu.matmul %20, %45, %cst_19 {dimension_numbers = #tpu.dot_dimension_numbers<[1], [0], [0], [1], [0, 0, 1, 1], [], []>} : vector<1x32xf32>, vector<32x32xf32>, vector<1x32xf32> -> vector<1x32xf32>
    %c0_20 = arith.constant 0 : index
    %c0_21 = arith.constant 0 : index
    %47 = vector.load %arg3[%c0_20, %c0_21] : memref<1x32xf32, #tpu.memory_space<vmem>>, vector<1x32xf32>
    %48 = arith.addf %46, %47 : vector<1x32xf32>
    %cst_22 = arith.constant 0.000000e+00 : f32
    %49 = vector.broadcast %cst_22 : f32 to vector<1x32xf32>
    %50 = arith.subf %49, %48 : vector<1x32xf32>
    %51 = math.exp %50 : vector<1x32xf32>
    %cst_23 = arith.constant 1.000000e+00 : f32
    %52 = vector.broadcast %cst_23 : f32 to vector<1x32xf32>
    %53 = arith.addf %52, %51 : vector<1x32xf32>
    %54 = tpu.reciprocal %53 {approx = true} : vector<1x32xf32> -> vector<1x32xf32>
    %55 = vector.shape_cast %54 : vector<1x32xf32> to vector<1x1x32xf32>
    %56 = vector.broadcast %34 : vector<16x1x1xf32> to vector<16x16x1xf32>
    %57 = vector.broadcast %44 : vector<1x16x1xf32> to vector<16x16x1xf32>
    %58 = arith.mulf %56, %57 : vector<16x16x1xf32>
    %59 = vector.broadcast %58 : vector<16x16x1xf32> to vector<16x16x32xf32>
    %60 = vector.broadcast %55 : vector<1x1x32xf32> to vector<16x16x32xf32>
    %61 = arith.mulf %59, %60 : vector<16x16x32xf32>
    %c0_24 = arith.constant 0 : index
    %c0_25 = arith.constant 0 : index
    %c0_26 = arith.constant 0 : index
    %c0_27 = arith.constant 0 : index
    %62 = vector.load %arg5[%c0_24, %c0_25, %c0_26, %c0_27] : memref<1x16x16x32xf32, #tpu.memory_space<vmem>>, vector<1x16x16x32xf32>
    %63 = vector.shape_cast %62 : vector<1x16x16x32xf32> to vector<16x16x32xf32>
    %64 = vector.shape_cast %61 : vector<16x16x32xf32> to vector<1x16x16x32xf32>
    tpu.vector_store %arg5[%c0_24, %c0_25, %c0_26, %c0_27], %64 {strides = array<i32>} : memref<1x16x16x32xf32, #tpu.memory_space<vmem>>, vector<1x16x16x32xf32>,
    return
  }
  func.func @transform_0(%arg0: i32) -> (i32, i32, i32, i32) {
    %c0_i32 = arith.constant 0 : i32
    %c0_i32_0 = arith.constant 0 : i32
    %c0_i32_1 = arith.constant 0 : i32
    %c0_i32_2 = arith.constant 0 : i32
    return %arg0, %c0_i32, %c0_i32_0, %c0_i32_1 : i32, i32, i32, i32
  }
  func.func @transform_1(%arg0: i32) -> (i32, i32) {
    %c0_i32 = arith.constant 0 : i32
    %c0_i32_0 = arith.constant 0 : i32
    %c0_i32_1 = arith.constant 0 : i32
    return %c0_i32, %c0_i32_0 : i32, i32
  }
  func.func @transform_2(%arg0: i32) -> (i32, i32) {
    %c0_i32 = arith.constant 0 : i32
    %c0_i32_0 = arith.constant 0 : i32
    %c0_i32_1 = arith.constant 0 : i32
    return %c0_i32, %c0_i32_0 : i32, i32
  }
  func.func @transform_3(%arg0: i32) -> i32 {
    %c0_i32 = arith.constant 0 : i32
    %c0_i32_0 = arith.constant 0 : i32
    return %c0_i32 : i32
  }
  func.func @transform_4(%arg0: i32) -> (i32, i32, i32, i32) {
    %c0_i32 = arith.constant 0 : i32
    %c0_i32_0 = arith.constant 0 : i32
    %c0_i32_1 = arith.constant 0 : i32
    %c0_i32_2 = arith.constant 0 : i32
    return %arg0, %c0_i32, %c0_i32_0, %c0_i32_1 : i32, i32, i32, i32
  }
}

module attributes {stable_mosaic.version = 11 : i64} {
  func.func @_lrte_kernel(%arg0: i32, %arg1: memref<1x16x16x32xf32, #tpu.memory_space<vmem>>, %arg2: memref<1x16x16x32xf32, #tpu.memory_space<vmem>>, %arg3: memref<32x32xf32, #tpu.memory_space<vmem>>, %arg4: memref<1x32xf32, #tpu.memory_space<vmem>>, %arg5: memref<4xf32, #tpu.memory_space<smem>>, %arg6: memref<1x16x16x32xf32, #tpu.memory_space<vmem>>, %arg7: memref<1x16x16x32xf32, #tpu.memory_space<vmem>>) attributes {dimension_semantics = [#tpu.dimension_semantics<parallel>], iteration_bounds = array<i64: 2>, scalar_prefetch = 0 : i64, scratch_operands = 0 : i64, tpu.core_type = #tpu.core_type<tc>, window_params = [{transform_indices = @transform_0, window_bounds = array<i64: 1, 16, 16, 32>}, {transform_indices = @transform_1, window_bounds = array<i64: 1, 16, 16, 32>}, {pipeline_mode = #tpu.pipeline_mode<synchronous>, transform_indices = @transform_2, window_bounds = array<i64: 32, 32>}, {pipeline_mode = #tpu.pipeline_mode<synchronous>, transform_indices = @transform_3, window_bounds = array<i64: 1, 32>}, {transform_indices = @transform_4, window_bounds = array<i64: 4>}, {transform_indices = @transform_5, window_bounds = array<i64: 1, 16, 16, 32>}, {transform_indices = @transform_6, window_bounds = array<i64: 1, 16, 16, 32>}]} {
    %c0 = arith.constant 0 : index
    %c0_0 = arith.constant 0 : index
    %c0_1 = arith.constant 0 : index
    %c0_2 = arith.constant 0 : index
    %0 = vector.load %arg1[%c0, %c0_0, %c0_1, %c0_2] : memref<1x16x16x32xf32, #tpu.memory_space<vmem>>, vector<1x16x16x32xf32>
    %1 = vector.shape_cast %0 : vector<1x16x16x32xf32> to vector<16x16x32xf32>
    %c0_3 = arith.constant 0 : index
    %c0_4 = arith.constant 0 : index
    %c0_5 = arith.constant 0 : index
    %c0_6 = arith.constant 0 : index
    %2 = vector.load %arg2[%c0_3, %c0_4, %c0_5, %c0_6] : memref<1x16x16x32xf32, #tpu.memory_space<vmem>>, vector<1x16x16x32xf32>
    %3 = vector.shape_cast %2 : vector<1x16x16x32xf32> to vector<16x16x32xf32>
    %4 = arith.subf %1, %3 : vector<16x16x32xf32>
    %c0_7 = arith.constant 0 : index
    %c0_8 = arith.constant 0 : index
    %c0_9 = arith.constant 0 : index
    %c0_10 = arith.constant 0 : index
    %5 = vector.load %arg7[%c0_7, %c0_8, %c0_9, %c0_10] : memref<1x16x16x32xf32, #tpu.memory_space<vmem>>, vector<1x16x16x32xf32>
    %6 = vector.shape_cast %5 : vector<1x16x16x32xf32> to vector<16x16x32xf32>
    %7 = vector.shape_cast %4 : vector<16x16x32xf32> to vector<1x16x16x32xf32>
    tpu.vector_store %arg7[%c0_7, %c0_8, %c0_9, %c0_10], %7 {strides = array<i32>} : memref<1x16x16x32xf32, #tpu.memory_space<vmem>>, vector<1x16x16x32xf32>,
    %cst = arith.constant dense<0.000000e+00> : vector<16x16xf32>
    %8 = vector.multi_reduction <add>, %4, %cst [2] : vector<16x16x32xf32> to vector<16x16xf32>
    %9 = vector.shape_cast %8 : vector<16x16xf32> to vector<16x16x1xf32>
    %cst_11 = arith.constant 3.200000e+01 : f32
    %10 = vector.broadcast %cst_11 : f32 to vector<16x16x1xf32>
    %11 = arith.divf %9, %10 : vector<16x16x1xf32>
    %cst_12 = arith.constant dense<0.000000e+00> : vector<16x1xf32>
    %12 = vector.multi_reduction <add>, %11, %cst_12 [1] : vector<16x16x1xf32> to vector<16x1xf32>
    %13 = vector.shape_cast %12 : vector<16x1xf32> to vector<16x1x1xf32>
    %cst_13 = arith.constant 1.600000e+01 : f32
    %14 = vector.broadcast %cst_13 : f32 to vector<16x1x1xf32>
    %15 = arith.divf %13, %14 : vector<16x1x1xf32>
    %cst_14 = arith.constant dense<0.000000e+00> : vector<16x1xf32>
    %16 = vector.multi_reduction <add>, %11, %cst_14 [0] : vector<16x16x1xf32> to vector<16x1xf32>
    %17 = vector.shape_cast %16 : vector<16x1xf32> to vector<1x16x1xf32>
    %cst_15 = arith.constant 1.600000e+01 : f32
    %18 = vector.broadcast %cst_15 : f32 to vector<1x16x1xf32>
    %19 = arith.divf %17, %18 : vector<1x16x1xf32>
    %cst_16 = arith.constant dense<0.000000e+00> : vector<16x32xf32>
    %20 = vector.multi_reduction <add>, %4, %cst_16 [0] : vector<16x16x32xf32> to vector<16x32xf32>
    %cst_17 = arith.constant 1.600000e+01 : f32
    %21 = vector.broadcast %cst_17 : f32 to vector<16x32xf32>
    %22 = arith.divf %20, %21 : vector<16x32xf32>
    %cst_18 = arith.constant dense<0.000000e+00> : vector<32xf32>
    %23 = vector.multi_reduction <add>, %22, %cst_18 [0] : vector<16x32xf32> to vector<32xf32>
    %24 = vector.shape_cast %23 : vector<32xf32> to vector<1x32xf32>
    %cst_19 = arith.constant 1.600000e+01 : f32
    %25 = vector.broadcast %cst_19 : f32 to vector<1x32xf32>
    %26 = arith.divf %24, %25 : vector<1x32xf32>
    %c0_20 = arith.constant 0 : index
    %27 = memref.load %arg5[%c0_20] : memref<4xf32, #tpu.memory_space<smem>>
    %c1 = arith.constant 1 : index
    %28 = memref.load %arg5[%c1] : memref<4xf32, #tpu.memory_space<smem>>
    %c2 = arith.constant 2 : index
    %29 = memref.load %arg5[%c2] : memref<4xf32, #tpu.memory_space<smem>>
    %c3 = arith.constant 3 : index
    %30 = memref.load %arg5[%c3] : memref<4xf32, #tpu.memory_space<smem>>
    %31 = vector.broadcast %27 : f32 to vector<16x1x1xf32>
    %32 = arith.mulf %31, %15 : vector<16x1x1xf32>
    %33 = vector.broadcast %28 : f32 to vector<16x1x1xf32>
    %34 = arith.addf %32, %33 : vector<16x1x1xf32>
    %cst_21 = arith.constant 0.000000e+00 : f32
    %35 = vector.broadcast %cst_21 : f32 to vector<16x1x1xf32>
    %36 = arith.subf %35, %34 : vector<16x1x1xf32>
    %37 = math.exp %36 : vector<16x1x1xf32>
    %cst_22 = arith.constant 1.000000e+00 : f32
    %38 = vector.broadcast %cst_22 : f32 to vector<16x1x1xf32>
    %39 = arith.addf %38, %37 : vector<16x1x1xf32>
    %40 = tpu.reciprocal %39 {approx = true} : vector<16x1x1xf32> -> vector<16x1x1xf32>
    %41 = vector.broadcast %29 : f32 to vector<1x16x1xf32>
    %42 = arith.mulf %41, %19 : vector<1x16x1xf32>
    %43 = vector.broadcast %30 : f32 to vector<1x16x1xf32>
    %44 = arith.addf %42, %43 : vector<1x16x1xf32>
    %cst_23 = arith.constant 0.000000e+00 : f32
    %45 = vector.broadcast %cst_23 : f32 to vector<1x16x1xf32>
    %46 = arith.subf %45, %44 : vector<1x16x1xf32>
    %47 = math.exp %46 : vector<1x16x1xf32>
    %cst_24 = arith.constant 1.000000e+00 : f32
    %48 = vector.broadcast %cst_24 : f32 to vector<1x16x1xf32>
    %49 = arith.addf %48, %47 : vector<1x16x1xf32>
    %50 = tpu.reciprocal %49 {approx = true} : vector<1x16x1xf32> -> vector<1x16x1xf32>
    %c0_25 = arith.constant 0 : index
    %c0_26 = arith.constant 0 : index
    %51 = vector.load %arg3[%c0_25, %c0_26] : memref<32x32xf32, #tpu.memory_space<vmem>>, vector<32x32xf32>
    %cst_27 = arith.constant dense<0.000000e+00> : vector<1x32xf32>
    %52 = tpu.matmul %26, %51, %cst_27 {dimension_numbers = #tpu.dot_dimension_numbers<[1], [0], [0], [1], [0, 0, 1, 1], [], []>} : vector<1x32xf32>, vector<32x32xf32>, vector<1x32xf32> -> vector<1x32xf32>
    %c0_28 = arith.constant 0 : index
    %c0_29 = arith.constant 0 : index
    %53 = vector.load %arg4[%c0_28, %c0_29] : memref<1x32xf32, #tpu.memory_space<vmem>>, vector<1x32xf32>
    %54 = arith.addf %52, %53 : vector<1x32xf32>
    %cst_30 = arith.constant 0.000000e+00 : f32
    %55 = vector.broadcast %cst_30 : f32 to vector<1x32xf32>
    %56 = arith.subf %55, %54 : vector<1x32xf32>
    %57 = math.exp %56 : vector<1x32xf32>
    %cst_31 = arith.constant 1.000000e+00 : f32
    %58 = vector.broadcast %cst_31 : f32 to vector<1x32xf32>
    %59 = arith.addf %58, %57 : vector<1x32xf32>
    %60 = tpu.reciprocal %59 {approx = true} : vector<1x32xf32> -> vector<1x32xf32>
    %61 = vector.shape_cast %60 : vector<1x32xf32> to vector<1x1x32xf32>
    %62 = vector.broadcast %40 : vector<16x1x1xf32> to vector<16x16x1xf32>
    %63 = vector.broadcast %50 : vector<1x16x1xf32> to vector<16x16x1xf32>
    %64 = arith.mulf %62, %63 : vector<16x16x1xf32>
    %65 = vector.broadcast %64 : vector<16x16x1xf32> to vector<16x16x32xf32>
    %66 = vector.broadcast %61 : vector<1x1x32xf32> to vector<16x16x32xf32>
    %67 = arith.mulf %65, %66 : vector<16x16x32xf32>
    %c0_32 = arith.constant 0 : index
    %c0_33 = arith.constant 0 : index
    %c0_34 = arith.constant 0 : index
    %c0_35 = arith.constant 0 : index
    %68 = vector.load %arg6[%c0_32, %c0_33, %c0_34, %c0_35] : memref<1x16x16x32xf32, #tpu.memory_space<vmem>>, vector<1x16x16x32xf32>
    %69 = vector.shape_cast %68 : vector<1x16x16x32xf32> to vector<16x16x32xf32>
    %70 = vector.shape_cast %67 : vector<16x16x32xf32> to vector<1x16x16x32xf32>
    tpu.vector_store %arg6[%c0_32, %c0_33, %c0_34, %c0_35], %70 {strides = array<i32>} : memref<1x16x16x32xf32, #tpu.memory_space<vmem>>, vector<1x16x16x32xf32>,
    return
  }
  func.func @transform_0(%arg0: i32) -> (i32, i32, i32, i32) {
    %c0_i32 = arith.constant 0 : i32
    %c0_i32_0 = arith.constant 0 : i32
    %c0_i32_1 = arith.constant 0 : i32
    %c0_i32_2 = arith.constant 0 : i32
    return %arg0, %c0_i32, %c0_i32_0, %c0_i32_1 : i32, i32, i32, i32
  }
  func.func @transform_1(%arg0: i32) -> (i32, i32, i32, i32) {
    %c0_i32 = arith.constant 0 : i32
    %c0_i32_0 = arith.constant 0 : i32
    %c0_i32_1 = arith.constant 0 : i32
    %c0_i32_2 = arith.constant 0 : i32
    return %arg0, %c0_i32, %c0_i32_0, %c0_i32_1 : i32, i32, i32, i32
  }
  func.func @transform_2(%arg0: i32) -> (i32, i32) {
    %c0_i32 = arith.constant 0 : i32
    %c0_i32_0 = arith.constant 0 : i32
    %c0_i32_1 = arith.constant 0 : i32
    return %c0_i32, %c0_i32_0 : i32, i32
  }
  func.func @transform_3(%arg0: i32) -> (i32, i32) {
    %c0_i32 = arith.constant 0 : i32
    %c0_i32_0 = arith.constant 0 : i32
    %c0_i32_1 = arith.constant 0 : i32
    return %c0_i32, %c0_i32_0 : i32, i32
  }
  func.func @transform_4(%arg0: i32) -> i32 {
    %c0_i32 = arith.constant 0 : i32
    %c0_i32_0 = arith.constant 0 : i32
    return %c0_i32 : i32
  }
  func.func @transform_5(%arg0: i32) -> (i32, i32, i32, i32) {
    %c0_i32 = arith.constant 0 : i32
    %c0_i32_0 = arith.constant 0 : i32
    %c0_i32_1 = arith.constant 0 : i32
    %c0_i32_2 = arith.constant 0 : i32
    return %arg0, %c0_i32, %c0_i32_0, %c0_i32_1 : i32, i32, i32, i32
  }
  func.func @transform_6(%arg0: i32) -> (i32, i32, i32, i32) {
    %c0_i32 = arith.constant 0 : i32
    %c0_i32_0 = arith.constant 0 : i32
    %c0_i32_1 = arith.constant 0 : i32
    %c0_i32_2 = arith.constant 0 : i32
    return %arg0, %c0_i32, %c0_i32_0, %c0_i32_1 : i32, i32, i32, i32
  }
}

module attributes {stable_mosaic.version = 11 : i64} {
  func.func @_lrte_kernel(%arg0: i32, %arg1: memref<1x16x16x32xf32, #tpu.memory_space<vmem>>, %arg2: memref<1x16x16x32xf32, #tpu.memory_space<vmem>>, %arg3: memref<32x32xf32, #tpu.memory_space<vmem>>, %arg4: memref<1x32xf32, #tpu.memory_space<vmem>>, %arg5: memref<4xf32, #tpu.memory_space<smem>>, %arg6: memref<1x16x16x32xf32, #tpu.memory_space<vmem>>) attributes {dimension_semantics = [#tpu.dimension_semantics<parallel>], iteration_bounds = array<i64: 2>, scalar_prefetch = 0 : i64, scratch_operands = 0 : i64, tpu.core_type = #tpu.core_type<tc>, window_params = [{transform_indices = @transform_0, window_bounds = array<i64: 1, 16, 16, 32>}, {transform_indices = @transform_1, window_bounds = array<i64: 1, 16, 16, 32>}, {pipeline_mode = #tpu.pipeline_mode<synchronous>, transform_indices = @transform_2, window_bounds = array<i64: 32, 32>}, {pipeline_mode = #tpu.pipeline_mode<synchronous>, transform_indices = @transform_3, window_bounds = array<i64: 1, 32>}, {transform_indices = @transform_4, window_bounds = array<i64: 4>}, {transform_indices = @transform_5, window_bounds = array<i64: 1, 16, 16, 32>}]} {
    %c0 = arith.constant 0 : index
    %c0_0 = arith.constant 0 : index
    %c0_1 = arith.constant 0 : index
    %c0_2 = arith.constant 0 : index
    %0 = vector.load %arg1[%c0, %c0_0, %c0_1, %c0_2] : memref<1x16x16x32xf32, #tpu.memory_space<vmem>>, vector<1x16x16x32xf32>
    %1 = vector.shape_cast %0 : vector<1x16x16x32xf32> to vector<16x16x32xf32>
    %c0_3 = arith.constant 0 : index
    %c0_4 = arith.constant 0 : index
    %c0_5 = arith.constant 0 : index
    %c0_6 = arith.constant 0 : index
    %2 = vector.load %arg2[%c0_3, %c0_4, %c0_5, %c0_6] : memref<1x16x16x32xf32, #tpu.memory_space<vmem>>, vector<1x16x16x32xf32>
    %3 = vector.shape_cast %2 : vector<1x16x16x32xf32> to vector<16x16x32xf32>
    %4 = arith.addf %1, %3 : vector<16x16x32xf32>
    %cst = arith.constant dense<0.000000e+00> : vector<16x16xf32>
    %5 = vector.multi_reduction <add>, %4, %cst [2] : vector<16x16x32xf32> to vector<16x16xf32>
    %6 = vector.shape_cast %5 : vector<16x16xf32> to vector<16x16x1xf32>
    %cst_7 = arith.constant 3.200000e+01 : f32
    %7 = vector.broadcast %cst_7 : f32 to vector<16x16x1xf32>
    %8 = arith.divf %6, %7 : vector<16x16x1xf32>
    %cst_8 = arith.constant dense<0.000000e+00> : vector<16x1xf32>
    %9 = vector.multi_reduction <add>, %8, %cst_8 [1] : vector<16x16x1xf32> to vector<16x1xf32>
    %10 = vector.shape_cast %9 : vector<16x1xf32> to vector<16x1x1xf32>
    %cst_9 = arith.constant 1.600000e+01 : f32
    %11 = vector.broadcast %cst_9 : f32 to vector<16x1x1xf32>
    %12 = arith.divf %10, %11 : vector<16x1x1xf32>
    %cst_10 = arith.constant dense<0.000000e+00> : vector<16x1xf32>
    %13 = vector.multi_reduction <add>, %8, %cst_10 [0] : vector<16x16x1xf32> to vector<16x1xf32>
    %14 = vector.shape_cast %13 : vector<16x1xf32> to vector<1x16x1xf32>
    %cst_11 = arith.constant 1.600000e+01 : f32
    %15 = vector.broadcast %cst_11 : f32 to vector<1x16x1xf32>
    %16 = arith.divf %14, %15 : vector<1x16x1xf32>
    %cst_12 = arith.constant dense<0.000000e+00> : vector<16x32xf32>
    %17 = vector.multi_reduction <add>, %4, %cst_12 [0] : vector<16x16x32xf32> to vector<16x32xf32>
    %cst_13 = arith.constant 1.600000e+01 : f32
    %18 = vector.broadcast %cst_13 : f32 to vector<16x32xf32>
    %19 = arith.divf %17, %18 : vector<16x32xf32>
    %cst_14 = arith.constant dense<0.000000e+00> : vector<32xf32>
    %20 = vector.multi_reduction <add>, %19, %cst_14 [0] : vector<16x32xf32> to vector<32xf32>
    %21 = vector.shape_cast %20 : vector<32xf32> to vector<1x32xf32>
    %cst_15 = arith.constant 1.600000e+01 : f32
    %22 = vector.broadcast %cst_15 : f32 to vector<1x32xf32>
    %23 = arith.divf %21, %22 : vector<1x32xf32>
    %c0_16 = arith.constant 0 : index
    %24 = memref.load %arg5[%c0_16] : memref<4xf32, #tpu.memory_space<smem>>
    %c1 = arith.constant 1 : index
    %25 = memref.load %arg5[%c1] : memref<4xf32, #tpu.memory_space<smem>>
    %c2 = arith.constant 2 : index
    %26 = memref.load %arg5[%c2] : memref<4xf32, #tpu.memory_space<smem>>
    %c3 = arith.constant 3 : index
    %27 = memref.load %arg5[%c3] : memref<4xf32, #tpu.memory_space<smem>>
    %28 = vector.broadcast %24 : f32 to vector<16x1x1xf32>
    %29 = arith.mulf %28, %12 : vector<16x1x1xf32>
    %30 = vector.broadcast %25 : f32 to vector<16x1x1xf32>
    %31 = arith.addf %29, %30 : vector<16x1x1xf32>
    %cst_17 = arith.constant 0.000000e+00 : f32
    %32 = vector.broadcast %cst_17 : f32 to vector<16x1x1xf32>
    %33 = arith.subf %32, %31 : vector<16x1x1xf32>
    %34 = math.exp %33 : vector<16x1x1xf32>
    %cst_18 = arith.constant 1.000000e+00 : f32
    %35 = vector.broadcast %cst_18 : f32 to vector<16x1x1xf32>
    %36 = arith.addf %35, %34 : vector<16x1x1xf32>
    %37 = tpu.reciprocal %36 {approx = true} : vector<16x1x1xf32> -> vector<16x1x1xf32>
    %38 = vector.broadcast %26 : f32 to vector<1x16x1xf32>
    %39 = arith.mulf %38, %16 : vector<1x16x1xf32>
    %40 = vector.broadcast %27 : f32 to vector<1x16x1xf32>
    %41 = arith.addf %39, %40 : vector<1x16x1xf32>
    %cst_19 = arith.constant 0.000000e+00 : f32
    %42 = vector.broadcast %cst_19 : f32 to vector<1x16x1xf32>
    %43 = arith.subf %42, %41 : vector<1x16x1xf32>
    %44 = math.exp %43 : vector<1x16x1xf32>
    %cst_20 = arith.constant 1.000000e+00 : f32
    %45 = vector.broadcast %cst_20 : f32 to vector<1x16x1xf32>
    %46 = arith.addf %45, %44 : vector<1x16x1xf32>
    %47 = tpu.reciprocal %46 {approx = true} : vector<1x16x1xf32> -> vector<1x16x1xf32>
    %c0_21 = arith.constant 0 : index
    %c0_22 = arith.constant 0 : index
    %48 = vector.load %arg3[%c0_21, %c0_22] : memref<32x32xf32, #tpu.memory_space<vmem>>, vector<32x32xf32>
    %cst_23 = arith.constant dense<0.000000e+00> : vector<1x32xf32>
    %49 = tpu.matmul %23, %48, %cst_23 {dimension_numbers = #tpu.dot_dimension_numbers<[1], [0], [0], [1], [0, 0, 1, 1], [], []>} : vector<1x32xf32>, vector<32x32xf32>, vector<1x32xf32> -> vector<1x32xf32>
    %c0_24 = arith.constant 0 : index
    %c0_25 = arith.constant 0 : index
    %50 = vector.load %arg4[%c0_24, %c0_25] : memref<1x32xf32, #tpu.memory_space<vmem>>, vector<1x32xf32>
    %51 = arith.addf %49, %50 : vector<1x32xf32>
    %cst_26 = arith.constant 0.000000e+00 : f32
    %52 = vector.broadcast %cst_26 : f32 to vector<1x32xf32>
    %53 = arith.subf %52, %51 : vector<1x32xf32>
    %54 = math.exp %53 : vector<1x32xf32>
    %cst_27 = arith.constant 1.000000e+00 : f32
    %55 = vector.broadcast %cst_27 : f32 to vector<1x32xf32>
    %56 = arith.addf %55, %54 : vector<1x32xf32>
    %57 = tpu.reciprocal %56 {approx = true} : vector<1x32xf32> -> vector<1x32xf32>
    %58 = vector.shape_cast %57 : vector<1x32xf32> to vector<1x1x32xf32>
    %59 = vector.broadcast %37 : vector<16x1x1xf32> to vector<16x16x1xf32>
    %60 = vector.broadcast %47 : vector<1x16x1xf32> to vector<16x16x1xf32>
    %61 = arith.mulf %59, %60 : vector<16x16x1xf32>
    %62 = vector.broadcast %61 : vector<16x16x1xf32> to vector<16x16x32xf32>
    %63 = vector.broadcast %58 : vector<1x1x32xf32> to vector<16x16x32xf32>
    %64 = arith.mulf %62, %63 : vector<16x16x32xf32>
    %c0_28 = arith.constant 0 : index
    %c0_29 = arith.constant 0 : index
    %c0_30 = arith.constant 0 : index
    %c0_31 = arith.constant 0 : index
    %65 = vector.load %arg6[%c0_28, %c0_29, %c0_30, %c0_31] : memref<1x16x16x32xf32, #tpu.memory_space<vmem>>, vector<1x16x16x32xf32>
    %66 = vector.shape_cast %65 : vector<1x16x16x32xf32> to vector<16x16x32xf32>
    %67 = vector.shape_cast %64 : vector<16x16x32xf32> to vector<1x16x16x32xf32>
    tpu.vector_store %arg6[%c0_28, %c0_29, %c0_30, %c0_31], %67 {strides = array<i32>} : memref<1x16x16x32xf32, #tpu.memory_space<vmem>>, vector<1x16x16x32xf32>,
    return
  }
  func.func @transform_0(%arg0: i32) -> (i32, i32, i32, i32) {
    %c0_i32 = arith.constant 0 : i32
    %c0_i32_0 = arith.constant 0 : i32
    %c0_i32_1 = arith.constant 0 : i32
    %c0_i32_2 = arith.constant 0 : i32
    return %arg0, %c0_i32, %c0_i32_0, %c0_i32_1 : i32, i32, i32, i32
  }
  func.func @transform_1(%arg0: i32) -> (i32, i32, i32, i32) {
    %c0_i32 = arith.constant 0 : i32
    %c0_i32_0 = arith.constant 0 : i32
    %c0_i32_1 = arith.constant 0 : i32
    %c0_i32_2 = arith.constant 0 : i32
    return %arg0, %c0_i32, %c0_i32_0, %c0_i32_1 : i32, i32, i32, i32
  }
  func.func @transform_2(%arg0: i32) -> (i32, i32) {
    %c0_i32 = arith.constant 0 : i32
    %c0_i32_0 = arith.constant 0 : i32
    %c0_i32_1 = arith.constant 0 : i32
    return %c0_i32, %c0_i32_0 : i32, i32
  }
  func.func @transform_3(%arg0: i32) -> (i32, i32) {
    %c0_i32 = arith.constant 0 : i32
    %c0_i32_0 = arith.constant 0 : i32
    %c0_i32_1 = arith.constant 0 : i32
    return %c0_i32, %c0_i32_0 : i32, i32
  }
  func.func @transform_4(%arg0: i32) -> i32 {
    %c0_i32 = arith.constant 0 : i32
    %c0_i32_0 = arith.constant 0 : i32
    return %c0_i32 : i32
  }
  func.func @transform_5(%arg0: i32) -> (i32, i32, i32, i32) {
    %c0_i32 = arith.constant 0 : i32
    %c0_i32_0 = arith.constant 0 : i32
    %c0_i32_1 = arith.constant 0 : i32
    %c0_i32_2 = arith.constant 0 : i32
    return %arg0, %c0_i32, %c0_i32_0, %c0_i32_1 : i32, i32, i32, i32
  }
}

module attributes {stable_mosaic.version = 11 : i64} {
  func.func @_conv3x3_kernel(%arg0: i32, %arg1: i32, %arg2: memref<1x18x18x64xf32, #tpu.memory_space<vmem>>, %arg3: memref<576x32xbf16, #tpu.memory_space<vmem>>, %arg4: memref<1x32xf32, #tpu.memory_space<vmem>>, %arg5: memref<1x4x16x32xf32, #tpu.memory_space<vmem>>, %arg6: memref<1x4x16x32xf32, #tpu.memory_space<vmem>>, %arg7: memref<1x4x16x32xf32, #tpu.memory_space<vmem>>, %arg8: memref<64x576xf32, #tpu.memory_space<vmem>>) attributes {dimension_semantics = [#tpu.dimension_semantics<parallel>, #tpu.dimension_semantics<parallel>], iteration_bounds = array<i64: 2, 4>, scalar_prefetch = 0 : i64, scratch_operands = 1 : i64, tpu.core_type = #tpu.core_type<tc>, window_params = [{transform_indices = @transform_0, window_bounds = array<i64: 1, 18, 18, 64>}, {pipeline_mode = #tpu.pipeline_mode<synchronous>, transform_indices = @transform_1, window_bounds = array<i64: 576, 32>}, {pipeline_mode = #tpu.pipeline_mode<synchronous>, transform_indices = @transform_2, window_bounds = array<i64: 1, 32>}, {transform_indices = @transform_3, window_bounds = array<i64: 1, 4, 16, 32>}, {transform_indices = @transform_4, window_bounds = array<i64: 1, 4, 16, 32>}, {transform_indices = @transform_5, window_bounds = array<i64: 1, 4, 16, 32>}]} {
    %c4_i32 = arith.constant 4 : i32
    %0 = arith.muli %arg1, %c4_i32 : i32
    %1 = tpu.assume_multiple %0, 4 : i32
    %c0_i32 = arith.constant 0 : i32
    %2 = arith.addi %1, %c0_i32 : i32
    %c0 = arith.constant 0 : index
    %3 = arith.index_cast %2 : i32 to index
    %c0_0 = arith.constant 0 : index
    %c0_1 = arith.constant 0 : index
    %4 = vector.load %arg2[%c0, %3, %c0_0, %c0_1] : memref<1x18x18x64xf32, #tpu.memory_space<vmem>>, vector<1x4x16x64xf32>
    %5 = vector.shape_cast %4 : vector<1x4x16x64xf32> to vector<4x16x64xf32>
    %6 = vector.shape_cast %5 : vector<4x16x64xf32> to vector<64x64xf32>
    %c0_2 = arith.constant 0 : index
    %c0_3 = arith.constant 0 : index
    %7 = vector.load %arg8[%c0_2, %c0_3] : memref<64x576xf32, #tpu.memory_space<vmem>>, vector<64x64xf32>
    tpu.vector_store %arg8[%c0_2, %c0_3], %6 {strides = array<i32>} : memref<64x576xf32, #tpu.memory_space<vmem>>, vector<64x64xf32>,
    %c0_i32_4 = arith.constant 0 : i32
    %8 = arith.addi %1, %c0_i32_4 : i32
    %c0_5 = arith.constant 0 : index
    %9 = arith.index_cast %8 : i32 to index
    %c1 = arith.constant 1 : index
    %c0_6 = arith.constant 0 : index
    %10 = vector.load %arg2[%c0_5, %9, %c1, %c0_6] : memref<1x18x18x64xf32, #tpu.memory_space<vmem>>, vector<1x4x16x64xf32>
    %11 = vector.shape_cast %10 : vector<1x4x16x64xf32> to vector<4x16x64xf32>
    %12 = vector.shape_cast %11 : vector<4x16x64xf32> to vector<64x64xf32>
    %c0_7 = arith.constant 0 : index
    %c64 = arith.constant 64 : index
    %13 = vector.load %arg8[%c0_7, %c64] : memref<64x576xf32, #tpu.memory_space<vmem>>, vector<64x64xf32>
    tpu.vector_store %arg8[%c0_7, %c64], %12 {strides = array<i32>} : memref<64x576xf32, #tpu.memory_space<vmem>>, vector<64x64xf32>,
    %c0_i32_8 = arith.constant 0 : i32
    %14 = arith.addi %1, %c0_i32_8 : i32
    %c0_9 = arith.constant 0 : index
    %15 = arith.index_cast %14 : i32 to index
    %c2 = arith.constant 2 : index
    %c0_10 = arith.constant 0 : index
    %16 = vector.load %arg2[%c0_9, %15, %c2, %c0_10] : memref<1x18x18x64xf32, #tpu.memory_space<vmem>>, vector<1x4x16x64xf32>
    %17 = vector.shape_cast %16 : vector<1x4x16x64xf32> to vector<4x16x64xf32>
    %18 = vector.shape_cast %17 : vector<4x16x64xf32> to vector<64x64xf32>
    %c0_11 = arith.constant 0 : index
    %c128 = arith.constant 128 : index
    %19 = vector.load %arg8[%c0_11, %c128] : memref<64x576xf32, #tpu.memory_space<vmem>>, vector<64x64xf32>
    tpu.vector_store %arg8[%c0_11, %c128], %18 {strides = array<i32>} : memref<64x576xf32, #tpu.memory_space<vmem>>, vector<64x64xf32>,
    %c1_i32 = arith.constant 1 : i32
    %20 = arith.addi %1, %c1_i32 : i32
    %c0_12 = arith.constant 0 : index
    %21 = arith.index_cast %20 : i32 to index
    %c0_13 = arith.constant 0 : index
    %c0_14 = arith.constant 0 : index
    %22 = vector.load %arg2[%c0_12, %21, %c0_13, %c0_14] : memref<1x18x18x64xf32, #tpu.memory_space<vmem>>, vector<1x4x16x64xf32>
    %23 = vector.shape_cast %22 : vector<1x4x16x64xf32> to vector<4x16x64xf32>
    %24 = vector.shape_cast %23 : vector<4x16x64xf32> to vector<64x64xf32>
    %c0_15 = arith.constant 0 : index
    %c192 = arith.constant 192 : index
    %25 = vector.load %arg8[%c0_15, %c192] : memref<64x576xf32, #tpu.memory_space<vmem>>, vector<64x64xf32>
    tpu.vector_store %arg8[%c0_15, %c192], %24 {strides = array<i32>} : memref<64x576xf32, #tpu.memory_space<vmem>>, vector<64x64xf32>,
    %c1_i32_16 = arith.constant 1 : i32
    %26 = arith.addi %1, %c1_i32_16 : i32
    %c0_17 = arith.constant 0 : index
    %27 = arith.index_cast %26 : i32 to index
    %c1_18 = arith.constant 1 : index
    %c0_19 = arith.constant 0 : index
    %28 = vector.load %arg2[%c0_17, %27, %c1_18, %c0_19] : memref<1x18x18x64xf32, #tpu.memory_space<vmem>>, vector<1x4x16x64xf32>
    %29 = vector.shape_cast %28 : vector<1x4x16x64xf32> to vector<4x16x64xf32>
    %30 = vector.shape_cast %29 : vector<4x16x64xf32> to vector<64x64xf32>
    %c0_20 = arith.constant 0 : index
    %c256 = arith.constant 256 : index
    %31 = vector.load %arg8[%c0_20, %c256] : memref<64x576xf32, #tpu.memory_space<vmem>>, vector<64x64xf32>
    tpu.vector_store %arg8[%c0_20, %c256], %30 {strides = array<i32>} : memref<64x576xf32, #tpu.memory_space<vmem>>, vector<64x64xf32>,
    %c1_i32_21 = arith.constant 1 : i32
    %32 = arith.addi %1, %c1_i32_21 : i32
    %c0_22 = arith.constant 0 : index
    %33 = arith.index_cast %32 : i32 to index
    %c2_23 = arith.constant 2 : index
    %c0_24 = arith.constant 0 : index
    %34 = vector.load %arg2[%c0_22, %33, %c2_23, %c0_24] : memref<1x18x18x64xf32, #tpu.memory_space<vmem>>, vector<1x4x16x64xf32>
    %35 = vector.shape_cast %34 : vector<1x4x16x64xf32> to vector<4x16x64xf32>
    %36 = vector.shape_cast %35 : vector<4x16x64xf32> to vector<64x64xf32>
    %c0_25 = arith.constant 0 : index
    %c320 = arith.constant 320 : index
    %37 = vector.load %arg8[%c0_25, %c320] : memref<64x576xf32, #tpu.memory_space<vmem>>, vector<64x64xf32>
    tpu.vector_store %arg8[%c0_25, %c320], %36 {strides = array<i32>} : memref<64x576xf32, #tpu.memory_space<vmem>>, vector<64x64xf32>,
    %c2_i32 = arith.constant 2 : i32
    %38 = arith.addi %1, %c2_i32 : i32
    %c0_26 = arith.constant 0 : index
    %39 = arith.index_cast %38 : i32 to index
    %c0_27 = arith.constant 0 : index
    %c0_28 = arith.constant 0 : index
    %40 = vector.load %arg2[%c0_26, %39, %c0_27, %c0_28] : memref<1x18x18x64xf32, #tpu.memory_space<vmem>>, vector<1x4x16x64xf32>
    %41 = vector.shape_cast %40 : vector<1x4x16x64xf32> to vector<4x16x64xf32>
    %42 = vector.shape_cast %41 : vector<4x16x64xf32> to vector<64x64xf32>
    %c0_29 = arith.constant 0 : index
    %c384 = arith.constant 384 : index
    %43 = vector.load %arg8[%c0_29, %c384] : memref<64x576xf32, #tpu.memory_space<vmem>>, vector<64x64xf32>
    tpu.vector_store %arg8[%c0_29, %c384], %42 {strides = array<i32>} : memref<64x576xf32, #tpu.memory_space<vmem>>, vector<64x64xf32>,
    %c2_i32_30 = arith.constant 2 : i32
    %44 = arith.addi %1, %c2_i32_30 : i32
    %c0_31 = arith.constant 0 : index
    %45 = arith.index_cast %44 : i32 to index
    %c1_32 = arith.constant 1 : index
    %c0_33 = arith.constant 0 : index
    %46 = vector.load %arg2[%c0_31, %45, %c1_32, %c0_33] : memref<1x18x18x64xf32, #tpu.memory_space<vmem>>, vector<1x4x16x64xf32>
    %47 = vector.shape_cast %46 : vector<1x4x16x64xf32> to vector<4x16x64xf32>
    %48 = vector.shape_cast %47 : vector<4x16x64xf32> to vector<64x64xf32>
    %c0_34 = arith.constant 0 : index
    %c448 = arith.constant 448 : index
    %49 = vector.load %arg8[%c0_34, %c448] : memref<64x576xf32, #tpu.memory_space<vmem>>, vector<64x64xf32>
    tpu.vector_store %arg8[%c0_34, %c448], %48 {strides = array<i32>} : memref<64x576xf32, #tpu.memory_space<vmem>>, vector<64x64xf32>,
    %c2_i32_35 = arith.constant 2 : i32
    %50 = arith.addi %1, %c2_i32_35 : i32
    %c0_36 = arith.constant 0 : index
    %51 = arith.index_cast %50 : i32 to index
    %c2_37 = arith.constant 2 : index
    %c0_38 = arith.constant 0 : index
    %52 = vector.load %arg2[%c0_36, %51, %c2_37, %c0_38] : memref<1x18x18x64xf32, #tpu.memory_space<vmem>>, vector<1x4x16x64xf32>
    %53 = vector.shape_cast %52 : vector<1x4x16x64xf32> to vector<4x16x64xf32>
    %54 = vector.shape_cast %53 : vector<4x16x64xf32> to vector<64x64xf32>
    %c0_39 = arith.constant 0 : index
    %c512 = arith.constant 512 : index
    %55 = vector.load %arg8[%c0_39, %c512] : memref<64x576xf32, #tpu.memory_space<vmem>>, vector<64x64xf32>
    tpu.vector_store %arg8[%c0_39, %c512], %54 {strides = array<i32>} : memref<64x576xf32, #tpu.memory_space<vmem>>, vector<64x64xf32>,
    %c0_40 = arith.constant 0 : index
    %c0_41 = arith.constant 0 : index
    %56 = vector.load %arg8[%c0_40, %c0_41] : memref<64x576xf32, #tpu.memory_space<vmem>>, vector<64x576xf32>
    %57 = arith.truncf %56 : vector<64x576xf32> to vector<64x576xbf16>
    %c0_42 = arith.constant 0 : index
    %c0_43 = arith.constant 0 : index
    %58 = vector.load %arg3[%c0_42, %c0_43] : memref<576x32xbf16, #tpu.memory_space<vmem>>, vector<576x32xbf16>
    %cst = arith.constant dense<0.000000e+00> : vector<64x32xf32>
    %59 = tpu.matmul %57, %58, %cst {dimension_numbers = #tpu.dot_dimension_numbers<[1], [0], [0], [1], [0, 0, 1, 1], [], []>} : vector<64x576xbf16>, vector<576x32xbf16>, vector<64x32xf32> -> vector<64x32xf32>
    %c0_44 = arith.constant 0 : index
    %c0_45 = arith.constant 0 : index
    %60 = vector.load %arg4[%c0_44, %c0_45] : memref<1x32xf32, #tpu.memory_space<vmem>>, vector<1x32xf32>
    %61 = vector.broadcast %60 : vector<1x32xf32> to vector<64x32xf32>
    %62 = arith.addf %59, %61 : vector<64x32xf32>
    %63 = vector.shape_cast %62 : vector<64x32xf32> to vector<4x16x32xf32>
    %c0_46 = arith.constant 0 : index
    %c0_47 = arith.constant 0 : index
    %c0_48 = arith.constant 0 : index
    %c0_49 = arith.constant 0 : index
    %64 = vector.load %arg5[%c0_46, %c0_47, %c0_48, %c0_49] : memref<1x4x16x32xf32, #tpu.memory_space<vmem>>, vector<1x4x16x32xf32>
    %65 = vector.shape_cast %64 : vector<1x4x16x32xf32> to vector<4x16x32xf32>
    %66 = arith.mulf %63, %65 : vector<4x16x32xf32>
    %c0_50 = arith.constant 0 : index
    %c0_51 = arith.constant 0 : index
    %c0_52 = arith.constant 0 : index
    %c0_53 = arith.constant 0 : index
    %67 = vector.load %arg6[%c0_50, %c0_51, %c0_52, %c0_53] : memref<1x4x16x32xf32, #tpu.memory_space<vmem>>, vector<1x4x16x32xf32>
    %68 = vector.shape_cast %67 : vector<1x4x16x32xf32> to vector<4x16x32xf32>
    %69 = arith.addf %66, %68 : vector<4x16x32xf32>
    %c0_54 = arith.constant 0 : index
    %c0_55 = arith.constant 0 : index
    %c0_56 = arith.constant 0 : index
    %c0_57 = arith.constant 0 : index
    %70 = vector.load %arg7[%c0_54, %c0_55, %c0_56, %c0_57] : memref<1x4x16x32xf32, #tpu.memory_space<vmem>>, vector<1x4x16x32xf32>
    %71 = vector.shape_cast %70 : vector<1x4x16x32xf32> to vector<4x16x32xf32>
    %72 = vector.shape_cast %69 : vector<4x16x32xf32> to vector<1x4x16x32xf32>
    tpu.vector_store %arg7[%c0_54, %c0_55, %c0_56, %c0_57], %72 {strides = array<i32>} : memref<1x4x16x32xf32, #tpu.memory_space<vmem>>, vector<1x4x16x32xf32>,
    return
  }
  func.func @transform_0(%arg0: i32, %arg1: i32) -> (i32, i32, i32, i32) {
    %c0_i32 = arith.constant 0 : i32
    %c0_i32_0 = arith.constant 0 : i32
    %c0_i32_1 = arith.constant 0 : i32
    %c0_i32_2 = arith.constant 0 : i32
    return %arg0, %c0_i32, %c0_i32_0, %c0_i32_1 : i32, i32, i32, i32
  }
  func.func @transform_1(%arg0: i32, %arg1: i32) -> (i32, i32) {
    %c0_i32 = arith.constant 0 : i32
    %c0_i32_0 = arith.constant 0 : i32
    %c0_i32_1 = arith.constant 0 : i32
    return %c0_i32, %c0_i32_0 : i32, i32
  }
  func.func @transform_2(%arg0: i32, %arg1: i32) -> (i32, i32) {
    %c0_i32 = arith.constant 0 : i32
    %c0_i32_0 = arith.constant 0 : i32
    %c0_i32_1 = arith.constant 0 : i32
    return %c0_i32, %c0_i32_0 : i32, i32
  }
  func.func @transform_3(%arg0: i32, %arg1: i32) -> (i32, i32, i32, i32) {
    %c0_i32 = arith.constant 0 : i32
    %c0_i32_0 = arith.constant 0 : i32
    %c0_i32_1 = arith.constant 0 : i32
    return %arg0, %arg1, %c0_i32, %c0_i32_0 : i32, i32, i32, i32
  }
  func.func @transform_4(%arg0: i32, %arg1: i32) -> (i32, i32, i32, i32) {
    %c0_i32 = arith.constant 0 : i32
    %c0_i32_0 = arith.constant 0 : i32
    %c0_i32_1 = arith.constant 0 : i32
    return %arg0, %arg1, %c0_i32, %c0_i32_0 : i32, i32, i32, i32
  }
  func.func @transform_5(%arg0: i32, %arg1: i32) -> (i32, i32, i32, i32) {
    %c0_i32 = arith.constant 0 : i32
    %c0_i32_0 = arith.constant 0 : i32
    %c0_i32_1 = arith.constant 0 : i32
    return %arg0, %arg1, %c0_i32, %c0_i32_0 : i32, i32, i32, i32
  }
}

</mosaic_0001>

<bundles_post_ra>
// kernel: low_rank_tensor_forward.6
= control target key start
LH: loop header
LB: loop body
LE: loop exit
PB: predicated region body
PF: predicated region fallthrough
CT: control target
= control target key end

     0   :  { %s1229_s12 = smov 0   ;;  %s1231_s13 = smov 0   ;;  %s1600_s0 = inlined_call_operand.vmem [shape: f32[2,18,18,32], index: 0, kind: input, shape index: {}]   ;;  %s1601_s1 = inlined_call_operand.vmem [shape: bf16[288,32], index: 1, kind: input, shape index: {}]   ;;  %s1602_s2 = inlined_call_operand.vmem [shape: f32[1,32], index: 2, kind: input, shape index: {}]   ;;  %s1603_s3 = inlined_call_operand.vmem [shape: f32[2,16,16,32], index: 3, kind: output, shape index: {}]  }
   0x1   :  { %s1233_s14 = smov 0   ;;  %s1235_s15 = smov 0  }
   0x2   :  { %s1237_s16 = smov 0  }
   0x3 LB: > { %s22_s17 = sadd.s32 1, %s1196_s14  ;;  %s25_s18 = sadd.s32 1, %s1200_s15  ;;  %s1204_s16 = sphi %s1237_s16, %s13_s16   ;;  %s1200_s15 = sphi %s1235_s15, %s1607_s15   ;;  %s1196_s14 = sphi %s1233_s14, %s1606_s14   ;;  %s1192_s13 = sphi %s1231_s13, %s1605_s13   ;;  %s1188_s12 = sphi %s1229_s12, %s1604_s12  }
   0x4   : > { %p23_p0 = scmp.ge.s32.totalorder %s22_s17, 4  ;;  %p949_p1 = scmp.ge.s32.totalorder %s1204_s16, 1 }
   0x5   : > { %p151_p2 = scmp.lt.s32.totalorder %s1204_s16, 9 }
   0x6   : > { %s1609_s17 = smov (%p23_p0, %s22_s17), 0  ;;  %s1611_s18 = smov (!%p23_p0, %s25_s18), %s1200_s15 }
   0x7   : > { %p152_p3 = pnand %p949_p1, %p151_p2  ;;  %p27_p4 = scmp.ge.s32.totalorder %s1611_s18, 2 }
   0x8   : > { %p180_p5 = scmp.lt.s32.totalorder (!%p152_p3), %s1192_s13, 1  ;;  %s956_s19 = smul.u32 (!%p152_p3), 96, %s1188_s12 }
   0x9   : > { %s1613_s18 = smov (%p27_p4, %s1611_s18), 0  ;;  %155 = sbr.rel (%p152_p3) target bundleno = 407 (0x197), region = 32 }
   0xa   : > { %s1206_s25 = smov (!%p152_p3), 64   ;;  %s1207_s26 = smov (!%p152_p3), 32  }
   0xb   : > { %s1208_s27 = smov (!%p152_p3), 96  }
   0xe   : > { %s1615_s13 = smov (!%p180_p5, %s1192_s13), 1  ;;  %v1094_v23 = vld [vmem:[%s1601_s1 + $0x38] sm:$0xff]  ;;  %v1093_v27 = vld [vmem:[%s1601_s1 + $0x30] sm:$0xff]  ;;  %v1092_v28 = vld [vmem:[%s1601_s1 + $0x28] sm:$0xff]  ;;  %vm208_vm0 = vcmask 261120   ;;  %vm257_vm1 = vcmask 523520  }
   0xf   : > { %s1121_s20 = smul.u32 432, %s1615_s13  ;;  %1105 = vmatpush.bf16.msra.mxu3 %v1094_v23  ;;  %742 = vmatpush.bf16.msra.mxu0 %v1094_v23  ;;  %v1091_v29 = vld [vmem:[%s1601_s1 + $0x20] sm:$0xff]  ;;  %v1102_v30 = vld [vmem:[%s1601_s1 + $0x78] sm:$0xff]  ;;  %v1101_v32 = vld [vmem:[%s1601_s1 + $0x70] sm:$0xff]  ;;  %vm306_vm2 = vcmask 785920   ;;  %vm358_vm3 = vcmask 1048320  }
  0x10   : > { %v1090_v31 = vld [vmem:[%s1601_s1 + $0x18] sm:$0xff]  ;;  %1113 = vmatpush.bf16.msra.mxu1 %v1102_v30  ;;  %v1104_v33 = vld [vmem:[%s1601_s1 + $0x88] sm:$0xff]  ;;  %v1089_v34 = vld [vmem:[%s1601_s1 + $0x10] sm:$0xff]  ;;  %s953_s5 = sshll.u32 %s1615_s13, 5 }
  0x11   : > { %s184_s23 = scalar_lea.vmem %s1600_s0, %s1121_s20  ;;  %806 = vmatpush.bf16.msra.mxu2 %v1104_v33  ;;  %v1100_v37 = vld [vmem:[%s1601_s1 + $0x68] sm:$0xff]  ;;  %v1103_v38 = vld [vmem:[%s1601_s1 + $0x80] sm:$0xff]  ;;  %v1098_v47 = vld [vmem:[%s1601_s1 + $0x58] sm:$0xff] }
  0x12   : > { %s1268_s24 = scalar_lea.vmem %s184_s23, %s956_s19  ;;  %v1088_v39 = vld [vmem:[%s1601_s1 + $0x8] sm:$0xff]  ;;  %v1099_v44 = vld [vmem:[%s1601_s1 + $0x60] sm:$0xff]  ;;  %v1097_v48 = vld [vmem:[%s1601_s1 + $0x50] sm:$0xff] }
  0x13   : > { %v1271_v0 = vld [vmem:[%s1268_s24 + $0x1a] sm:$0xff]  ;;  %v1281_v2 = vld [vmem:[%s1268_s24 + $0x30] sm:$0xff]  ;;  %v1286_v3 = vld [vmem:[%s1268_s24 + $0x22] sm:$0xff]  ;;  %1106 = vmatpush.bf16.msra.mxu3 %v1093_v27  ;;  %743 = vmatpush.bf16.msra.mxu0 %v1093_v27 }
  0x14   : > { %v1274_v1 = vld [vmem:[%s1268_s24 + $0x19] sm:$0xff]  ;;  %286 = vrot.lane.b32.xlu1 %v1271_v0, %s1206_s25  ;;  %338 = vrot.lane.b32.xlu2 %v1281_v2, %s1208_s27  ;;  %v1289_v4 = vld [vmem:[%s1268_s24 + $0x21] sm:$0xff]  ;;  %213 = vst.msk [vmem:[#allocation2 + $0x60] sm:$0xff] %vm208_vm0, %v1281_v2 }
  0x15   : > { %237 = vrot.lane.b32.xlu0 %v1274_v1, %s1207_s26  ;;  %v1292_v5 = vld [vmem:[%s1268_s24 + $0x38] sm:$0xff]  ;;  %v1305_v8 = vld [vmem:[%s1268_s24 + $0x48] sm:$0xff]  ;;  %v1316_v10 = vld [vmem:[%s1268_s24 + $0x50] sm:$0xff]  ;;  %1114 = vmatpush.bf16.msra.mxu1 %v1101_v32  ;;  %376 = vst.msk [vmem:[#allocation2 + $0x20] sm:$0xff] %vm208_vm0, %v1289_v4 }
  0x16   : > { %v1301_v6 = vld [vmem:[%s1268_s24 + $0x3a] sm:$0xff]  ;;  %v977_v7 = vld [vmem:[%s1268_s24 + $0x32] sm:$0xff]  ;;  %v1313_v9 = vld [vmem:[%s1268_s24 + $0x49] sm:$0xff]  ;;  %214 = vst.msk [vmem:[#allocation2 + $0x78] sm:$0xff] %vm208_vm0, %v1292_v5  ;;  %807 = vmatpush.bf16.msra.mxu2 %v1103_v38 }
  0x17   : > { %v1319_v11 = vld [vmem:[%s1268_s24 + $0x51] sm:$0xff]  ;;  %v1328_v12 = vld [vmem:[%s1268_s24 + $0x39] sm:$0xff]  ;;  %v218_v14 = vld [vmem:[%s1268_s24 + $0x9] sm:$0xff]  ;;  %1107 = vmatpush.bf16.msra.mxu3 %v1092_v28  ;;  %744 = vmatpush.bf16.msra.mxu0 %v1092_v28  ;;  %538 = vst.msk [vmem:[#allocation2 + $0x10] sm:$0xff] %vm208_vm0, %v977_v7 }
  0x18   : > { %v1331_v13 = vld [vmem:[%s1268_s24 + $0x31] sm:$0xff]  ;;  %v217_v15 = vld [vmem:[%s1268_s24 + $0x1] sm:$0xff]  ;;  %v1370_v26 = vld [vmem:[%s1268_s24 + $0x69] sm:$0xff]  ;;  %539 = vst.msk [vmem:[#allocation2 + $0x28] sm:$0xff] %vm208_vm0, %v1301_v6 }
  0x19   : > { %v979_v16 = vld [vmem:[%s1268_s24 + $0x4a] sm:$0xff]  ;;  %v266_v17 = vld [vmem:[%s1268_s24 + $0x2] sm:$0xff]  ;;  %v980_v18 = vld [vmem:[%s1268_s24 + $0x52] sm:$0xff]  ;;  %378 = vst.msk [vmem:[#allocation2 + $0x50] sm:$0xff] %vm208_vm0, %v1328_v12  ;;  %1115 = vmatpush.bf16.msra.mxu1 %v1100_v37 }
  0x1a   : > { %v267_v19 = vld [vmem:[%s1268_s24 + $0xa] sm:$0xff]  ;;  %v989_v21 = vld [vmem:[%s1268_s24 + $0x60] sm:$0xff]  ;;  %v959_v22 = vld [vmem:[%s1268_s24 + $0x18] sm:$0xff]  ;;  %377 = vst.msk [vmem:[#allocation2 + $0x38] sm:$0xff] %vm208_vm0, %v1331_v13 }
  0x1b   : > { %v990_v20 = vld [vmem:[%s1268_s24 + $0x68] sm:$0xff]  ;;  %v960_v25 = vld [vmem:[%s1268_s24 + $0x20] sm:$0xff]  ;;  %211 = vst.msk [vmem:[#allocation2 + $0x30] sm:$0xff] %vm208_vm0, %v959_v22  ;;  %1108 = vmatpush.bf16.msra.mxu3 %v1091_v29  ;;  %745 = vmatpush.bf16.msra.mxu0 %v1091_v29  ;;  %v991_v51 = vld [vmem:[%s1268_s24 + $0x78] sm:$0xff] }
  0x1c   : > { %288 = vrot.lane.b32.xlu1 %v1286_v3, %s1206_s25  ;;  %340 = vrot.lane.b32.xlu2 %v1292_v5, %s1208_s27  ;;  %v1366_v24 = vld [vmem:[%s1268_s24 + $0x61] sm:$0xff]  ;;  %212 = vst.msk [vmem:[#allocation2 + $0x48] sm:$0xff] %vm208_vm0, %v960_v25  ;;  %v982_v40 = vld [vmem:[%s1268_s24 + $0x6a] sm:$0xff] }
  0x1d   : > { %239 = vrot.lane.b32.xlu0 %v1289_v4, %s1207_s26  ;;  %540 = vst.msk [vmem:[#allocation2 + $0x40] sm:$0xff] %vm208_vm0, %v979_v16  ;;  %v981_v36 = vld [vmem:[%s1268_s24 + $0x62] sm:$0xff]  ;;  %1116 = vmatpush.bf16.msra.mxu1 %v1099_v44  ;;  %v999_v60 = vld [vmem:[%s1268_s24 + $0x79] sm:$0xff] }
  0x1e   : > { %541 = vst.msk [vmem:[#allocation2 + $0x58] sm:$0xff] %vm208_vm0, %v980_v18  ;;  %v548_v41 = vld [vmem:[#allocation2 + $0x10] sm:$0xff]  ;;  %v1087_v45 = vld [vmem:[%s1601_s1] sm:$0xff]  ;;  %v1096_v52 = vld [vmem:[%s1601_s1 + $0x48] sm:$0xff] }
  0x1f   : > { %1109 = vmatpush.bf16.msra.mxu3 %v1090_v31  ;;  %746 = vmatpush.bf16.msra.mxu0 %v1090_v31  ;;  %379 = vst.msk [vmem:[#allocation2 + $0x68] sm:$0xff] %vm208_vm0, %v1313_v9  ;;  %v551_v42 = vld [vmem:[#allocation2 + $0x28] sm:$0xff]  ;;  %v992_v49 = vld [vmem:[%s1268_s24 + $0x80] sm:$0xff] }
  0x20   : > { %380 = vst.msk [vmem:[#allocation2 + $0x80] sm:$0xff] %vm208_vm0, %v1319_v11  ;;  %v572_v43 = vpack.c.bf16 %v551_v42, %v548_v41  ;;  %v1095_v58 = vld [vmem:[%s1601_s1 + $0x40] sm:$0xff] }
  0x21   : > { %542 = vst.msk [vmem:[#allocation2 + $0x70] sm:$0xff] %vm208_vm0, %v981_v36  ;;  %1117 = vmatpush.bf16.msra.mxu1 %v1098_v47  ;;  %v1000_v61 = vld [vmem:[%s1268_s24 + $0x81] sm:$0xff] }
  0x22   : > { %543 = vst.msk [vmem:[#allocation2 + $0x88] sm:$0xff] %vm208_vm0, %v982_v40  ;;  %1081 = vmatmul.msk.bf16.vlgmr.msra.gmra.mxu2 %vm208_vm0, %v572_v43 }
  0x23   : > { %1110 = vmatpush.bf16.msra.mxu3 %v1089_v34  ;;  %747 = vmatpush.bf16.msra.mxu0 %v1089_v34  ;;  %216 = vst.msk [vmem:[#allocation2 + $0xa8] sm:$0xff] %vm208_vm0, %v1316_v10 }
  0x24   : > { %405 = vrot.lane.b32.xlu1 %v1301_v6, %s1207_s26  ;;  %454 = vrot.lane.b32.xlu2 %v1305_v8, %s1206_s25  ;;  %215 = vst.msk [vmem:[#allocation2 + $0x90] sm:$0xff] %vm208_vm0, %v1305_v8  ;;  %v554_v53 = vld [vmem:[#allocation2 + $0x40] sm:$0xff] }
  0x25   : > { %403 = vrot.lane.b32.xlu0 %v977_v7, %s1207_s26  ;;  %381 = vst.msk [vmem:[#allocation2 + $0x98] sm:$0xff] %vm208_vm0, %v1366_v24  ;;  %1118 = vmatpush.bf16.msra.mxu1 %v1097_v48  ;;  %v557_v54 = vld [vmem:[#allocation2 + $0x58] sm:$0xff] }
  0x26   : > { %375 = vst.msk [vmem:[#allocation2 + $0x8] sm:$0xff] %vm208_vm0, %v1274_v1  ;;  %v575_v55 = vpack.c.bf16 %v557_v54, %v554_v53 }
  0x27   : > { %1111 = vmatpush.bf16.msra.mxu3 %v1088_v39  ;;  %748 = vmatpush.bf16.msra.mxu0 %v1088_v39  ;;  %382 = vst.msk [vmem:[#allocation2 + $0xb0] sm:$0xff] %vm208_vm0, %v1370_v26  ;;  %v1007_v39 = vld [vmem:[%s1268_s24 + $0x7a] sm:$0xff] }
  0x28   : > { %544 = vst.msk [vmem:[#allocation2 + $0xa0] sm:$0xff] %vm208_vm0, %v1007_v39 }
  0x29   : > { %1119 = vmatpush.bf16.msra.mxu1 %v1096_v52 }
  0x2b   : > { %1112 = vmatpush.bf16.msra.mxu3 %v1087_v45  ;;  %749 = vmatpush.bf16.msra.mxu0 %v1087_v45 }
  0x2c   : > { %502 = vrot.lane.b32.xlu1 %v1313_v9, %s1208_s27  ;;  %504 = vrot.lane.b32.xlu2 %v1319_v11, %s1208_s27 }
  0x2d   : > { %456 = vrot.lane.b32.xlu0 %v1316_v10, %s1206_s25  ;;  %1120 = vmatpush.bf16.msra.mxu1 %v1095_v58 }
  0x2f   : > { %771 = vmatpush.bf16.msrb.mxu0 %v1102_v30 }
  0x32   : > { %1082 = vmatmul.msk.bf16.gmra.mxu2 %vm208_vm0, %v575_v55 }
  0x33   : > { %772 = vmatpush.bf16.msrb.mxu0 %v1101_v32 }
  0x34   : > { %243 = vrot.lane.b32.xlu1 %v1328_v12, %s1207_s26  ;;  %290 = vrot.lane.b32.xlu2 %v977_v7, %s1206_s25  ;;  %v200_v7 = vld [vmem:[%s1268_s24] sm:$0xff] }
  0x35   : > { %241 = vrot.lane.b32.xlu0 %v1331_v13, %s1207_s26  ;;  %209 = vst.msk [vmem:[#allocation2] sm:$0xff] %vm208_vm0, %v200_v7 }
  0x37   : > { %773 = vmatpush.bf16.msrb.mxu0 %v1100_v37 }
  0x3b   : > { %774 = vmatpush.bf16.msrb.mxu0 %v1099_v44 }
  0x3c   : > { %342 = vrot.lane.b32.xlu1 %v1305_v8, %s1208_s27  ;;  %344 = vrot.lane.b32.xlu2 %v1316_v10, %s1208_s27 }
  0x3d   : > { %292 = vrot.lane.b32.xlu0 %v1301_v6, %s1206_s25 }
  0x3f   : > { %775 = vmatpush.bf16.msrb.mxu0 %v1098_v47 }
  0x43   : > { %776 = vmatpush.bf16.msrb.mxu0 %v1097_v48 }
  0x44   : > { %235 = vrot.lane.b32.xlu1 %v218_v14, %s1207_s26  ;;  %407 = vrot.lane.b32.xlu2 %v979_v16, %s1207_s26 }
  0x45   : > { %233 = vrot.lane.b32.xlu0 %v217_v15, %s1207_s26 }
  0x47   : > { %777 = vmatpush.bf16.msrb.mxu0 %v1096_v52 }
  0x4b   : > { %778 = vmatpush.bf16.msrb.mxu0 %v1095_v58 }
  0x4c   : > { %282 = vrot.lane.b32.xlu1 %v266_v17, %s1206_s25  ;;  %284 = vrot.lane.b32.xlu2 %v267_v19, %s1206_s25 }
  0x4d   : > { %409 = vrot.lane.b32.xlu0 %v980_v18, %s1207_s26 }
  0x54   : > { %460 = vrot.lane.b32.xlu1 %v990_v20, %s1206_s25  ;;  %334 = vrot.lane.b32.xlu2 %v959_v22, %s1208_s27  ;;  %v563_v22 = vld [vmem:[#allocation2 + $0x88] sm:$0xff] }
  0x55   : > { %458 = vrot.lane.b32.xlu0 %v989_v21, %s1206_s25 }
  0x5c   : > { %506 = vrot.lane.b32.xlu1 %v1366_v24, %s1208_s27  ;;  %508 = vrot.lane.b32.xlu2 %v1370_v26, %s1208_s27 }
  0x5d   : > { %336 = vrot.lane.b32.xlu0 %v960_v25, %s1208_s27 }
  0x64   : > { %247 = vrot.lane.b32.xlu1 %v1319_v11, %s1207_s26  ;;  %294 = vrot.lane.b32.xlu2 %v979_v16, %s1206_s25 }
  0x65   : > { %245 = vrot.lane.b32.xlu0 %v1313_v9, %s1207_s26 }
  0x6c   : > { %346 = vrot.lane.b32.xlu1 %v989_v21, %s1208_s27  ;;  %348 = vrot.lane.b32.xlu2 %v990_v20, %s1208_s27  ;;  %v560_v21 = vld [vmem:[#allocation2 + $0x70] sm:$0xff] }
  0x6d   : > { %296 = vrot.lane.b32.xlu0 %v980_v18, %s1206_s25  ;;  %v578_v23 = vpack.c.bf16 %v563_v22, %v560_v21 }
  0x6e   : > { %v1424_v35 = vpop.permute.xlu2 %338 }
  0x6f   : > { %1083 = vmatmul.msk.bf16.gmra.mxu2 %vm208_vm0, %v578_v23 }
  0x74   : > { %401 = vrot.lane.b32.xlu1 %v1286_v3, %s1207_s26  ;;  %411 = vrot.lane.b32.xlu2 %v981_v36, %s1207_s26  ;;  %v201_v3 = vld [vmem:[%s1268_s24 + $0x8] sm:$0xff] }
  0x75   : > { %399 = vrot.lane.b32.xlu0 %v1271_v0, %s1207_s26  ;;  %210 = vst.msk [vmem:[#allocation2 + $0x18] sm:$0xff] %vm208_vm0, %v201_v3 }
  0x76   : > { %v341_v46 = vpop.permute.xlu2 %340 }
  0x7c   : > { %450 = vrot.lane.b32.xlu1 %v1281_v2, %s1206_s25  ;;  %452 = vrot.lane.b32.xlu2 %v1292_v5, %s1206_s25 }
  0x7d   : > { %413 = vrot.lane.b32.xlu0 %v982_v40, %s1207_s26  ;;  %v1008_v40 = vld [vmem:[%s1268_s24 + $0x82] sm:$0xff]  ;;  %s951_s24 = sshll.u32 %s1188_s12, 2 }
  0x7e   : > { %v455_v50 = vpop.permute.xlu2 %454  ;;  %545 = vst.msk [vmem:[#allocation2 + $0xb8] sm:$0xff] %vm208_vm0, %v1008_v40  ;;  %p188_p6 = scmp.lt.s32.totalorder %s951_s24, 15 }
  0x80   : > { %s1617_s24 = smov (!%p188_p6, %s951_s24), 15 }
  0x81   : > { %s952_s4 = sshll.u32 %s1617_s24, 1 }
  0x82   : > { %s192_s6 = sadd.s32 %s953_s5, %s952_s4 }
  0x83   : > { %s954_s7 = sshll.u32 %s192_s6, 3 }
  0x84   : > { %464 = vrot.lane.b32.xlu1 %v992_v49, %s1206_s25  ;;  %498 = vrot.lane.b32.xlu2 %v1331_v13, %s1208_s27  ;;  %v566_v49 = vld [vmem:[#allocation2 + $0xa0] sm:$0xff]  ;;  %s1566_s9 = scalar_lea.vmem %s1603_s3, %s954_s7 }
  0x85   : > { %462 = vrot.lane.b32.xlu0 %v991_v51, %s1206_s25 }
  0x86   : > { %v287_v56 = vpop.permute.xlu1 %286  ;;  %v505_v59 = vpop.permute.xlu2 %504 }
  0x87   : > { %v238_v57 = vpop.permute.xlu0 %237 }
  0x88   : > { %260 = vst.msk [vmem:[#allocation2 + $0x30] sm:$0xff] %vm257_vm1, %v238_v57 }
  0x89   : > { %309 = vst.msk [vmem:[#allocation2 + $0x30] sm:$0xff] %vm306_vm2, %v287_v56 }
  0x8a   : > { %361 = vst.msk [vmem:[#allocation2 + $0x30] sm:$0xff] %vm358_vm3, %v1424_v35 }
  0x8c   : > { %510 = vrot.lane.b32.xlu1 %v999_v60, %s1208_s27  ;;  %512 = vrot.lane.b32.xlu2 %v1000_v61, %s1208_s27 }
  0x8d   : > { %500 = vrot.lane.b32.xlu0 %v1328_v12, %s1208_s27 }
  0x8e   : > { %v289_v62 = vpop.permute.xlu1 %288  ;;  %v291_v0 = vpop.permute.xlu2 %290 }
  0x8f   : > { %v240_v63 = vpop.permute.xlu0 %239 }
  0x90   : > { %261 = vst.msk [vmem:[#allocation2 + $0x48] sm:$0xff] %vm257_vm1, %v240_v63 }
  0x91   : > { %310 = vst.msk [vmem:[#allocation2 + $0x48] sm:$0xff] %vm306_vm2, %v289_v62  ;;  %v552_v4 = vld [vmem:[#allocation2 + $0x30] sm:$0xff] }
  0x92   : > { %362 = vst.msk [vmem:[#allocation2 + $0x48] sm:$0xff] %vm358_vm3, %v341_v46 }
  0x96   : > { %v406_v1 = vpop.permute.xlu1 %405  ;;  %v345_v6 = vpop.permute.xlu2 %344 }
  0x97   : > { %v404_v2 = vpop.permute.xlu0 %403  ;;  %426 = vst.msk [vmem:[#allocation2 + $0x50] sm:$0xff] %vm257_vm1, %v406_v1 }
  0x98   : > { %425 = vst.msk [vmem:[#allocation2 + $0x38] sm:$0xff] %vm257_vm1, %v404_v2 }
  0x99   : > { %v555_v5 = vld [vmem:[#allocation2 + $0x48] sm:$0xff]  ;;  %476 = vst.msk [vmem:[#allocation2 + $0x38] sm:$0xff] %vm306_vm2, %v455_v50  ;;  %v569_v50 = vld [vmem:[#allocation2 + $0xb8] sm:$0xff] }
  0x9a   : > { %v573_v8 = vpack.c.bf16 %v555_v5, %v552_v4  ;;  %v581_v51 = vpack.c.bf16 %v569_v50, %v566_v49 }
  0x9c   : > { %755 = vmatmul.bf16.vlgmr.msra.gmra.mxu3 %v573_v8  ;;  %1084 = vmatmul.msk.bf16.gmra.mxu2 %vm208_vm0, %v581_v51 }
  0x9e   : > { %v503_v9 = vpop.permute.xlu1 %502  ;;  %v408_v11 = vpop.permute.xlu2 %407 }
  0x9f   : > { %v457_v10 = vpop.permute.xlu0 %456  ;;  %524 = vst.msk [vmem:[#allocation2 + $0x38] sm:$0xff] %vm358_vm3, %v503_v9 }
  0xa0   : > { %477 = vst.msk [vmem:[#allocation2 + $0x50] sm:$0xff] %vm306_vm2, %v457_v10 }
  0xa1   : > { %525 = vst.msk [vmem:[#allocation2 + $0x50] sm:$0xff] %vm358_vm3, %v505_v59 }
  0xa2   : > { %427 = vst.msk [vmem:[#allocation2 + $0x68] sm:$0xff] %vm257_vm1, %v408_v11 }
  0xa5   : > { %v809_v10 = vpop.f32.mrf.mxu2 }
  0xa6   : > { %v244_v12 = vpop.permute.xlu1 %243  ;;  %v553_v14 = vld [vmem:[#allocation2 + $0x38] sm:$0xff]  ;;  %v285_v16 = vpop.permute.xlu2 %284 }
  0xa7   : > { %v242_v13 = vpop.permute.xlu0 %241  ;;  %263 = vst.msk [vmem:[#allocation2 + $0x78] sm:$0xff] %vm257_vm1, %v244_v12 }
  0xa8   : > { %262 = vst.msk [vmem:[#allocation2 + $0x60] sm:$0xff] %vm257_vm1, %v242_v13  ;;  %v556_v15 = vld [vmem:[#allocation2 + $0x50] sm:$0xff]  ;;  %v1165_v13 = vld [vmem:[%s1602_s2] ss:$0 sm:$0xff] }
  0xa9   : > { %311 = vst.msk [vmem:[#allocation2 + $0x60] sm:$0xff] %vm306_vm2, %v291_v0  ;;  %v574_v17 = vpack.c.bf16 %v556_v15, %v553_v14 }
  0xab   : > { %784 = vmatmul.bf16.vlgmr.msra.gmra.mxu1 %v574_v17 }
  0xad   : > { %v1557_v11 = vpop.f32.mrf.mxu2 }
  0xae   : > { %v343_v18 = vpop.permute.xlu1 %342  ;;  %v335_v20 = vpop.permute.xlu2 %334 }
  0xaf   : > { %v293_v19 = vpop.permute.xlu0 %292  ;;  %363 = vst.msk [vmem:[#allocation2 + $0x60] sm:$0xff] %vm358_vm3, %v343_v18 }
  0xb0   : > { %312 = vst.msk [vmem:[#allocation2 + $0x78] sm:$0xff] %vm306_vm2, %v293_v19 }
  0xb1   : > { %364 = vst.msk [vmem:[#allocation2 + $0x78] sm:$0xff] %vm358_vm3, %v345_v6 }
  0xb5   : > { %v814_v14 = vpop.f32.mrf.mxu2 }
  0xb6   : > { %v236_v24 = vpop.permute.xlu1 %235  ;;  %v558_v26 = vld [vmem:[#allocation2 + $0x60] sm:$0xff]  ;;  %v509_v28 = vpop.permute.xlu2 %508 }
  0xb7   : > { %v234_v25 = vpop.permute.xlu0 %233  ;;  %259 = vst.msk [vmem:[#allocation2 + $0x18] sm:$0xff] %vm257_vm1, %v236_v24 }
  0xb8   : > { %258 = vst.msk [vmem:[#allocation2] sm:$0xff] %vm257_vm1, %v234_v25  ;;  %v561_v27 = vld [vmem:[#allocation2 + $0x78] sm:$0xff] }
  0xb9   : > { %v576_v29 = vpack.c.bf16 %v561_v27, %v558_v26  ;;  %308 = vst.msk [vmem:[#allocation2 + $0x18] sm:$0xff] %vm306_vm2, %v285_v16 }
  0xbb   : > { %760 = vmatmul.bf16.gmra.mxu3 %v576_v29 }
  0xbd   : > { %v816_v23 = vpop.f32.mrf.mxu2 }
  0xbe   : > { %v283_v30 = vpop.permute.xlu1 %282  ;;  %v295_v32 = vpop.permute.xlu2 %294 }
  0xbf   : > { %v410_v31 = vpop.permute.xlu0 %409  ;;  %307 = vst.msk [vmem:[#allocation2] sm:$0xff] %vm306_vm2, %v283_v30 }
  0xc0   : > { %428 = vst.msk [vmem:[#allocation2 + $0x80] sm:$0xff] %vm257_vm1, %v410_v31 }
  0xc1   : > { %359 = vst.msk [vmem:[#allocation2] sm:$0xff] %vm358_vm3, %v335_v20 }
  0xc6   : > { %v461_v33 = vpop.permute.xlu1 %460  ;;  %v349_v35 = vpop.permute.xlu2 %348 }
  0xc7   : > { %v459_v34 = vpop.permute.xlu0 %458  ;;  %479 = vst.msk [vmem:[#allocation2 + $0x80] sm:$0xff] %vm306_vm2, %v461_v33 }
  0xc8   : > { %478 = vst.msk [vmem:[#allocation2 + $0x68] sm:$0xff] %vm306_vm2, %v459_v34  ;;  %v546_v45 = vld [vmem:[#allocation2] sm:$0xff] }
  0xc9   : > { %527 = vst.msk [vmem:[#allocation2 + $0x80] sm:$0xff] %vm358_vm3, %v509_v28 }
  0xce   : > { %v507_v36 = vpop.permute.xlu1 %506  ;;  %v412_v38 = vpop.permute.xlu2 %411 }
  0xcf   : > { %v337_v37 = vpop.permute.xlu0 %336  ;;  %526 = vst.msk [vmem:[#allocation2 + $0x68] sm:$0xff] %vm358_vm3, %v507_v36 }
  0xd0   : > { %360 = vst.msk [vmem:[#allocation2 + $0x18] sm:$0xff] %vm358_vm3, %v337_v37  ;;  %v562_v41 = vld [vmem:[#allocation2 + $0x80] sm:$0xff] }
  0xd1   : > { %429 = vst.msk [vmem:[#allocation2 + $0x98] sm:$0xff] %vm257_vm1, %v412_v38 }
  0xd6   : > { %v248_v42 = vpop.permute.xlu1 %247  ;;  %v559_v44 = vld [vmem:[#allocation2 + $0x68] sm:$0xff]  ;;  %v453_v54 = vpop.permute.xlu2 %452 }
  0xd7   : > { %v246_v43 = vpop.permute.xlu0 %245  ;;  %265 = vst.msk [vmem:[#allocation2 + $0xa8] sm:$0xff] %vm257_vm1, %v248_v42  ;;  %v549_v46 = vld [vmem:[#allocation2 + $0x18] sm:$0xff]  ;;  %v577_v47 = vpack.c.bf16 %v562_v41, %v559_v44 }
  0xd8   : > { %264 = vst.msk [vmem:[#allocation2 + $0x90] sm:$0xff] %vm257_vm1, %v246_v43  ;;  %v570_v48 = vpack.c.bf16 %v549_v46, %v546_v45 }
  0xd9   : > { %313 = vst.msk [vmem:[#allocation2 + $0x90] sm:$0xff] %vm306_vm2, %v295_v32  ;;  %789 = vmatmul.bf16.gmra.mxu1 %v577_v47 }
  0xda   : > { %750 = vmatmul.bf16.vlgmr.msra.gmra.mxu0 %v570_v48 }
  0xde   : > { %v347_v52 = vpop.permute.xlu1 %346  ;;  %v499_v60 = vpop.permute.xlu2 %498 }
  0xdf   : > { %v297_v53 = vpop.permute.xlu0 %296  ;;  %365 = vst.msk [vmem:[#allocation2 + $0x90] sm:$0xff] %vm358_vm3, %v347_v52 }
  0xe0   : > { %314 = vst.msk [vmem:[#allocation2 + $0xa8] sm:$0xff] %vm306_vm2, %v297_v53 }
  0xe1   : > { %366 = vst.msk [vmem:[#allocation2 + $0xa8] sm:$0xff] %vm358_vm3, %v349_v35 }
  0xe6   : > { %v402_v55 = vpop.permute.xlu1 %401  ;;  %v564_v57 = vld [vmem:[#allocation2 + $0x90] sm:$0xff]  ;;  %v513_v63 = vpop.permute.xlu2 %512 }
  0xe7   : > { %v400_v56 = vpop.permute.xlu0 %399  ;;  %424 = vst.msk [vmem:[#allocation2 + $0x20] sm:$0xff] %vm257_vm1, %v402_v55 }
  0xe8   : > { %423 = vst.msk [vmem:[#allocation2 + $0x8] sm:$0xff] %vm257_vm1, %v400_v56  ;;  %v567_v58 = vld [vmem:[#allocation2 + $0xa8] sm:$0xff] }
  0xe9   : > { %v579_v59 = vpack.c.bf16 %v567_v58, %v564_v57  ;;  %475 = vst.msk [vmem:[#allocation2 + $0x20] sm:$0xff] %vm306_vm2, %v453_v54 }
  0xeb   : > { %765 = vmatmul.bf16.gmra.mxu3 %v579_v59 }
  0xee   : > { %v451_v61 = vpop.permute.xlu1 %450 }
  0xef   : > { %v414_v62 = vpop.permute.xlu0 %413  ;;  %474 = vst.msk [vmem:[#allocation2 + $0x8] sm:$0xff] %vm306_vm2, %v451_v61 }
  0xf0   : > { %430 = vst.msk [vmem:[#allocation2 + $0xb0] sm:$0xff] %vm257_vm1, %v414_v62 }
  0xf1   : > { %522 = vst.msk [vmem:[#allocation2 + $0x8] sm:$0xff] %vm358_vm3, %v499_v60 }
  0xf2   : > { %v819_v28 = vpop.f32.mrf.mxu2 }
  0xf6   : > { %v465_v0 = vpop.permute.xlu1 %464 }
  0xf7   : > { %v463_v1 = vpop.permute.xlu0 %462  ;;  %481 = vst.msk [vmem:[#allocation2 + $0xb0] sm:$0xff] %vm306_vm2, %v465_v0 }
  0xf8   : > { %480 = vst.msk [vmem:[#allocation2 + $0x98] sm:$0xff] %vm306_vm2, %v463_v1  ;;  %v547_v6 = vld [vmem:[#allocation2 + $0x8] sm:$0xff] }
  0xf9   : > { %529 = vst.msk [vmem:[#allocation2 + $0xb0] sm:$0xff] %vm358_vm3, %v513_v63 }
  0xfa   : > { %v821_v37 = vpop.f32.mrf.mxu2 }
  0xfe   : > { %v511_v2 = vpop.permute.xlu1 %510 }
  0xff   : > { %v501_v3 = vpop.permute.xlu0 %500  ;;  %528 = vst.msk [vmem:[#allocation2 + $0x98] sm:$0xff] %vm358_vm3, %v511_v2 }
 0x100   : > { %523 = vst.msk [vmem:[#allocation2 + $0x20] sm:$0xff] %vm358_vm3, %v501_v3  ;;  %v568_v4 = vld [vmem:[#allocation2 + $0xb0] sm:$0xff] }
 0x106   : > { %v565_v5 = vld [vmem:[#allocation2 + $0x98] sm:$0xff] }
 0x107   : > { %v550_v7 = vld [vmem:[#allocation2 + $0x20] sm:$0xff]  ;;  %v580_v8 = vpack.c.bf16 %v568_v4, %v565_v5 }
 0x108   : > { %v571_v9 = vpack.c.bf16 %v550_v7, %v547_v6 }
 0x109   : > { %794 = vmatmul.bf16.gmra.mxu1 %v580_v8 }
 0x10a   : > { %779 = vmatmul.bf16.vlgmr.msrb.gmra.mxu0 %v571_v9 }
 0x11f   : > { %v756_v12 = vpop.f32.mrf.mxu3  ;;  %v824_v46 = vpop.f32.mrf.mxu2 }
 0x120   : > { %v757_v15 = vadd.f32 %v1165_v13, %v756_v12 }
 0x127   : > { %v758_v19 = vpop.f32.mrf.mxu3  ;;  %v826_v61 = vpop.f32.mrf.mxu2 }
 0x128   : > { %v785_v16 = vpop.f32.mrf.mxu1  ;;  %v759_v21 = vadd.f32 %v1165_v13, %v758_v19 }
 0x129   : > { %v786_v17 = vadd.f32 %v785_v16, %v757_v15 }
 0x12b   : > { %v815_v18 = vadd.f32 %v814_v14, %v786_v17 }
 0x12d   : > { %v831_v20 = vmax.f32 %v815_v18, 0.0 }
 0x12f   : > { %839 = vst.msk [vmem:[%s1566_s9 + $0x10] sm:$0xff] %vm208_vm0, %v831_v20 }
 0x130   : > { %v787_v22 = vpop.f32.mrf.mxu1 }
 0x131   : > { %v788_v24 = vadd.f32 %v787_v22, %v759_v21 }
 0x133   : > { %v817_v25 = vadd.f32 %v816_v23, %v788_v24 }
 0x135   : > { %v832_v26 = vmax.f32 %v817_v25, 0.0 }
 0x137   : > { %840 = vst.msk [vmem:[%s1566_s9 + $0x18] sm:$0xff] %vm208_vm0, %v832_v26 }
 0x13e   : > { %v761_v27 = vpop.f32.mrf.mxu3 }
 0x13f   : > { %v762_v29 = vadd.f32 %v1165_v13, %v761_v27 }
 0x146   : > { %v763_v33 = vpop.f32.mrf.mxu3 }
 0x147   : > { %v764_v35 = vadd.f32 %v1165_v13, %v763_v33 }
 0x156   : > { %v790_v30 = vpop.f32.mrf.mxu1 }
 0x157   : > { %v791_v31 = vadd.f32 %v790_v30, %v762_v29  ;;  %v751_v41 = vpop.f32.mrf.mxu0 }
 0x158   : > { %v752_v45 = vadd.f32 %v1165_v13, %v751_v41 }
 0x159   : > { %v820_v32 = vadd.f32 %v819_v28, %v791_v31 }
 0x15b   : > { %v833_v34 = vmax.f32 %v820_v32, 0.0 }
 0x15d   : > { %841 = vst.msk [vmem:[%s1566_s9 + $0x20] sm:$0xff] %vm208_vm0, %v833_v34 }
 0x15e   : > { %v792_v36 = vpop.f32.mrf.mxu1 }
 0x15f   : > { %v793_v38 = vadd.f32 %v792_v36, %v764_v35  ;;  %v753_v42 = vpop.f32.mrf.mxu0 }
 0x160   : > { %v754_v57 = vadd.f32 %v1165_v13, %v753_v42 }
 0x161   : > { %v822_v39 = vadd.f32 %v821_v37, %v793_v38 }
 0x163   : > { %v834_v40 = vmax.f32 %v822_v39, 0.0 }
 0x165   : > { %842 = vst.msk [vmem:[%s1566_s9 + $0x28] sm:$0xff] %vm208_vm0, %v834_v40 }
 0x16e   : > { %v766_v43 = vpop.f32.mrf.mxu3 }
 0x16f   : > { %v767_v44 = vadd.f32 %v1165_v13, %v766_v43 }
 0x176   : > { %v768_v52 = vpop.f32.mrf.mxu3 }
 0x177   : > { %v769_v56 = vadd.f32 %v1165_v13, %v768_v52 }
 0x186   : > { %v795_v47 = vpop.f32.mrf.mxu1 }
 0x187   : > { %v780_v48 = vpop.f32.mrf.mxu0  ;;  %v796_v49 = vadd.f32 %v795_v47, %v767_v44 }
 0x188   : > { %v781_v50 = vadd.f32 %v780_v48, %v752_v45 }
 0x189   : > { %v825_v51 = vadd.f32 %v824_v46, %v796_v49 }
 0x18a   : > { %v810_v53 = vadd.f32 %v809_v10, %v781_v50 }
 0x18b   : > { %v835_v54 = vmax.f32 %v825_v51, 0.0 }
 0x18c   : > { %v829_v55 = vmax.f32 %v810_v53, 0.0 }
 0x18d   : > { %843 = vst.msk [vmem:[%s1566_s9 + $0x30] sm:$0xff] %vm208_vm0, %v835_v54 }
 0x18e   : > { %837 = vst.msk [vmem:[%s1566_s9] sm:$0xff] %vm208_vm0, %v829_v55  ;;  %v797_v58 = vpop.f32.mrf.mxu1 }
 0x18f   : > { %v782_v59 = vpop.f32.mrf.mxu0  ;;  %v798_v60 = vadd.f32 %v797_v58, %v769_v56 }
 0x190   : > { %v783_v62 = vadd.f32 %v782_v59, %v754_v57 }
 0x191   : > { %v827_v63 = vadd.f32 %v826_v61, %v798_v60 }
 0x192   : > { %v812_v0 = vadd.f32 %v1557_v11, %v783_v62 }
 0x193   : > { %v836_v1 = vmax.f32 %v827_v63, 0.0 }
 0x194   : > { %v830_v2 = vmax.f32 %v812_v0, 0.0 }
 0x195   : > { %844 = vst.msk [vmem:[%s1566_s9 + $0x38] sm:$0xff] %vm208_vm0, %v836_v1 }
 0x196   : > { %838 = vst.msk [vmem:[%s1566_s9 + $0x8] sm:$0xff] %vm208_vm0, %v830_v2 }
 0x197 PF: > { %s13_s16 = sadd.s32 1, %s1204_s16   ;;  %s1604_s12 = smov %s1196_s14 }
 0x198   : > { %p10_p7 = scmp.ge.s32.totalorder %s13_s16, 10   ;;  %s1605_s13 = smov %s1200_s15 }
 0x199   : > { %s1606_s14 = smov %s1609_s17  ;;  %s1607_s15 = smov %s1613_s18 }
 0x19a   :  { %12 = sbr.rel (!%p10_p7) target bundleno = 3 (0x3), region = 65 }

// kernel: low_rank_tensor_forward.7
= control target key start
LH: loop header
LB: loop body
LE: loop exit
PB: predicated region body
PF: predicated region fallthrough
CT: control target
= control target key end

     0   :  { %s1221_s12 = smov 0   ;;  %s1223_s13 = smov 0   ;;  %s1589_s0 = inlined_call_operand.vmem [shape: f32[2,18,18,32], index: 0, kind: input, shape index: {}]   ;;  %s1590_s1 = inlined_call_operand.vmem [shape: bf16[288,32], index: 1, kind: input, shape index: {}]   ;;  %s1591_s2 = inlined_call_operand.vmem [shape: f32[1,32], index: 2, kind: input, shape index: {}]   ;;  %s1592_s3 = inlined_call_operand.vmem [shape: f32[2,16,16,32], index: 3, kind: output, shape index: {}]  }
   0x1   :  { %s1225_s14 = smov 0   ;;  %s1227_s15 = smov 0  }
   0x2   :  { %s1229_s16 = smov 0  }
   0x3 LB: > { %s22_s17 = sadd.s32 1, %s1188_s14  ;;  %s25_s18 = sadd.s32 1, %s1192_s15  ;;  %s1196_s16 = sphi %s1229_s16, %s13_s16   ;;  %s1192_s15 = sphi %s1227_s15, %s1596_s15   ;;  %s1188_s14 = sphi %s1225_s14, %s1595_s14   ;;  %s1184_s13 = sphi %s1223_s13, %s1594_s13   ;;  %s1180_s12 = sphi %s1221_s12, %s1593_s12  }
   0x4   : > { %p23_p0 = scmp.ge.s32.totalorder %s22_s17, 4  ;;  %p941_p1 = scmp.ge.s32.totalorder %s1196_s16, 1 }
   0x5   : > { %p151_p2 = scmp.lt.s32.totalorder %s1196_s16, 9 }
   0x6   : > { %s1598_s17 = smov (%p23_p0, %s22_s17), 0  ;;  %s1600_s18 = smov (!%p23_p0, %s25_s18), %s1192_s15 }
   0x7   : > { %p152_p3 = pnand %p941_p1, %p151_p2  ;;  %p27_p4 = scmp.ge.s32.totalorder %s1600_s18, 2 }
   0x8   : > { %p180_p5 = scmp.lt.s32.totalorder (!%p152_p3), %s1184_s13, 1  ;;  %s948_s19 = smul.u32 (!%p152_p3), 96, %s1180_s12 }
   0x9   : > { %s1602_s18 = smov (%p27_p4, %s1600_s18), 0  ;;  %155 = sbr.rel (%p152_p3) target bundleno = 405 (0x195), region = 32 }
   0xa   : > { %s1198_s25 = smov (!%p152_p3), 64   ;;  %s1199_s26 = smov (!%p152_p3), 32  }
   0xb   : > { %s1200_s27 = smov (!%p152_p3), 96  }
   0xe   : > { %s1604_s13 = smov (!%p180_p5, %s1184_s13), 1  ;;  %v1086_v23 = vld [vmem:[%s1590_s1 + $0x38] sm:$0xff]  ;;  %v1085_v27 = vld [vmem:[%s1590_s1 + $0x30] sm:$0xff]  ;;  %v1084_v28 = vld [vmem:[%s1590_s1 + $0x28] sm:$0xff]  ;;  %vm208_vm0 = vcmask 261120   ;;  %vm257_vm1 = vcmask 523520  }
   0xf   : > { %s1113_s20 = smul.u32 432, %s1604_s13  ;;  %1097 = vmatpush.bf16.msra.mxu3 %v1086_v23  ;;  %742 = vmatpush.bf16.msra.mxu0 %v1086_v23  ;;  %v1083_v29 = vld [vmem:[%s1590_s1 + $0x20] sm:$0xff]  ;;  %v1094_v30 = vld [vmem:[%s1590_s1 + $0x78] sm:$0xff]  ;;  %v1093_v32 = vld [vmem:[%s1590_s1 + $0x70] sm:$0xff]  ;;  %vm306_vm2 = vcmask 785920   ;;  %vm358_vm3 = vcmask 1048320  }
  0x10   : > { %v1082_v31 = vld [vmem:[%s1590_s1 + $0x18] sm:$0xff]  ;;  %1105 = vmatpush.bf16.msra.mxu1 %v1094_v30  ;;  %v1096_v33 = vld [vmem:[%s1590_s1 + $0x88] sm:$0xff]  ;;  %v1081_v34 = vld [vmem:[%s1590_s1 + $0x10] sm:$0xff] }
  0x11   : > { %s184_s23 = scalar_lea.vmem %s1589_s0, %s1113_s20  ;;  %806 = vmatpush.bf16.msra.mxu2 %v1096_v33  ;;  %v1092_v37 = vld [vmem:[%s1590_s1 + $0x68] sm:$0xff]  ;;  %v1095_v38 = vld [vmem:[%s1590_s1 + $0x80] sm:$0xff]  ;;  %v1090_v47 = vld [vmem:[%s1590_s1 + $0x58] sm:$0xff] }
  0x12   : > { %s1260_s24 = scalar_lea.vmem %s184_s23, %s948_s19  ;;  %v1080_v39 = vld [vmem:[%s1590_s1 + $0x8] sm:$0xff]  ;;  %v1091_v44 = vld [vmem:[%s1590_s1 + $0x60] sm:$0xff]  ;;  %v1089_v48 = vld [vmem:[%s1590_s1 + $0x50] sm:$0xff] }
  0x13   : > { %v1263_v0 = vld [vmem:[%s1260_s24 + $0x1a] sm:$0xff]  ;;  %v1273_v2 = vld [vmem:[%s1260_s24 + $0x30] sm:$0xff]  ;;  %v1278_v3 = vld [vmem:[%s1260_s24 + $0x22] sm:$0xff]  ;;  %1098 = vmatpush.bf16.msra.mxu3 %v1085_v27  ;;  %743 = vmatpush.bf16.msra.mxu0 %v1085_v27 }
  0x14   : > { %v1266_v1 = vld [vmem:[%s1260_s24 + $0x19] sm:$0xff]  ;;  %286 = vrot.lane.b32.xlu1 %v1263_v0, %s1198_s25  ;;  %338 = vrot.lane.b32.xlu2 %v1273_v2, %s1200_s27  ;;  %v1281_v4 = vld [vmem:[%s1260_s24 + $0x21] sm:$0xff]  ;;  %213 = vst.msk [vmem:[#allocation2 + $0x60] sm:$0xff] %vm208_vm0, %v1273_v2 }
  0x15   : > { %237 = vrot.lane.b32.xlu0 %v1266_v1, %s1199_s26  ;;  %v1284_v5 = vld [vmem:[%s1260_s24 + $0x38] sm:$0xff]  ;;  %v1297_v8 = vld [vmem:[%s1260_s24 + $0x48] sm:$0xff]  ;;  %v1308_v10 = vld [vmem:[%s1260_s24 + $0x50] sm:$0xff]  ;;  %1106 = vmatpush.bf16.msra.mxu1 %v1093_v32  ;;  %376 = vst.msk [vmem:[#allocation2 + $0x20] sm:$0xff] %vm208_vm0, %v1281_v4 }
  0x16   : > { %v1293_v6 = vld [vmem:[%s1260_s24 + $0x3a] sm:$0xff]  ;;  %v969_v7 = vld [vmem:[%s1260_s24 + $0x32] sm:$0xff]  ;;  %v1305_v9 = vld [vmem:[%s1260_s24 + $0x49] sm:$0xff]  ;;  %214 = vst.msk [vmem:[#allocation2 + $0x78] sm:$0xff] %vm208_vm0, %v1284_v5  ;;  %807 = vmatpush.bf16.msra.mxu2 %v1095_v38 }
  0x17   : > { %v1311_v11 = vld [vmem:[%s1260_s24 + $0x51] sm:$0xff]  ;;  %v1320_v12 = vld [vmem:[%s1260_s24 + $0x39] sm:$0xff]  ;;  %v218_v14 = vld [vmem:[%s1260_s24 + $0x9] sm:$0xff]  ;;  %1099 = vmatpush.bf16.msra.mxu3 %v1084_v28  ;;  %744 = vmatpush.bf16.msra.mxu0 %v1084_v28  ;;  %538 = vst.msk [vmem:[#allocation2 + $0x10] sm:$0xff] %vm208_vm0, %v969_v7 }
  0x18   : > { %v1323_v13 = vld [vmem:[%s1260_s24 + $0x31] sm:$0xff]  ;;  %v217_v15 = vld [vmem:[%s1260_s24 + $0x1] sm:$0xff]  ;;  %v1362_v26 = vld [vmem:[%s1260_s24 + $0x69] sm:$0xff]  ;;  %539 = vst.msk [vmem:[#allocation2 + $0x28] sm:$0xff] %vm208_vm0, %v1293_v6 }
  0x19   : > { %v971_v16 = vld [vmem:[%s1260_s24 + $0x4a] sm:$0xff]  ;;  %v266_v17 = vld [vmem:[%s1260_s24 + $0x2] sm:$0xff]  ;;  %v972_v18 = vld [vmem:[%s1260_s24 + $0x52] sm:$0xff]  ;;  %378 = vst.msk [vmem:[#allocation2 + $0x50] sm:$0xff] %vm208_vm0, %v1320_v12  ;;  %1107 = vmatpush.bf16.msra.mxu1 %v1092_v37 }
  0x1a   : > { %v267_v19 = vld [vmem:[%s1260_s24 + $0xa] sm:$0xff]  ;;  %v981_v21 = vld [vmem:[%s1260_s24 + $0x60] sm:$0xff]  ;;  %v951_v22 = vld [vmem:[%s1260_s24 + $0x18] sm:$0xff]  ;;  %377 = vst.msk [vmem:[#allocation2 + $0x38] sm:$0xff] %vm208_vm0, %v1323_v13 }
  0x1b   : > { %v982_v20 = vld [vmem:[%s1260_s24 + $0x68] sm:$0xff]  ;;  %v952_v25 = vld [vmem:[%s1260_s24 + $0x20] sm:$0xff]  ;;  %211 = vst.msk [vmem:[#allocation2 + $0x30] sm:$0xff] %vm208_vm0, %v951_v22  ;;  %1100 = vmatpush.bf16.msra.mxu3 %v1083_v29  ;;  %745 = vmatpush.bf16.msra.mxu0 %v1083_v29  ;;  %v983_v51 = vld [vmem:[%s1260_s24 + $0x78] sm:$0xff] }
  0x1c   : > { %288 = vrot.lane.b32.xlu1 %v1278_v3, %s1198_s25  ;;  %340 = vrot.lane.b32.xlu2 %v1284_v5, %s1200_s27  ;;  %v1358_v24 = vld [vmem:[%s1260_s24 + $0x61] sm:$0xff]  ;;  %212 = vst.msk [vmem:[#allocation2 + $0x48] sm:$0xff] %vm208_vm0, %v952_v25  ;;  %v974_v40 = vld [vmem:[%s1260_s24 + $0x6a] sm:$0xff] }
  0x1d   : > { %239 = vrot.lane.b32.xlu0 %v1281_v4, %s1199_s26  ;;  %540 = vst.msk [vmem:[#allocation2 + $0x40] sm:$0xff] %vm208_vm0, %v971_v16  ;;  %v973_v36 = vld [vmem:[%s1260_s24 + $0x62] sm:$0xff]  ;;  %1108 = vmatpush.bf16.msra.mxu1 %v1091_v44  ;;  %v991_v60 = vld [vmem:[%s1260_s24 + $0x79] sm:$0xff] }
  0x1e   : > { %541 = vst.msk [vmem:[#allocation2 + $0x58] sm:$0xff] %vm208_vm0, %v972_v18  ;;  %v548_v41 = vld [vmem:[#allocation2 + $0x10] sm:$0xff]  ;;  %v1079_v45 = vld [vmem:[%s1590_s1] sm:$0xff]  ;;  %v1088_v52 = vld [vmem:[%s1590_s1 + $0x48] sm:$0xff] }
  0x1f   : > { %1101 = vmatpush.bf16.msra.mxu3 %v1082_v31  ;;  %746 = vmatpush.bf16.msra.mxu0 %v1082_v31  ;;  %379 = vst.msk [vmem:[#allocation2 + $0x68] sm:$0xff] %vm208_vm0, %v1305_v9  ;;  %v551_v42 = vld [vmem:[#allocation2 + $0x28] sm:$0xff]  ;;  %v984_v49 = vld [vmem:[%s1260_s24 + $0x80] sm:$0xff] }
  0x20   : > { %380 = vst.msk [vmem:[#allocation2 + $0x80] sm:$0xff] %vm208_vm0, %v1311_v11  ;;  %v572_v43 = vpack.c.bf16 %v551_v42, %v548_v41  ;;  %v1087_v58 = vld [vmem:[%s1590_s1 + $0x40] sm:$0xff] }
  0x21   : > { %542 = vst.msk [vmem:[#allocation2 + $0x70] sm:$0xff] %vm208_vm0, %v973_v36  ;;  %1109 = vmatpush.bf16.msra.mxu1 %v1090_v47  ;;  %v992_v61 = vld [vmem:[%s1260_s24 + $0x81] sm:$0xff] }
  0x22   : > { %543 = vst.msk [vmem:[#allocation2 + $0x88] sm:$0xff] %vm208_vm0, %v974_v40  ;;  %1073 = vmatmul.msk.bf16.vlgmr.msra.gmra.mxu2 %vm208_vm0, %v572_v43 }
  0x23   : > { %1102 = vmatpush.bf16.msra.mxu3 %v1081_v34  ;;  %747 = vmatpush.bf16.msra.mxu0 %v1081_v34  ;;  %216 = vst.msk [vmem:[#allocation2 + $0xa8] sm:$0xff] %vm208_vm0, %v1308_v10 }
  0x24   : > { %405 = vrot.lane.b32.xlu1 %v1293_v6, %s1199_s26  ;;  %454 = vrot.lane.b32.xlu2 %v1297_v8, %s1198_s25  ;;  %215 = vst.msk [vmem:[#allocation2 + $0x90] sm:$0xff] %vm208_vm0, %v1297_v8  ;;  %v554_v53 = vld [vmem:[#allocation2 + $0x40] sm:$0xff] }
  0x25   : > { %403 = vrot.lane.b32.xlu0 %v969_v7, %s1199_s26  ;;  %381 = vst.msk [vmem:[#allocation2 + $0x98] sm:$0xff] %vm208_vm0, %v1358_v24  ;;  %1110 = vmatpush.bf16.msra.mxu1 %v1089_v48  ;;  %v557_v54 = vld [vmem:[#allocation2 + $0x58] sm:$0xff] }
  0x26   : > { %375 = vst.msk [vmem:[#allocation2 + $0x8] sm:$0xff] %vm208_vm0, %v1266_v1  ;;  %v575_v55 = vpack.c.bf16 %v557_v54, %v554_v53 }
  0x27   : > { %1103 = vmatpush.bf16.msra.mxu3 %v1080_v39  ;;  %748 = vmatpush.bf16.msra.mxu0 %v1080_v39  ;;  %382 = vst.msk [vmem:[#allocation2 + $0xb0] sm:$0xff] %vm208_vm0, %v1362_v26  ;;  %v999_v39 = vld [vmem:[%s1260_s24 + $0x7a] sm:$0xff] }
  0x28   : > { %544 = vst.msk [vmem:[#allocation2 + $0xa0] sm:$0xff] %vm208_vm0, %v999_v39 }
  0x29   : > { %1111 = vmatpush.bf16.msra.mxu1 %v1088_v52 }
  0x2b   : > { %1104 = vmatpush.bf16.msra.mxu3 %v1079_v45  ;;  %749 = vmatpush.bf16.msra.mxu0 %v1079_v45 }
  0x2c   : > { %502 = vrot.lane.b32.xlu1 %v1305_v9, %s1200_s27  ;;  %504 = vrot.lane.b32.xlu2 %v1311_v11, %s1200_s27 }
  0x2d   : > { %456 = vrot.lane.b32.xlu0 %v1308_v10, %s1198_s25  ;;  %1112 = vmatpush.bf16.msra.mxu1 %v1087_v58 }
  0x2f   : > { %771 = vmatpush.bf16.msrb.mxu0 %v1094_v30 }
  0x32   : > { %1074 = vmatmul.msk.bf16.gmra.mxu2 %vm208_vm0, %v575_v55 }
  0x33   : > { %772 = vmatpush.bf16.msrb.mxu0 %v1093_v32 }
  0x34   : > { %243 = vrot.lane.b32.xlu1 %v1320_v12, %s1199_s26  ;;  %290 = vrot.lane.b32.xlu2 %v969_v7, %s1198_s25  ;;  %v200_v7 = vld [vmem:[%s1260_s24] sm:$0xff] }
  0x35   : > { %241 = vrot.lane.b32.xlu0 %v1323_v13, %s1199_s26  ;;  %209 = vst.msk [vmem:[#allocation2] sm:$0xff] %vm208_vm0, %v200_v7 }
  0x37   : > { %773 = vmatpush.bf16.msrb.mxu0 %v1092_v37 }
  0x3b   : > { %774 = vmatpush.bf16.msrb.mxu0 %v1091_v44 }
  0x3c   : > { %342 = vrot.lane.b32.xlu1 %v1297_v8, %s1200_s27  ;;  %344 = vrot.lane.b32.xlu2 %v1308_v10, %s1200_s27 }
  0x3d   : > { %292 = vrot.lane.b32.xlu0 %v1293_v6, %s1198_s25 }
  0x3f   : > { %775 = vmatpush.bf16.msrb.mxu0 %v1090_v47 }
  0x43   : > { %776 = vmatpush.bf16.msrb.mxu0 %v1089_v48 }
  0x44   : > { %235 = vrot.lane.b32.xlu1 %v218_v14, %s1199_s26  ;;  %407 = vrot.lane.b32.xlu2 %v971_v16, %s1199_s26 }
  0x45   : > { %233 = vrot.lane.b32.xlu0 %v217_v15, %s1199_s26 }
  0x47   : > { %777 = vmatpush.bf16.msrb.mxu0 %v1088_v52 }
  0x4b   : > { %778 = vmatpush.bf16.msrb.mxu0 %v1087_v58 }
  0x4c   : > { %282 = vrot.lane.b32.xlu1 %v266_v17, %s1198_s25  ;;  %284 = vrot.lane.b32.xlu2 %v267_v19, %s1198_s25 }
  0x4d   : > { %409 = vrot.lane.b32.xlu0 %v972_v18, %s1199_s26 }
  0x54   : > { %460 = vrot.lane.b32.xlu1 %v982_v20, %s1198_s25  ;;  %334 = vrot.lane.b32.xlu2 %v951_v22, %s1200_s27  ;;  %v563_v22 = vld [vmem:[#allocation2 + $0x88] sm:$0xff] }
  0x55   : > { %458 = vrot.lane.b32.xlu0 %v981_v21, %s1198_s25 }
  0x5c   : > { %506 = vrot.lane.b32.xlu1 %v1358_v24, %s1200_s27  ;;  %508 = vrot.lane.b32.xlu2 %v1362_v26, %s1200_s27 }
  0x5d   : > { %336 = vrot.lane.b32.xlu0 %v952_v25, %s1200_s27 }
  0x64   : > { %247 = vrot.lane.b32.xlu1 %v1311_v11, %s1199_s26  ;;  %294 = vrot.lane.b32.xlu2 %v971_v16, %s1198_s25 }
  0x65   : > { %245 = vrot.lane.b32.xlu0 %v1305_v9, %s1199_s26 }
  0x6c   : > { %346 = vrot.lane.b32.xlu1 %v981_v21, %s1200_s27  ;;  %348 = vrot.lane.b32.xlu2 %v982_v20, %s1200_s27  ;;  %v560_v21 = vld [vmem:[#allocation2 + $0x70] sm:$0xff] }
  0x6d   : > { %296 = vrot.lane.b32.xlu0 %v972_v18, %s1198_s25  ;;  %v578_v23 = vpack.c.bf16 %v563_v22, %v560_v21 }
  0x6e   : > { %v1416_v35 = vpop.permute.xlu2 %338 }
  0x6f   : > { %1075 = vmatmul.msk.bf16.gmra.mxu2 %vm208_vm0, %v578_v23 }
  0x74   : > { %401 = vrot.lane.b32.xlu1 %v1278_v3, %s1199_s26  ;;  %411 = vrot.lane.b32.xlu2 %v973_v36, %s1199_s26  ;;  %v201_v3 = vld [vmem:[%s1260_s24 + $0x8] sm:$0xff] }
  0x75   : > { %399 = vrot.lane.b32.xlu0 %v1263_v0, %s1199_s26  ;;  %210 = vst.msk [vmem:[#allocation2 + $0x18] sm:$0xff] %vm208_vm0, %v201_v3 }
  0x76   : > { %v341_v46 = vpop.permute.xlu2 %340 }
  0x7c   : > { %450 = vrot.lane.b32.xlu1 %v1273_v2, %s1198_s25  ;;  %452 = vrot.lane.b32.xlu2 %v1284_v5, %s1198_s25 }
  0x7d   : > { %413 = vrot.lane.b32.xlu0 %v974_v40, %s1199_s26  ;;  %v1000_v40 = vld [vmem:[%s1260_s24 + $0x82] sm:$0xff]  ;;  %s943_s24 = sshll.u32 %s1180_s12, 2 }
  0x7e   : > { %v455_v50 = vpop.permute.xlu2 %454  ;;  %545 = vst.msk [vmem:[#allocation2 + $0xb8] sm:$0xff] %vm208_vm0, %v1000_v40  ;;  %p188_p6 = scmp.lt.s32.totalorder %s943_s24, 15 }
  0x80   : > { %s1606_s24 = smov (!%p188_p6, %s943_s24), 15 }
  0x84   : > { %464 = vrot.lane.b32.xlu1 %v984_v49, %s1198_s25  ;;  %498 = vrot.lane.b32.xlu2 %v1323_v13, %s1200_s27  ;;  %v566_v49 = vld [vmem:[#allocation2 + $0xa0] sm:$0xff] }
  0x85   : > { %462 = vrot.lane.b32.xlu0 %v983_v51, %s1198_s25  ;;  %s944_s25 = sshll.u32 %s1606_s24, 1 }
  0x86   : > { %v287_v56 = vpop.permute.xlu1 %286  ;;  %v505_v59 = vpop.permute.xlu2 %504 }
  0x87   : > { %v238_v57 = vpop.permute.xlu0 %237 }
  0x88   : > { %260 = vst.msk [vmem:[#allocation2 + $0x30] sm:$0xff] %vm257_vm1, %v238_v57 }
  0x89   : > { %309 = vst.msk [vmem:[#allocation2 + $0x30] sm:$0xff] %vm306_vm2, %v287_v56 }
  0x8a   : > { %361 = vst.msk [vmem:[#allocation2 + $0x30] sm:$0xff] %vm358_vm3, %v1416_v35 }
  0x8c   : > { %510 = vrot.lane.b32.xlu1 %v991_v60, %s1200_s27  ;;  %512 = vrot.lane.b32.xlu2 %v992_v61, %s1200_s27 }
  0x8d   : > { %500 = vrot.lane.b32.xlu0 %v1320_v12, %s1200_s27  ;;  %s945_s27 = sshll.u32 %s1604_s13, 5 }
  0x8e   : > { %v289_v62 = vpop.permute.xlu1 %288  ;;  %v291_v0 = vpop.permute.xlu2 %290  ;;  %s192_s6 = sadd.s32 %s945_s27, %s944_s25 }
  0x8f   : > { %v240_v63 = vpop.permute.xlu0 %239  ;;  %s946_s7 = sshll.u32 %s192_s6, 3 }
  0x90   : > { %261 = vst.msk [vmem:[#allocation2 + $0x48] sm:$0xff] %vm257_vm1, %v240_v63  ;;  %s1556_s12 = scalar_lea.vmem %s1592_s3, %s946_s7 }
  0x91   : > { %310 = vst.msk [vmem:[#allocation2 + $0x48] sm:$0xff] %vm306_vm2, %v289_v62  ;;  %v552_v4 = vld [vmem:[#allocation2 + $0x30] sm:$0xff] }
  0x92   : > { %362 = vst.msk [vmem:[#allocation2 + $0x48] sm:$0xff] %vm358_vm3, %v341_v46 }
  0x96   : > { %v406_v1 = vpop.permute.xlu1 %405  ;;  %v345_v6 = vpop.permute.xlu2 %344 }
  0x97   : > { %v404_v2 = vpop.permute.xlu0 %403  ;;  %426 = vst.msk [vmem:[#allocation2 + $0x50] sm:$0xff] %vm257_vm1, %v406_v1 }
  0x98   : > { %425 = vst.msk [vmem:[#allocation2 + $0x38] sm:$0xff] %vm257_vm1, %v404_v2 }
  0x99   : > { %v555_v5 = vld [vmem:[#allocation2 + $0x48] sm:$0xff]  ;;  %476 = vst.msk [vmem:[#allocation2 + $0x38] sm:$0xff] %vm306_vm2, %v455_v50  ;;  %v569_v50 = vld [vmem:[#allocation2 + $0xb8] sm:$0xff] }
  0x9a   : > { %v573_v8 = vpack.c.bf16 %v555_v5, %v552_v4  ;;  %v581_v51 = vpack.c.bf16 %v569_v50, %v566_v49 }
  0x9c   : > { %755 = vmatmul.bf16.vlgmr.msra.gmra.mxu3 %v573_v8  ;;  %1076 = vmatmul.msk.bf16.gmra.mxu2 %vm208_vm0, %v581_v51 }
  0x9e   : > { %v503_v9 = vpop.permute.xlu1 %502  ;;  %v408_v11 = vpop.permute.xlu2 %407 }
  0x9f   : > { %v457_v10 = vpop.permute.xlu0 %456  ;;  %524 = vst.msk [vmem:[#allocation2 + $0x38] sm:$0xff] %vm358_vm3, %v503_v9 }
  0xa0   : > { %477 = vst.msk [vmem:[#allocation2 + $0x50] sm:$0xff] %vm306_vm2, %v457_v10 }
  0xa1   : > { %525 = vst.msk [vmem:[#allocation2 + $0x50] sm:$0xff] %vm358_vm3, %v505_v59 }
  0xa2   : > { %427 = vst.msk [vmem:[#allocation2 + $0x68] sm:$0xff] %vm257_vm1, %v408_v11 }
  0xa5   : > { %v809_v10 = vpop.f32.mrf.mxu2 }
  0xa6   : > { %v244_v12 = vpop.permute.xlu1 %243  ;;  %v553_v14 = vld [vmem:[#allocation2 + $0x38] sm:$0xff]  ;;  %v285_v16 = vpop.permute.xlu2 %284 }
  0xa7   : > { %v242_v13 = vpop.permute.xlu0 %241  ;;  %263 = vst.msk [vmem:[#allocation2 + $0x78] sm:$0xff] %vm257_vm1, %v244_v12 }
  0xa8   : > { %262 = vst.msk [vmem:[#allocation2 + $0x60] sm:$0xff] %vm257_vm1, %v242_v13  ;;  %v556_v15 = vld [vmem:[#allocation2 + $0x50] sm:$0xff]  ;;  %v1157_v13 = vld [vmem:[%s1591_s2] ss:$0 sm:$0xff] }
  0xa9   : > { %311 = vst.msk [vmem:[#allocation2 + $0x60] sm:$0xff] %vm306_vm2, %v291_v0  ;;  %v574_v17 = vpack.c.bf16 %v556_v15, %v553_v14 }
  0xab   : > { %784 = vmatmul.bf16.vlgmr.msra.gmra.mxu1 %v574_v17 }
  0xad   : > { %v811_v11 = vpop.f32.mrf.mxu2 }
  0xae   : > { %v343_v18 = vpop.permute.xlu1 %342  ;;  %v335_v20 = vpop.permute.xlu2 %334 }
  0xaf   : > { %v293_v19 = vpop.permute.xlu0 %292  ;;  %363 = vst.msk [vmem:[#allocation2 + $0x60] sm:$0xff] %vm358_vm3, %v343_v18 }
  0xb0   : > { %312 = vst.msk [vmem:[#allocation2 + $0x78] sm:$0xff] %vm306_vm2, %v293_v19 }
  0xb1   : > { %364 = vst.msk [vmem:[#allocation2 + $0x78] sm:$0xff] %vm358_vm3, %v345_v6 }
  0xb5   : > { %v814_v14 = vpop.f32.mrf.mxu2 }
  0xb6   : > { %v236_v24 = vpop.permute.xlu1 %235  ;;  %v558_v26 = vld [vmem:[#allocation2 + $0x60] sm:$0xff]  ;;  %v509_v28 = vpop.permute.xlu2 %508 }
  0xb7   : > { %v234_v25 = vpop.permute.xlu0 %233  ;;  %259 = vst.msk [vmem:[#allocation2 + $0x18] sm:$0xff] %vm257_vm1, %v236_v24 }
  0xb8   : > { %258 = vst.msk [vmem:[#allocation2] sm:$0xff] %vm257_vm1, %v234_v25  ;;  %v561_v27 = vld [vmem:[#allocation2 + $0x78] sm:$0xff] }
  0xb9   : > { %v576_v29 = vpack.c.bf16 %v561_v27, %v558_v26  ;;  %308 = vst.msk [vmem:[#allocation2 + $0x18] sm:$0xff] %vm306_vm2, %v285_v16 }
  0xbb   : > { %760 = vmatmul.bf16.gmra.mxu3 %v576_v29 }
  0xbd   : > { %v816_v22 = vpop.f32.mrf.mxu2 }
  0xbe   : > { %v283_v30 = vpop.permute.xlu1 %282  ;;  %v295_v32 = vpop.permute.xlu2 %294 }
  0xbf   : > { %v410_v31 = vpop.permute.xlu0 %409  ;;  %307 = vst.msk [vmem:[#allocation2] sm:$0xff] %vm306_vm2, %v283_v30 }
  0xc0   : > { %428 = vst.msk [vmem:[#allocation2 + $0x80] sm:$0xff] %vm257_vm1, %v410_v31 }
  0xc1   : > { %359 = vst.msk [vmem:[#allocation2] sm:$0xff] %vm358_vm3, %v335_v20 }
  0xc6   : > { %v461_v33 = vpop.permute.xlu1 %460  ;;  %v349_v35 = vpop.permute.xlu2 %348 }
  0xc7   : > { %v459_v34 = vpop.permute.xlu0 %458  ;;  %479 = vst.msk [vmem:[#allocation2 + $0x80] sm:$0xff] %vm306_vm2, %v461_v33 }
  0xc8   : > { %478 = vst.msk [vmem:[#allocation2 + $0x68] sm:$0xff] %vm306_vm2, %v459_v34  ;;  %v546_v45 = vld [vmem:[#allocation2] sm:$0xff] }
  0xc9   : > { %527 = vst.msk [vmem:[#allocation2 + $0x80] sm:$0xff] %vm358_vm3, %v509_v28 }
  0xce   : > { %v507_v36 = vpop.permute.xlu1 %506  ;;  %v412_v38 = vpop.permute.xlu2 %411 }
  0xcf   : > { %v337_v37 = vpop.permute.xlu0 %336  ;;  %526 = vst.msk [vmem:[#allocation2 + $0x68] sm:$0xff] %vm358_vm3, %v507_v36 }
  0xd0   : > { %360 = vst.msk [vmem:[#allocation2 + $0x18] sm:$0xff] %vm358_vm3, %v337_v37  ;;  %v562_v41 = vld [vmem:[#allocation2 + $0x80] sm:$0xff] }
  0xd1   : > { %429 = vst.msk [vmem:[#allocation2 + $0x98] sm:$0xff] %vm257_vm1, %v412_v38 }
  0xd6   : > { %v248_v42 = vpop.permute.xlu1 %247  ;;  %v559_v44 = vld [vmem:[#allocation2 + $0x68] sm:$0xff]  ;;  %v453_v54 = vpop.permute.xlu2 %452 }
  0xd7   : > { %v246_v43 = vpop.permute.xlu0 %245  ;;  %265 = vst.msk [vmem:[#allocation2 + $0xa8] sm:$0xff] %vm257_vm1, %v248_v42  ;;  %v549_v46 = vld [vmem:[#allocation2 + $0x18] sm:$0xff]  ;;  %v577_v47 = vpack.c.bf16 %v562_v41, %v559_v44 }
  0xd8   : > { %264 = vst.msk [vmem:[#allocation2 + $0x90] sm:$0xff] %vm257_vm1, %v246_v43  ;;  %v570_v48 = vpack.c.bf16 %v549_v46, %v546_v45 }
  0xd9   : > { %313 = vst.msk [vmem:[#allocation2 + $0x90] sm:$0xff] %vm306_vm2, %v295_v32  ;;  %789 = vmatmul.bf16.gmra.mxu1 %v577_v47 }
  0xda   : > { %750 = vmatmul.bf16.vlgmr.msra.gmra.mxu0 %v570_v48 }
  0xde   : > { %v347_v52 = vpop.permute.xlu1 %346  ;;  %v499_v60 = vpop.permute.xlu2 %498 }
  0xdf   : > { %v297_v53 = vpop.permute.xlu0 %296  ;;  %365 = vst.msk [vmem:[#allocation2 + $0x90] sm:$0xff] %vm358_vm3, %v347_v52 }
  0xe0   : > { %314 = vst.msk [vmem:[#allocation2 + $0xa8] sm:$0xff] %vm306_vm2, %v297_v53 }
  0xe1   : > { %366 = vst.msk [vmem:[#allocation2 + $0xa8] sm:$0xff] %vm358_vm3, %v349_v35 }
  0xe6   : > { %v402_v55 = vpop.permute.xlu1 %401  ;;  %v564_v57 = vld [vmem:[#allocation2 + $0x90] sm:$0xff]  ;;  %v513_v63 = vpop.permute.xlu2 %512 }
  0xe7   : > { %v400_v56 = vpop.permute.xlu0 %399  ;;  %424 = vst.msk [vmem:[#allocation2 + $0x20] sm:$0xff] %vm257_vm1, %v402_v55 }
  0xe8   : > { %423 = vst.msk [vmem:[#allocation2 + $0x8] sm:$0xff] %vm257_vm1, %v400_v56  ;;  %v567_v58 = vld [vmem:[#allocation2 + $0xa8] sm:$0xff] }
  0xe9   : > { %v579_v59 = vpack.c.bf16 %v567_v58, %v564_v57  ;;  %475 = vst.msk [vmem:[#allocation2 + $0x20] sm:$0xff] %vm306_vm2, %v453_v54 }
  0xeb   : > { %765 = vmatmul.bf16.gmra.mxu3 %v579_v59 }
  0xee   : > { %v451_v61 = vpop.permute.xlu1 %450 }
  0xef   : > { %v414_v62 = vpop.permute.xlu0 %413  ;;  %474 = vst.msk [vmem:[#allocation2 + $0x8] sm:$0xff] %vm306_vm2, %v451_v61 }
  0xf0   : > { %430 = vst.msk [vmem:[#allocation2 + $0xb0] sm:$0xff] %vm257_vm1, %v414_v62 }
  0xf1   : > { %522 = vst.msk [vmem:[#allocation2 + $0x8] sm:$0xff] %vm358_vm3, %v499_v60 }
  0xf2   : > { %v819_v26 = vpop.f32.mrf.mxu2 }
  0xf6   : > { %v465_v0 = vpop.permute.xlu1 %464 }
  0xf7   : > { %v463_v1 = vpop.permute.xlu0 %462  ;;  %481 = vst.msk [vmem:[#allocation2 + $0xb0] sm:$0xff] %vm306_vm2, %v465_v0 }
  0xf8   : > { %480 = vst.msk [vmem:[#allocation2 + $0x98] sm:$0xff] %vm306_vm2, %v463_v1  ;;  %v547_v6 = vld [vmem:[#allocation2 + $0x8] sm:$0xff] }
  0xf9   : > { %529 = vst.msk [vmem:[#allocation2 + $0xb0] sm:$0xff] %vm358_vm3, %v513_v63 }
  0xfa   : > { %v821_v34 = vpop.f32.mrf.mxu2 }
  0xfe   : > { %v511_v2 = vpop.permute.xlu1 %510 }
  0xff   : > { %v501_v3 = vpop.permute.xlu0 %500  ;;  %528 = vst.msk [vmem:[#allocation2 + $0x98] sm:$0xff] %vm358_vm3, %v511_v2 }
 0x100   : > { %523 = vst.msk [vmem:[#allocation2 + $0x20] sm:$0xff] %vm358_vm3, %v501_v3  ;;  %v568_v4 = vld [vmem:[#allocation2 + $0xb0] sm:$0xff] }
 0x106   : > { %v565_v5 = vld [vmem:[#allocation2 + $0x98] sm:$0xff] }
 0x107   : > { %v550_v7 = vld [vmem:[#allocation2 + $0x20] sm:$0xff]  ;;  %v580_v8 = vpack.c.bf16 %v568_v4, %v565_v5 }
 0x108   : > { %v571_v9 = vpack.c.bf16 %v550_v7, %v547_v6 }
 0x109   : > { %794 = vmatmul.bf16.gmra.mxu1 %v580_v8 }
 0x10a   : > { %779 = vmatmul.bf16.vlgmr.msrb.gmra.mxu0 %v571_v9 }
 0x11f   : > { %v756_v12 = vpop.f32.mrf.mxu3  ;;  %v824_v42 = vpop.f32.mrf.mxu2 }
 0x120   : > { %v757_v15 = vadd.f32 %v1157_v13, %v756_v12 }
 0x127   : > { %v758_v19 = vpop.f32.mrf.mxu3  ;;  %v826_v55 = vpop.f32.mrf.mxu2 }
 0x128   : > { %v785_v16 = vpop.f32.mrf.mxu1  ;;  %v759_v20 = vadd.f32 %v1157_v13, %v758_v19 }
 0x129   : > { %v786_v17 = vadd.f32 %v785_v16, %v757_v15 }
 0x12b   : > { %v815_v18 = vadd.f32 %v814_v14, %v786_v17 }
 0x12d   : > { %831 = vst.msk [vmem:[%s1556_s12 + $0x10] sm:$0xff] %vm208_vm0, %v815_v18 }
 0x130   : > { %v787_v21 = vpop.f32.mrf.mxu1 }
 0x131   : > { %v788_v23 = vadd.f32 %v787_v21, %v759_v20 }
 0x133   : > { %v817_v24 = vadd.f32 %v816_v22, %v788_v23 }
 0x135   : > { %832 = vst.msk [vmem:[%s1556_s12 + $0x18] sm:$0xff] %vm208_vm0, %v817_v24 }
 0x13e   : > { %v761_v25 = vpop.f32.mrf.mxu3 }
 0x13f   : > { %v762_v27 = vadd.f32 %v1157_v13, %v761_v25 }
 0x146   : > { %v763_v31 = vpop.f32.mrf.mxu3 }
 0x147   : > { %v764_v32 = vadd.f32 %v1157_v13, %v763_v31 }
 0x156   : > { %v790_v28 = vpop.f32.mrf.mxu1 }
 0x157   : > { %v791_v29 = vadd.f32 %v790_v28, %v762_v27  ;;  %v751_v37 = vpop.f32.mrf.mxu0 }
 0x158   : > { %v752_v41 = vadd.f32 %v1157_v13, %v751_v37 }
 0x159   : > { %v820_v30 = vadd.f32 %v819_v26, %v791_v29 }
 0x15b   : > { %833 = vst.msk [vmem:[%s1556_s12 + $0x20] sm:$0xff] %vm208_vm0, %v820_v30 }
 0x15e   : > { %v792_v33 = vpop.f32.mrf.mxu1 }
 0x15f   : > { %v793_v35 = vadd.f32 %v792_v33, %v764_v32  ;;  %v753_v38 = vpop.f32.mrf.mxu0 }
 0x160   : > { %v754_v51 = vadd.f32 %v1157_v13, %v753_v38 }
 0x161   : > { %v822_v36 = vadd.f32 %v821_v34, %v793_v35 }
 0x163   : > { %834 = vst.msk [vmem:[%s1556_s12 + $0x28] sm:$0xff] %vm208_vm0, %v822_v36 }
 0x16e   : > { %v766_v39 = vpop.f32.mrf.mxu3 }
 0x16f   : > { %v767_v40 = vadd.f32 %v1157_v13, %v766_v39 }
 0x176   : > { %v768_v48 = vpop.f32.mrf.mxu3 }
 0x177   : > { %v769_v50 = vadd.f32 %v1157_v13, %v768_v48 }
 0x186   : > { %v795_v43 = vpop.f32.mrf.mxu1 }
 0x187   : > { %v780_v44 = vpop.f32.mrf.mxu0  ;;  %v796_v45 = vadd.f32 %v795_v43, %v767_v40 }
 0x188   : > { %v781_v46 = vadd.f32 %v780_v44, %v752_v41 }
 0x189   : > { %v825_v47 = vadd.f32 %v824_v42, %v796_v45 }
 0x18a   : > { %v810_v49 = vadd.f32 %v809_v10, %v781_v46 }
 0x18b   : > { %835 = vst.msk [vmem:[%s1556_s12 + $0x30] sm:$0xff] %vm208_vm0, %v825_v47 }
 0x18c   : > { %829 = vst.msk [vmem:[%s1556_s12] sm:$0xff] %vm208_vm0, %v810_v49 }
 0x18e   : > { %v797_v52 = vpop.f32.mrf.mxu1 }
 0x18f   : > { %v782_v53 = vpop.f32.mrf.mxu0  ;;  %v798_v54 = vadd.f32 %v797_v52, %v769_v50 }
 0x190   : > { %v783_v56 = vadd.f32 %v782_v53, %v754_v51 }
 0x191   : > { %v827_v57 = vadd.f32 %v826_v55, %v798_v54 }
 0x192   : > { %v812_v58 = vadd.f32 %v811_v11, %v783_v56 }
 0x193   : > { %836 = vst.msk [vmem:[%s1556_s12 + $0x38] sm:$0xff] %vm208_vm0, %v827_v57 }
 0x194   : > { %830 = vst.msk [vmem:[%s1556_s12 + $0x8] sm:$0xff] %vm208_vm0, %v812_v58 }
 0x195 PF: > { %s13_s16 = sadd.s32 1, %s1196_s16   ;;  %s1593_s12 = smov %s1188_s14 }
 0x196   : > { %p10_p7 = scmp.ge.s32.totalorder %s13_s16, 10   ;;  %s1594_s13 = smov %s1192_s15 }
 0x197   : > { %s1595_s14 = smov %s1598_s17  ;;  %s1596_s15 = smov %s1602_s18 }
 0x198   :  { %12 = sbr.rel (!%p10_p7) target bundleno = 3 (0x3), region = 65 }

// kernel: low_rank_tensor_forward.8
= control target key start
LH: loop header
LB: loop body
LE: loop exit
PB: predicated region body
PF: predicated region fallthrough
CT: control target
= control target key end

     0   :  { %9 = vsyncpa [#allocation3], 0  ;;  %s1095_s15 = smov 0   ;;  %s1571_s0 = inlined_call_operand.vmem [shape: f32[2,16,16,32], index: 0, kind: input, shape index: {}]   ;;  %s1572_s1 = inlined_call_operand.vmem [shape: f32[32,32], index: 1, kind: input, shape index: {}]   ;;  %s1573_s2 = inlined_call_operand.vmem [shape: f32[1,32], index: 2, kind: input, shape index: {}]   ;;  %s1574_s3 = inlined_call_operand.vmem [shape: f32[4], index: 3, kind: input, shape index: {}]   ;;  %s1575_s4 = inlined_call_operand.vmem [shape: f32[2,16,16,32], index: 4, kind: output, shape index: {}]  }
   0x1 LB: > { %s920_s16 = sadd.s32 4294967295, %s1065_s15   ;;  %p922_p0 = scmp.ge.s32.totalorder %s1065_s15, 1  ;;  %s1065_s15 = sphi %s1095_s15, %s15_s15  }
   0x2   : > { %p135_p1 = scmp.lt.s32.totalorder %s1065_s15, 3  ;;  %s153_s19 = sshll.u32 %s1574_s3, 4  ;;  %s154_s19 = int_to_ptr.vmem [resolvable:$true] %s153_s19 }
   0x3   : > { %p947_p3 = scmp.eq.s32.totalorder %s920_s16, 0  ;;  %s1067_s20 = smov [#allocation2]  }
   0x4   : > { %p136_p2 = pnand %p922_p0, %p135_p1 }
   0x6   : > { %p943_p4 = pneg %p136_p2  ;;  %174 = sbr.rel (%p136_p2) target bundleno = 284 (0x11c), region = 36 }
   0x8   : > { %p944_p5 = pnand %p947_p3, %p943_p4 }
   0xa   : > { %946 = dma.vmem_to_smem (!%p944_p5), %s154_s19, 16, %s1067_s20, [#allocation3]  }
   0xb   : > { %1060 = dma.done.wait (%p947_p3), [#allocation3], 16  }
   0xc   : > { %1062 = vsyncadd (%p947_p3), [#allocation3], 4294967280 }
   0xd   : > { %181 = sfence }
   0xe   : > { %p202_p6 = scmp.lt.s32.totalorder %s920_s16, 1  ;;  %vm244_vm0 = vcmask 261120   ;;  %v1068_v50 = vmov 16.0   ;;  %s589_s7 = sld [smem:[#allocation2]] }
   0xf   : > { %960 = vrcp.f32 %v1068_v50  ;;  %v723_v50 = vld [vmem:[%s1572_s1] sm:$0xff]  ;;  %s931_s8 = sld [smem:[#allocation2 + $0x1]] }
  0x10   : > { %s1577_s16 = smov (!%p202_p6, %s920_s16), 1  ;;  %s1369_s9 = sld [smem:[#allocation2 + $0x2]] }
  0x11   : > { %s937_s21 = sshll.u32 %s1577_s16, 8  ;;  %s1377_s12 = sld [smem:[#allocation2 + $0x3]] }
  0x12   : > { %s1114_s24 = scalar_lea.vmem %s1571_s0, %s937_s21  ;;  %s1442_s17 = scalar_lea.vmem %s1575_s4, %s937_s21 }
  0x13   : > { %v216_v0 = vld [vmem:[%s1114_s24 + $0x20] sm:$0xff]  ;;  %v214_v1 = vld [vmem:[%s1114_s24 + $0x10] sm:$0xff]  ;;  %v217_v6 = vld [vmem:[%s1114_s24 + $0x28] sm:$0xff] }
  0x14   : > { %v212_v2 = vld [vmem:[%s1114_s24] sm:$0xff]  ;;  %v257_v3 = vsel %vm244_vm0, %v216_v0, 0.0  ;;  %v251_v4 = vsel %vm244_vm0, %v214_v1, 0.0  ;;  %v215_v7 = vld [vmem:[%s1114_s24 + $0x18] sm:$0xff]  ;;  %v213_v8 = vld [vmem:[%s1114_s24 + $0x8] sm:$0xff]  ;;  %v260_v15 = vsel %vm244_vm0, %v217_v6, 0.0 }
  0x15   : > { %v245_v5 = vsel %vm244_vm0, %v212_v2, 0.0  ;;  %258 = vadd.xlane.f32.xlu2 %v257_v3  ;;  %252 = vadd.xlane.f32.xlu1 %v251_v4  ;;  %v254_v10 = vsel %vm244_vm0, %v215_v7, 0.0  ;;  %v248_v11 = vsel %vm244_vm0, %v213_v8, 0.0  ;;  %v218_v12 = vld [vmem:[%s1114_s24 + $0x30] sm:$0xff]  ;;  %v219_v14 = vld [vmem:[%s1114_s24 + $0x38] sm:$0xff]  ;;  %v220_v16 = vld [vmem:[%s1114_s24 + $0x40] sm:$0xff]  ;;  %v961_v2 = vpop.eup %960 }
  0x16   : > { %v547_v9 = vadd.f32 %v251_v4, %v245_v5  ;;  %246 = vadd.xlane.f32.xlu0 %v245_v5  ;;  %v562_v13 = vadd.f32 %v254_v10, %v248_v11  ;;  %v263_v19 = vsel %vm244_vm0, %v218_v12, 0.0  ;;  %v221_v20 = vld [vmem:[%s1114_s24 + $0x48] sm:$0xff]  ;;  %v266_v21 = vsel %vm244_vm0, %v219_v14, 0.0  ;;  %v222_v23 = vld [vmem:[%s1114_s24 + $0x50] sm:$0xff]  ;;  %v223_v26 = vld [vmem:[%s1114_s24 + $0x58] sm:$0xff] }
  0x17   : > { %v269_v24 = vsel %vm244_vm0, %v220_v16, 0.0  ;;  %v1138_v28 = vsel %vm244_vm0, %v221_v20, 0.0  ;;  %v224_v29 = vld [vmem:[%s1114_s24 + $0x60] sm:$0xff]  ;;  %v1142_v30 = vsel %vm244_vm0, %v222_v23, 0.0  ;;  %v225_v32 = vld [vmem:[%s1114_s24 + $0x68] sm:$0xff]  ;;  %v227_v33 = vld [vmem:[%s1114_s24 + $0x78] sm:$0xff]  ;;  %vm497_vm1 = vweird.f32 %v961_v2 }
  0x18   : > { %v548_v17 = vadd.f32 %v547_v9, %v257_v3  ;;  %v563_v18 = vadd.f32 %v562_v13, %v260_v15  ;;  %v278_v34 = vsel %vm244_vm0, %v223_v26, 0.0  ;;  %v226_v36 = vld [vmem:[%s1114_s24 + $0x70] sm:$0xff]  ;;  %v1151_v38 = vsel %vm244_vm0, %v224_v29, 0.0  ;;  %v228_v41 = vld [vmem:[%s1114_s24 + $0x80] sm:$0xff]  ;;  %v229_v45 = vld [vmem:[%s1114_s24 + $0x88] sm:$0xff] }
  0x19   : > { %v1154_v39 = vsel %vm244_vm0, %v225_v32, 0.0  ;;  %v1159_v42 = vsel %vm244_vm0, %v227_v33, 0.0  ;;  %v1162_v43 = vsel %vm244_vm0, %v226_v36, 0.0  ;;  %v232_v47 = vld [vmem:[%s1114_s24 + $0xa0] sm:$0xff]  ;;  %v231_v48 = vld [vmem:[%s1114_s24 + $0x98] sm:$0xff]  ;;  %v230_v49 = vld [vmem:[%s1114_s24 + $0x90] sm:$0xff] }
  0x1a   : > { %v549_v22 = vadd.f32 %v548_v17, %v263_v19  ;;  %v564_v25 = vadd.f32 %v563_v18, %v266_v21  ;;  %v1171_v51 = vsel %vm244_vm0, %v228_v41, 0.0  ;;  %v1175_v53 = vsel %vm244_vm0, %v230_v49, 0.0  ;;  %v233_v57 = vld [vmem:[%s1114_s24 + $0xa8] sm:$0xff]  ;;  %v235_v61 = vld [vmem:[%s1114_s24 + $0xb8] sm:$0xff]  ;;  %v234_v62 = vld [vmem:[%s1114_s24 + $0xb0] sm:$0xff] }
  0x1b   : > { %v1178_v54 = vsel %vm244_vm0, %v229_v45, 0.0  ;;  %v1182_v56 = vsel %vm244_vm0, %v231_v48, 0.0  ;;  %v1186_v58 = vsel %vm244_vm0, %v232_v47, 0.0  ;;  %v1193_v63 = vsel %vm244_vm0, %v233_v57, 0.0  ;;  %v237_v5 = vld [vmem:[%s1114_s24 + $0xc8] sm:$0xff]  ;;  %v236_v6 = vld [vmem:[%s1114_s24 + $0xc0] sm:$0xff] }
  0x1c   : > { %v550_v27 = vadd.f32 %v549_v22, %v269_v24  ;;  %v565_v31 = vadd.f32 %v564_v25, %v1138_v28  ;;  %v1197_v1 = vsel %vm244_vm0, %v234_v62, 0.0  ;;  %v1200_v3 = vsel %vm244_vm0, %v235_v61, 0.0  ;;  %v239_v13 = vld [vmem:[%s1114_s24 + $0xd8] sm:$0xff]  ;;  %v241_v18 = vld [vmem:[%s1114_s24 + $0xe8] sm:$0xff]  ;;  %v242_v25 = vld [vmem:[%s1114_s24 + $0xf0] sm:$0xff] }
  0x1d   : > { %261 = vadd.xlane.f32.xlu2 %v260_v15  ;;  %255 = vadd.xlane.f32.xlu1 %v254_v10  ;;  %v1207_v8 = vsel %vm244_vm0, %v236_v6, 0.0  ;;  %v493_v9 = vmul.f32 16.0, %v961_v2  ;;  %v320_v12 = vsel %vm244_vm0, %v237_v5, 0.0  ;;  %v326_v20 = vsel %vm244_vm0, %v239_v13, 0.0 }
  0x1e   : > { %v551_v35 = vadd.f32 %v550_v27, %v1142_v30  ;;  %249 = vadd.xlane.f32.xlu0 %v248_v11  ;;  %v566_v37 = vadd.f32 %v565_v31, %v278_v34  ;;  %v238_v11 = vld [vmem:[%s1114_s24 + $0xd0] sm:$0xff]  ;;  %v243_v27 = vld [vmem:[%s1114_s24 + $0xf8] sm:$0xff]  ;;  %v335_v29 = vsel %vm244_vm0, %v242_v25, 0.0 }
  0x1f   : > { %v323_v14 = vsel %vm244_vm0, %v238_v11, 0.0  ;;  %v494_v16 = vsub.f32 1.0, %v493_v9 }
  0x20   : > { %v552_v40 = vadd.f32 %v551_v35, %v1151_v38  ;;  %v567_v44 = vadd.f32 %v566_v37, %v1154_v39  ;;  %v338_v35 = vsel %vm244_vm0, %v243_v27, 0.0 }
  0x21   : > { %v495_v23 = vmul.f32 %v961_v2, %v494_v16 }
  0x22   : > { %v553_v46 = vadd.f32 %v552_v40, %v1162_v43  ;;  %v568_v52 = vadd.f32 %v567_v44, %v1159_v42  ;;  %v726_v44 = vld [vmem:[%s1572_s1 + $0x18] sm:$0xff] }
  0x23   : > { %v496_v31 = vadd.f32 %v961_v2, %v495_v23  ;;  %743 = vmatpush.msra.mxu0 %v726_v44 }
  0x24   : > { %v554_v55 = vadd.f32 %v553_v46, %v1171_v51  ;;  %v569_v59 = vadd.f32 %v568_v52, %v1178_v54 }
  0x25   : > { %270 = vadd.xlane.f32.xlu2 %v269_v24  ;;  %267 = vadd.xlane.f32.xlu1 %v266_v21  ;;  %v332_v24 = vsel %vm244_vm0, %v241_v18, 0.0  ;;  %v1227_v36 = vsel %vm497_vm1, %v961_v2, %v496_v31 }
  0x26   : > { %v555_v60 = vadd.f32 %v554_v55, %v1175_v53  ;;  %264 = vadd.xlane.f32.xlu0 %v263_v19  ;;  %v570_v0 = vadd.f32 %v569_v59, %v1182_v56  ;;  %v240_v19 = vld [vmem:[%s1114_s24 + $0xe0] sm:$0xff] }
  0x27   : > { %v329_v22 = vsel %vm244_vm0, %v240_v19, 0.0 }
  0x28   : > { %v556_v4 = vadd.f32 %v555_v60, %v1186_v58  ;;  %v571_v7 = vadd.f32 %v570_v0, %v1193_v63 }
  0x2a   : > { %v557_v10 = vadd.f32 %v556_v4, %v1197_v1  ;;  %v572_v15 = vadd.f32 %v571_v7, %v1200_v3 }
  0x2c   : > { %v558_v17 = vadd.f32 %v557_v10, %v1207_v8  ;;  %v573_v21 = vadd.f32 %v572_v15, %v320_v12 }
  0x2d   : > { %279 = vadd.xlane.f32.xlu2 %v278_v34  ;;  %276 = vadd.xlane.f32.xlu1 %v1142_v30 }
  0x2e   : > { %v559_v26 = vadd.f32 %v558_v17, %v323_v14  ;;  %273 = vadd.xlane.f32.xlu0 %v1138_v28  ;;  %v574_v32 = vadd.f32 %v573_v21, %v326_v20 }
  0x30   : > { %v560_v33 = vadd.f32 %v559_v26, %v329_v22  ;;  %v575_v34 = vadd.f32 %v574_v32, %v332_v24 }
  0x32   : > { %v561_v37 = vadd.f32 %v560_v33, %v335_v29  ;;  %v576_v30 = vadd.f32 %v575_v34, %v338_v35 }
  0x34   : > { %v577_v40 = vmul.f32 %v561_v37, %v1227_v36  ;;  %v578_v41 = vmul.f32 %v576_v30, %v1227_v36 }
  0x35   : > { %288 = vadd.xlane.f32.xlu2 %v1162_v43  ;;  %285 = vadd.xlane.f32.xlu1 %v1154_v39  ;;  %v724_v39 = vld [vmem:[%s1572_s1 + $0x8] sm:$0xff] }
  0x36   : > { %v579_v28 = vsel %vm244_vm0, %v577_v40, 0.0  ;;  %282 = vadd.xlane.f32.xlu0 %v1151_v38  ;;  %v580_v45 = vsel %vm244_vm0, %v578_v41, 0.0  ;;  %v725_v38 = vld [vmem:[%s1572_s1 + $0x10] sm:$0xff] }
  0x37   : > { %v581_v46 = vadd.f32 %v580_v45, %v579_v28  ;;  %744 = vmatpush.msra.mxu0 %v725_v38 }
  0x39   : > { %v582_v47 = vrot.slane %v581_v46, 4  ;;  %745 = vmatpush.msra.mxu0 %v724_v39 }
  0x3b   : > { %v583_v48 = vadd.f32 %v582_v47, %v581_v46  ;;  %746 = vmatpush.msra.mxu0 %v723_v50 }
  0x3d   : > { %297 = vadd.xlane.f32.xlu2 %v1178_v54  ;;  %294 = vadd.xlane.f32.xlu1 %v1171_v51  ;;  %v584_v43 = vrot.slane %v583_v48, 2  ;;  %v1069_v54 = vmov 32.0  }
  0x3e   : > { %291 = vadd.xlane.f32.xlu0 %v1159_v42  ;;  %962 = vrcp.f32 %v1069_v54 }
  0x3f   : > { %v585_v49 = vadd.f32 %v584_v43, %v583_v48 }
  0x41   : > { %v586_v52 = vrot.slane %v585_v49, 1 }
  0x43   : > { %v587_v51 = vadd.f32 %v586_v52, %v585_v49  ;;  %v1302_v52 = vstv %s589_s7 }
  0x45   : > { %306 = vadd.xlane.f32.xlu2 %v1186_v58  ;;  %303 = vadd.xlane.f32.xlu1 %v1182_v56  ;;  %v588_v42 = vmul.f32 %v587_v51, %v1227_v36 }
  0x46   : > { %300 = vadd.xlane.f32.xlu0 %v1175_v53  ;;  %v963_v53 = vpop.eup %962 }
  0x47   : > { %934 = vmatmul.msk.f32.vlgmr.msra.gmra.mxu0 %vm244_vm0, %v588_v42  ;;  %v342_v55 = vmul.f32 32.0, %v963_v53  ;;  %vm346_vm2 = vweird.f32 %v963_v53 }
  0x49   : > { %v343_v56 = vsub.f32 1.0, %v342_v55 }
  0x4b   : > { %v344_v57 = vmul.f32 %v963_v53, %v343_v56 }
  0x4d   : > { %315 = vadd.xlane.f32.xlu2 %v1200_v3  ;;  %312 = vadd.xlane.f32.xlu1 %v1197_v1  ;;  %v345_v61 = vadd.f32 %v963_v53, %v344_v57 }
  0x4e   : > { %309 = vadd.xlane.f32.xlu0 %v1193_v63 }
  0x4f   : > { %v1260_v62 = vsel %vm346_vm2, %v963_v53, %v345_v61 }
  0x55   : > { %324 = vadd.xlane.f32.xlu2 %v323_v14  ;;  %321 = vadd.xlane.f32.xlu1 %v320_v12 }
  0x56   : > { %318 = vadd.xlane.f32.xlu0 %v1207_v8 }
  0x5d   : > { %333 = vadd.xlane.f32.xlu2 %v332_v24  ;;  %330 = vadd.xlane.f32.xlu1 %v329_v22 }
  0x5e   : > { %327 = vadd.xlane.f32.xlu0 %v326_v20 }
  0x65   : > { %339 = vadd.xlane.f32.xlu1 %v338_v35 }
  0x66   : > { %336 = vadd.xlane.f32.xlu0 %v335_v29 }
  0x88   : > { %v259_v58 = vpop.xlane.xlu2 %258  ;;  %v253_v59 = vpop.xlane.xlu1 %252 }
  0x89   : > { %v247_v60 = vpop.xlane.xlu0 %246  ;;  %v1263_v1 = vmul.f32 %v1260_v62, %v259_v58  ;;  %v1266_v2 = vmul.f32 %v1260_v62, %v253_v59  ;;  %v1312_v59 = vstv %s931_s8 }
  0x8a   : > { %v348_v11 = vmul.f32 %v1260_v62, %v247_v60 }
  0x90   : > { %v262_v63 = vpop.xlane.xlu2 %261  ;;  %v256_v0 = vpop.xlane.xlu1 %255 }
  0x91   : > { %v1269_v3 = vmul.f32 %v1260_v62, %v262_v63  ;;  %v1272_v4 = vmul.f32 %v1260_v62, %v256_v0  ;;  %v250_v5 = vpop.xlane.xlu0 %249 }
  0x92   : > { %v349_v10 = vmul.f32 %v1260_v62, %v250_v5 }
  0x93   : > { %v394_v6 = vadd.f32 %v1269_v3, %v1263_v1  ;;  %v387_v7 = vadd.f32 %v1272_v4, %v1266_v2 }
  0x94   : > { %v380_v16 = vadd.f32 %v349_v10, %v348_v11 }
  0x95   : > { %v395_v8 = vrot.slane %v394_v6, 4  ;;  %v388_v9 = vrot.slane %v387_v7, 4 }
  0x96   : > { %v381_v22 = vrot.slane %v380_v16, 4 }
  0x97   : > { %v396_v12 = vadd.f32 %v395_v8, %v394_v6  ;;  %v389_v13 = vadd.f32 %v388_v9, %v387_v7  ;;  %v515_v8 = vadd.f32 %v1266_v2, %v348_v11  ;;  %v530_v9 = vadd.f32 %v1272_v4, %v349_v10 }
  0x98   : > { %v271_v14 = vpop.xlane.xlu2 %270  ;;  %v268_v15 = vpop.xlane.xlu1 %267  ;;  %v382_v29 = vadd.f32 %v381_v22, %v380_v16 }
  0x99   : > { %v265_v17 = vpop.xlane.xlu0 %264  ;;  %v397_v18 = vrot.slane %v396_v12, 2  ;;  %v390_v19 = vrot.slane %v389_v13, 2  ;;  %v1281_v20 = vmul.f32 %v1260_v62, %v268_v15  ;;  %v1296_v28 = vmul.f32 %v1260_v62, %v271_v14 }
  0x9a   : > { %v1284_v21 = vmul.f32 %v1260_v62, %v265_v17  ;;  %v383_v30 = vrot.slane %v382_v29, 2  ;;  %v516_v22 = vadd.f32 %v515_v8, %v1263_v1 }
  0x9b   : > { %v398_v23 = vadd.f32 %v397_v18, %v396_v12  ;;  %v391_v24 = vadd.f32 %v390_v19, %v389_v13  ;;  %v531_v19 = vadd.f32 %v530_v9, %v1269_v3 }
  0x9c   : > { %v401_v25 = vadd.f32 %v1281_v20, %v1284_v21  ;;  %v384_v43 = vadd.f32 %v383_v30, %v382_v29 }
  0x9d   : > { %v399_v32 = vrot.slane %v398_v23, 1  ;;  %v392_v34 = vrot.slane %v391_v24, 1 }
  0x9e   : > { %v402_v37 = vrot.slane %v401_v25, 4  ;;  %v385_v54 = vrot.slane %v384_v43, 1 }
  0x9f   : > { %v400_v41 = vadd.f32 %v399_v32, %v398_v23  ;;  %v393_v45 = vadd.f32 %v392_v34, %v391_v24  ;;  %v532_v24 = vadd.f32 %v531_v19, %v1281_v20 }
  0xa0   : > { %v280_v26 = vpop.xlane.xlu2 %279  ;;  %v277_v27 = vpop.xlane.xlu1 %276  ;;  %v403_v46 = vadd.f32 %v402_v37, %v401_v25  ;;  %v386_v5 = vadd.f32 %v385_v54, %v384_v43 }
  0xa1   : > { %v274_v31 = vpop.xlane.xlu0 %273  ;;  %v1289_v33 = vmul.f32 %v1260_v62, %v280_v26  ;;  %v1292_v35 = vmul.f32 %v1260_v62, %v277_v27  ;;  %v501_v49 = vmul.f32 %v1227_v36, %v400_v41  ;;  %v500_v51 = vmul.f32 %v1227_v36, %v393_v45 }
  0xa2   : > { %v357_v40 = vmul.f32 %v1260_v62, %v274_v31  ;;  %v404_v42 = vrot.slane %v403_v46, 2  ;;  %v499_v17 = vmul.f32 %v1227_v36, %v386_v5  ;;  %v517_v26 = vadd.f32 %v516_v22, %v1284_v21 }
  0xa3   : > { %v415_v44 = vadd.f32 %v1289_v33, %v1292_v35  ;;  %v596_v55 = vmul.f32 %v1302_v52, %v501_v49  ;;  %v595_v60 = vmul.f32 %v1302_v52, %v500_v51 }
  0xa4   : > { %v408_v38 = vadd.f32 %v357_v40, %v1296_v28  ;;  %v405_v61 = vadd.f32 %v404_v42, %v403_v46  ;;  %v594_v31 = vmul.f32 %v1302_v52, %v499_v17  ;;  %v533_v1 = vadd.f32 %v532_v24, %v357_v40 }
  0xa5   : > { %v416_v50 = vrot.slane %v415_v44, 4  ;;  %v613_v12 = vadd.f32 %v1312_v59, %v596_v55  ;;  %v612_v15 = vadd.f32 %v1312_v59, %v595_v60 }
  0xa6   : > { %v409_v53 = vrot.slane %v408_v38, 4  ;;  %v406_v16 = vrot.slane %v405_v61, 1  ;;  %v611_v43 = vadd.f32 %v1312_v59, %v594_v31  ;;  %v534_v40 = vadd.f32 %v533_v1, %v1289_v33 }
  0xa7   : > { %v417_v56 = vadd.f32 %v416_v50, %v415_v44  ;;  %v629_v23 = vsub.f32 0.0, %v613_v12  ;;  %v628_v10 = vsub.f32 0.0, %v612_v15 }
  0xa8   : > { %v289_v47 = vpop.xlane.xlu2 %288  ;;  %v286_v48 = vpop.xlane.xlu1 %285  ;;  %v410_v6 = vadd.f32 %v409_v53, %v408_v38  ;;  %v407_v25 = vadd.f32 %v406_v16, %v405_v61 }
  0xa9   : > { %v283_v39 = vpop.xlane.xlu0 %282  ;;  %v1307_v57 = vmul.f32 %v1260_v62, %v286_v48  ;;  %v418_v13 = vrot.slane %v417_v56, 2  ;;  %v362_v3 = vmul.f32 %v1260_v62, %v289_v47  ;;  %v647_v41 = vmul.f32 1.442695, %v629_v23 }
  0xaa   : > { %v1310_v58 = vmul.f32 %v1260_v62, %v283_v39  ;;  %v411_v18 = vrot.slane %v410_v6, 2  ;;  %v645_v46 = vmul.f32 1.442695, %v628_v10  ;;  %v502_v21 = vmul.f32 %v1227_v36, %v407_v25 }
  0xab   : > { %v419_v2 = vadd.f32 %v418_v13, %v417_v56  ;;  %v518_v48 = vadd.f32 %v517_v26, %v1296_v28  ;;  %964 = vpow2.f32 %v647_v41  ;;  %v627_v56 = vsub.f32 0.0, %v611_v43 }
  0xac   : > { %v422_v14 = vadd.f32 %v1307_v57, %v1310_v58  ;;  %v412_v32 = vadd.f32 %v411_v18, %v410_v6  ;;  %966 = vpow2.f32 %v645_v46  ;;  %v597_v42 = vmul.f32 %v1302_v52, %v502_v21 }
  0xad   : > { %v420_v44 = vrot.slane %v419_v2, 1  ;;  %v519_v47 = vadd.f32 %v518_v48, %v1292_v35  ;;  %v535_v35 = vadd.f32 %v534_v40, %v1307_v57  ;;  %v643_v18 = vmul.f32 1.442695, %v627_v56 }
  0xae   : > { %v423_v11 = vrot.slane %v422_v14, 4  ;;  %v413_v38 = vrot.slane %v412_v32, 1  ;;  %v614_v9 = vadd.f32 %v1312_v59, %v597_v42 }
  0xaf   : > { %v421_v49 = vadd.f32 %v420_v44, %v419_v2  ;;  %v520_v33 = vadd.f32 %v519_v47, %v1310_v58  ;;  %968 = vpow2.f32 %v643_v18 }
  0xb0   : > { %v298_v63 = vpop.xlane.xlu2 %297  ;;  %v295_v0 = vpop.xlane.xlu1 %294  ;;  %v424_v45 = vadd.f32 %v423_v11, %v422_v14  ;;  %v414_v60 = vadd.f32 %v413_v38, %v412_v32  ;;  %v630_v24 = vsub.f32 0.0, %v614_v9 }
  0xb1   : > { %v292_v7 = vpop.xlane.xlu0 %291  ;;  %v365_v37 = vmul.f32 %v1260_v62, %v298_v63  ;;  %v364_v30 = vmul.f32 %v1260_v62, %v295_v0  ;;  %v504_v5 = vmul.f32 %v1227_v36, %v421_v49  ;;  %v965_v57 = vpop.eup %964  ;;  %v521_v2 = vadd.f32 %v520_v33, %v362_v3 }
  0xb2   : > { %v363_v4 = vmul.f32 %v1260_v62, %v292_v7  ;;  %v425_v50 = vrot.slane %v424_v45, 2  ;;  %v503_v58 = vmul.f32 %v1227_v36, %v414_v60  ;;  %v967_v17 = vpop.eup %966  ;;  %v677_v10 = vadd.f32 1.0, %v965_v57 }
  0xb3   : > { %v436_v39 = vadd.f32 %v365_v37, %v364_v30  ;;  %v599_v22 = vmul.f32 %v1302_v52, %v504_v5  ;;  %v676_v31 = vadd.f32 1.0, %v967_v17  ;;  %v522_v44 = vadd.f32 %v521_v2, %v364_v30 }
  0xb4   : > { %v429_v20 = vadd.f32 %v363_v4, %v362_v3  ;;  %v426_v6 = vadd.f32 %v425_v50, %v424_v45  ;;  %v536_v15 = vadd.f32 %v535_v35, %v363_v4  ;;  %v598_v32 = vmul.f32 %v1302_v52, %v503_v58 }
  0xb5   : > { %v437_v63 = vrot.slane %v436_v39, 4  ;;  %970 = vrcp.f32 %v677_v10  ;;  %v649_v49 = vmul.f32 1.442695, %v630_v24  ;;  %v1364_v57 = vpop.eup %968 }
  0xb6   : > { %v430_v51 = vrot.slane %v429_v20, 4  ;;  %v427_v23 = vrot.slane %v426_v6, 1  ;;  %v537_v4 = vadd.f32 %v536_v15, %v365_v37  ;;  %972 = vrcp.f32 %v676_v31 }
  0xb7   : > { %v438_v19 = vadd.f32 %v437_v63, %v436_v39  ;;  %v1357_v42 = vadd.f32 %v1312_v59, %v598_v32  ;;  %974 = vpow2.f32 %v649_v49 }
  0xb8   : > { %v307_v27 = vpop.xlane.xlu2 %306  ;;  %v304_v29 = vpop.xlane.xlu1 %303  ;;  %v431_v7 = vadd.f32 %v430_v51, %v429_v20  ;;  %v616_v20 = vadd.f32 %v1312_v59, %v599_v22  ;;  %v428_v46 = vadd.f32 %v427_v23, %v426_v6  ;;  %v727_v22 = vld [vmem:[%s1573_s2] sm:$0x1] }
  0xb9   : > { %v301_v34 = vpop.xlane.xlu0 %300  ;;  %v367_v54 = vmul.f32 %v1260_v62, %v304_v29  ;;  %v368_v8 = vmul.f32 %v1260_v62, %v307_v27  ;;  %v439_v41 = vrot.slane %v438_v19, 2 }
  0xba   : > { %v366_v53 = vmul.f32 %v1260_v62, %v301_v34  ;;  %v432_v11 = vrot.slane %v431_v7, 2  ;;  %v632_v51 = vsub.f32 0.0, %v616_v20 }
  0xbb   : > { %v538_v48 = vadd.f32 %v537_v4, %v367_v54  ;;  %v440_v50 = vadd.f32 %v439_v41, %v438_v19  ;;  %v1367_v17 = vpop.eup %970 }
  0xbc   : > { %v443_v12 = vadd.f32 %v367_v54, %v366_v53  ;;  %v433_v21 = vadd.f32 %v432_v11, %v431_v7  ;;  %v523_v38 = vadd.f32 %v522_v44, %v366_v53  ;;  %v1374_v2 = vpop.eup %972  ;;  %v631_v11 = vsub.f32 0.0, %v1357_v42 }
  0xbd   : > { %v441_v6 = vrot.slane %v440_v50, 1 }
  0xbe   : > { %v444_v25 = vrot.slane %v443_v12, 4  ;;  %v524_v53 = vadd.f32 %v523_v38, %v368_v8  ;;  %v1384_v38 = vpop.eup %974 }
  0xbf   : > { %v442_v32 = vadd.f32 %v441_v6, %v440_v50 }
  0xc0   : > { %v316_v28 = vpop.xlane.xlu2 %315  ;;  %v313_v55 = vpop.xlane.xlu1 %312  ;;  %v445_v43 = vadd.f32 %v444_v25, %v443_v12  ;;  %v1379_v25 = vmul.f32 1.442695, %v632_v51 }
  0xc1   : > { %v310_v61 = vpop.xlane.xlu0 %309  ;;  %v371_v13 = vmul.f32 %v1260_v62, %v316_v28  ;;  %v1347_v14 = vmul.f32 %v1260_v62, %v313_v55  ;;  %v434_v28 = vrot.slane %v433_v21, 1  ;;  %v505_v55 = vmul.f32 %v1227_v36, %v428_v46 }
  0xc2   : > { %v369_v0 = vmul.f32 %v1260_v62, %v310_v61  ;;  %v446_v54 = vrot.slane %v445_v43, 2  ;;  %v507_v49 = vmul.f32 %v1227_v36, %v442_v32 }
  0xc3   : > { %v457_v26 = vadd.f32 %v371_v13, %v1347_v14  ;;  %v435_v58 = vadd.f32 %v434_v28, %v433_v21  ;;  %v600_v31 = vmul.f32 %v1302_v52, %v505_v55 }
  0xc4   : > { %v450_v16 = vadd.f32 %v369_v0, %v368_v8  ;;  %v539_v37 = vadd.f32 %v538_v48, %v369_v0  ;;  %v525_v8 = vadd.f32 %v524_v53, %v1347_v14  ;;  %v748_v23 = vpop.f32.mrf.mxu0  ;;  %v710_v53 = vstv %s1377_s12 }
  0xc5   : > { %v458_v47 = vrot.slane %v457_v26, 4  ;;  %v506_v4 = vmul.f32 %v1227_v36, %v435_v58  ;;  %v602_v58 = vmul.f32 %v1302_v52, %v507_v49 }
  0xc6   : > { %v451_v34 = vrot.slane %v450_v16, 4  ;;  %v540_v33 = vadd.f32 %v539_v37, %v371_v13  ;;  %v447_v13 = vadd.f32 %v446_v54, %v445_v43 }
  0xc7   : > { %v459_v56 = vadd.f32 %v458_v47, %v457_v26  ;;  %v601_v28 = vmul.f32 %v1302_v52, %v506_v4  ;;  %v619_v32 = vadd.f32 %v1312_v59, %v602_v58 }
  0xc8   : > { %v325_v27 = vpop.xlane.xlu2 %324  ;;  %v322_v29 = vpop.xlane.xlu1 %321  ;;  %v452_v39 = vadd.f32 %v451_v34, %v450_v16  ;;  %v749_v34 = vadd.f32 %v748_v23, %v727_v22 }
  0xc9   : > { %v319_v1 = vpop.xlane.xlu0 %318  ;;  %v373_v45 = vmul.f32 %v1260_v62, %v322_v29  ;;  %v374_v7 = vmul.f32 %v1260_v62, %v325_v27  ;;  %v460_v18 = vrot.slane %v459_v56, 2 }
  0xca   : > { %v372_v3 = vmul.f32 %v1260_v62, %v319_v1  ;;  %v453_v35 = vrot.slane %v452_v39, 2  ;;  %v448_v1 = vrot.slane %v447_v13, 1  ;;  %v751_v51 = vsub.f32 0.0, %v749_v34 }
  0xcb   : > { %v541_v15 = vadd.f32 %v540_v33, %v373_v45  ;;  %v461_v41 = vadd.f32 %v460_v18, %v459_v56  ;;  %v707_v56 = vstv %s1369_s9 }
  0xcc   : > { %v464_v40 = vadd.f32 %v373_v45, %v372_v3  ;;  %v454_v14 = vadd.f32 %v453_v35, %v452_v39  ;;  %v526_v10 = vadd.f32 %v525_v8, %v372_v3  ;;  %v449_v55 = vadd.f32 %v448_v1, %v447_v13 }
  0xcd   : > { %v462_v33 = vrot.slane %v461_v41, 1  ;;  %v618_v8 = vadd.f32 %v1312_v59, %v601_v28 }
  0xce   : > { %v465_v30 = vrot.slane %v464_v40, 4  ;;  %v455_v3 = vrot.slane %v454_v14, 1  ;;  %v527_v46 = vadd.f32 %v526_v10, %v374_v7 }
  0xcf   : > { %v463_v22 = vadd.f32 %v462_v33, %v461_v41 }
  0xd0   : > { %v334_v60 = vpop.xlane.xlu2 %333  ;;  %v331_v61 = vpop.xlane.xlu1 %330  ;;  %v466_v9 = vadd.f32 %v465_v30, %v464_v40 }
  0xd1   : > { %v377_v63 = vmul.f32 %v1260_v62, %v334_v60  ;;  %v376_v0 = vmul.f32 %v1260_v62, %v331_v61  ;;  %v328_v5 = vpop.xlane.xlu0 %327 }
  0xd2   : > { %v375_v12 = vmul.f32 %v1260_v62, %v328_v5  ;;  %v467_v26 = vrot.slane %v466_v9, 2 }
  0xd3   : > { %v478_v16 = vadd.f32 %v377_v63, %v376_v0  ;;  %v528_v50 = vadd.f32 %v527_v46, %v376_v0 }
  0xd4   : > { %v471_v19 = vadd.f32 %v375_v12, %v374_v7  ;;  %v542_v24 = vadd.f32 %v541_v15, %v375_v12  ;;  %v468_v47 = vadd.f32 %v467_v26, %v466_v9  ;;  %v752_v9 = vmul.f32 1.442695, %v751_v51 }
  0xd5   : > { %v479_v27 = vrot.slane %v478_v16, 4  ;;  %v617_v12 = vadd.f32 %v1312_v59, %v600_v31 }
  0xd6   : > { %v472_v29 = vrot.slane %v471_v19, 4  ;;  %v543_v48 = vadd.f32 %v542_v24, %v377_v63  ;;  %v456_v63 = vadd.f32 %v455_v3, %v454_v14  ;;  %v469_v5 = vrot.slane %v468_v47, 1 }
  0xd7   : > { %v480_v44 = vadd.f32 %v479_v27, %v478_v16  ;;  %v508_v16 = vmul.f32 %v1227_v36, %v449_v55  ;;  %976 = vpow2.f32 %v752_v9  ;;  %v633_v31 = vsub.f32 0.0, %v617_v12 }
  0xd8   : > { %v473_v45 = vadd.f32 %v472_v29, %v471_v19  ;;  %v340_v20 = vpop.xlane.xlu1 %339  ;;  %v509_v23 = vmul.f32 %v1227_v36, %v456_v63  ;;  %v470_v14 = vadd.f32 %v469_v5, %v468_v47  ;;  %v651_v29 = vmul.f32 1.442695, %v631_v11 }
  0xd9   : > { %v379_v21 = vmul.f32 %v1260_v62, %v340_v20  ;;  %v337_v43 = vpop.xlane.xlu0 %336  ;;  %v481_v40 = vrot.slane %v480_v44, 2  ;;  %v603_v34 = vmul.f32 %v1302_v52, %v508_v16  ;;  %v510_v20 = vmul.f32 %v1227_v36, %v463_v22 }
  0xda   : > { %v474_v39 = vrot.slane %v473_v45, 2  ;;  %v378_v37 = vmul.f32 %v1260_v62, %v337_v43  ;;  %v604_v3 = vmul.f32 %v1302_v52, %v509_v23 }
  0xdb   : > { %v544_v30 = vadd.f32 %v543_v48, %v379_v21  ;;  %v482_v6 = vadd.f32 %v481_v40, %v480_v44  ;;  %v655_v48 = vmul.f32 1.442695, %v633_v31  ;;  %v675_v40 = vadd.f32 1.0, %v1364_v57 }
  0xdc   : > { %v475_v54 = vadd.f32 %v474_v39, %v473_v45  ;;  %v485_v61 = vadd.f32 %v379_v21, %v378_v37  ;;  %v529_v35 = vadd.f32 %v528_v50, %v378_v37  ;;  %v634_v45 = vsub.f32 0.0, %v618_v8 }
  0xdd   : > { %v546_v60 = vmul.f32 %v544_v30, %v1227_v36  ;;  %v483_v10 = vrot.slane %v482_v6, 1  ;;  %v511_v21 = vmul.f32 %v1227_v36, %v470_v14  ;;  %v977_v47 = vpop.eup %976  ;;  %v620_v39 = vadd.f32 %v1312_v59, %v603_v34 }
  0xde   : > { %v486_v7 = vrot.slane %v485_v61, 4  ;;  %v545_v0 = vmul.f32 %v529_v35, %v1227_v36  ;;  %v476_v15 = vrot.slane %v475_v54, 1  ;;  %v605_v49 = vmul.f32 %v1302_v52, %v510_v20 }
  0xdf   : > { %v709_v62 = vmul.f32 %v707_v56, %v546_v60  ;;  %v484_v46 = vadd.f32 %v483_v10, %v482_v6  ;;  %v635_v30 = vsub.f32 0.0, %v619_v32  ;;  %v657_v51 = vmul.f32 1.442695, %v634_v45 }
  0xe0   : > { %v487_v18 = vadd.f32 %v486_v7, %v485_v61  ;;  %v708_v19 = vmul.f32 %v707_v56, %v545_v0  ;;  %v477_v4 = vadd.f32 %v476_v15, %v475_v54  ;;  %v621_v28 = vadd.f32 %v1312_v59, %v604_v3 }
  0xe1   : > { %v712_v13 = vadd.f32 %v710_v53, %v709_v62  ;;  %v513_v50 = vmul.f32 %v1227_v36, %v484_v46  ;;  %v754_v54 = vadd.f32 1.0, %v977_v47  ;;  %v678_v61 = vadd.f32 1.0, %v1384_v38 }
  0xe2   : > { %v488_v26 = vrot.slane %v487_v18, 2  ;;  %v711_v27 = vadd.f32 %v710_v53, %v708_v19  ;;  %v512_v43 = vmul.f32 %v1227_v36, %v477_v4  ;;  %v636_v53 = vsub.f32 0.0, %v620_v39 }
  0xe3   : > { %v714_v24 = vsub.f32 0.0, %v712_v13  ;;  %v622_v35 = vadd.f32 %v1312_v59, %v605_v49  ;;  %v608_v33 = vmul.f32 %v1302_v52, %v513_v50  ;;  %v659_v6 = vmul.f32 1.442695, %v635_v30 }
  0xe4   : > { %v489_v44 = vadd.f32 %v488_v26, %v487_v18  ;;  %v713_v41 = vsub.f32 0.0, %v711_v27  ;;  %v607_v55 = vmul.f32 %v1302_v52, %v512_v43  ;;  %v637_v62 = vsub.f32 0.0, %v621_v28 }
  0xe5   : > { %v717_v1 = vmul.f32 1.442695, %v714_v24  ;;  %v661_v58 = vmul.f32 1.442695, %v636_v53  ;;  %v638_v15 = vsub.f32 0.0, %v622_v35  ;;  %v625_v16 = vadd.f32 %v1312_v59, %v608_v33 }
  0xe6   : > { %v490_v42 = vrot.slane %v489_v44, 1  ;;  %v715_v11 = vmul.f32 1.442695, %v713_v41  ;;  %v663_v22 = vmul.f32 1.442695, %v637_v62 }
  0xe7   : > { %978 = vpow2.f32 %v717_v1  ;;  %v665_v26 = vmul.f32 1.442695, %v638_v15  ;;  %v641_v27 = vsub.f32 0.0, %v625_v16 }
  0xe8   : > { %980 = vpow2.f32 %v1379_v25  ;;  %v491_v37 = vadd.f32 %v490_v42, %v489_v44  ;;  %v606_v25 = vmul.f32 %v1302_v52, %v511_v21 }
  0xe9   : > { %982 = vpow2.f32 %v715_v11  ;;  %v671_v41 = vmul.f32 1.442695, %v641_v27 }
  0xea   : > { %984 = vpow2.f32 %v651_v29  ;;  %v514_v57 = vmul.f32 %v1227_v36, %v491_v37  ;;  %v623_v7 = vadd.f32 %v1312_v59, %v606_v25  ;;  %v624_v36 = vadd.f32 %v1312_v59, %v607_v55 }
  0xeb   : > { %986 = vpow2.f32 %v655_v48 }
  0xec   : > { %988 = vrcp.f32 %v675_v40  ;;  %v609_v9 = vmul.f32 %v1302_v52, %v514_v57  ;;  %v639_v19 = vsub.f32 0.0, %v623_v7  ;;  %v640_v23 = vsub.f32 0.0, %v624_v36 }
  0xed   : > { %v979_v56 = vpop.eup %978  ;;  %990 = vpow2.f32 %v657_v51 }
  0xee   : > { %v981_v60 = vpop.eup %980  ;;  %v720_v63 = vadd.f32 1.0, %v979_v56  ;;  %992 = vrcp.f32 %v754_v54  ;;  %v626_v14 = vadd.f32 %v1312_v59, %v609_v9  ;;  %v667_v31 = vmul.f32 1.442695, %v639_v19 }
  0xef   : > { %v983_v5 = vpop.eup %982  ;;  %v680_v8 = vadd.f32 1.0, %v981_v60  ;;  %v669_v4 = vmul.f32 1.442695, %v640_v23 }
  0xf0   : > { %v985_v0 = vpop.eup %984  ;;  %v719_v12 = vadd.f32 1.0, %v983_v5  ;;  %994 = vrcp.f32 %v720_v63  ;;  %v642_v34 = vsub.f32 0.0, %v626_v14 }
  0xf1   : > { %v987_v38 = vpop.eup %986  ;;  %v679_v18 = vadd.f32 1.0, %v985_v0 }
  0xf2   : > { %996 = vrcp.f32 %v719_v12  ;;  %v989_v13 = vpop.eup %988  ;;  %v681_v10 = vadd.f32 1.0, %v987_v38  ;;  %v673_v48 = vmul.f32 1.442695, %v642_v34 }
  0xf3   : > { %998 = vrcp.f32 %v678_v61  ;;  %v991_v52 = vpop.eup %990 }
  0xf4   : > { %1000 = vpow2.f32 %v659_v6  ;;  %v993_v24 = vpop.eup %992  ;;  %v682_v44 = vadd.f32 1.0, %v991_v52 }
  0xf5   : > { %1002 = vpow2.f32 %v661_v58  ;;  %v1428_v20 = vperm.slane %v993_v24, 0 }
  0xf6   : > { %1004 = vrcp.f32 %v680_v8  ;;  %v1423_v29 = vpop.eup %994 }
  0xf7   : > { %1006 = vrcp.f32 %v679_v18  ;;  %v757_v46 = vmul.f32 %v1423_v29, %v989_v13  ;;  %v759_v21 = vmul.f32 %v1423_v29, %v1374_v2  ;;  %v761_v39 = vmul.f32 %v1423_v29, %v1367_v17 }
  0xf8   : > { %v1425_v32 = vpop.eup %996  ;;  %1008 = vpow2.f32 %v663_v22 }
  0xf9   : > { %v999_v1 = vpop.eup %998  ;;  %1010 = vrcp.f32 %v681_v10  ;;  %v756_v45 = vmul.f32 %v1425_v32, %v989_v13  ;;  %v758_v42 = vmul.f32 %v1425_v32, %v1374_v2  ;;  %v760_v43 = vmul.f32 %v1425_v32, %v1367_v17 }
  0xfa   : > { %v1001_v59 = vpop.eup %1000  ;;  %1012 = vpow2.f32 %v665_v26  ;;  %v762_v49 = vmul.f32 %v999_v1, %v1425_v32  ;;  %v763_v51 = vmul.f32 %v999_v1, %v1423_v29  ;;  %v790_v28 = vmul.f32 %v1428_v20, %v757_v46 }
  0xfb   : > { %v1003_v3 = vpop.eup %1002  ;;  %1014 = vpow2.f32 %v667_v31  ;;  %v683_v40 = vadd.f32 1.0, %v1001_v59  ;;  %v789_v50 = vmul.f32 %v1428_v20, %v756_v45  ;;  %v791_v25 = vmul.f32 %v1428_v20, %v758_v42 }
  0xfc   : > { %v1005_v11 = vpop.eup %1004  ;;  %1016 = vpow2.f32 %v669_v4  ;;  %v684_v37 = vadd.f32 1.0, %v1003_v3  ;;  %v792_v55 = vmul.f32 %v1428_v20, %v759_v21  ;;  %v793_v54 = vmul.f32 %v1428_v20, %v760_v43  ;;  %822 = vst.msk [vmem:[%s1442_s17 + $0x8] sm:$0xff] %vm244_vm0, %v790_v28 }
  0xfd   : > { %v1007_v47 = vpop.eup %1006  ;;  %1018 = vrcp.f32 %v682_v44  ;;  %821 = vst.msk [vmem:[%s1442_s17] sm:$0xff] %vm244_vm0, %v789_v50  ;;  %v794_v61 = vmul.f32 %v1428_v20, %v761_v39  ;;  %v766_v33 = vmul.f32 %v1005_v11, %v1425_v32  ;;  %v795_v63 = vmul.f32 %v1428_v20, %v762_v49 }
  0xfe   : > { %v1009_v2 = vpop.eup %1008  ;;  %1020 = vpow2.f32 %v671_v41  ;;  %v764_v17 = vmul.f32 %v1007_v47, %v1425_v32  ;;  %v765_v60 = vmul.f32 %v1007_v47, %v1423_v29  ;;  %823 = vst.msk [vmem:[%s1442_s17 + $0x10] sm:$0xff] %vm244_vm0, %v791_v25  ;;  %v767_v62 = vmul.f32 %v1005_v11, %v1423_v29 }
  0xff   : > { %v1011_v30 = vpop.eup %1010  ;;  %1022 = vpow2.f32 %v673_v48  ;;  %v685_v53 = vadd.f32 1.0, %v1009_v2  ;;  %v796_v7 = vmul.f32 %v1428_v20, %v763_v51  ;;  %824 = vst.msk [vmem:[%s1442_s17 + $0x18] sm:$0xff] %vm244_vm0, %v792_v55  ;;  %v799_v13 = vmul.f32 %v1428_v20, %v766_v33 }
 0x100   : > { %v1013_v57 = vpop.eup %1012  ;;  %1024 = vrcp.f32 %v683_v40  ;;  %v768_v9 = vmul.f32 %v1011_v30, %v1425_v32  ;;  %v797_v12 = vmul.f32 %v1428_v20, %v764_v17  ;;  %825 = vst.msk [vmem:[%s1442_s17 + $0x20] sm:$0xff] %vm244_vm0, %v793_v54  ;;  %v769_v38 = vmul.f32 %v1011_v30, %v1423_v29 }
 0x101   : > { %v1015_v56 = vpop.eup %1014  ;;  %1026 = vrcp.f32 %v684_v37  ;;  %v686_v6 = vadd.f32 1.0, %v1013_v57  ;;  %v798_v8 = vmul.f32 %v1428_v20, %v765_v60  ;;  %826 = vst.msk [vmem:[%s1442_s17 + $0x28] sm:$0xff] %vm244_vm0, %v794_v61  ;;  %v800_v23 = vmul.f32 %v1428_v20, %v767_v62 }
 0x102   : > { %v1017_v35 = vpop.eup %1016  ;;  %v687_v36 = vadd.f32 1.0, %v1015_v56  ;;  %1028 = vrcp.f32 %v685_v53  ;;  %827 = vst.msk [vmem:[%s1442_s17 + $0x30] sm:$0xff] %vm244_vm0, %v795_v63  ;;  %v801_v52 = vmul.f32 %v1428_v20, %v768_v9  ;;  %v802_v27 = vmul.f32 %v1428_v20, %v769_v38 }
 0x103   : > { %v1019_v5 = vpop.eup %1018  ;;  %v688_v58 = vadd.f32 1.0, %v1017_v35  ;;  %1030 = vrcp.f32 %v686_v6  ;;  %828 = vst.msk [vmem:[%s1442_s17 + $0x38] sm:$0xff] %vm244_vm0, %v796_v7 }
 0x104   : > { %v1021_v0 = vpop.eup %1020  ;;  %v770_v16 = vmul.f32 %v1019_v5, %v1425_v32  ;;  %v771_v22 = vmul.f32 %v1019_v5, %v1423_v29  ;;  %1032 = vrcp.f32 %v687_v36  ;;  %829 = vst.msk [vmem:[%s1442_s17 + $0x40] sm:$0xff] %vm244_vm0, %v797_v12 }
 0x105   : > { %v1023_v15 = vpop.eup %1022  ;;  %v689_v19 = vadd.f32 1.0, %v1021_v0  ;;  %1034 = vrcp.f32 %v688_v58  ;;  %830 = vst.msk [vmem:[%s1442_s17 + $0x48] sm:$0xff] %vm244_vm0, %v798_v8 }
 0x106   : > { %v1025_v18 = vpop.eup %1024  ;;  %v690_v26 = vadd.f32 1.0, %v1023_v15  ;;  %v803_v4 = vmul.f32 %v1428_v20, %v770_v16  ;;  %831 = vst.msk [vmem:[%s1442_s17 + $0x50] sm:$0xff] %vm244_vm0, %v799_v13  ;;  %v804_v44 = vmul.f32 %v1428_v20, %v771_v22 }
 0x107   : > { %v772_v14 = vmul.f32 %v1025_v18, %v1425_v32  ;;  %v1027_v10 = vpop.eup %1026  ;;  %v773_v24 = vmul.f32 %v1025_v18, %v1423_v29  ;;  %1036 = vrcp.f32 %v689_v19  ;;  %832 = vst.msk [vmem:[%s1442_s17 + $0x58] sm:$0xff] %vm244_vm0, %v800_v23 }
 0x108   : > { %v774_v31 = vmul.f32 %v1027_v10, %v1425_v32  ;;  %v1029_v34 = vpop.eup %1028  ;;  %v775_v1 = vmul.f32 %v1027_v10, %v1423_v29  ;;  %833 = vst.msk [vmem:[%s1442_s17 + $0x60] sm:$0xff] %vm244_vm0, %v801_v52  ;;  %1038 = vrcp.f32 %v690_v26 }
 0x109   : > { %v776_v59 = vmul.f32 %v1029_v34, %v1425_v32  ;;  %v805_v41 = vmul.f32 %v1428_v20, %v772_v14  ;;  %v1031_v45 = vpop.eup %1030  ;;  %v777_v3 = vmul.f32 %v1029_v34, %v1423_v29  ;;  %v806_v46 = vmul.f32 %v1428_v20, %v773_v24  ;;  %834 = vst.msk [vmem:[%s1442_s17 + $0x68] sm:$0xff] %vm244_vm0, %v802_v27 }
 0x10a   : > { %v1033_v21 = vpop.eup %1032  ;;  %v778_v42 = vmul.f32 %v1031_v45, %v1425_v32  ;;  %v807_v11 = vmul.f32 %v1428_v20, %v774_v31  ;;  %835 = vst.msk [vmem:[%s1442_s17 + $0x70] sm:$0xff] %vm244_vm0, %v803_v4  ;;  %v779_v43 = vmul.f32 %v1031_v45, %v1423_v29  ;;  %v808_v47 = vmul.f32 %v1428_v20, %v775_v1 }
 0x10b   : > { %v1035_v48 = vpop.eup %1034  ;;  %836 = vst.msk [vmem:[%s1442_s17 + $0x78] sm:$0xff] %vm244_vm0, %v804_v44  ;;  %v780_v40 = vmul.f32 %v1033_v21, %v1425_v32  ;;  %v809_v39 = vmul.f32 %v1428_v20, %v776_v59  ;;  %v781_v37 = vmul.f32 %v1033_v21, %v1423_v29  ;;  %v810_v49 = vmul.f32 %v1428_v20, %v777_v3 }
 0x10c   : > { %837 = vst.msk [vmem:[%s1442_s17 + $0x80] sm:$0xff] %vm244_vm0, %v805_v41  ;;  %v782_v50 = vmul.f32 %v1035_v48, %v1425_v32  ;;  %v811_v30 = vmul.f32 %v1428_v20, %v778_v42  ;;  %v783_v28 = vmul.f32 %v1035_v48, %v1423_v29  ;;  %v812_v25 = vmul.f32 %v1428_v20, %v779_v43 }
 0x10d   : > { %v1037_v2 = vpop.eup %1036  ;;  %838 = vst.msk [vmem:[%s1442_s17 + $0x88] sm:$0xff] %vm244_vm0, %v806_v46  ;;  %v813_v57 = vmul.f32 %v1428_v20, %v780_v40  ;;  %v814_v54 = vmul.f32 %v1428_v20, %v781_v37 }
 0x10e   : > { %839 = vst.msk [vmem:[%s1442_s17 + $0x90] sm:$0xff] %vm244_vm0, %v807_v11  ;;  %v1039_v51 = vpop.eup %1038  ;;  %v784_v55 = vmul.f32 %v1037_v2, %v1425_v32  ;;  %v785_v17 = vmul.f32 %v1037_v2, %v1423_v29  ;;  %v815_v53 = vmul.f32 %v1428_v20, %v782_v50  ;;  %v816_v61 = vmul.f32 %v1428_v20, %v783_v28 }
 0x10f   : > { %840 = vst.msk [vmem:[%s1442_s17 + $0x98] sm:$0xff] %vm244_vm0, %v808_v47  ;;  %v786_v56 = vmul.f32 %v1039_v51, %v1425_v32  ;;  %v787_v60 = vmul.f32 %v1039_v51, %v1423_v29 }
 0x110   : > { %841 = vst.msk [vmem:[%s1442_s17 + $0xa0] sm:$0xff] %vm244_vm0, %v809_v39  ;;  %v817_v35 = vmul.f32 %v1428_v20, %v784_v55  ;;  %v818_v33 = vmul.f32 %v1428_v20, %v785_v17 }
 0x111   : > { %842 = vst.msk [vmem:[%s1442_s17 + $0xa8] sm:$0xff] %vm244_vm0, %v810_v49  ;;  %v819_v32 = vmul.f32 %v1428_v20, %v786_v56  ;;  %v820_v63 = vmul.f32 %v1428_v20, %v787_v60 }
 0x112   : > { %843 = vst.msk [vmem:[%s1442_s17 + $0xb0] sm:$0xff] %vm244_vm0, %v811_v30 }
 0x113   : > { %844 = vst.msk [vmem:[%s1442_s17 + $0xb8] sm:$0xff] %vm244_vm0, %v812_v25 }
 0x114   : > { %845 = vst.msk [vmem:[%s1442_s17 + $0xc0] sm:$0xff] %vm244_vm0, %v813_v57 }
 0x115   : > { %846 = vst.msk [vmem:[%s1442_s17 + $0xc8] sm:$0xff] %vm244_vm0, %v814_v54 }
 0x116   : > { %847 = vst.msk [vmem:[%s1442_s17 + $0xd0] sm:$0xff] %vm244_vm0, %v815_v53 }
 0x117   : > { %848 = vst.msk [vmem:[%s1442_s17 + $0xd8] sm:$0xff] %vm244_vm0, %v816_v61 }
 0x118   : > { %849 = vst.msk [vmem:[%s1442_s17 + $0xe0] sm:$0xff] %vm244_vm0, %v817_v35 }
 0x119   : > { %850 = vst.msk [vmem:[%s1442_s17 + $0xe8] sm:$0xff] %vm244_vm0, %v818_v33 }
 0x11a   : > { %851 = vst.msk [vmem:[%s1442_s17 + $0xf0] sm:$0xff] %vm244_vm0, %v819_v32 }
 0x11b   : > { %852 = vst.msk [vmem:[%s1442_s17 + $0xf8] sm:$0xff] %vm244_vm0, %v820_v63 }
 0x11c PF: > { %s15_s15 = sadd.s32 1, %s1065_s15  }
 0x11d   : > { %p12_p7 = scmp.ge.s32.totalorder %s15_s15, 4  }
 0x11f   :  { %14 = sbr.rel (!%p12_p7) target bundleno = 1 (0x1), region = 71 }
 0x124   :  { %874 = vsyncpa [#allocation3], 1 }
 0x125   :  { %876 = vsyncpa [#allocation3 + $0x1], 1 }

// kernel: low_rank_tensor_forward.9
= control target key start
LH: loop header
LB: loop body
LE: loop exit
PB: predicated region body
PF: predicated region fallthrough
CT: control target
= control target key end

     0   :  { %12 = vsyncpa [#allocation3], 0  ;;  %s1339_s21 = smov 0   ;;  %s1949_s0 = inlined_call_operand.vmem [shape: f32[2,16,16,32], index: 0, kind: input, shape index: {}]   ;;  %s1950_s1 = inlined_call_operand.vmem [shape: f32[2,16,16,32], index: 1, kind: input, shape index: {}]   ;;  %s1951_s2 = inlined_call_operand.vmem [shape: f32[32,32], index: 2, kind: input, shape index: {}]   ;;  %s1952_s3 = inlined_call_operand.vmem [shape: f32[1,32], index: 3, kind: input, shape index: {}]   ;;  %s1953_s4 = inlined_call_operand.vmem [shape: f32[4], index: 4, kind: input, shape index: {}]   ;;  %s1954_s5 = inlined_call_operand.vmem [shape: f32[2,16,16,32], index: 5, kind: output, shape index: {0}]   ;;  %s1955_s6 = inlined_call_operand.vmem [shape: f32[2,16,16,32], index: 6, kind: output, shape index: {1}]  }
   0x1 LB: > { %s1148_s22 = sadd.s32 4294967295, %s1299_s21   ;;  %p1150_p0 = scmp.ge.s32.totalorder %s1299_s21, 1  ;;  %s1299_s21 = sphi %s1339_s21, %s18_s21  }
   0x2   : > { %p190_p1 = scmp.lt.s32.totalorder %s1299_s21, 3  ;;  %s208_s25 = sshll.u32 %s1953_s4, 4  ;;  %s209_s25 = int_to_ptr.vmem [resolvable:$true] %s208_s25 }
   0x3   : > { %p1181_p3 = scmp.eq.s32.totalorder %s1148_s22, 0  ;;  %s1301_s26 = smov [#allocation2]  }
   0x4   : > { %p191_p2 = pnand %p1150_p0, %p190_p1 }
   0x6   : > { %p1177_p4 = pneg %p191_p2  ;;  %237 = sbr.rel (%p191_p2) target bundleno = 287 (0x11f), region = 40 }
   0x8   : > { %p1178_p5 = pnand %p1181_p3, %p1177_p4 }
   0xa   : > { %1180 = dma.vmem_to_smem (!%p1178_p5), %s209_s25, 16, %s1301_s26, [#allocation3]  }
   0xb   : > { %1294 = dma.done.wait (%p1181_p3), [#allocation3], 16  }
   0xc   : > { %1296 = vsyncadd (%p1181_p3), [#allocation3], 4294967280 }
   0xd   : > { %244 = sfence }
   0xe   : > { %p279_p6 = scmp.lt.s32.totalorder %s1148_s22, 1  ;;  %vm395_vm0 = vcmask 261120   ;;  %s1163_s23 = sld [smem:[#allocation2 + $0x1]] }
   0xf   : > { %s1754_s24 = sld [smem:[#allocation2 + $0x2]] }
  0x10   : > { %s1957_s22 = smov (!%p279_p6, %s1148_s22), 1  ;;  %s1764_s28 = sld [smem:[#allocation2 + $0x3]] }
  0x11   : > { %s1350_s27 = sshll.u32 %s1957_s22, 8  ;;  %s772_s22 = sld [smem:[#allocation2]] }
  0x12   : > { %s1356_s30 = scalar_lea.vmem %s1949_s0, %s1350_s27  ;;  %s1362_s9 = scalar_lea.vmem %s1950_s1, %s1350_s27 }
  0x13   : > { %s1368_s12 = scalar_lea.vmem %s1955_s6, %s1350_s27  ;;  %v303_v0 = vld [vmem:[%s1356_s30 + $0x20] sm:$0xff]  ;;  %v301_v2 = vld [vmem:[%s1356_s30 + $0x10] sm:$0xff]  ;;  %v304_v9 = vld [vmem:[%s1356_s30 + $0x28] sm:$0xff]  ;;  %s1820_s7 = scalar_lea.vmem %s1954_s5, %s1350_s27 }
  0x14   : > { %v335_v1 = vld [vmem:[%s1362_s9 + $0x20] sm:$0xff]  ;;  %v333_v4 = vld [vmem:[%s1362_s9 + $0x10] sm:$0xff]  ;;  %v336_v10 = vld [vmem:[%s1362_s9 + $0x28] sm:$0xff] }
  0x15   : > { %v367_v3 = vsub.f32 %v303_v0, %v335_v1  ;;  %v299_v5 = vld [vmem:[%s1356_s30] sm:$0xff]  ;;  %v365_v7 = vsub.f32 %v301_v2, %v333_v4  ;;  %v302_v11 = vld [vmem:[%s1356_s30 + $0x18] sm:$0xff]  ;;  %v368_v13 = vsub.f32 %v304_v9, %v336_v10  ;;  %v300_v15 = vld [vmem:[%s1356_s30 + $0x8] sm:$0xff] }
  0x16   : > { %v331_v6 = vld [vmem:[%s1362_s9] sm:$0xff]  ;;  %v334_v14 = vld [vmem:[%s1362_s9 + $0x18] sm:$0xff]  ;;  %v332_v16 = vld [vmem:[%s1362_s9 + $0x8] sm:$0xff] }
  0x17   : > { %v363_v8 = vsub.f32 %v299_v5, %v331_v6  ;;  %v440_v12 = vsel %vm395_vm0, %v367_v3, 0.0  ;;  %400 = vst.msk [vmem:[%s1368_s12 + $0x20] sm:$0xff] %vm395_vm0, %v367_v3  ;;  %v434_v17 = vsel %vm395_vm0, %v365_v7, 0.0  ;;  %v366_v19 = vsub.f32 %v302_v11, %v334_v14  ;;  %v307_v21 = vld [vmem:[%s1356_s30 + $0x40] sm:$0xff]  ;;  %v306_v23 = vld [vmem:[%s1356_s30 + $0x38] sm:$0xff]  ;;  %v305_v27 = vld [vmem:[%s1356_s30 + $0x30] sm:$0xff] }
  0x18   : > { %441 = vadd.xlane.f32.xlu2 %v440_v12  ;;  %398 = vst.msk [vmem:[%s1368_s12 + $0x10] sm:$0xff] %vm395_vm0, %v365_v7  ;;  %v364_v20 = vsub.f32 %v300_v15, %v332_v16  ;;  %v339_v22 = vld [vmem:[%s1362_s9 + $0x40] sm:$0xff]  ;;  %435 = vadd.xlane.f32.xlu1 %v434_v17  ;;  %v338_v26 = vld [vmem:[%s1362_s9 + $0x38] sm:$0xff]  ;;  %v337_v28 = vld [vmem:[%s1362_s9 + $0x30] sm:$0xff]  ;;  %v443_v41 = vsel %vm395_vm0, %v368_v13, 0.0 }
  0x19   : > { %v428_v18 = vsel %vm395_vm0, %v363_v8, 0.0  ;;  %396 = vst.msk [vmem:[%s1368_s12] sm:$0xff] %vm395_vm0, %v363_v8  ;;  %v371_v25 = vsub.f32 %v307_v21, %v339_v22  ;;  %v437_v29 = vsel %vm395_vm0, %v366_v19, 0.0  ;;  %v370_v31 = vsub.f32 %v306_v23, %v338_v26  ;;  %v310_v33 = vld [vmem:[%s1356_s30 + $0x58] sm:$0xff]  ;;  %v309_v35 = vld [vmem:[%s1356_s30 + $0x50] sm:$0xff]  ;;  %v308_v39 = vld [vmem:[%s1356_s30 + $0x48] sm:$0xff] }
  0x1a   : > { %429 = vadd.xlane.f32.xlu0 %v428_v18  ;;  %v730_v24 = vadd.f32 %v434_v17, %v428_v18  ;;  %401 = vst.msk [vmem:[%s1368_s12 + $0x28] sm:$0xff] %vm395_vm0, %v368_v13  ;;  %v431_v30 = vsel %vm395_vm0, %v364_v20, 0.0  ;;  %v369_v32 = vsub.f32 %v305_v27, %v337_v28  ;;  %v342_v34 = vld [vmem:[%s1362_s9 + $0x58] sm:$0xff]  ;;  %v341_v38 = vld [vmem:[%s1362_s9 + $0x50] sm:$0xff]  ;;  %v340_v40 = vld [vmem:[%s1362_s9 + $0x48] sm:$0xff]  ;;  %v1302_v28 = vmov 16.0  }
  0x1b   : > { %399 = vst.msk [vmem:[%s1368_s12 + $0x18] sm:$0xff] %vm395_vm0, %v366_v19  ;;  %v745_v36 = vadd.f32 %v437_v29, %v431_v30  ;;  %v373_v43 = vsub.f32 %v309_v35, %v341_v38  ;;  %v372_v44 = vsub.f32 %v308_v39, %v340_v40  ;;  %v313_v45 = vld [vmem:[%s1356_s30 + $0x70] sm:$0xff]  ;;  %v312_v47 = vld [vmem:[%s1356_s30 + $0x68] sm:$0xff]  ;;  %v374_v50 = vsub.f32 %v310_v33, %v342_v34  ;;  %v311_v53 = vld [vmem:[%s1356_s30 + $0x60] sm:$0xff] }
  0x1c   : > { %v731_v37 = vadd.f32 %v730_v24, %v440_v12  ;;  %397 = vst.msk [vmem:[%s1368_s12 + $0x8] sm:$0xff] %vm395_vm0, %v364_v20  ;;  %v1413_v42 = vsel %vm395_vm0, %v369_v32, 0.0  ;;  %v345_v46 = vld [vmem:[%s1362_s9 + $0x70] sm:$0xff]  ;;  %v344_v52 = vld [vmem:[%s1362_s9 + $0x68] sm:$0xff]  ;;  %v343_v54 = vld [vmem:[%s1362_s9 + $0x60] sm:$0xff]  ;;  %v1425_v55 = vsel %vm395_vm0, %v371_v25, 0.0  ;;  %1194 = vrcp.f32 %v1302_v28 }
  0x1d   : > { %404 = vst.msk [vmem:[%s1368_s12 + $0x40] sm:$0xff] %vm395_vm0, %v371_v25  ;;  %v746_v48 = vadd.f32 %v745_v36, %v443_v41  ;;  %v377_v51 = vsub.f32 %v313_v45, %v345_v46  ;;  %v1430_v56 = vsel %vm395_vm0, %v370_v31, 0.0  ;;  %v376_v57 = vsub.f32 %v312_v47, %v344_v52  ;;  %v316_v59 = vld [vmem:[%s1356_s30 + $0x88] sm:$0xff]  ;;  %v315_v61 = vld [vmem:[%s1356_s30 + $0x80] sm:$0xff]  ;;  %v314_v1 = vld [vmem:[%s1356_s30 + $0x78] sm:$0xff] }
  0x1e   : > { %v732_v49 = vadd.f32 %v731_v37, %v1413_v42  ;;  %403 = vst.msk [vmem:[%s1368_s12 + $0x38] sm:$0xff] %vm395_vm0, %v370_v31  ;;  %v375_v58 = vsub.f32 %v311_v53, %v343_v54  ;;  %v348_v60 = vld [vmem:[%s1362_s9 + $0x88] sm:$0xff]  ;;  %v347_v0 = vld [vmem:[%s1362_s9 + $0x80] sm:$0xff]  ;;  %v346_v2 = vld [vmem:[%s1362_s9 + $0x78] sm:$0xff]  ;;  %v1445_v3 = vsel %vm395_vm0, %v373_v43, 0.0  ;;  %v1448_v4 = vsel %vm395_vm0, %v372_v44, 0.0 }
  0x1f   : > { %v747_v62 = vadd.f32 %v746_v48, %v1430_v56  ;;  %402 = vst.msk [vmem:[%s1368_s12 + $0x30] sm:$0xff] %vm395_vm0, %v369_v32  ;;  %v378_v5 = vsub.f32 %v314_v1, %v346_v2  ;;  %v1451_v6 = vsel %vm395_vm0, %v374_v50, 0.0  ;;  %v1458_v9 = vsel %vm395_vm0, %v377_v51, 0.0  ;;  %v319_v10 = vld [vmem:[%s1356_s30 + $0xa0] sm:$0xff]  ;;  %v318_v16 = vld [vmem:[%s1356_s30 + $0x98] sm:$0xff]  ;;  %v317_v18 = vld [vmem:[%s1356_s30 + $0x90] sm:$0xff] }
  0x20   : > { %v733_v63 = vadd.f32 %v732_v49, %v1425_v55  ;;  %444 = vadd.xlane.f32.xlu2 %v443_v41  ;;  %407 = vst.msk [vmem:[%s1368_s12 + $0x58] sm:$0xff] %vm395_vm0, %v374_v50  ;;  %438 = vadd.xlane.f32.xlu1 %v437_v29  ;;  %v351_v11 = vld [vmem:[%s1362_s9 + $0xa0] sm:$0xff]  ;;  %v1465_v12 = vsel %vm395_vm0, %v376_v57, 0.0  ;;  %v1468_v13 = vsel %vm395_vm0, %v375_v58, 0.0  ;;  %v380_v14 = vsub.f32 %v316_v59, %v348_v60  ;;  %v350_v17 = vld [vmem:[%s1362_s9 + $0x98] sm:$0xff]  ;;  %v349_v22 = vld [vmem:[%s1362_s9 + $0x90] sm:$0xff] }
  0x21   : > { %406 = vst.msk [vmem:[%s1368_s12 + $0x50] sm:$0xff] %vm395_vm0, %v373_v43  ;;  %v748_v8 = vadd.f32 %v747_v62, %v1448_v4  ;;  %v379_v15 = vsub.f32 %v315_v61, %v347_v0  ;;  %v1478_v21 = vsel %vm395_vm0, %v378_v5, 0.0  ;;  %v383_v23 = vsub.f32 %v319_v10, %v351_v11  ;;  %v320_v26 = vld [vmem:[%s1356_s30 + $0xa8] sm:$0xff]  ;;  %v322_v33 = vld [vmem:[%s1356_s30 + $0xb8] sm:$0xff]  ;;  %v321_v35 = vld [vmem:[%s1356_s30 + $0xb0] sm:$0xff] }
  0x22   : > { %432 = vadd.xlane.f32.xlu0 %v431_v30  ;;  %v734_v7 = vadd.f32 %v733_v63, %v1445_v3  ;;  %405 = vst.msk [vmem:[%s1368_s12 + $0x48] sm:$0xff] %vm395_vm0, %v372_v44  ;;  %v382_v24 = vsub.f32 %v318_v16, %v350_v17  ;;  %v381_v25 = vsub.f32 %v317_v18, %v349_v22  ;;  %v352_v27 = vld [vmem:[%s1362_s9 + $0xa8] sm:$0xff]  ;;  %v354_v34 = vld [vmem:[%s1362_s9 + $0xb8] sm:$0xff]  ;;  %v1501_v37 = vsel %vm395_vm0, %v380_v14, 0.0  ;;  %v353_v40 = vld [vmem:[%s1362_s9 + $0xb0] sm:$0xff]  ;;  %v1195_v52 = vpop.eup %1194 }
  0x23   : > { %410 = vst.msk [vmem:[%s1368_s12 + $0x70] sm:$0xff] %vm395_vm0, %v377_v51  ;;  %v749_v19 = vadd.f32 %v748_v8, %v1451_v6  ;;  %v1492_v31 = vsel %vm395_vm0, %v379_v15, 0.0  ;;  %v384_v36 = vsub.f32 %v320_v26, %v352_v27  ;;  %v1512_v41 = vsel %vm395_vm0, %v383_v23, 0.0  ;;  %v324_v46 = vld [vmem:[%s1356_s30 + $0xc8] sm:$0xff]  ;;  %v323_v48 = vld [vmem:[%s1356_s30 + $0xc0] sm:$0xff]  ;;  %v358_v63 = vld [vmem:[%s1362_s9 + $0xd8] sm:$0xff] }
  0x24   : > { %v735_v20 = vadd.f32 %v734_v7, %v1468_v13  ;;  %409 = vst.msk [vmem:[%s1368_s12 + $0x68] sm:$0xff] %vm395_vm0, %v376_v57  ;;  %v1495_v32 = vsel %vm395_vm0, %v381_v25, 0.0  ;;  %v1515_v43 = vsel %vm395_vm0, %v382_v24, 0.0  ;;  %v386_v44 = vsub.f32 %v322_v33, %v354_v34  ;;  %v356_v47 = vld [vmem:[%s1362_s9 + $0xc8] sm:$0xff]  ;;  %v355_v51 = vld [vmem:[%s1362_s9 + $0xc0] sm:$0xff]  ;;  %v329_v18 = vld [vmem:[%s1356_s30 + $0xf0] sm:$0xff] }
  0x25   : > { %v750_v29 = vadd.f32 %v749_v19, %v1465_v12  ;;  %408 = vst.msk [vmem:[%s1368_s12 + $0x60] sm:$0xff] %vm395_vm0, %v375_v58  ;;  %v385_v45 = vsub.f32 %v321_v35, %v353_v40  ;;  %v1533_v54 = vsel %vm395_vm0, %v384_v36, 0.0  ;;  %v387_v57 = vsub.f32 %v323_v48, %v355_v51  ;;  %v326_v58 = vld [vmem:[%s1356_s30 + $0xd8] sm:$0xff]  ;;  %v328_v2 = vld [vmem:[%s1356_s30 + $0xe8] sm:$0xff]  ;;  %v327_v7 = vld [vmem:[%s1356_s30 + $0xe0] sm:$0xff] }
  0x26   : > { %v736_v30 = vadd.f32 %v735_v20, %v1458_v9  ;;  %413 = vst.msk [vmem:[%s1368_s12 + $0x88] sm:$0xff] %vm395_vm0, %v380_v14  ;;  %v676_v62 = vmul.f32 16.0, %v1195_v52  ;;  %v1546_v0 = vsel %vm395_vm0, %v386_v44, 0.0  ;;  %v390_v8 = vsub.f32 %v326_v58, %v358_v63  ;;  %v361_v19 = vld [vmem:[%s1362_s9 + $0xf0] sm:$0xff]  ;;  %v362_v27 = vld [vmem:[%s1362_s9 + $0xf8] sm:$0xff] }
  0x27   : > { %412 = vst.msk [vmem:[%s1368_s12 + $0x80] sm:$0xff] %vm395_vm0, %v379_v15  ;;  %v751_v39 = vadd.f32 %v750_v29, %v1478_v21  ;;  %v1530_v53 = vsel %vm395_vm0, %v385_v45, 0.0  ;;  %v1549_v1 = vsel %vm395_vm0, %v387_v57, 0.0  ;;  %v359_v15 = vld [vmem:[%s1362_s9 + $0xe0] sm:$0xff]  ;;  %v393_v26 = vsub.f32 %v329_v18, %v361_v19  ;;  %v909_v48 = vld [vmem:[%s1951_s2 + $0x18] sm:$0xff] }
  0x28   : > { %v737_v38 = vadd.f32 %v736_v30, %v1492_v31  ;;  %453 = vadd.xlane.f32.xlu2 %v1425_v55  ;;  %411 = vst.msk [vmem:[%s1368_s12 + $0x78] sm:$0xff] %vm395_vm0, %v378_v5  ;;  %450 = vadd.xlane.f32.xlu1 %v1430_v56  ;;  %v357_v55 = vld [vmem:[%s1362_s9 + $0xd0] sm:$0xff]  ;;  %v388_v56 = vsub.f32 %v324_v46, %v356_v47  ;;  %v360_v5 = vld [vmem:[%s1362_s9 + $0xe8] sm:$0xff]  ;;  %v677_v22 = vsub.f32 1.0, %v676_v62  ;;  %v509_v33 = vsel %vm395_vm0, %v390_v8, 0.0 }
  0x29   : > { %416 = vst.msk [vmem:[%s1368_s12 + $0xa0] sm:$0xff] %vm395_vm0, %v383_v23  ;;  %v752_v49 = vadd.f32 %v751_v39, %v1501_v37  ;;  %v392_v17 = vsub.f32 %v328_v2, %v360_v5  ;;  %v391_v20 = vsub.f32 %v327_v7, %v359_v15  ;;  %v330_v23 = vld [vmem:[%s1356_s30 + $0xf8] sm:$0xff]  ;;  %vm680_vm1 = vweird.f32 %v1195_v52  ;;  %926 = vmatpush.msra.mxu0 %v909_v48 }
  0x2a   : > { %447 = vadd.xlane.f32.xlu0 %v1413_v42  ;;  %v738_v50 = vadd.f32 %v737_v38, %v1495_v32  ;;  %415 = vst.msk [vmem:[%s1368_s12 + $0x98] sm:$0xff] %vm395_vm0, %v382_v24  ;;  %v325_v42 = vld [vmem:[%s1356_s30 + $0xd0] sm:$0xff]  ;;  %v1559_v14 = vsel %vm395_vm0, %v388_v56, 0.0  ;;  %v678_v29 = vmul.f32 %v1195_v52, %v677_v22  ;;  %v394_v30 = vsub.f32 %v330_v23, %v362_v27 }
  0x2b   : > { %v753_v59 = vadd.f32 %v752_v49, %v1515_v43  ;;  %414 = vst.msk [vmem:[%s1368_s12 + $0x90] sm:$0xff] %vm395_vm0, %v381_v25  ;;  %v389_v61 = vsub.f32 %v325_v42, %v357_v55  ;;  %v512_v28 = vsel %vm395_vm0, %v391_v20, 0.0  ;;  %v515_v35 = vsel %vm395_vm0, %v392_v17, 0.0 }
  0x2c   : > { %v739_v60 = vadd.f32 %v738_v50, %v1512_v41  ;;  %419 = vst.msk [vmem:[%s1368_s12 + $0xb8] sm:$0xff] %vm395_vm0, %v386_v44  ;;  %v679_v38 = vadd.f32 %v1195_v52, %v678_v29  ;;  %v521_v40 = vsel %vm395_vm0, %v394_v30, 0.0 }
  0x2d   : > { %418 = vst.msk [vmem:[%s1368_s12 + $0xb0] sm:$0xff] %vm395_vm0, %v385_v45  ;;  %v754_v11 = vadd.f32 %v753_v59, %v1533_v54  ;;  %v1565_v16 = vsel %vm395_vm0, %v389_v61, 0.0 }
  0x2e   : > { %v740_v10 = vadd.f32 %v739_v60, %v1530_v53  ;;  %417 = vst.msk [vmem:[%s1368_s12 + $0xa8] sm:$0xff] %vm395_vm0, %v384_v36  ;;  %v518_v36 = vsel %vm395_vm0, %v393_v26, 0.0  ;;  %v1594_v39 = vsel %vm680_vm1, %v1195_v52, %v679_v38 }
  0x2f   : > { %422 = vst.msk [vmem:[%s1368_s12 + $0xd0] sm:$0xff] %vm395_vm0, %v389_v61  ;;  %v755_v24 = vadd.f32 %v754_v11, %v1546_v0 }
  0x30   : > { %v741_v25 = vadd.f32 %v740_v10, %v1549_v1  ;;  %462 = vadd.xlane.f32.xlu2 %v1451_v6  ;;  %421 = vst.msk [vmem:[%s1368_s12 + $0xc8] sm:$0xff] %vm395_vm0, %v388_v56  ;;  %459 = vadd.xlane.f32.xlu1 %v1445_v3  ;;  %v906_v56 = vld [vmem:[%s1951_s2] sm:$0xff] }
  0x31   : > { %v756_v34 = vadd.f32 %v755_v24, %v1559_v14  ;;  %420 = vst.msk [vmem:[%s1368_s12 + $0xc0] sm:$0xff] %vm395_vm0, %v387_v57 }
  0x32   : > { %456 = vadd.xlane.f32.xlu0 %v1448_v4  ;;  %v742_v6 = vadd.f32 %v741_v25, %v1565_v16  ;;  %425 = vst.msk [vmem:[%s1368_s12 + $0xe8] sm:$0xff] %vm395_vm0, %v392_v17 }
  0x33   : > { %424 = vst.msk [vmem:[%s1368_s12 + $0xe0] sm:$0xff] %vm395_vm0, %v391_v20  ;;  %v757_v4 = vadd.f32 %v756_v34, %v509_v33 }
  0x34   : > { %v743_v3 = vadd.f32 %v742_v6, %v512_v28  ;;  %426 = vst.msk [vmem:[%s1368_s12 + $0xf0] sm:$0xff] %vm395_vm0, %v393_v26 }
  0x35   : > { %423 = vst.msk [vmem:[%s1368_s12 + $0xd8] sm:$0xff] %vm395_vm0, %v390_v8  ;;  %v758_v45 = vadd.f32 %v757_v4, %v515_v35 }
  0x36   : > { %v744_v44 = vadd.f32 %v743_v3, %v518_v36  ;;  %427 = vst.msk [vmem:[%s1368_s12 + $0xf8] sm:$0xff] %vm395_vm0, %v394_v30 }
  0x37   : > { %v759_v47 = vadd.f32 %v758_v45, %v521_v40 }
  0x38   : > { %v760_v46 = vmul.f32 %v744_v44, %v1594_v39  ;;  %471 = vadd.xlane.f32.xlu2 %v1458_v9  ;;  %468 = vadd.xlane.f32.xlu1 %v1465_v12  ;;  %v908_v12 = vld [vmem:[%s1951_s2 + $0x10] sm:$0xff] }
  0x39   : > { %v761_v50 = vmul.f32 %v759_v47, %v1594_v39  ;;  %927 = vmatpush.msra.mxu0 %v908_v12 }
  0x3a   : > { %465 = vadd.xlane.f32.xlu0 %v1468_v13  ;;  %v762_v49 = vsel %vm395_vm0, %v760_v46, 0.0  ;;  %v907_v13 = vld [vmem:[%s1951_s2 + $0x8] sm:$0xff] }
  0x3b   : > { %v763_v51 = vsel %vm395_vm0, %v761_v50, 0.0  ;;  %928 = vmatpush.msra.mxu0 %v907_v13 }
  0x3c   : > { %v764_v52 = vadd.f32 %v763_v51, %v762_v49 }
  0x3d   : > { %929 = vmatpush.msra.mxu0 %v906_v56 }
  0x3e   : > { %v765_v42 = vrot.slane %v764_v52, 4 }
  0x40   : > { %480 = vadd.xlane.f32.xlu2 %v1501_v37  ;;  %v766_v9 = vadd.f32 %v765_v42, %v764_v52  ;;  %477 = vadd.xlane.f32.xlu1 %v1492_v31 }
  0x42   : > { %474 = vadd.xlane.f32.xlu0 %v1478_v21  ;;  %v767_v55 = vrot.slane %v766_v9, 2 }
  0x44   : > { %v768_v37 = vadd.f32 %v767_v55, %v766_v9 }
  0x46   : > { %v769_v31 = vrot.slane %v768_v37, 1 }
  0x48   : > { %489 = vadd.xlane.f32.xlu2 %v1512_v41  ;;  %v770_v21 = vadd.f32 %v769_v31, %v768_v37  ;;  %486 = vadd.xlane.f32.xlu1 %v1515_v43  ;;  %v1681_v31 = vstv %s772_s22 }
  0x4a   : > { %483 = vadd.xlane.f32.xlu0 %v1495_v32  ;;  %v771_v57 = vmul.f32 %v770_v21, %v1594_v39  ;;  %v1303_v32 = vmov 32.0  }
  0x4b   : > { %1196 = vrcp.f32 %v1303_v32 }
  0x4c   : > { %1166 = vmatmul.msk.f32.vlgmr.msra.gmra.mxu0 %vm395_vm0, %v771_v57 }
  0x50   : > { %498 = vadd.xlane.f32.xlu2 %v1546_v0  ;;  %495 = vadd.xlane.f32.xlu1 %v1530_v53 }
  0x51   : > { %v1197_v41 = vpop.eup %1196 }
  0x52   : > { %492 = vadd.xlane.f32.xlu0 %v1533_v54  ;;  %v525_v43 = vmul.f32 32.0, %v1197_v41  ;;  %vm529_vm2 = vweird.f32 %v1197_v41 }
  0x54   : > { %v526_v58 = vsub.f32 1.0, %v525_v43 }
  0x56   : > { %v527_v59 = vmul.f32 %v1197_v41, %v526_v58 }
  0x58   : > { %507 = vadd.xlane.f32.xlu2 %v1565_v16  ;;  %504 = vadd.xlane.f32.xlu1 %v1559_v14  ;;  %v528_v61 = vadd.f32 %v1197_v41, %v527_v59 }
  0x5a   : > { %501 = vadd.xlane.f32.xlu0 %v1549_v1  ;;  %v1634_v62 = vsel %vm529_vm2, %v1197_v41, %v528_v61 }
  0x60   : > { %516 = vadd.xlane.f32.xlu2 %v515_v35  ;;  %513 = vadd.xlane.f32.xlu1 %v512_v28 }
  0x62   : > { %510 = vadd.xlane.f32.xlu0 %v509_v33 }
  0x68   : > { %522 = vadd.xlane.f32.xlu1 %v521_v40 }
  0x6a   : > { %519 = vadd.xlane.f32.xlu0 %v518_v36 }
  0x8b   : > { %v442_v53 = vpop.xlane.xlu2 %441  ;;  %v436_v60 = vpop.xlane.xlu1 %435 }
  0x8c   : > { %v1637_v0 = vmul.f32 %v1634_v62, %v442_v53  ;;  %v1648_v10 = vmul.f32 %v1634_v62, %v436_v60 }
  0x8d   : > { %v430_v54 = vpop.xlane.xlu0 %429 }
  0x8e   : > { %v1654_v15 = vmul.f32 %v1634_v62, %v430_v54 }
  0x93   : > { %v445_v63 = vpop.xlane.xlu2 %444  ;;  %v439_v2 = vpop.xlane.xlu1 %438 }
  0x94   : > { %v1640_v1 = vmul.f32 %v1634_v62, %v445_v63  ;;  %v1643_v7 = vmul.f32 %v1634_v62, %v439_v2  ;;  %v1691_v2 = vstv %s1163_s23 }
  0x95   : > { %v433_v5 = vpop.xlane.xlu0 %432 }
  0x96   : > { %v577_v8 = vadd.f32 %v1640_v1, %v1637_v0  ;;  %v1651_v11 = vmul.f32 %v1634_v62, %v433_v5  ;;  %v570_v16 = vadd.f32 %v1643_v7, %v1648_v10 }
  0x98   : > { %v578_v14 = vrot.slane %v577_v8, 4  ;;  %v563_v17 = vadd.f32 %v1651_v11, %v1654_v15  ;;  %v571_v23 = vrot.slane %v570_v16, 4 }
  0x9a   : > { %v579_v19 = vadd.f32 %v578_v14, %v577_v8  ;;  %v564_v26 = vrot.slane %v563_v17, 4  ;;  %v572_v28 = vadd.f32 %v571_v23, %v570_v16 }
  0x9b   : > { %v454_v18 = vpop.xlane.xlu2 %453  ;;  %v451_v20 = vpop.xlane.xlu1 %450 }
  0x9c   : > { %v1661_v24 = vmul.f32 %v1634_v62, %v451_v20  ;;  %v580_v27 = vrot.slane %v579_v19, 2  ;;  %v565_v30 = vadd.f32 %v564_v26, %v563_v17  ;;  %v573_v36 = vrot.slane %v572_v28, 2 }
  0x9d   : > { %v448_v22 = vpop.xlane.xlu0 %447  ;;  %v539_v12 = vmul.f32 %v1634_v62, %v454_v18  ;;  %v713_v20 = vadd.f32 %v1643_v7, %v1651_v11 }
  0x9e   : > { %v1664_v25 = vmul.f32 %v1634_v62, %v448_v22  ;;  %v581_v34 = vadd.f32 %v580_v27, %v579_v19  ;;  %v566_v3 = vrot.slane %v565_v30, 2  ;;  %v574_v45 = vadd.f32 %v573_v36, %v572_v28 }
  0x9f   : > { %v698_v22 = vadd.f32 %v1648_v10, %v1654_v15 }
  0xa0   : > { %v584_v29 = vadd.f32 %v1661_v24, %v1664_v25  ;;  %v582_v44 = vrot.slane %v581_v34, 1  ;;  %v567_v47 = vadd.f32 %v566_v3, %v565_v30  ;;  %v575_v9 = vrot.slane %v574_v45, 1 }
  0xa1   : > { %v699_v10 = vadd.f32 %v698_v22, %v1637_v0 }
  0xa2   : > { %v585_v38 = vrot.slane %v584_v29, 4  ;;  %v583_v51 = vadd.f32 %v582_v44, %v581_v34  ;;  %v568_v55 = vrot.slane %v567_v47, 1  ;;  %v576_v57 = vadd.f32 %v575_v9, %v574_v45 }
  0xa3   : > { %v463_v33 = vpop.xlane.xlu2 %462  ;;  %v460_v6 = vpop.xlane.xlu1 %459 }
  0xa4   : > { %v1669_v4 = vmul.f32 %v1634_v62, %v463_v33  ;;  %v1672_v40 = vmul.f32 %v1634_v62, %v460_v6  ;;  %v586_v46 = vadd.f32 %v585_v38, %v584_v29  ;;  %v684_v21 = vmul.f32 %v1594_v39, %v583_v51 }
  0xa5   : > { %v457_v35 = vpop.xlane.xlu0 %456  ;;  %v569_v58 = vadd.f32 %v568_v55, %v567_v47  ;;  %v683_v5 = vmul.f32 %v1594_v39, %v576_v57  ;;  %v714_v6 = vadd.f32 %v713_v20, %v1640_v1  ;;  %v700_v47 = vadd.f32 %v699_v10, %v1664_v25 }
  0xa6   : > { %v598_v48 = vadd.f32 %v1669_v4, %v1672_v40  ;;  %v1677_v49 = vmul.f32 %v1634_v62, %v457_v35  ;;  %v587_v13 = vrot.slane %v586_v46, 2  ;;  %v779_v54 = vmul.f32 %v1681_v31, %v684_v21 }
  0xa7   : > { %v682_v16 = vmul.f32 %v1594_v39, %v569_v58  ;;  %v778_v23 = vmul.f32 %v1681_v31, %v683_v5  ;;  %v715_v3 = vadd.f32 %v714_v6, %v1661_v24 }
  0xa8   : > { %v599_v56 = vrot.slane %v598_v48, 4  ;;  %v591_v37 = vadd.f32 %v1677_v49, %v539_v12  ;;  %v588_v32 = vadd.f32 %v587_v13, %v586_v46  ;;  %v796_v19 = vadd.f32 %v1691_v2, %v779_v54 }
  0xa9   : > { %v777_v28 = vmul.f32 %v1681_v31, %v682_v16  ;;  %v795_v7 = vadd.f32 %v1691_v2, %v778_v23  ;;  %v716_v24 = vadd.f32 %v715_v3, %v1677_v49 }
  0xaa   : > { %v600_v59 = vadd.f32 %v599_v56, %v598_v48  ;;  %v592_v53 = vrot.slane %v591_v37, 4  ;;  %v589_v8 = vrot.slane %v588_v32, 1  ;;  %v812_v34 = vsub.f32 0.0, %v796_v19 }
  0xab   : > { %v472_v50 = vpop.xlane.xlu2 %471  ;;  %v469_v52 = vpop.xlane.xlu1 %468  ;;  %v794_v1 = vadd.f32 %v1691_v2, %v777_v28  ;;  %v717_v49 = vadd.f32 %v716_v24, %v1669_v4 }
  0xac   : > { %v1685_v41 = vmul.f32 %v1634_v62, %v469_v52  ;;  %v601_v17 = vrot.slane %v600_v59, 2  ;;  %v593_v18 = vadd.f32 %v592_v53, %v591_v37  ;;  %v590_v26 = vadd.f32 %v589_v8, %v588_v32 }
  0xad   : > { %v466_v42 = vpop.xlane.xlu0 %465  ;;  %v545_v44 = vmul.f32 %v1634_v62, %v472_v50  ;;  %v830_v52 = vmul.f32 1.442695, %v812_v34  ;;  %v810_v55 = vsub.f32 0.0, %v794_v1  ;;  %v701_v37 = vadd.f32 %v700_v47, %v539_v12 }
  0xae   : > { %v1688_v43 = vmul.f32 %v1634_v62, %v466_v42  ;;  %v602_v29 = vadd.f32 %v601_v17, %v600_v59  ;;  %v594_v30 = vrot.slane %v593_v18, 2  ;;  %v685_v11 = vmul.f32 %v1594_v39, %v590_v26 }
  0xaf   : > { %v811_v42 = vsub.f32 0.0, %v795_v7  ;;  %1198 = vpow2.f32 %v830_v52  ;;  %v826_v12 = vmul.f32 1.442695, %v810_v55  ;;  %v718_v16 = vadd.f32 %v717_v49, %v1685_v41 }
  0xb0   : > { %v605_v14 = vadd.f32 %v1685_v41, %v1688_v43  ;;  %v603_v48 = vrot.slane %v602_v29, 1  ;;  %v595_v51 = vadd.f32 %v594_v30, %v593_v18  ;;  %v780_v9 = vmul.f32 %v1681_v31, %v685_v11 }
  0xb2   : > { %v606_v27 = vrot.slane %v605_v14, 4  ;;  %v604_v56 = vadd.f32 %v603_v48, %v602_v29  ;;  %v596_v21 = vrot.slane %v595_v51, 1  ;;  %v797_v54 = vadd.f32 %v1691_v2, %v780_v9 }
  0xb3   : > { %v481_v60 = vpop.xlane.xlu2 %480  ;;  %v478_v61 = vpop.xlane.xlu1 %477 }
  0xb4   : > { %v607_v15 = vadd.f32 %v606_v27, %v605_v14  ;;  %v548_v45 = vmul.f32 %v1634_v62, %v481_v60  ;;  %v1713_v46 = vmul.f32 %v1634_v62, %v478_v61  ;;  %v828_v60 = vmul.f32 1.442695, %v811_v42 }
  0xb5   : > { %v475_v63 = vpop.xlane.xlu0 %474  ;;  %v687_v8 = vmul.f32 %v1594_v39, %v604_v56  ;;  %v597_v14 = vadd.f32 %v596_v21, %v595_v51  ;;  %v813_v22 = vsub.f32 0.0, %v797_v54  ;;  %v1199_v26 = vpop.eup %1198 }
  0xb6   : > { %v546_v35 = vmul.f32 %v1634_v62, %v475_v63  ;;  %v608_v13 = vrot.slane %v607_v15, 2  ;;  %v619_v50 = vadd.f32 %v548_v45, %v1713_v46  ;;  %v702_v63 = vadd.f32 %v701_v37, %v1672_v40 }
  0xb7   : > { %1200 = vpow2.f32 %v828_v60  ;;  %v782_v41 = vmul.f32 %v1681_v31, %v687_v8  ;;  %v860_v10 = vadd.f32 1.0, %v1199_v26  ;;  %v832_v11 = vmul.f32 1.442695, %v813_v22 }
  0xb8   : > { %v612_v0 = vadd.f32 %v546_v35, %v545_v44  ;;  %v609_v61 = vadd.f32 %v608_v13, %v607_v15  ;;  %v620_v5 = vrot.slane %v619_v50, 4  ;;  %v703_v17 = vadd.f32 %v702_v63, %v1688_v43 }
  0xb9   : > { %v719_v4 = vadd.f32 %v718_v16, %v546_v35  ;;  %1202 = vpow2.f32 %v826_v12  ;;  %v686_v43 = vmul.f32 %v1594_v39, %v597_v14  ;;  %v799_v52 = vadd.f32 %v1691_v2, %v782_v41 }
  0xba   : > { %v613_v32 = vrot.slane %v612_v0, 4  ;;  %v610_v23 = vrot.slane %v609_v61, 1  ;;  %v621_v27 = vadd.f32 %v620_v5, %v619_v50  ;;  %v704_v34 = vadd.f32 %v703_v17, %v545_v44 }
  0xbb   : > { %v490_v33 = vpop.xlane.xlu2 %489  ;;  %v487_v36 = vpop.xlane.xlu1 %486  ;;  %v720_v15 = vadd.f32 %v719_v4, %v548_v45  ;;  %v781_v44 = vmul.f32 %v1681_v31, %v686_v43  ;;  %1204 = vrcp.f32 %v860_v10  ;;  %v910_v43 = vld [vmem:[%s1952_s3] sm:$0x1] }
  0xbc   : > { %v550_v25 = vmul.f32 %v1634_v62, %v487_v36  ;;  %v614_v18 = vadd.f32 %v613_v32, %v612_v0  ;;  %v551_v40 = vmul.f32 %v1634_v62, %v490_v33  ;;  %v611_v3 = vadd.f32 %v610_v23, %v609_v61 }
  0xbd   : > { %v484_v38 = vpop.xlane.xlu0 %483  ;;  %v622_v1 = vrot.slane %v621_v27, 2  ;;  %v1736_v51 = vpop.eup %1200  ;;  %v705_v0 = vadd.f32 %v704_v34, %v1713_v46  ;;  %1206 = vpow2.f32 %v832_v11  ;;  %v815_v32 = vsub.f32 0.0, %v799_v52 }
  0xbe   : > { %v549_v58 = vmul.f32 %v1634_v62, %v484_v38  ;;  %v615_v6 = vrot.slane %v614_v18, 2  ;;  %v721_v42 = vadd.f32 %v720_v15, %v550_v25  ;;  %v688_v56 = vmul.f32 %v1594_v39, %v611_v3 }
  0xbf   : > { %v1741_v50 = vpop.eup %1202  ;;  %v623_v37 = vadd.f32 %v622_v1, %v621_v27 }
  0xc0   : > { %v626_v19 = vadd.f32 %v550_v25, %v549_v58  ;;  %v616_v9 = vadd.f32 %v615_v6, %v614_v18  ;;  %v706_v55 = vadd.f32 %v705_v0, %v549_v58  ;;  %v783_v14 = vmul.f32 %v1681_v31, %v688_v56 }
  0xc1   : > { %v624_v16 = vrot.slane %v623_v37, 1 }
  0xc2   : > { %v627_v36 = vrot.slane %v626_v19, 4  ;;  %v707_v58 = vadd.f32 %v706_v55, %v551_v40  ;;  %v800_v1 = vadd.f32 %v1691_v2, %v783_v14 }
  0xc3   : > { %v499_v57 = vpop.xlane.xlu2 %498  ;;  %v496_v59 = vpop.xlane.xlu1 %495 }
  0xc4   : > { %v554_v28 = vmul.f32 %v1634_v62, %v499_v57  ;;  %v553_v29 = vmul.f32 %v1634_v62, %v496_v59  ;;  %v628_v24 = vadd.f32 %v627_v36, %v626_v19  ;;  %v1745_v59 = vadd.f32 %v1691_v2, %v781_v44  ;;  %v1752_v19 = vpop.eup %1204 }
  0xc5   : > { %v493_v53 = vpop.xlane.xlu0 %492  ;;  %v1759_v34 = vpop.eup %1206 }
  0xc6   : > { %v552_v20 = vmul.f32 %v1634_v62, %v493_v53  ;;  %v640_v47 = vadd.f32 %v554_v28, %v553_v29  ;;  %v617_v53 = vrot.slane %v616_v9, 1  ;;  %v629_v60 = vrot.slane %v628_v24, 2 }
  0xc8   : > { %v633_v38 = vadd.f32 %v552_v20, %v551_v40  ;;  %v641_v21 = vrot.slane %v640_v47, 4  ;;  %v722_v57 = vadd.f32 %v721_v42, %v552_v20  ;;  %v708_v20 = vadd.f32 %v707_v58, %v553_v29 }
  0xc9   : > { %v618_v26 = vadd.f32 %v617_v53, %v616_v9  ;;  %v630_v27 = vadd.f32 %v629_v60, %v628_v24  ;;  %v890_v53 = vstv %s1754_s24 }
  0xca   : > { %v634_v13 = vrot.slane %v633_v38, 4  ;;  %v642_v17 = vadd.f32 %v641_v21, %v640_v47  ;;  %v723_v18 = vadd.f32 %v722_v57, %v554_v28  ;;  %v814_v28 = vsub.f32 0.0, %v1745_v59 }
  0xcb   : > { %v508_v30 = vpop.xlane.xlu2 %507  ;;  %v505_v7 = vpop.xlane.xlu1 %504  ;;  %v689_v47 = vmul.f32 %v1594_v39, %v618_v26  ;;  %v631_v52 = vrot.slane %v630_v27, 1 }
  0xcc   : > { %v556_v33 = vmul.f32 %v1634_v62, %v505_v7  ;;  %v635_v54 = vadd.f32 %v634_v13, %v633_v38  ;;  %v557_v5 = vmul.f32 %v1634_v62, %v508_v30  ;;  %v931_v30 = vpop.f32.mrf.mxu0  ;;  %v1762_v38 = vmul.f32 1.442695, %v815_v32 }
  0xcd   : > { %v502_v35 = vpop.xlane.xlu0 %501  ;;  %v625_v7 = vadd.f32 %v624_v16, %v623_v37  ;;  %v932_v3 = vadd.f32 %v931_v30, %v910_v43 }
  0xce   : > { %v555_v48 = vmul.f32 %v1634_v62, %v502_v35  ;;  %v636_v40 = vrot.slane %v635_v54, 2  ;;  %v724_v41 = vadd.f32 %v723_v18, %v556_v33  ;;  %v643_v35 = vrot.slane %v642_v17, 2 }
  0xcf   : > { %v934_v59 = vsub.f32 0.0, %v932_v3  ;;  %v834_v18 = vmul.f32 1.442695, %v814_v28 }
  0xd0   : > { %v647_v45 = vadd.f32 %v556_v33, %v555_v48  ;;  %v709_v6 = vadd.f32 %v708_v20, %v555_v48  ;;  %v637_v44 = vadd.f32 %v636_v40, %v635_v54  ;;  %v644_v55 = vadd.f32 %v643_v35, %v642_v17 }
  0xd1   : > { %v784_v54 = vmul.f32 %v1681_v31, %v689_v47  ;;  %v935_v17 = vmul.f32 1.442695, %v934_v59  ;;  %v861_v59 = vadd.f32 1.0, %v1759_v34 }
  0xd2   : > { %v648_v46 = vrot.slane %v647_v45, 4  ;;  %v710_v42 = vadd.f32 %v709_v6, %v557_v5  ;;  %v645_v58 = vrot.slane %v644_v55, 1 }
  0xd3   : > { %v517_v25 = vpop.xlane.xlu2 %516  ;;  %v514_v61 = vpop.xlane.xlu1 %513  ;;  %1208 = vpow2.f32 %v935_v17 }
  0xd4   : > { %v560_v49 = vmul.f32 %v1634_v62, %v517_v25  ;;  %v559_v12 = vmul.f32 %v1634_v62, %v514_v61  ;;  %v649_v22 = vadd.f32 %v648_v46, %v647_v45  ;;  %v690_v45 = vmul.f32 %v1594_v39, %v625_v7 }
  0xd5   : > { %v511_v63 = vpop.xlane.xlu0 %510  ;;  %v638_v46 = vrot.slane %v637_v44, 1  ;;  %v632_v61 = vadd.f32 %v631_v52, %v630_v27  ;;  %v646_v43 = vadd.f32 %v645_v58, %v644_v55  ;;  %1210 = vpow2.f32 %v1762_v38 }
  0xd6   : > { %v558_v8 = vmul.f32 %v1634_v62, %v511_v63  ;;  %v661_v23 = vadd.f32 %v560_v49, %v559_v12  ;;  %v650_v11 = vrot.slane %v649_v22, 2  ;;  %v711_v57 = vadd.f32 %v710_v42, %v559_v12 }
  0xd7   : > { %v639_v20 = vadd.f32 %v638_v46, %v637_v44  ;;  %v691_v26 = vmul.f32 %v1594_v39, %v632_v61  ;;  %v859_v55 = vadd.f32 1.0, %v1736_v51 }
  0xd8   : > { %v654_v4 = vadd.f32 %v558_v8, %v557_v5  ;;  %v662_v29 = vrot.slane %v661_v23, 4  ;;  %v725_v10 = vadd.f32 %v724_v41, %v558_v8  ;;  %v651_v21 = vadd.f32 %v650_v11, %v649_v22 }
  0xd9   : > { %v893_v8 = vstv %s1764_s28  ;;  %v785_v41 = vmul.f32 %v1681_v31, %v690_v45  ;;  %v692_v28 = vmul.f32 %v1594_v39, %v639_v20  ;;  %v1209_v45 = vpop.eup %1208 }
  0xda   : > { %v655_v36 = vrot.slane %v654_v4, 4  ;;  %v663_v15 = vadd.f32 %v662_v29, %v661_v23  ;;  %v726_v13 = vadd.f32 %v725_v10, %v560_v49  ;;  %v652_v16 = vrot.slane %v651_v21, 1 }
  0xdb   : > { %v523_v48 = vpop.xlane.xlu1 %522  ;;  %v801_v29 = vadd.f32 %v1691_v2, %v784_v54 }
  0xdc   : > { %v656_v33 = vadd.f32 %v655_v36, %v654_v4  ;;  %v562_v24 = vmul.f32 %v1634_v62, %v523_v48  ;;  %v664_v56 = vrot.slane %v663_v15, 2  ;;  %v816_v4 = vsub.f32 0.0, %v800_v1 }
  0xdd   : > { %v520_v0 = vpop.xlane.xlu0 %519  ;;  %v653_v36 = vadd.f32 %v652_v16, %v651_v21  ;;  %v693_v1 = vmul.f32 %v1594_v39, %v646_v43  ;;  %v802_v48 = vadd.f32 %v1691_v2, %v785_v41 }
  0xde   : > { %v657_v9 = vrot.slane %v656_v33, 2  ;;  %v561_v37 = vmul.f32 %v1634_v62, %v520_v0  ;;  %v727_v32 = vadd.f32 %v726_v13, %v562_v24  ;;  %v665_v5 = vadd.f32 %v664_v56, %v663_v15 }
  0xdf   : > { %v838_v15 = vmul.f32 1.442695, %v816_v4  ;;  %v817_v0 = vsub.f32 0.0, %v801_v29  ;;  %v694_v42 = vmul.f32 %v1594_v39, %v653_v36  ;;  %v788_v21 = vmul.f32 %v1681_v31, %v693_v1 }
  0xe0   : > { %v658_v25 = vadd.f32 %v657_v9, %v656_v33  ;;  %v668_v60 = vadd.f32 %v562_v24, %v561_v37  ;;  %v729_v49 = vmul.f32 %v727_v32, %v1594_v39  ;;  %v712_v63 = vadd.f32 %v711_v57, %v561_v37  ;;  %v1211_v32 = vpop.eup %1210 }
  0xe1   : > { %v666_v30 = vrot.slane %v665_v5, 1  ;;  %v786_v33 = vmul.f32 %v1681_v31, %v691_v26  ;;  %v787_v9 = vmul.f32 %v1681_v31, %v692_v28  ;;  %v858_v37 = vadd.f32 1.0, %v1741_v50 }
  0xe2   : > { %v669_v14 = vrot.slane %v668_v60, 4  ;;  %v892_v62 = vmul.f32 %v890_v53, %v729_v49  ;;  %v728_v12 = vmul.f32 %v712_v63, %v1594_v39  ;;  %v659_v22 = vrot.slane %v658_v25, 1 }
  0xe3   : > { %v667_v47 = vadd.f32 %v666_v30, %v665_v5  ;;  %v803_v56 = vadd.f32 %v1691_v2, %v786_v33  ;;  %v818_v46 = vsub.f32 0.0, %v802_v48  ;;  %v804_v51 = vadd.f32 %v1691_v2, %v787_v9 }
  0xe4   : > { %v670_v23 = vadd.f32 %v669_v14, %v668_v60  ;;  %v895_v27 = vadd.f32 %v893_v8, %v892_v62  ;;  %v891_v40 = vmul.f32 %v890_v53, %v728_v12  ;;  %v660_v35 = vadd.f32 %v659_v22, %v658_v25 }
  0xe5   : > { %v696_v57 = vmul.f32 %v1594_v39, %v667_v47  ;;  %v789_v25 = vmul.f32 %v1681_v31, %v694_v42  ;;  %v840_v53 = vmul.f32 1.442695, %v817_v0  ;;  %v819_v61 = vsub.f32 0.0, %v803_v56 }
  0xe6   : > { %v671_v6 = vrot.slane %v670_v23, 2  ;;  %v897_v7 = vsub.f32 0.0, %v895_v27  ;;  %v894_v11 = vadd.f32 %v893_v8, %v891_v40  ;;  %v695_v24 = vmul.f32 %v1594_v39, %v660_v35 }
  0xe7   : > { %v937_v49 = vadd.f32 1.0, %v1209_v45  ;;  %v805_v63 = vadd.f32 %v1691_v2, %v788_v21  ;;  %v791_v34 = vmul.f32 %v1681_v31, %v696_v57  ;;  %v842_v8 = vmul.f32 1.442695, %v818_v46 }
  0xe8   : > { %v672_v10 = vadd.f32 %v671_v6, %v670_v23  ;;  %v900_v3 = vmul.f32 1.442695, %v897_v7  ;;  %v896_v44 = vsub.f32 0.0, %v894_v11  ;;  %v790_v60 = vmul.f32 %v1681_v31, %v695_v24 }
  0xe9   : > { %v806_v14 = vadd.f32 %v1691_v2, %v789_v25  ;;  %v820_v62 = vsub.f32 0.0, %v804_v51  ;;  %v863_v22 = vadd.f32 1.0, %v1211_v32  ;;  %v821_v23 = vsub.f32 0.0, %v805_v63 }
  0xea   : > { %v673_v52 = vrot.slane %v672_v10, 1  ;;  %1212 = vpow2.f32 %v900_v3  ;;  %v898_v13 = vmul.f32 1.442695, %v896_v44  ;;  %v808_v4 = vadd.f32 %v1691_v2, %v791_v34 }
  0xeb   : > { %1214 = vpow2.f32 %v834_v18  ;;  %v844_v18 = vmul.f32 1.442695, %v819_v61  ;;  %v822_v40 = vsub.f32 0.0, %v806_v14  ;;  %v846_v43 = vmul.f32 1.442695, %v820_v62 }
  0xec   : > { %v674_v38 = vadd.f32 %v673_v52, %v672_v10  ;;  %1216 = vpow2.f32 %v898_v13  ;;  %v848_v7 = vmul.f32 1.442695, %v821_v23  ;;  %v824_v28 = vsub.f32 0.0, %v808_v4 }
  0xed   : > { %1218 = vpow2.f32 %v838_v15  ;;  %v850_v10 = vmul.f32 1.442695, %v822_v40 }
  0xee   : > { %v697_v54 = vmul.f32 %v1594_v39, %v674_v38  ;;  %1220 = vrcp.f32 %v859_v55  ;;  %v807_v39 = vadd.f32 %v1691_v2, %v790_v60  ;;  %v854_v47 = vmul.f32 1.442695, %v824_v28 }
  0xef   : > { %1222 = vrcp.f32 %v858_v37 }
  0xf0   : > { %v1213_v50 = vpop.eup %1212  ;;  %1224 = vrcp.f32 %v861_v59  ;;  %v792_v12 = vmul.f32 %v1681_v31, %v697_v54  ;;  %v823_v30 = vsub.f32 0.0, %v807_v39 }
  0xf1   : > { %v903_v58 = vadd.f32 1.0, %v1213_v50  ;;  %v1215_v5 = vpop.eup %1214  ;;  %1226 = vpow2.f32 %v840_v53 }
  0xf2   : > { %v1217_v16 = vpop.eup %1216  ;;  %1228 = vrcp.f32 %v937_v49  ;;  %v862_v27 = vadd.f32 1.0, %v1215_v5  ;;  %v809_v6 = vadd.f32 %v1691_v2, %v792_v12  ;;  %v852_v15 = vmul.f32 1.442695, %v823_v30 }
  0xf3   : > { %v1219_v17 = vpop.eup %1218  ;;  %v902_v20 = vadd.f32 1.0, %v1217_v16  ;;  %1230 = vrcp.f32 %v903_v58 }
  0xf4   : > { %v1221_v26 = vpop.eup %1220  ;;  %v864_v29 = vadd.f32 1.0, %v1219_v17  ;;  %v825_v33 = vsub.f32 0.0, %v809_v6 }
  0xf5   : > { %1232 = vrcp.f32 %v902_v20  ;;  %v1223_v41 = vpop.eup %1222 }
  0xf6   : > { %1234 = vpow2.f32 %v842_v8  ;;  %v1225_v31 = vpop.eup %1224  ;;  %v856_v38 = vmul.f32 1.442695, %v825_v33 }
  0xf7   : > { %1236 = vpow2.f32 %v844_v18  ;;  %v1227_v36 = vpop.eup %1226 }
  0xf8   : > { %1238 = vrcp.f32 %v863_v22  ;;  %v1229_v35 = vpop.eup %1228  ;;  %v865_v1 = vadd.f32 1.0, %v1227_v36 }
  0xf9   : > { %1240 = vrcp.f32 %v862_v27  ;;  %v1804_v11 = vpop.eup %1230  ;;  %v1809_v44 = vperm.slane %v1229_v35, 0 }
  0xfa   : > { %1242 = vpow2.f32 %v846_v43  ;;  %v940_v0 = vmul.f32 %v1804_v11, %v1223_v41  ;;  %v942_v42 = vmul.f32 %v1804_v11, %v1221_v26  ;;  %v944_v56 = vmul.f32 %v1804_v11, %v1752_v19 }
  0xfb   : > { %v1806_v3 = vpop.eup %1232  ;;  %1244 = vrcp.f32 %v864_v29  ;;  %v946_v46 = vmul.f32 %v1804_v11, %v1225_v31 }
  0xfc   : > { %v1235_v2 = vpop.eup %1234  ;;  %1246 = vpow2.f32 %v848_v7  ;;  %v939_v52 = vmul.f32 %v1806_v3, %v1223_v41  ;;  %v941_v9 = vmul.f32 %v1806_v3, %v1221_v26  ;;  %v943_v13 = vmul.f32 %v1806_v3, %v1752_v19 }
  0xfd   : > { %v1237_v48 = vpop.eup %1236  ;;  %1248 = vpow2.f32 %v850_v10  ;;  %v866_v55 = vadd.f32 1.0, %v1235_v2  ;;  %v945_v57 = vmul.f32 %v1806_v3, %v1225_v31  ;;  %v973_v25 = vmul.f32 %v1809_v44, %v940_v0 }
  0xfe   : > { %v1239_v24 = vpop.eup %1238  ;;  %1250 = vpow2.f32 %v852_v15  ;;  %v867_v21 = vadd.f32 1.0, %v1237_v48  ;;  %v972_v32 = vmul.f32 %v1809_v44, %v939_v52  ;;  %v974_v53 = vmul.f32 %v1809_v44, %v941_v9 }
  0xff   : > { %v1241_v45 = vpop.eup %1240  ;;  %1252 = vrcp.f32 %v865_v1  ;;  %v975_v51 = vmul.f32 %v1809_v44, %v942_v42  ;;  %v976_v54 = vmul.f32 %v1809_v44, %v943_v13  ;;  %v977_v63 = vmul.f32 %v1809_v44, %v944_v56  ;;  %1005 = vst.msk [vmem:[%s1820_s7 + $0x8] sm:$0xff] %vm395_vm0, %v973_v25 }
 0x100   : > { %v1243_v37 = vpop.eup %1242  ;;  %1254 = vpow2.f32 %v854_v47  ;;  %v947_v19 = vmul.f32 %v1241_v45, %v1806_v3  ;;  %1004 = vst.msk [vmem:[%s1820_s7] sm:$0xff] %vm395_vm0, %v972_v32  ;;  %v948_v49 = vmul.f32 %v1241_v45, %v1804_v11  ;;  %v949_v58 = vmul.f32 %v1239_v24, %v1806_v3 }
 0x101   : > { %v1245_v59 = vpop.eup %1244  ;;  %1256 = vpow2.f32 %v856_v38  ;;  %v868_v61 = vadd.f32 1.0, %v1243_v37  ;;  %v978_v5 = vmul.f32 %v1809_v44, %v945_v57  ;;  %1006 = vst.msk [vmem:[%s1820_s7 + $0x10] sm:$0xff] %vm395_vm0, %v974_v53  ;;  %v950_v16 = vmul.f32 %v1239_v24, %v1804_v11 }
 0x102   : > { %v1247_v60 = vpop.eup %1246  ;;  %1258 = vrcp.f32 %v866_v55  ;;  %v979_v62 = vmul.f32 %v1809_v44, %v946_v46  ;;  %1007 = vst.msk [vmem:[%s1820_s7 + $0x18] sm:$0xff] %vm395_vm0, %v975_v51  ;;  %v951_v17 = vmul.f32 %v1245_v59, %v1806_v3  ;;  %v980_v18 = vmul.f32 %v1809_v44, %v947_v19 }
 0x103   : > { %v1249_v50 = vpop.eup %1248  ;;  %1260 = vrcp.f32 %v867_v21  ;;  %v869_v14 = vadd.f32 1.0, %v1247_v60  ;;  %1008 = vst.msk [vmem:[%s1820_s7 + $0x20] sm:$0xff] %vm395_vm0, %v976_v54  ;;  %v952_v22 = vmul.f32 %v1245_v59, %v1804_v11  ;;  %v981_v23 = vmul.f32 %v1809_v44, %v948_v49 }
 0x104   : > { %v1251_v34 = vpop.eup %1250  ;;  %v870_v12 = vadd.f32 1.0, %v1249_v50  ;;  %1262 = vrcp.f32 %v868_v61  ;;  %1009 = vst.msk [vmem:[%s1820_s7 + $0x28] sm:$0xff] %vm395_vm0, %v977_v63  ;;  %v982_v27 = vmul.f32 %v1809_v44, %v949_v58  ;;  %v983_v30 = vmul.f32 %v1809_v44, %v950_v16 }
 0x105   : > { %v1253_v8 = vpop.eup %1252  ;;  %v871_v20 = vadd.f32 1.0, %v1251_v34  ;;  %1010 = vst.msk [vmem:[%s1820_s7 + $0x30] sm:$0xff] %vm395_vm0, %v978_v5  ;;  %1264 = vrcp.f32 %v869_v14  ;;  %v984_v31 = vmul.f32 %v1809_v44, %v951_v17  ;;  %v985_v28 = vmul.f32 %v1809_v44, %v952_v22 }
 0x106   : > { %v1255_v39 = vpop.eup %1254  ;;  %v953_v26 = vmul.f32 %v1253_v8, %v1806_v3  ;;  %v954_v43 = vmul.f32 %v1253_v8, %v1804_v11  ;;  %1011 = vst.msk [vmem:[%s1820_s7 + $0x38] sm:$0xff] %vm395_vm0, %v979_v62  ;;  %1266 = vrcp.f32 %v870_v12 }
 0x107   : > { %v1257_v4 = vpop.eup %1256  ;;  %v872_v41 = vadd.f32 1.0, %v1255_v39  ;;  %1012 = vst.msk [vmem:[%s1820_s7 + $0x40] sm:$0xff] %vm395_vm0, %v980_v18  ;;  %1268 = vrcp.f32 %v871_v20 }
 0x108   : > { %v1259_v40 = vpop.eup %1258  ;;  %v873_v7 = vadd.f32 1.0, %v1257_v4  ;;  %1013 = vst.msk [vmem:[%s1820_s7 + $0x48] sm:$0xff] %vm395_vm0, %v981_v23  ;;  %v986_v10 = vmul.f32 %v1809_v44, %v953_v26  ;;  %v987_v1 = vmul.f32 %v1809_v44, %v954_v43 }
 0x109   : > { %v955_v6 = vmul.f32 %v1259_v40, %v1806_v3  ;;  %v1261_v29 = vpop.eup %1260  ;;  %v956_v36 = vmul.f32 %v1259_v40, %v1804_v11  ;;  %1014 = vst.msk [vmem:[%s1820_s7 + $0x50] sm:$0xff] %vm395_vm0, %v982_v27  ;;  %1270 = vrcp.f32 %v872_v41 }
 0x10a   : > { %v957_v35 = vmul.f32 %v1261_v29, %v1806_v3  ;;  %v1263_v15 = vpop.eup %1262  ;;  %v958_v33 = vmul.f32 %v1261_v29, %v1804_v11  ;;  %1015 = vst.msk [vmem:[%s1820_s7 + $0x58] sm:$0xff] %vm395_vm0, %v983_v30  ;;  %1272 = vrcp.f32 %v873_v7 }
 0x10b   : > { %v959_v2 = vmul.f32 %v1263_v15, %v1806_v3  ;;  %v988_v47 = vmul.f32 %v1809_v44, %v955_v6  ;;  %1016 = vst.msk [vmem:[%s1820_s7 + $0x60] sm:$0xff] %vm395_vm0, %v984_v31  ;;  %v1265_v52 = vpop.eup %1264  ;;  %v960_v48 = vmul.f32 %v1263_v15, %v1804_v11  ;;  %v989_v0 = vmul.f32 %v1809_v44, %v956_v36 }
 0x10c   : > { %1017 = vst.msk [vmem:[%s1820_s7 + $0x68] sm:$0xff] %vm395_vm0, %v985_v28  ;;  %v1267_v42 = vpop.eup %1266  ;;  %v961_v9 = vmul.f32 %v1265_v52, %v1806_v3  ;;  %v990_v24 = vmul.f32 %v1809_v44, %v957_v35  ;;  %v962_v13 = vmul.f32 %v1265_v52, %v1804_v11  ;;  %v991_v45 = vmul.f32 %v1809_v44, %v958_v33 }
 0x10d   : > { %1018 = vst.msk [vmem:[%s1820_s7 + $0x70] sm:$0xff] %vm395_vm0, %v986_v10  ;;  %v1269_v38 = vpop.eup %1268  ;;  %v963_v55 = vmul.f32 %v1267_v42, %v1806_v3  ;;  %v992_v56 = vmul.f32 %v1809_v44, %v959_v2  ;;  %v964_v21 = vmul.f32 %v1267_v42, %v1804_v11  ;;  %v993_v57 = vmul.f32 %v1809_v44, %v960_v48 }
 0x10e   : > { %1019 = vst.msk [vmem:[%s1820_s7 + $0x78] sm:$0xff] %vm395_vm0, %v987_v1  ;;  %v965_v32 = vmul.f32 %v1269_v38, %v1806_v3  ;;  %v994_v59 = vmul.f32 %v1809_v44, %v961_v9  ;;  %v966_v25 = vmul.f32 %v1269_v38, %v1804_v11  ;;  %v995_v53 = vmul.f32 %v1809_v44, %v962_v13 }
 0x10f   : > { %1020 = vst.msk [vmem:[%s1820_s7 + $0x80] sm:$0xff] %vm395_vm0, %v988_v47  ;;  %v1271_v37 = vpop.eup %1270  ;;  %v996_v60 = vmul.f32 %v1809_v44, %v963_v55  ;;  %v997_v54 = vmul.f32 %v1809_v44, %v964_v21 }
 0x110   : > { %1021 = vst.msk [vmem:[%s1820_s7 + $0x88] sm:$0xff] %vm395_vm0, %v989_v0  ;;  %v1273_v46 = vpop.eup %1272  ;;  %v967_v51 = vmul.f32 %v1271_v37, %v1806_v3  ;;  %v968_v19 = vmul.f32 %v1271_v37, %v1804_v11  ;;  %v998_v61 = vmul.f32 %v1809_v44, %v965_v32  ;;  %v999_v63 = vmul.f32 %v1809_v44, %v966_v25 }
 0x111   : > { %1022 = vst.msk [vmem:[%s1820_s7 + $0x90] sm:$0xff] %vm395_vm0, %v990_v24  ;;  %v969_v50 = vmul.f32 %v1273_v46, %v1806_v3  ;;  %v970_v49 = vmul.f32 %v1273_v46, %v1804_v11 }
 0x112   : > { %1023 = vst.msk [vmem:[%s1820_s7 + $0x98] sm:$0xff] %vm395_vm0, %v991_v45  ;;  %v1000_v34 = vmul.f32 %v1809_v44, %v967_v51  ;;  %v1001_v58 = vmul.f32 %v1809_v44, %v968_v19 }
 0x113   : > { %1024 = vst.msk [vmem:[%s1820_s7 + $0xa0] sm:$0xff] %vm395_vm0, %v992_v56  ;;  %v1002_v3 = vmul.f32 %v1809_v44, %v969_v50  ;;  %v1003_v5 = vmul.f32 %v1809_v44, %v970_v49 }
 0x114   : > { %1025 = vst.msk [vmem:[%s1820_s7 + $0xa8] sm:$0xff] %vm395_vm0, %v993_v57 }
 0x115   : > { %1026 = vst.msk [vmem:[%s1820_s7 + $0xb0] sm:$0xff] %vm395_vm0, %v994_v59 }
 0x116   : > { %1027 = vst.msk [vmem:[%s1820_s7 + $0xb8] sm:$0xff] %vm395_vm0, %v995_v53 }
 0x117   : > { %1028 = vst.msk [vmem:[%s1820_s7 + $0xc0] sm:$0xff] %vm395_vm0, %v996_v60 }
 0x118   : > { %1029 = vst.msk [vmem:[%s1820_s7 + $0xc8] sm:$0xff] %vm395_vm0, %v997_v54 }
 0x119   : > { %1030 = vst.msk [vmem:[%s1820_s7 + $0xd0] sm:$0xff] %vm395_vm0, %v998_v61 }
 0x11a   : > { %1031 = vst.msk [vmem:[%s1820_s7 + $0xd8] sm:$0xff] %vm395_vm0, %v999_v63 }
 0x11b   : > { %1032 = vst.msk [vmem:[%s1820_s7 + $0xe0] sm:$0xff] %vm395_vm0, %v1000_v34 }
 0x11c   : > { %1033 = vst.msk [vmem:[%s1820_s7 + $0xe8] sm:$0xff] %vm395_vm0, %v1001_v58 }
 0x11d   : > { %1034 = vst.msk [vmem:[%s1820_s7 + $0xf0] sm:$0xff] %vm395_vm0, %v1002_v3 }
 0x11e   : > { %1035 = vst.msk [vmem:[%s1820_s7 + $0xf8] sm:$0xff] %vm395_vm0, %v1003_v5 }
 0x11f PF: > { %s18_s21 = sadd.s32 1, %s1299_s21  }
 0x120   : > { %p15_p7 = scmp.ge.s32.totalorder %s18_s21, 4  }
 0x122   :  { %17 = sbr.rel (!%p15_p7) target bundleno = 1 (0x1), region = 90 }
 0x127   :  { %1073 = vsyncpa [#allocation3], 1 }
 0x128   :  { %1075 = vsyncpa [#allocation3 + $0x1], 1 }

// kernel: low_rank_tensor_forward.10
= control target key start
LH: loop header
LB: loop body
LE: loop exit
PB: predicated region body
PF: predicated region fallthrough
CT: control target
= control target key end

     0   :  { %10 = vsyncpa [#allocation3], 0  ;;  %s1226_s18 = smov 0   ;;  %s1758_s0 = inlined_call_operand.vmem [shape: f32[2,16,16,32], index: 0, kind: input, shape index: {}]   ;;  %s1759_s1 = inlined_call_operand.vmem [shape: f32[2,16,16,32], index: 1, kind: input, shape index: {}]   ;;  %s1760_s2 = inlined_call_operand.vmem [shape: f32[32,32], index: 2, kind: input, shape index: {}]   ;;  %s1761_s3 = inlined_call_operand.vmem [shape: f32[1,32], index: 3, kind: input, shape index: {}]   ;;  %s1762_s4 = inlined_call_operand.vmem [shape: f32[4], index: 4, kind: input, shape index: {}]   ;;  %s1763_s5 = inlined_call_operand.vmem [shape: f32[2,16,16,32], index: 5, kind: output, shape index: {}]  }
   0x1 LB: > { %s1043_s19 = sadd.s32 4294967295, %s1191_s18   ;;  %p1045_p0 = scmp.ge.s32.totalorder %s1191_s18, 1  ;;  %s1191_s18 = sphi %s1226_s18, %s16_s18  }
   0x2   : > { %p162_p1 = scmp.lt.s32.totalorder %s1191_s18, 3  ;;  %s180_s22 = sshll.u32 %s1762_s4, 4  ;;  %s181_s22 = int_to_ptr.vmem [resolvable:$true] %s180_s22 }
   0x3   : > { %p1073_p3 = scmp.eq.s32.totalorder %s1043_s19, 0  ;;  %s1193_s23 = smov [#allocation2]  }
   0x4   : > { %p163_p2 = pnand %p1045_p0, %p162_p1 }
   0x6   : > { %p1069_p4 = pneg %p163_p2  ;;  %209 = sbr.rel (%p163_p2) target bundleno = 287 (0x11f), region = 40 }
   0x8   : > { %p1070_p5 = pnand %p1073_p3, %p1069_p4 }
   0xa   : > { %1072 = dma.vmem_to_smem (!%p1070_p5), %s181_s22, 16, %s1193_s23, [#allocation3]  }
   0xb   : > { %1186 = dma.done.wait (%p1073_p3), [#allocation3], 16  }
   0xc   : > { %1188 = vsyncadd (%p1073_p3), [#allocation3], 4294967280 }
   0xd   : > { %216 = sfence }
   0xe   : > { %p244_p6 = scmp.lt.s32.totalorder %s1043_s19, 1  ;;  %vm355_vm0 = vcmask 261120   ;;  %s700_s14 = sld [smem:[#allocation2]] }
   0xf   : > { %s1056_s15 = sld [smem:[#allocation2 + $0x1]] }
  0x10   : > { %s1765_s19 = smov (!%p244_p6, %s1043_s19), 1  ;;  %s1563_s16 = sld [smem:[#allocation2 + $0x2]] }
  0x11   : > { %s1237_s24 = sshll.u32 %s1765_s19, 8  ;;  %s1573_s20 = sld [smem:[#allocation2 + $0x3]] }
  0x12   : > { %s1243_s27 = scalar_lea.vmem %s1758_s0, %s1237_s24  ;;  %s1249_s30 = scalar_lea.vmem %s1759_s1, %s1237_s24 }
  0x13   : > { %v263_v0 = vld [vmem:[%s1243_s27 + $0x20] sm:$0xff]  ;;  %v261_v2 = vld [vmem:[%s1243_s27 + $0x10] sm:$0xff]  ;;  %v264_v9 = vld [vmem:[%s1243_s27 + $0x28] sm:$0xff]  ;;  %s1629_s23 = scalar_lea.vmem %s1763_s5, %s1237_s24 }
  0x14   : > { %v295_v1 = vld [vmem:[%s1249_s30 + $0x20] sm:$0xff]  ;;  %v293_v4 = vld [vmem:[%s1249_s30 + $0x10] sm:$0xff]  ;;  %v296_v10 = vld [vmem:[%s1249_s30 + $0x28] sm:$0xff] }
  0x15   : > { %v327_v3 = vadd.f32 %v295_v1, %v263_v0  ;;  %v259_v5 = vld [vmem:[%s1243_s27] sm:$0xff]  ;;  %v325_v7 = vadd.f32 %v293_v4, %v261_v2  ;;  %v262_v11 = vld [vmem:[%s1243_s27 + $0x18] sm:$0xff]  ;;  %v328_v13 = vadd.f32 %v296_v10, %v264_v9  ;;  %v260_v15 = vld [vmem:[%s1243_s27 + $0x8] sm:$0xff] }
  0x16   : > { %v291_v6 = vld [vmem:[%s1249_s30] sm:$0xff]  ;;  %v294_v14 = vld [vmem:[%s1249_s30 + $0x18] sm:$0xff]  ;;  %v292_v16 = vld [vmem:[%s1249_s30 + $0x8] sm:$0xff] }
  0x17   : > { %v323_v8 = vadd.f32 %v291_v6, %v259_v5  ;;  %v368_v12 = vsel %vm355_vm0, %v327_v3, 0.0  ;;  %v362_v17 = vsel %vm355_vm0, %v325_v7, 0.0  ;;  %v326_v19 = vadd.f32 %v294_v14, %v262_v11  ;;  %v267_v21 = vld [vmem:[%s1243_s27 + $0x40] sm:$0xff]  ;;  %v266_v23 = vld [vmem:[%s1243_s27 + $0x38] sm:$0xff]  ;;  %v265_v27 = vld [vmem:[%s1243_s27 + $0x30] sm:$0xff] }
  0x18   : > { %369 = vadd.xlane.f32.xlu2 %v368_v12  ;;  %v324_v20 = vadd.f32 %v292_v16, %v260_v15  ;;  %v299_v22 = vld [vmem:[%s1249_s30 + $0x40] sm:$0xff]  ;;  %363 = vadd.xlane.f32.xlu1 %v362_v17  ;;  %v298_v26 = vld [vmem:[%s1249_s30 + $0x38] sm:$0xff]  ;;  %v297_v28 = vld [vmem:[%s1249_s30 + $0x30] sm:$0xff]  ;;  %v371_v41 = vsel %vm355_vm0, %v328_v13, 0.0 }
  0x19   : > { %v356_v18 = vsel %vm355_vm0, %v323_v8, 0.0  ;;  %v331_v25 = vadd.f32 %v299_v22, %v267_v21  ;;  %v365_v29 = vsel %vm355_vm0, %v326_v19, 0.0  ;;  %v330_v31 = vadd.f32 %v298_v26, %v266_v23  ;;  %v270_v33 = vld [vmem:[%s1243_s27 + $0x58] sm:$0xff]  ;;  %v269_v35 = vld [vmem:[%s1243_s27 + $0x50] sm:$0xff]  ;;  %v268_v39 = vld [vmem:[%s1243_s27 + $0x48] sm:$0xff] }
  0x1a   : > { %357 = vadd.xlane.f32.xlu0 %v356_v18  ;;  %v658_v24 = vadd.f32 %v362_v17, %v356_v18  ;;  %v359_v30 = vsel %vm355_vm0, %v324_v20, 0.0  ;;  %v329_v32 = vadd.f32 %v297_v28, %v265_v27  ;;  %v302_v34 = vld [vmem:[%s1249_s30 + $0x58] sm:$0xff]  ;;  %v301_v38 = vld [vmem:[%s1249_s30 + $0x50] sm:$0xff]  ;;  %v300_v40 = vld [vmem:[%s1249_s30 + $0x48] sm:$0xff]  ;;  %v1194_v28 = vmov 16.0  }
  0x1b   : > { %v673_v36 = vadd.f32 %v365_v29, %v359_v30  ;;  %v333_v43 = vadd.f32 %v301_v38, %v269_v35  ;;  %v332_v44 = vadd.f32 %v300_v40, %v268_v39  ;;  %v273_v45 = vld [vmem:[%s1243_s27 + $0x70] sm:$0xff]  ;;  %v272_v47 = vld [vmem:[%s1243_s27 + $0x68] sm:$0xff]  ;;  %v334_v50 = vadd.f32 %v302_v34, %v270_v33  ;;  %v271_v53 = vld [vmem:[%s1243_s27 + $0x60] sm:$0xff] }
  0x1c   : > { %v659_v37 = vadd.f32 %v658_v24, %v368_v12  ;;  %v1282_v42 = vsel %vm355_vm0, %v329_v32, 0.0  ;;  %v305_v46 = vld [vmem:[%s1249_s30 + $0x70] sm:$0xff]  ;;  %v304_v52 = vld [vmem:[%s1249_s30 + $0x68] sm:$0xff]  ;;  %v303_v54 = vld [vmem:[%s1249_s30 + $0x60] sm:$0xff]  ;;  %v380_v55 = vsel %vm355_vm0, %v331_v25, 0.0  ;;  %v377_v56 = vsel %vm355_vm0, %v330_v31, 0.0 }
  0x1d   : > { %v674_v48 = vadd.f32 %v673_v36, %v371_v41  ;;  %v337_v51 = vadd.f32 %v305_v46, %v273_v45  ;;  %v336_v57 = vadd.f32 %v304_v52, %v272_v47  ;;  %v335_v58 = vadd.f32 %v303_v54, %v271_v53  ;;  %v276_v59 = vld [vmem:[%s1243_s27 + $0x88] sm:$0xff]  ;;  %v275_v61 = vld [vmem:[%s1243_s27 + $0x80] sm:$0xff]  ;;  %v274_v1 = vld [vmem:[%s1243_s27 + $0x78] sm:$0xff] }
  0x1e   : > { %v660_v49 = vadd.f32 %v659_v37, %v1282_v42  ;;  %v308_v60 = vld [vmem:[%s1249_s30 + $0x88] sm:$0xff]  ;;  %v307_v0 = vld [vmem:[%s1249_s30 + $0x80] sm:$0xff]  ;;  %v306_v2 = vld [vmem:[%s1249_s30 + $0x78] sm:$0xff]  ;;  %v1300_v3 = vsel %vm355_vm0, %v333_v43, 0.0  ;;  %v1303_v4 = vsel %vm355_vm0, %v332_v44, 0.0  ;;  %v1306_v6 = vsel %vm355_vm0, %v334_v50, 0.0 }
  0x1f   : > { %v675_v62 = vadd.f32 %v674_v48, %v377_v56  ;;  %v338_v5 = vadd.f32 %v306_v2, %v274_v1  ;;  %v1311_v9 = vsel %vm355_vm0, %v337_v51, 0.0  ;;  %v279_v10 = vld [vmem:[%s1243_s27 + $0xa0] sm:$0xff]  ;;  %v1316_v12 = vsel %vm355_vm0, %v336_v57, 0.0  ;;  %v278_v16 = vld [vmem:[%s1243_s27 + $0x98] sm:$0xff]  ;;  %v277_v18 = vld [vmem:[%s1243_s27 + $0x90] sm:$0xff] }
  0x20   : > { %v661_v63 = vadd.f32 %v660_v49, %v380_v55  ;;  %372 = vadd.xlane.f32.xlu2 %v371_v41  ;;  %366 = vadd.xlane.f32.xlu1 %v365_v29  ;;  %v311_v11 = vld [vmem:[%s1249_s30 + $0xa0] sm:$0xff]  ;;  %v1319_v13 = vsel %vm355_vm0, %v335_v58, 0.0  ;;  %v340_v14 = vadd.f32 %v308_v60, %v276_v59  ;;  %v339_v15 = vadd.f32 %v307_v0, %v275_v61  ;;  %v310_v17 = vld [vmem:[%s1249_s30 + $0x98] sm:$0xff]  ;;  %v309_v22 = vld [vmem:[%s1249_s30 + $0x90] sm:$0xff] }
  0x21   : > { %v676_v8 = vadd.f32 %v675_v62, %v1303_v4  ;;  %v1327_v21 = vsel %vm355_vm0, %v338_v5, 0.0  ;;  %v343_v23 = vadd.f32 %v311_v11, %v279_v10  ;;  %v342_v24 = vadd.f32 %v310_v17, %v278_v16  ;;  %v280_v26 = vld [vmem:[%s1243_s27 + $0xa8] sm:$0xff]  ;;  %v282_v33 = vld [vmem:[%s1243_s27 + $0xb8] sm:$0xff]  ;;  %v281_v35 = vld [vmem:[%s1243_s27 + $0xb0] sm:$0xff] }
  0x22   : > { %360 = vadd.xlane.f32.xlu0 %v359_v30  ;;  %v662_v7 = vadd.f32 %v661_v63, %v1300_v3  ;;  %v341_v25 = vadd.f32 %v309_v22, %v277_v18  ;;  %v312_v27 = vld [vmem:[%s1249_s30 + $0xa8] sm:$0xff]  ;;  %1086 = vrcp.f32 %v1194_v28  ;;  %v1335_v31 = vsel %vm355_vm0, %v339_v15, 0.0  ;;  %v314_v34 = vld [vmem:[%s1249_s30 + $0xb8] sm:$0xff]  ;;  %v313_v40 = vld [vmem:[%s1249_s30 + $0xb0] sm:$0xff] }
  0x23   : > { %v677_v19 = vadd.f32 %v676_v8, %v1306_v6  ;;  %v344_v36 = vadd.f32 %v312_v27, %v280_v26  ;;  %v1344_v37 = vsel %vm355_vm0, %v340_v14, 0.0  ;;  %v1350_v41 = vsel %vm355_vm0, %v343_v23, 0.0  ;;  %v284_v46 = vld [vmem:[%s1243_s27 + $0xc8] sm:$0xff]  ;;  %v283_v48 = vld [vmem:[%s1243_s27 + $0xc0] sm:$0xff]  ;;  %v317_v57 = vld [vmem:[%s1249_s30 + $0xd0] sm:$0xff] }
  0x24   : > { %v663_v20 = vadd.f32 %v662_v7, %v1319_v13  ;;  %v1338_v32 = vsel %vm355_vm0, %v341_v25, 0.0  ;;  %v1353_v43 = vsel %vm355_vm0, %v342_v24, 0.0  ;;  %v346_v44 = vadd.f32 %v314_v34, %v282_v33  ;;  %v316_v47 = vld [vmem:[%s1249_s30 + $0xc8] sm:$0xff]  ;;  %v315_v52 = vld [vmem:[%s1249_s30 + $0xc0] sm:$0xff]  ;;  %v318_v62 = vld [vmem:[%s1249_s30 + $0xd8] sm:$0xff] }
  0x25   : > { %v678_v29 = vadd.f32 %v677_v19, %v1316_v12  ;;  %v345_v45 = vadd.f32 %v313_v40, %v281_v35  ;;  %v348_v51 = vadd.f32 %v316_v47, %v284_v46  ;;  %v347_v58 = vadd.f32 %v315_v52, %v283_v48  ;;  %v288_v1 = vld [vmem:[%s1243_s27 + $0xe8] sm:$0xff]  ;;  %v287_v5 = vld [vmem:[%s1243_s27 + $0xe0] sm:$0xff]  ;;  %v289_v18 = vld [vmem:[%s1243_s27 + $0xf0] sm:$0xff] }
  0x26   : > { %v664_v30 = vadd.f32 %v663_v20, %v1311_v9  ;;  %v1375_v63 = vsel %vm355_vm0, %v346_v44, 0.0  ;;  %v320_v2 = vld [vmem:[%s1249_s30 + $0xe8] sm:$0xff]  ;;  %v319_v15 = vld [vmem:[%s1249_s30 + $0xe0] sm:$0xff]  ;;  %v321_v19 = vld [vmem:[%s1249_s30 + $0xf0] sm:$0xff] }
  0x27   : > { %v679_v39 = vadd.f32 %v678_v29, %v1327_v21  ;;  %v1363_v54 = vsel %vm355_vm0, %v345_v45, 0.0  ;;  %v1378_v0 = vsel %vm355_vm0, %v347_v58, 0.0  ;;  %v1386_v14 = vsel %vm355_vm0, %v348_v51, 0.0  ;;  %v290_v23 = vld [vmem:[%s1243_s27 + $0xf8] sm:$0xff] }
  0x28   : > { %v665_v38 = vadd.f32 %v664_v30, %v1335_v31  ;;  %381 = vadd.xlane.f32.xlu2 %v380_v55  ;;  %378 = vadd.xlane.f32.xlu1 %v377_v56  ;;  %v1087_v53 = vpop.eup %1086  ;;  %v1366_v55 = vsel %vm355_vm0, %v344_v36, 0.0  ;;  %v285_v56 = vld [vmem:[%s1243_s27 + $0xd0] sm:$0xff]  ;;  %v352_v17 = vadd.f32 %v320_v2, %v288_v1  ;;  %v351_v20 = vadd.f32 %v319_v15, %v287_v5  ;;  %v322_v27 = vld [vmem:[%s1249_s30 + $0xf8] sm:$0xff] }
  0x29   : > { %v680_v49 = vadd.f32 %v679_v39, %v1344_v37  ;;  %v349_v61 = vadd.f32 %v317_v57, %v285_v56  ;;  %v604_v7 = vmul.f32 16.0, %v1087_v53  ;;  %v353_v26 = vadd.f32 %v321_v19, %v289_v18  ;;  %v837_v48 = vld [vmem:[%s1760_s2 + $0x18] sm:$0xff]  ;;  %v834_v57 = vld [vmem:[%s1760_s2] sm:$0xff] }
  0x2a   : > { %375 = vadd.xlane.f32.xlu0 %v1282_v42  ;;  %v666_v50 = vadd.f32 %v665_v38, %v1338_v32  ;;  %v286_v42 = vld [vmem:[%s1243_s27 + $0xd8] sm:$0xff]  ;;  %v440_v28 = vsel %vm355_vm0, %v351_v20, 0.0  ;;  %v354_v30 = vadd.f32 %v322_v27, %v290_v23  ;;  %v443_v36 = vsel %vm355_vm0, %v352_v17, 0.0  ;;  %854 = vmatpush.msra.mxu0 %v837_v48 }
  0x2b   : > { %v681_v59 = vadd.f32 %v680_v49, %v1353_v43  ;;  %v350_v8 = vadd.f32 %v318_v62, %v286_v42  ;;  %v1390_v16 = vsel %vm355_vm0, %v349_v61, 0.0  ;;  %v605_v22 = vsub.f32 1.0, %v604_v7 }
  0x2c   : > { %v667_v60 = vadd.f32 %v666_v50, %v1350_v41  ;;  %v446_v38 = vsel %vm355_vm0, %v353_v26, 0.0  ;;  %vm608_vm1 = vweird.f32 %v1087_v53  ;;  %v449_v45 = vsel %vm355_vm0, %v354_v30, 0.0 }
  0x2d   : > { %v682_v11 = vadd.f32 %v681_v59, %v1366_v55  ;;  %v606_v29 = vmul.f32 %v1087_v53, %v605_v22  ;;  %v437_v33 = vsel %vm355_vm0, %v350_v8, 0.0 }
  0x2e   : > { %v668_v10 = vadd.f32 %v667_v60, %v1363_v54 }
  0x2f   : > { %v683_v24 = vadd.f32 %v682_v11, %v1375_v63  ;;  %v607_v39 = vadd.f32 %v1087_v53, %v606_v29 }
  0x30   : > { %v669_v25 = vadd.f32 %v668_v10, %v1378_v0  ;;  %390 = vadd.xlane.f32.xlu2 %v1306_v6  ;;  %387 = vadd.xlane.f32.xlu1 %v1300_v3 }
  0x31   : > { %v684_v34 = vadd.f32 %v683_v24, %v1386_v14  ;;  %v1407_v44 = vsel %vm608_vm1, %v1087_v53, %v607_v39 }
  0x32   : > { %384 = vadd.xlane.f32.xlu0 %v1303_v4  ;;  %v670_v35 = vadd.f32 %v669_v25, %v1390_v16 }
  0x33   : > { %v685_v40 = vadd.f32 %v684_v34, %v437_v33 }
  0x34   : > { %v671_v6 = vadd.f32 %v670_v35, %v440_v28 }
  0x35   : > { %v686_v3 = vadd.f32 %v685_v40, %v443_v36 }
  0x36   : > { %v672_v46 = vadd.f32 %v671_v6, %v446_v38 }
  0x37   : > { %v687_v47 = vadd.f32 %v686_v3, %v449_v45 }
  0x38   : > { %v688_v4 = vmul.f32 %v672_v46, %v1407_v44  ;;  %399 = vadd.xlane.f32.xlu2 %v1311_v9  ;;  %396 = vadd.xlane.f32.xlu1 %v1316_v12  ;;  %v836_v12 = vld [vmem:[%s1760_s2 + $0x10] sm:$0xff] }
  0x39   : > { %v689_v50 = vmul.f32 %v687_v47, %v1407_v44  ;;  %855 = vmatpush.msra.mxu0 %v836_v12 }
  0x3a   : > { %393 = vadd.xlane.f32.xlu0 %v1319_v13  ;;  %v690_v49 = vsel %vm355_vm0, %v688_v4, 0.0  ;;  %v835_v13 = vld [vmem:[%s1760_s2 + $0x8] sm:$0xff] }
  0x3b   : > { %v691_v51 = vsel %vm355_vm0, %v689_v50, 0.0  ;;  %856 = vmatpush.msra.mxu0 %v835_v13 }
  0x3c   : > { %v692_v52 = vadd.f32 %v691_v51, %v690_v49 }
  0x3d   : > { %857 = vmatpush.msra.mxu0 %v834_v57 }
  0x3e   : > { %v693_v53 = vrot.slane %v692_v52, 4 }
  0x40   : > { %408 = vadd.xlane.f32.xlu2 %v1344_v37  ;;  %v694_v9 = vadd.f32 %v693_v53, %v692_v52  ;;  %405 = vadd.xlane.f32.xlu1 %v1335_v31 }
  0x42   : > { %402 = vadd.xlane.f32.xlu0 %v1327_v21  ;;  %v695_v56 = vrot.slane %v694_v9, 2 }
  0x44   : > { %v696_v37 = vadd.f32 %v695_v56, %v694_v9 }
  0x46   : > { %v697_v31 = vrot.slane %v696_v37, 1 }
  0x48   : > { %417 = vadd.xlane.f32.xlu2 %v1350_v41  ;;  %v698_v21 = vadd.f32 %v697_v31, %v696_v37  ;;  %414 = vadd.xlane.f32.xlu1 %v1353_v43  ;;  %v1490_v31 = vstv %s700_s14 }
  0x4a   : > { %411 = vadd.xlane.f32.xlu0 %v1338_v32  ;;  %v699_v58 = vmul.f32 %v698_v21, %v1407_v44  ;;  %v1195_v32 = vmov 32.0  }
  0x4b   : > { %1088 = vrcp.f32 %v1195_v32 }
  0x4c   : > { %1059 = vmatmul.msk.f32.vlgmr.msra.gmra.mxu0 %vm355_vm0, %v699_v58 }
  0x50   : > { %426 = vadd.xlane.f32.xlu2 %v1375_v63  ;;  %423 = vadd.xlane.f32.xlu1 %v1363_v54 }
  0x51   : > { %v1089_v41 = vpop.eup %1088 }
  0x52   : > { %420 = vadd.xlane.f32.xlu0 %v1366_v55  ;;  %v453_v43 = vmul.f32 32.0, %v1089_v41  ;;  %vm457_vm2 = vweird.f32 %v1089_v41 }
  0x54   : > { %v454_v42 = vsub.f32 1.0, %v453_v43 }
  0x56   : > { %v455_v59 = vmul.f32 %v1089_v41, %v454_v42 }
  0x58   : > { %435 = vadd.xlane.f32.xlu2 %v1390_v16  ;;  %432 = vadd.xlane.f32.xlu1 %v1386_v14  ;;  %v456_v61 = vadd.f32 %v1089_v41, %v455_v59 }
  0x5a   : > { %429 = vadd.xlane.f32.xlu0 %v1378_v0  ;;  %v1443_v62 = vsel %vm457_vm2, %v1089_v41, %v456_v61 }
  0x60   : > { %444 = vadd.xlane.f32.xlu2 %v443_v36  ;;  %441 = vadd.xlane.f32.xlu1 %v440_v28 }
  0x62   : > { %438 = vadd.xlane.f32.xlu0 %v437_v33 }
  0x68   : > { %450 = vadd.xlane.f32.xlu1 %v449_v45 }
  0x6a   : > { %447 = vadd.xlane.f32.xlu0 %v446_v38 }
  0x8b   : > { %v370_v54 = vpop.xlane.xlu2 %369  ;;  %v364_v60 = vpop.xlane.xlu1 %363 }
  0x8c   : > { %v1446_v0 = vmul.f32 %v1443_v62, %v370_v54  ;;  %v1457_v10 = vmul.f32 %v1443_v62, %v364_v60 }
  0x8d   : > { %v358_v55 = vpop.xlane.xlu0 %357 }
  0x8e   : > { %v1463_v15 = vmul.f32 %v1443_v62, %v358_v55 }
  0x93   : > { %v373_v63 = vpop.xlane.xlu2 %372  ;;  %v367_v2 = vpop.xlane.xlu1 %366 }
  0x94   : > { %v1449_v1 = vmul.f32 %v1443_v62, %v373_v63  ;;  %v1452_v7 = vmul.f32 %v1443_v62, %v367_v2  ;;  %v1500_v2 = vstv %s1056_s15 }
  0x95   : > { %v361_v5 = vpop.xlane.xlu0 %360 }
  0x96   : > { %v505_v8 = vadd.f32 %v1449_v1, %v1446_v0  ;;  %v1460_v11 = vmul.f32 %v1443_v62, %v361_v5  ;;  %v498_v16 = vadd.f32 %v1452_v7, %v1457_v10 }
  0x98   : > { %v506_v14 = vrot.slane %v505_v8, 4  ;;  %v491_v17 = vadd.f32 %v1460_v11, %v1463_v15  ;;  %v499_v23 = vrot.slane %v498_v16, 4 }
  0x9a   : > { %v507_v19 = vadd.f32 %v506_v14, %v505_v8  ;;  %v492_v26 = vrot.slane %v491_v17, 4  ;;  %v500_v28 = vadd.f32 %v499_v23, %v498_v16 }
  0x9b   : > { %v382_v18 = vpop.xlane.xlu2 %381  ;;  %v379_v20 = vpop.xlane.xlu1 %378 }
  0x9c   : > { %v1470_v24 = vmul.f32 %v1443_v62, %v379_v20  ;;  %v508_v27 = vrot.slane %v507_v19, 2  ;;  %v493_v30 = vadd.f32 %v492_v26, %v491_v17  ;;  %v501_v38 = vrot.slane %v500_v28, 2 }
  0x9d   : > { %v376_v22 = vpop.xlane.xlu0 %375  ;;  %v467_v12 = vmul.f32 %v1443_v62, %v382_v18  ;;  %v641_v20 = vadd.f32 %v1452_v7, %v1460_v11 }
  0x9e   : > { %v1473_v25 = vmul.f32 %v1443_v62, %v376_v22  ;;  %v509_v34 = vadd.f32 %v508_v27, %v507_v19  ;;  %v494_v6 = vrot.slane %v493_v30, 2  ;;  %v502_v3 = vadd.f32 %v501_v38, %v500_v28 }
  0x9f   : > { %v626_v22 = vadd.f32 %v1457_v10, %v1463_v15 }
  0xa0   : > { %v512_v29 = vadd.f32 %v1470_v24, %v1473_v25  ;;  %v510_v46 = vrot.slane %v509_v34, 1  ;;  %v495_v47 = vadd.f32 %v494_v6, %v493_v30  ;;  %v503_v9 = vrot.slane %v502_v3, 1 }
  0xa1   : > { %v627_v10 = vadd.f32 %v626_v22, %v1446_v0 }
  0xa2   : > { %v513_v39 = vrot.slane %v512_v29, 4  ;;  %v511_v51 = vadd.f32 %v510_v46, %v509_v34  ;;  %v496_v56 = vrot.slane %v495_v47, 1  ;;  %v504_v58 = vadd.f32 %v503_v9, %v502_v3 }
  0xa3   : > { %v391_v33 = vpop.xlane.xlu2 %390  ;;  %v388_v35 = vpop.xlane.xlu1 %387 }
  0xa4   : > { %v1478_v40 = vmul.f32 %v1443_v62, %v391_v33  ;;  %v1481_v45 = vmul.f32 %v1443_v62, %v388_v35  ;;  %v514_v4 = vadd.f32 %v513_v39, %v512_v29  ;;  %v612_v21 = vmul.f32 %v1407_v44, %v511_v51 }
  0xa5   : > { %v385_v36 = vpop.xlane.xlu0 %384  ;;  %v497_v42 = vadd.f32 %v496_v56, %v495_v47  ;;  %v611_v5 = vmul.f32 %v1407_v44, %v504_v58  ;;  %v642_v35 = vadd.f32 %v641_v20, %v1449_v1  ;;  %v628_v47 = vadd.f32 %v627_v10, %v1473_v25 }
  0xa6   : > { %v526_v48 = vadd.f32 %v1478_v40, %v1481_v45  ;;  %v1486_v49 = vmul.f32 %v1443_v62, %v385_v36  ;;  %v515_v13 = vrot.slane %v514_v4, 2  ;;  %v707_v55 = vmul.f32 %v1490_v31, %v612_v21 }
  0xa7   : > { %v610_v16 = vmul.f32 %v1407_v44, %v497_v42  ;;  %v706_v23 = vmul.f32 %v1490_v31, %v611_v5  ;;  %v643_v6 = vadd.f32 %v642_v35, %v1470_v24 }
  0xa8   : > { %v527_v57 = vrot.slane %v526_v48, 4  ;;  %v519_v37 = vadd.f32 %v1486_v49, %v467_v12  ;;  %v516_v32 = vadd.f32 %v515_v13, %v514_v4  ;;  %v724_v19 = vadd.f32 %v1500_v2, %v707_v55 }
  0xa9   : > { %v705_v28 = vmul.f32 %v1490_v31, %v610_v16  ;;  %v723_v7 = vadd.f32 %v1500_v2, %v706_v23  ;;  %v644_v24 = vadd.f32 %v643_v6, %v1486_v49 }
  0xaa   : > { %v528_v59 = vadd.f32 %v527_v57, %v526_v48  ;;  %v520_v54 = vrot.slane %v519_v37, 4  ;;  %v517_v8 = vrot.slane %v516_v32, 1  ;;  %v740_v34 = vsub.f32 0.0, %v724_v19 }
  0xab   : > { %v400_v50 = vpop.xlane.xlu2 %399  ;;  %v397_v52 = vpop.xlane.xlu1 %396  ;;  %v722_v1 = vadd.f32 %v1500_v2, %v705_v28  ;;  %v645_v49 = vadd.f32 %v644_v24, %v1478_v40 }
  0xac   : > { %v1494_v41 = vmul.f32 %v1443_v62, %v397_v52  ;;  %v529_v17 = vrot.slane %v528_v59, 2  ;;  %v521_v18 = vadd.f32 %v520_v54, %v519_v37  ;;  %v518_v26 = vadd.f32 %v517_v8, %v516_v32 }
  0xad   : > { %v394_v53 = vpop.xlane.xlu0 %393  ;;  %v473_v46 = vmul.f32 %v1443_v62, %v400_v50  ;;  %v758_v52 = vmul.f32 1.442695, %v740_v34  ;;  %v738_v56 = vsub.f32 0.0, %v722_v1  ;;  %v629_v37 = vadd.f32 %v628_v47, %v467_v12 }
  0xae   : > { %v1497_v43 = vmul.f32 %v1443_v62, %v394_v53  ;;  %v530_v29 = vadd.f32 %v529_v17, %v528_v59  ;;  %v522_v30 = vrot.slane %v521_v18, 2  ;;  %v613_v11 = vmul.f32 %v1407_v44, %v518_v26 }
  0xaf   : > { %v739_v53 = vsub.f32 0.0, %v723_v7  ;;  %1090 = vpow2.f32 %v758_v52  ;;  %v754_v12 = vmul.f32 1.442695, %v738_v56  ;;  %v646_v16 = vadd.f32 %v645_v49, %v1494_v41 }
  0xb0   : > { %v533_v14 = vadd.f32 %v1494_v41, %v1497_v43  ;;  %v531_v48 = vrot.slane %v530_v29, 1  ;;  %v523_v51 = vadd.f32 %v522_v30, %v521_v18  ;;  %v708_v9 = vmul.f32 %v1490_v31, %v613_v11 }
  0xb2   : > { %v534_v27 = vrot.slane %v533_v14, 4  ;;  %v532_v57 = vadd.f32 %v531_v48, %v530_v29  ;;  %v524_v21 = vrot.slane %v523_v51, 1  ;;  %v725_v55 = vadd.f32 %v1500_v2, %v708_v9 }
  0xb3   : > { %v409_v60 = vpop.xlane.xlu2 %408  ;;  %v406_v61 = vpop.xlane.xlu1 %405 }
  0xb4   : > { %v535_v15 = vadd.f32 %v534_v27, %v533_v14  ;;  %v476_v3 = vmul.f32 %v1443_v62, %v409_v60  ;;  %v1522_v4 = vmul.f32 %v1443_v62, %v406_v61  ;;  %v756_v60 = vmul.f32 1.442695, %v739_v53 }
  0xb5   : > { %v403_v63 = vpop.xlane.xlu0 %402  ;;  %v615_v8 = vmul.f32 %v1407_v44, %v532_v57  ;;  %v525_v14 = vadd.f32 %v524_v21, %v523_v51  ;;  %v741_v22 = vsub.f32 0.0, %v725_v55  ;;  %v1091_v26 = vpop.eup %1090 }
  0xb6   : > { %v474_v36 = vmul.f32 %v1443_v62, %v403_v63  ;;  %v536_v13 = vrot.slane %v535_v15, 2  ;;  %v547_v50 = vadd.f32 %v476_v3, %v1522_v4  ;;  %v630_v63 = vadd.f32 %v629_v37, %v1481_v45 }
  0xb7   : > { %1092 = vpow2.f32 %v756_v60  ;;  %v710_v41 = vmul.f32 %v1490_v31, %v615_v8  ;;  %v788_v10 = vadd.f32 1.0, %v1091_v26  ;;  %v760_v11 = vmul.f32 1.442695, %v741_v22 }
  0xb8   : > { %v540_v0 = vadd.f32 %v474_v36, %v473_v46  ;;  %v537_v61 = vadd.f32 %v536_v13, %v535_v15  ;;  %v548_v5 = vrot.slane %v547_v50, 4  ;;  %v631_v17 = vadd.f32 %v630_v63, %v1497_v43 }
  0xb9   : > { %v647_v40 = vadd.f32 %v646_v16, %v474_v36  ;;  %1094 = vpow2.f32 %v754_v12  ;;  %v614_v43 = vmul.f32 %v1407_v44, %v525_v14  ;;  %v727_v52 = vadd.f32 %v1500_v2, %v710_v41 }
  0xba   : > { %v541_v32 = vrot.slane %v540_v0, 4  ;;  %v538_v23 = vrot.slane %v537_v61, 1  ;;  %v549_v27 = vadd.f32 %v548_v5, %v547_v50  ;;  %v632_v34 = vadd.f32 %v631_v17, %v473_v46 }
  0xbb   : > { %v418_v33 = vpop.xlane.xlu2 %417  ;;  %v415_v38 = vpop.xlane.xlu1 %414  ;;  %v648_v15 = vadd.f32 %v647_v40, %v476_v3  ;;  %v709_v46 = vmul.f32 %v1490_v31, %v614_v43  ;;  %1096 = vrcp.f32 %v788_v10  ;;  %v838_v43 = vld [vmem:[%s1761_s3] sm:$0x1] }
  0xbc   : > { %v478_v25 = vmul.f32 %v1443_v62, %v415_v38  ;;  %v542_v18 = vadd.f32 %v541_v32, %v540_v0  ;;  %v479_v45 = vmul.f32 %v1443_v62, %v418_v33  ;;  %v539_v6 = vadd.f32 %v538_v23, %v537_v61 }
  0xbd   : > { %v412_v39 = vpop.xlane.xlu0 %411  ;;  %v550_v1 = vrot.slane %v549_v27, 2  ;;  %v1545_v51 = vpop.eup %1092  ;;  %v633_v0 = vadd.f32 %v632_v34, %v1522_v4  ;;  %1098 = vpow2.f32 %v760_v11  ;;  %v743_v32 = vsub.f32 0.0, %v727_v52 }
  0xbe   : > { %v477_v42 = vmul.f32 %v1443_v62, %v412_v39  ;;  %v543_v35 = vrot.slane %v542_v18, 2  ;;  %v649_v53 = vadd.f32 %v648_v15, %v478_v25  ;;  %v616_v57 = vmul.f32 %v1407_v44, %v539_v6 }
  0xbf   : > { %v1550_v50 = vpop.eup %1094  ;;  %v551_v37 = vadd.f32 %v550_v1, %v549_v27 }
  0xc0   : > { %v554_v19 = vadd.f32 %v478_v25, %v477_v42  ;;  %v544_v9 = vadd.f32 %v543_v35, %v542_v18  ;;  %v634_v56 = vadd.f32 %v633_v0, %v477_v42  ;;  %v711_v14 = vmul.f32 %v1490_v31, %v616_v57 }
  0xc1   : > { %v552_v16 = vrot.slane %v551_v37, 1 }
  0xc2   : > { %v555_v38 = vrot.slane %v554_v19, 4  ;;  %v635_v42 = vadd.f32 %v634_v56, %v479_v45  ;;  %v728_v1 = vadd.f32 %v1500_v2, %v711_v14 }
  0xc3   : > { %v427_v58 = vpop.xlane.xlu2 %426  ;;  %v424_v59 = vpop.xlane.xlu1 %423 }
  0xc4   : > { %v482_v28 = vmul.f32 %v1443_v62, %v427_v58  ;;  %v481_v29 = vmul.f32 %v1443_v62, %v424_v59  ;;  %v556_v24 = vadd.f32 %v555_v38, %v554_v19  ;;  %v1554_v59 = vadd.f32 %v1500_v2, %v709_v46  ;;  %v1561_v19 = vpop.eup %1096 }
  0xc5   : > { %v421_v54 = vpop.xlane.xlu0 %420  ;;  %v1568_v34 = vpop.eup %1098 }
  0xc6   : > { %v480_v20 = vmul.f32 %v1443_v62, %v421_v54  ;;  %v568_v47 = vadd.f32 %v482_v28, %v481_v29  ;;  %v545_v54 = vrot.slane %v544_v9, 1  ;;  %v557_v60 = vrot.slane %v556_v24, 2 }
  0xc8   : > { %v561_v39 = vadd.f32 %v480_v20, %v479_v45  ;;  %v569_v21 = vrot.slane %v568_v47, 4  ;;  %v650_v58 = vadd.f32 %v649_v53, %v480_v20  ;;  %v636_v20 = vadd.f32 %v635_v42, %v481_v29 }
  0xc9   : > { %v546_v26 = vadd.f32 %v545_v54, %v544_v9  ;;  %v558_v27 = vadd.f32 %v557_v60, %v556_v24  ;;  %v818_v54 = vstv %s1563_s16 }
  0xca   : > { %v562_v13 = vrot.slane %v561_v39, 4  ;;  %v570_v17 = vadd.f32 %v569_v21, %v568_v47  ;;  %v651_v18 = vadd.f32 %v650_v58, %v482_v28  ;;  %v742_v28 = vsub.f32 0.0, %v1554_v59 }
  0xcb   : > { %v436_v30 = vpop.xlane.xlu2 %435  ;;  %v433_v7 = vpop.xlane.xlu1 %432  ;;  %v617_v47 = vmul.f32 %v1407_v44, %v546_v26  ;;  %v559_v52 = vrot.slane %v558_v27, 1 }
  0xcc   : > { %v484_v33 = vmul.f32 %v1443_v62, %v433_v7  ;;  %v563_v55 = vadd.f32 %v562_v13, %v561_v39  ;;  %v485_v5 = vmul.f32 %v1443_v62, %v436_v30  ;;  %v859_v30 = vpop.f32.mrf.mxu0  ;;  %v1571_v39 = vmul.f32 1.442695, %v743_v32 }
  0xcd   : > { %v430_v36 = vpop.xlane.xlu0 %429  ;;  %v553_v7 = vadd.f32 %v552_v16, %v551_v37  ;;  %v860_v6 = vadd.f32 %v859_v30, %v838_v43 }
  0xce   : > { %v483_v48 = vmul.f32 %v1443_v62, %v430_v36  ;;  %v564_v45 = vrot.slane %v563_v55, 2  ;;  %v652_v41 = vadd.f32 %v651_v18, %v484_v33  ;;  %v571_v36 = vrot.slane %v570_v17, 2 }
  0xcf   : > { %v862_v59 = vsub.f32 0.0, %v860_v6  ;;  %v762_v18 = vmul.f32 1.442695, %v742_v28 }
  0xd0   : > { %v575_v3 = vadd.f32 %v484_v33, %v483_v48  ;;  %v637_v35 = vadd.f32 %v636_v20, %v483_v48  ;;  %v565_v46 = vadd.f32 %v564_v45, %v563_v55  ;;  %v572_v56 = vadd.f32 %v571_v36, %v570_v17 }
  0xd1   : > { %v712_v55 = vmul.f32 %v1490_v31, %v617_v47  ;;  %v863_v17 = vmul.f32 1.442695, %v862_v59  ;;  %v789_v59 = vadd.f32 1.0, %v1568_v34 }
  0xd2   : > { %v576_v4 = vrot.slane %v575_v3, 4  ;;  %v638_v53 = vadd.f32 %v637_v35, %v485_v5  ;;  %v573_v42 = vrot.slane %v572_v56, 1 }
  0xd3   : > { %v445_v25 = vpop.xlane.xlu2 %444  ;;  %v442_v61 = vpop.xlane.xlu1 %441  ;;  %1100 = vpow2.f32 %v863_v17 }
  0xd4   : > { %v488_v49 = vmul.f32 %v1443_v62, %v445_v25  ;;  %v487_v12 = vmul.f32 %v1443_v62, %v442_v61  ;;  %v577_v22 = vadd.f32 %v576_v4, %v575_v3  ;;  %v618_v3 = vmul.f32 %v1407_v44, %v553_v7 }
  0xd5   : > { %v439_v63 = vpop.xlane.xlu0 %438  ;;  %v566_v4 = vrot.slane %v565_v46, 1  ;;  %v560_v61 = vadd.f32 %v559_v52, %v558_v27  ;;  %v574_v43 = vadd.f32 %v573_v42, %v572_v56  ;;  %1102 = vpow2.f32 %v1571_v39 }
  0xd6   : > { %v486_v8 = vmul.f32 %v1443_v62, %v439_v63  ;;  %v589_v23 = vadd.f32 %v488_v49, %v487_v12  ;;  %v578_v11 = vrot.slane %v577_v22, 2  ;;  %v639_v58 = vadd.f32 %v638_v53, %v487_v12 }
  0xd7   : > { %v567_v20 = vadd.f32 %v566_v4, %v565_v46  ;;  %v619_v26 = vmul.f32 %v1407_v44, %v560_v61  ;;  %v787_v56 = vadd.f32 1.0, %v1545_v51 }
  0xd8   : > { %v582_v40 = vadd.f32 %v486_v8, %v485_v5  ;;  %v590_v29 = vrot.slane %v589_v23, 4  ;;  %v653_v10 = vadd.f32 %v652_v41, %v486_v8  ;;  %v579_v21 = vadd.f32 %v578_v11, %v577_v22 }
  0xd9   : > { %v821_v8 = vstv %s1573_s20  ;;  %v713_v41 = vmul.f32 %v1490_v31, %v618_v3  ;;  %v620_v28 = vmul.f32 %v1407_v44, %v567_v20  ;;  %v1101_v3 = vpop.eup %1100 }
  0xda   : > { %v583_v38 = vrot.slane %v582_v40, 4  ;;  %v591_v15 = vadd.f32 %v590_v29, %v589_v23  ;;  %v654_v13 = vadd.f32 %v653_v10, %v488_v49  ;;  %v580_v16 = vrot.slane %v579_v21, 1 }
  0xdb   : > { %v451_v48 = vpop.xlane.xlu1 %450  ;;  %v729_v29 = vadd.f32 %v1500_v2, %v712_v55 }
  0xdc   : > { %v584_v33 = vadd.f32 %v583_v38, %v582_v40  ;;  %v490_v24 = vmul.f32 %v1443_v62, %v451_v48  ;;  %v592_v57 = vrot.slane %v591_v15, 2  ;;  %v744_v40 = vsub.f32 0.0, %v728_v1 }
  0xdd   : > { %v448_v0 = vpop.xlane.xlu0 %447  ;;  %v581_v38 = vadd.f32 %v580_v16, %v579_v21  ;;  %v621_v1 = vmul.f32 %v1407_v44, %v574_v43  ;;  %v730_v48 = vadd.f32 %v1500_v2, %v713_v41 }
  0xde   : > { %v585_v9 = vrot.slane %v584_v33, 2  ;;  %v489_v37 = vmul.f32 %v1443_v62, %v448_v0  ;;  %v655_v32 = vadd.f32 %v654_v13, %v490_v24  ;;  %v593_v5 = vadd.f32 %v592_v57, %v591_v15 }
  0xdf   : > { %v766_v15 = vmul.f32 1.442695, %v744_v40  ;;  %v745_v0 = vsub.f32 0.0, %v729_v29  ;;  %v622_v53 = vmul.f32 %v1407_v44, %v581_v38  ;;  %v716_v21 = vmul.f32 %v1490_v31, %v621_v1 }
  0xe0   : > { %v586_v25 = vadd.f32 %v585_v9, %v584_v33  ;;  %v596_v60 = vadd.f32 %v490_v24, %v489_v37  ;;  %v657_v49 = vmul.f32 %v655_v32, %v1407_v44  ;;  %v640_v63 = vadd.f32 %v639_v58, %v489_v37  ;;  %v1103_v32 = vpop.eup %1102 }
  0xe1   : > { %v594_v30 = vrot.slane %v593_v5, 1  ;;  %v714_v33 = vmul.f32 %v1490_v31, %v619_v26  ;;  %v715_v9 = vmul.f32 %v1490_v31, %v620_v28  ;;  %v786_v37 = vadd.f32 1.0, %v1550_v50 }
  0xe2   : > { %v597_v14 = vrot.slane %v596_v60, 4  ;;  %v820_v62 = vmul.f32 %v818_v54, %v657_v49  ;;  %v656_v12 = vmul.f32 %v640_v63, %v1407_v44  ;;  %v587_v22 = vrot.slane %v586_v25, 1 }
  0xe3   : > { %v595_v47 = vadd.f32 %v594_v30, %v593_v5  ;;  %v731_v57 = vadd.f32 %v1500_v2, %v714_v33  ;;  %v746_v4 = vsub.f32 0.0, %v730_v48  ;;  %v732_v51 = vadd.f32 %v1500_v2, %v715_v9 }
  0xe4   : > { %v598_v23 = vadd.f32 %v597_v14, %v596_v60  ;;  %v823_v27 = vadd.f32 %v821_v8, %v820_v62  ;;  %v819_v45 = vmul.f32 %v818_v54, %v656_v12  ;;  %v588_v36 = vadd.f32 %v587_v22, %v586_v25 }
  0xe5   : > { %v624_v58 = vmul.f32 %v1407_v44, %v595_v47  ;;  %v717_v25 = vmul.f32 %v1490_v31, %v622_v53  ;;  %v768_v54 = vmul.f32 1.442695, %v745_v0  ;;  %v747_v61 = vsub.f32 0.0, %v731_v57 }
  0xe6   : > { %v599_v35 = vrot.slane %v598_v23, 2  ;;  %v825_v7 = vsub.f32 0.0, %v823_v27  ;;  %v822_v11 = vadd.f32 %v821_v8, %v819_v45  ;;  %v623_v24 = vmul.f32 %v1407_v44, %v588_v36 }
  0xe7   : > { %v865_v49 = vadd.f32 1.0, %v1101_v3  ;;  %v733_v63 = vadd.f32 %v1500_v2, %v716_v21  ;;  %v719_v34 = vmul.f32 %v1490_v31, %v624_v58  ;;  %v770_v8 = vmul.f32 1.442695, %v746_v4 }
  0xe8   : > { %v600_v10 = vadd.f32 %v599_v35, %v598_v23  ;;  %v828_v6 = vmul.f32 1.442695, %v825_v7  ;;  %v824_v46 = vsub.f32 0.0, %v822_v11  ;;  %v718_v60 = vmul.f32 %v1490_v31, %v623_v24 }
  0xe9   : > { %v734_v14 = vadd.f32 %v1500_v2, %v717_v25  ;;  %v748_v62 = vsub.f32 0.0, %v732_v51  ;;  %v791_v22 = vadd.f32 1.0, %v1103_v32  ;;  %v749_v23 = vsub.f32 0.0, %v733_v63 }
  0xea   : > { %v601_v52 = vrot.slane %v600_v10, 1  ;;  %1104 = vpow2.f32 %v828_v6  ;;  %v826_v13 = vmul.f32 1.442695, %v824_v46  ;;  %v736_v40 = vadd.f32 %v1500_v2, %v719_v34 }
  0xeb   : > { %1106 = vpow2.f32 %v762_v18  ;;  %v772_v18 = vmul.f32 1.442695, %v747_v61  ;;  %v750_v45 = vsub.f32 0.0, %v734_v14  ;;  %v774_v43 = vmul.f32 1.442695, %v748_v62 }
  0xec   : > { %v602_v39 = vadd.f32 %v601_v52, %v600_v10  ;;  %1108 = vpow2.f32 %v826_v13  ;;  %v776_v7 = vmul.f32 1.442695, %v749_v23  ;;  %v752_v28 = vsub.f32 0.0, %v736_v40 }
  0xed   : > { %1110 = vpow2.f32 %v766_v15  ;;  %v778_v10 = vmul.f32 1.442695, %v750_v45 }
  0xee   : > { %v625_v55 = vmul.f32 %v1407_v44, %v602_v39  ;;  %1112 = vrcp.f32 %v787_v56  ;;  %v735_v44 = vadd.f32 %v1500_v2, %v718_v60  ;;  %v782_v47 = vmul.f32 1.442695, %v752_v28 }
  0xef   : > { %1114 = vrcp.f32 %v786_v37 }
  0xf0   : > { %v1105_v50 = vpop.eup %1104  ;;  %1116 = vrcp.f32 %v789_v59  ;;  %v720_v12 = vmul.f32 %v1490_v31, %v625_v55  ;;  %v751_v30 = vsub.f32 0.0, %v735_v44 }
  0xf1   : > { %v831_v42 = vadd.f32 1.0, %v1105_v50  ;;  %v1107_v5 = vpop.eup %1106  ;;  %1118 = vpow2.f32 %v768_v54 }
  0xf2   : > { %v1109_v16 = vpop.eup %1108  ;;  %1120 = vrcp.f32 %v865_v49  ;;  %v790_v27 = vadd.f32 1.0, %v1107_v5  ;;  %v737_v35 = vadd.f32 %v1500_v2, %v720_v12  ;;  %v780_v15 = vmul.f32 1.442695, %v751_v30 }
  0xf3   : > { %v1111_v17 = vpop.eup %1110  ;;  %v830_v20 = vadd.f32 1.0, %v1109_v16  ;;  %1122 = vrcp.f32 %v831_v42 }
  0xf4   : > { %v1113_v26 = vpop.eup %1112  ;;  %v792_v29 = vadd.f32 1.0, %v1111_v17  ;;  %v753_v33 = vsub.f32 0.0, %v737_v35 }
  0xf5   : > { %1124 = vrcp.f32 %v830_v20  ;;  %v1115_v41 = vpop.eup %1114 }
  0xf6   : > { %1126 = vpow2.f32 %v770_v8  ;;  %v1117_v31 = vpop.eup %1116  ;;  %v784_v39 = vmul.f32 1.442695, %v753_v33 }
  0xf7   : > { %1128 = vpow2.f32 %v772_v18  ;;  %v1119_v38 = vpop.eup %1118 }
  0xf8   : > { %1130 = vrcp.f32 %v791_v22  ;;  %v1121_v36 = vpop.eup %1120  ;;  %v793_v1 = vadd.f32 1.0, %v1119_v38 }
  0xf9   : > { %1132 = vrcp.f32 %v790_v27  ;;  %v1613_v11 = vpop.eup %1122  ;;  %v1618_v46 = vperm.slane %v1121_v36, 0 }
  0xfa   : > { %1134 = vpow2.f32 %v774_v43  ;;  %v868_v0 = vmul.f32 %v1613_v11, %v1115_v41  ;;  %v870_v53 = vmul.f32 %v1613_v11, %v1113_v26  ;;  %v872_v57 = vmul.f32 %v1613_v11, %v1561_v19 }
  0xfb   : > { %v1615_v6 = vpop.eup %1124  ;;  %1136 = vrcp.f32 %v792_v29  ;;  %v874_v4 = vmul.f32 %v1613_v11, %v1117_v31 }
  0xfc   : > { %v1127_v2 = vpop.eup %1126  ;;  %1138 = vpow2.f32 %v776_v7  ;;  %v867_v52 = vmul.f32 %v1615_v6, %v1115_v41  ;;  %v869_v9 = vmul.f32 %v1615_v6, %v1113_v26  ;;  %v871_v13 = vmul.f32 %v1615_v6, %v1561_v19 }
  0xfd   : > { %v1129_v48 = vpop.eup %1128  ;;  %1140 = vpow2.f32 %v778_v10  ;;  %v794_v56 = vadd.f32 1.0, %v1127_v2  ;;  %v873_v58 = vmul.f32 %v1615_v6, %v1117_v31  ;;  %v901_v25 = vmul.f32 %v1618_v46, %v868_v0 }
  0xfe   : > { %v1131_v24 = vpop.eup %1130  ;;  %1142 = vpow2.f32 %v780_v15  ;;  %v795_v21 = vadd.f32 1.0, %v1129_v48  ;;  %v900_v32 = vmul.f32 %v1618_v46, %v867_v52  ;;  %v902_v54 = vmul.f32 %v1618_v46, %v869_v9 }
  0xff   : > { %v1133_v3 = vpop.eup %1132  ;;  %1144 = vrcp.f32 %v793_v1  ;;  %v903_v51 = vmul.f32 %v1618_v46, %v870_v53  ;;  %v904_v55 = vmul.f32 %v1618_v46, %v871_v13  ;;  %v905_v63 = vmul.f32 %v1618_v46, %v872_v57  ;;  %933 = vst.msk [vmem:[%s1629_s23 + $0x8] sm:$0xff] %vm355_vm0, %v901_v25 }
 0x100   : > { %v1135_v37 = vpop.eup %1134  ;;  %1146 = vpow2.f32 %v782_v47  ;;  %v875_v19 = vmul.f32 %v1133_v3, %v1615_v6  ;;  %932 = vst.msk [vmem:[%s1629_s23] sm:$0xff] %vm355_vm0, %v900_v32  ;;  %v876_v49 = vmul.f32 %v1133_v3, %v1613_v11  ;;  %v877_v42 = vmul.f32 %v1131_v24, %v1615_v6 }
 0x101   : > { %v1137_v59 = vpop.eup %1136  ;;  %1148 = vpow2.f32 %v784_v39  ;;  %v796_v61 = vadd.f32 1.0, %v1135_v37  ;;  %v906_v5 = vmul.f32 %v1618_v46, %v873_v58  ;;  %934 = vst.msk [vmem:[%s1629_s23 + $0x10] sm:$0xff] %vm355_vm0, %v902_v54  ;;  %v878_v16 = vmul.f32 %v1131_v24, %v1613_v11 }
 0x102   : > { %v1139_v60 = vpop.eup %1138  ;;  %1150 = vrcp.f32 %v794_v56  ;;  %v907_v62 = vmul.f32 %v1618_v46, %v874_v4  ;;  %935 = vst.msk [vmem:[%s1629_s23 + $0x18] sm:$0xff] %vm355_vm0, %v903_v51  ;;  %v879_v17 = vmul.f32 %v1137_v59, %v1615_v6  ;;  %v908_v18 = vmul.f32 %v1618_v46, %v875_v19 }
 0x103   : > { %v1141_v50 = vpop.eup %1140  ;;  %1152 = vrcp.f32 %v795_v21  ;;  %v797_v14 = vadd.f32 1.0, %v1139_v60  ;;  %936 = vst.msk [vmem:[%s1629_s23 + $0x20] sm:$0xff] %vm355_vm0, %v904_v55  ;;  %v880_v22 = vmul.f32 %v1137_v59, %v1613_v11  ;;  %v909_v23 = vmul.f32 %v1618_v46, %v876_v49 }
 0x104   : > { %v1143_v34 = vpop.eup %1142  ;;  %v798_v12 = vadd.f32 1.0, %v1141_v50  ;;  %1154 = vrcp.f32 %v796_v61  ;;  %937 = vst.msk [vmem:[%s1629_s23 + $0x28] sm:$0xff] %vm355_vm0, %v905_v63  ;;  %v910_v27 = vmul.f32 %v1618_v46, %v877_v42  ;;  %v911_v30 = vmul.f32 %v1618_v46, %v878_v16 }
 0x105   : > { %v1145_v8 = vpop.eup %1144  ;;  %v799_v20 = vadd.f32 1.0, %v1143_v34  ;;  %938 = vst.msk [vmem:[%s1629_s23 + $0x30] sm:$0xff] %vm355_vm0, %v906_v5  ;;  %1156 = vrcp.f32 %v797_v14  ;;  %v912_v31 = vmul.f32 %v1618_v46, %v879_v17  ;;  %v913_v28 = vmul.f32 %v1618_v46, %v880_v22 }
 0x106   : > { %v1147_v44 = vpop.eup %1146  ;;  %v881_v26 = vmul.f32 %v1145_v8, %v1615_v6  ;;  %v882_v43 = vmul.f32 %v1145_v8, %v1613_v11  ;;  %939 = vst.msk [vmem:[%s1629_s23 + $0x38] sm:$0xff] %vm355_vm0, %v907_v62  ;;  %1158 = vrcp.f32 %v798_v12 }
 0x107   : > { %v1149_v40 = vpop.eup %1148  ;;  %v800_v41 = vadd.f32 1.0, %v1147_v44  ;;  %940 = vst.msk [vmem:[%s1629_s23 + $0x40] sm:$0xff] %vm355_vm0, %v908_v18  ;;  %1160 = vrcp.f32 %v799_v20 }
 0x108   : > { %v1151_v45 = vpop.eup %1150  ;;  %v801_v7 = vadd.f32 1.0, %v1149_v40  ;;  %941 = vst.msk [vmem:[%s1629_s23 + $0x48] sm:$0xff] %vm355_vm0, %v909_v23  ;;  %v914_v10 = vmul.f32 %v1618_v46, %v881_v26  ;;  %v915_v1 = vmul.f32 %v1618_v46, %v882_v43 }
 0x109   : > { %v883_v35 = vmul.f32 %v1151_v45, %v1615_v6  ;;  %v1153_v29 = vpop.eup %1152  ;;  %v884_v38 = vmul.f32 %v1151_v45, %v1613_v11  ;;  %942 = vst.msk [vmem:[%s1629_s23 + $0x50] sm:$0xff] %vm355_vm0, %v910_v27  ;;  %1162 = vrcp.f32 %v800_v41 }
 0x10a   : > { %v885_v36 = vmul.f32 %v1153_v29, %v1615_v6  ;;  %v1155_v15 = vpop.eup %1154  ;;  %v886_v33 = vmul.f32 %v1153_v29, %v1613_v11  ;;  %943 = vst.msk [vmem:[%s1629_s23 + $0x58] sm:$0xff] %vm355_vm0, %v911_v30  ;;  %1164 = vrcp.f32 %v801_v7 }
 0x10b   : > { %v887_v2 = vmul.f32 %v1155_v15, %v1615_v6  ;;  %v916_v47 = vmul.f32 %v1618_v46, %v883_v35  ;;  %944 = vst.msk [vmem:[%s1629_s23 + $0x60] sm:$0xff] %vm355_vm0, %v912_v31  ;;  %v1157_v52 = vpop.eup %1156  ;;  %v888_v48 = vmul.f32 %v1155_v15, %v1613_v11  ;;  %v917_v0 = vmul.f32 %v1618_v46, %v884_v38 }
 0x10c   : > { %945 = vst.msk [vmem:[%s1629_s23 + $0x68] sm:$0xff] %vm355_vm0, %v913_v28  ;;  %v1159_v53 = vpop.eup %1158  ;;  %v889_v9 = vmul.f32 %v1157_v52, %v1615_v6  ;;  %v918_v24 = vmul.f32 %v1618_v46, %v885_v36  ;;  %v890_v13 = vmul.f32 %v1157_v52, %v1613_v11  ;;  %v919_v3 = vmul.f32 %v1618_v46, %v886_v33 }
 0x10d   : > { %946 = vst.msk [vmem:[%s1629_s23 + $0x70] sm:$0xff] %vm355_vm0, %v914_v10  ;;  %v1161_v39 = vpop.eup %1160  ;;  %v891_v56 = vmul.f32 %v1159_v53, %v1615_v6  ;;  %v920_v57 = vmul.f32 %v1618_v46, %v887_v2  ;;  %v892_v21 = vmul.f32 %v1159_v53, %v1613_v11  ;;  %v921_v58 = vmul.f32 %v1618_v46, %v888_v48 }
 0x10e   : > { %947 = vst.msk [vmem:[%s1629_s23 + $0x78] sm:$0xff] %vm355_vm0, %v915_v1  ;;  %v893_v32 = vmul.f32 %v1161_v39, %v1615_v6  ;;  %v922_v59 = vmul.f32 %v1618_v46, %v889_v9  ;;  %v894_v25 = vmul.f32 %v1161_v39, %v1613_v11  ;;  %v923_v54 = vmul.f32 %v1618_v46, %v890_v13 }
 0x10f   : > { %948 = vst.msk [vmem:[%s1629_s23 + $0x80] sm:$0xff] %vm355_vm0, %v916_v47  ;;  %v1163_v37 = vpop.eup %1162  ;;  %v924_v60 = vmul.f32 %v1618_v46, %v891_v56  ;;  %v925_v55 = vmul.f32 %v1618_v46, %v892_v21 }
 0x110   : > { %949 = vst.msk [vmem:[%s1629_s23 + $0x88] sm:$0xff] %vm355_vm0, %v917_v0  ;;  %v1165_v4 = vpop.eup %1164  ;;  %v895_v51 = vmul.f32 %v1163_v37, %v1615_v6  ;;  %v896_v19 = vmul.f32 %v1163_v37, %v1613_v11  ;;  %v926_v61 = vmul.f32 %v1618_v46, %v893_v32  ;;  %v927_v63 = vmul.f32 %v1618_v46, %v894_v25 }
 0x111   : > { %950 = vst.msk [vmem:[%s1629_s23 + $0x90] sm:$0xff] %vm355_vm0, %v918_v24  ;;  %v897_v50 = vmul.f32 %v1165_v4, %v1615_v6  ;;  %v898_v49 = vmul.f32 %v1165_v4, %v1613_v11 }
 0x112   : > { %951 = vst.msk [vmem:[%s1629_s23 + $0x98] sm:$0xff] %vm355_vm0, %v919_v3  ;;  %v928_v34 = vmul.f32 %v1618_v46, %v895_v51  ;;  %v929_v42 = vmul.f32 %v1618_v46, %v896_v19 }
 0x113   : > { %952 = vst.msk [vmem:[%s1629_s23 + $0xa0] sm:$0xff] %vm355_vm0, %v920_v57  ;;  %v930_v6 = vmul.f32 %v1618_v46, %v897_v50  ;;  %v931_v5 = vmul.f32 %v1618_v46, %v898_v49 }
 0x114   : > { %953 = vst.msk [vmem:[%s1629_s23 + $0xa8] sm:$0xff] %vm355_vm0, %v921_v58 }
 0x115   : > { %954 = vst.msk [vmem:[%s1629_s23 + $0xb0] sm:$0xff] %vm355_vm0, %v922_v59 }
 0x116   : > { %955 = vst.msk [vmem:[%s1629_s23 + $0xb8] sm:$0xff] %vm355_vm0, %v923_v54 }
 0x117   : > { %956 = vst.msk [vmem:[%s1629_s23 + $0xc0] sm:$0xff] %vm355_vm0, %v924_v60 }
 0x118   : > { %957 = vst.msk [vmem:[%s1629_s23 + $0xc8] sm:$0xff] %vm355_vm0, %v925_v55 }
 0x119   : > { %958 = vst.msk [vmem:[%s1629_s23 + $0xd0] sm:$0xff] %vm355_vm0, %v926_v61 }
 0x11a   : > { %959 = vst.msk [vmem:[%s1629_s23 + $0xd8] sm:$0xff] %vm355_vm0, %v927_v63 }
 0x11b   : > { %960 = vst.msk [vmem:[%s1629_s23 + $0xe0] sm:$0xff] %vm355_vm0, %v928_v34 }
 0x11c   : > { %961 = vst.msk [vmem:[%s1629_s23 + $0xe8] sm:$0xff] %vm355_vm0, %v929_v42 }
 0x11d   : > { %962 = vst.msk [vmem:[%s1629_s23 + $0xf0] sm:$0xff] %vm355_vm0, %v930_v6 }
 0x11e   : > { %963 = vst.msk [vmem:[%s1629_s23 + $0xf8] sm:$0xff] %vm355_vm0, %v931_v5 }
 0x11f PF: > { %s16_s18 = sadd.s32 1, %s1191_s18  }
 0x120   : > { %p13_p7 = scmp.ge.s32.totalorder %s16_s18, 4  }
 0x122   :  { %15 = sbr.rel (!%p13_p7) target bundleno = 1 (0x1), region = 78 }
 0x127   :  { %985 = vsyncpa [#allocation3], 1 }
 0x128   :  { %987 = vsyncpa [#allocation3 + $0x1], 1 }

// kernel: low_rank_tensor_forward.11
= control target key start
LH: loop header
LB: loop body
LE: loop exit
PB: predicated region body
PF: predicated region fallthrough
CT: control target
= control target key end

     0   :  { %10 = vsyncpa [#allocation4], 0  ;;  %s2281_s0 = inlined_call_operand.vmem [shape: f32[2,18,18,64], index: 0, kind: input, shape index: {}]   ;;  %s2282_s1 = inlined_call_operand.vmem [shape: bf16[576,32], index: 1, kind: input, shape index: {}]   ;;  %s2283_s2 = inlined_call_operand.vmem [shape: f32[1,32], index: 2, kind: input, shape index: {}]   ;;  %s2284_s3 = inlined_call_operand.vmem [shape: f32[2,16,16,32], index: 3, kind: input, shape index: {}]   ;;  %s2285_s4 = inlined_call_operand.vmem [shape: f32[2,16,16,32], index: 4, kind: input, shape index: {}]   ;;  %s2286_s5 = inlined_call_operand.hbm [shape: f32[2,16,16,32], index: 5, kind: output, shape index: {}]  }
   0x1   :  { %12 = vsyncpa [#allocation4 + $0x1], 0  ;;  %s1779_s18 = smov 0   ;;  %s1781_s19 = smov 0  }
   0x2   :  { %s1783_s20 = smov 0   ;;  %s1785_s21 = smov 0  }
   0x3   :  { %s1787_s22 = smov 0   ;;  %s1789_s23 = smov 0  }
   0x4   :  { %s1791_s24 = smov 0   ;;  %s1793_s25 = smov 0  }
   0x5 LB: > { %s1297_s26 = sadd.s32 4294967295, %s1744_s25   ;;  %s1298_s27 = sadd.s32 4294967294, %s1744_s25   ;;  %s1744_s25 = sphi %s1793_s25, %s18_s25   ;;  %s1740_s24 = sphi %s1791_s24, %s2295_s24   ;;  %s1736_s23 = sphi %s1789_s23, %s2294_s23   ;;  %s1732_s22 = sphi %s1787_s22, %s2293_s22   ;;  %s1728_s21 = sphi %s1785_s21, %s2292_s21   ;;  %s1724_s20 = sphi %s1783_s20, %s2291_s20   ;;  %s1720_s19 = sphi %s1781_s19, %s2290_s19   ;;  %s1716_s18 = sphi %s1779_s18, %s2289_s18  }
   0x6   : > { %s27_s28 = sadd.s32 1, %s1736_s23  ;;  %s30_s29 = sadd.s32 1, %s1740_s24 }
   0x7   : > { %p28_p0 = scmp.ge.s32.totalorder %s27_s28, 4  ;;  %p173_p1 = scmp.ne.s32.totalorder %s1724_s20, %s1720_s19 }
   0x8   : > { %p174_p2 = scmp.eq.s32.totalorder %s1297_s26, 7  ;;  %p179_p5 = scmp.ne.s32.totalorder %s1720_s19, %s1716_s18 }
   0x9   : > { %s2297_s28 = smov (%p28_p0, %s27_s28), 0  ;;  %s2299_s29 = smov (!%p28_p0, %s30_s29), %s1740_s24 }
   0xa   : > { %s159_s30 = ssub.s32 %s1736_s23, %s2297_s28  ;;  %p1830_p3 = por %p174_p2, %p173_p1 }
   0xb   : > { %p32_p4 = scmp.ge.s32.totalorder %s2299_s29, 2  ;;  %p180_p6 = scmp.eq.s32.totalorder %s1298_s27, 7 }
   0xc   : > { %p1301_p7 = scmp.ge.s32.totalorder %s1744_s25, 1  ;;  %p240_p9 = scmp.lt.s32.totalorder %s1744_s25, 9 }
   0xd   : > { %s2301_s29 = smov (%p32_p4, %s2299_s29), 0  ;;  %p1839_p8 = por %p180_p6, %p179_p5 }
   0xe   : > { %s158_s8 = ssub.s32 %s1740_s24, %s2301_s29  ;;  %s163_s9 = sadd.s32 1, %s1724_s20 }
   0xf   : > { %s160_s10 = sor.u32 %s159_s30, %s158_s8  ;;  %p241_p10 = pnand %p1301_p7, %p240_p9 }
  0x10   : > { %p161_p11 = scmp.eq.s32.totalorder %s160_s10, 0  ;;  %p288_p12 = scmp.lt.s32.totalorder (!%p241_p10), %s1732_s22, 1 }
  0x11   : > { %244 = sbr.rel (%p241_p10) target bundleno = 393 (0x189), region = 40  ;;  %s1746_s27 = smov (!%p241_p10), 64  }
  0x12   : > { %s1848_s11 = scalar_select %p161_p11, %s1724_s20, %s163_s9  }
  0x13   : > { %s1313_s13 = smul.u32 (!%p241_p10), 96, %s1728_s21  ;;  %s1557_s15 = sshll.u32 (!%p241_p10), %s1728_s21, 3 }
  0x16   : > { %s1852_s12 = scalar_select %p288_p12, %s1732_s22, 1  ;;  %v1528_v18 = vld [vmem:[%s2282_s1 + $0x38] sm:$0xff]  ;;  %vm328_vm0 = vcmask 523264   ;;  %v1527_v19 = vld [vmem:[%s2282_s1 + $0x30] sm:$0xff]  ;;  %v1526_v23 = vld [vmem:[%s2282_s1 + $0x28] sm:$0xff]  ;;  %vm377_vm1 = vcmask 1048064  }
  0x17   : > { %1559 = vmatpush.bf16.msra.mxu2 %v1528_v18  ;;  %1558 = vmatpush.bf16.msra.mxu1 %v1528_v18  ;;  %v1525_v25 = vld [vmem:[%s2282_s1 + $0x20] sm:$0xff]  ;;  %v1524_v26 = vld [vmem:[%s2282_s1 + $0x18] sm:$0xff]  ;;  %v1523_v28 = vld [vmem:[%s2282_s1 + $0x10] sm:$0xff]  ;;  %vm1141_vm2 = vcmask 261120  }
  0x18   : > { %s1574_s14 = smul.u32 432, %s1852_s12  ;;  %964 = vmatpush.bf16.msra.mxu0 %v1528_v18  ;;  %v1522_v33 = vld [vmem:[%s2282_s1 + $0x8] sm:$0xff]  ;;  %v1521_v35 = vld [vmem:[%s2282_s1] sm:$0xff]  ;;  %v1544_v36 = vld [vmem:[%s2282_s1 + $0xb8] sm:$0xff] }
  0x19   : > { %v1552_v37 = vld [vmem:[%s2282_s1 + $0xf8] sm:$0xff]  ;;  %v1551_v38 = vld [vmem:[%s2282_s1 + $0xf0] sm:$0xff]  ;;  %v1542_v41 = vld [vmem:[%s2282_s1 + $0xa8] sm:$0xff] }
  0x1a   : > { %s292_s17 = scalar_lea.vmem %s2281_s0, %s1574_s14  ;;  %1051 = vmatpush.bf16.msra.mxu3 %v1552_v37  ;;  %v1543_v39 = vld [vmem:[%s2282_s1 + $0xb0] sm:$0xff]  ;;  %v1550_v42 = vld [vmem:[%s2282_s1 + $0xe8] sm:$0xff]  ;;  %v1549_v43 = vld [vmem:[%s2282_s1 + $0xe0] sm:$0xff] }
  0x1b   : > { %s1859_s26 = scalar_lea.vmem %s292_s17, %s1313_s13  ;;  %1561 = vmatpush.bf16.msra.mxu2 %v1527_v19  ;;  %1560 = vmatpush.bf16.msra.mxu1 %v1527_v19  ;;  %v1541_v44 = vld [vmem:[%s2282_s1 + $0xa0] sm:$0xff]  ;;  %v1536_v48 = vld [vmem:[%s2282_s1 + $0x78] sm:$0xff]  ;;  %v1535_v51 = vld [vmem:[%s2282_s1 + $0x70] sm:$0xff]  ;;  %s1306_s13 = sshll.u32 %s1852_s12, 5 }
  0x1c   : > { %v1862_v0 = vld [vmem:[%s1859_s26 + $0x49] sm:$0xff]  ;;  %v339_v1 = vld [vmem:[%s1859_s26 + $0x19] sm:$0xff]  ;;  %v1869_v2 = vld [vmem:[%s1859_s26 + $0x31] sm:$0xff]  ;;  %965 = vmatpush.bf16.msra.mxu0 %v1527_v19  ;;  %s285_s12 = sand.u32 1, %s1720_s19  }
  0x1d   : > { %365 = vrot.lane.b32.xlu1 %v1862_v0, %s1746_s27  ;;  %357 = vrot.lane.b32.xlu0 %v339_v1, %s1746_s27  ;;  %v1874_v3 = vld [vmem:[%s1859_s26 + $0x51] sm:$0xff]  ;;  %v340_v4 = vld [vmem:[%s1859_s26 + $0x21] sm:$0xff]  ;;  %461 = vst.msk [vmem:[#allocation2 + $0x10] sm:$0xff] %vm328_vm0, %v339_v1 }
  0x1e   : > { %361 = vrot.lane.b32.xlu2 %v1869_v2, %s1746_s27  ;;  %v1878_v5 = vld [vmem:[%s1859_s26 + $0x39] sm:$0xff]  ;;  %v338_v6 = vld [vmem:[%s1859_s26 + $0x9] sm:$0xff]  ;;  %v337_v7 = vld [vmem:[%s1859_s26 + $0x1] sm:$0xff]  ;;  %462 = vst.msk [vmem:[#allocation2 + $0x38] sm:$0xff] %vm328_vm0, %v340_v4  ;;  %1052 = vmatpush.bf16.msra.mxu3 %v1551_v38 }
  0x1f   : > { %v1888_v8 = vld [vmem:[%s1859_s26 + $0x1a] sm:$0xff]  ;;  %v1895_v9 = vld [vmem:[%s1859_s26 + $0x22] sm:$0xff]  ;;  %v1906_v12 = vld [vmem:[%s1859_s26 + $0x32] sm:$0xff]  ;;  %1563 = vmatpush.bf16.msra.mxu2 %v1526_v23  ;;  %1562 = vmatpush.bf16.msra.mxu1 %v1526_v23  ;;  %463 = vst.msk [vmem:[#allocation2 + $0x60] sm:$0xff] %vm328_vm0, %v1869_v2 }
  0x20   : > { %v1317_v10 = vld [vmem:[%s1859_s26 + $0x20] sm:$0xff]  ;;  %v1316_v11 = vld [vmem:[%s1859_s26 + $0x18] sm:$0xff]  ;;  %v1318_v15 = vld [vmem:[%s1859_s26 + $0x30] sm:$0xff]  ;;  %966 = vmatpush.bf16.msra.mxu0 %v1526_v23  ;;  %464 = vst.msk [vmem:[#allocation2 + $0x88] sm:$0xff] %vm328_vm0, %v1878_v5 }
  0x21   : > { %v1913_v13 = vld [vmem:[%s1859_s26 + $0x3a] sm:$0xff]  ;;  %v1924_v16 = vld [vmem:[%s1859_s26 + $0x4a] sm:$0xff]  ;;  %333 = vst.msk [vmem:[#allocation2 + $0xa0] sm:$0xff] %vm328_vm0, %v1318_v15  ;;  %v1944_v22 = vld [vmem:[%s1859_s26 + $0x52] sm:$0xff] }
  0x22   : > { %v1319_v14 = vld [vmem:[%s1859_s26 + $0x38] sm:$0xff]  ;;  %v1320_v17 = vld [vmem:[%s1859_s26 + $0x48] sm:$0xff]  ;;  %v1321_v20 = vld [vmem:[%s1859_s26 + $0x50] sm:$0xff]  ;;  %331 = vst.msk [vmem:[#allocation2 + $0x50] sm:$0xff] %vm328_vm0, %v1316_v11  ;;  %1053 = vmatpush.bf16.msra.mxu3 %v1550_v42 }
  0x23   : > { %335 = vst.msk [vmem:[#allocation2 + $0xf0] sm:$0xff] %vm328_vm0, %v1320_v17  ;;  %v1354_v21 = vld [vmem:[%s1859_s26 + $0x61] sm:$0xff]  ;;  %v1355_v24 = vld [vmem:[%s1859_s26 + $0x69] sm:$0xff]  ;;  %1565 = vmatpush.bf16.msra.mxu2 %v1525_v25  ;;  %1564 = vmatpush.bf16.msra.mxu1 %v1525_v25  ;;  %v1356_v31 = vld [vmem:[%s1859_s26 + $0x79] sm:$0xff] }
  0x24   : > { %336 = vst.msk [vmem:[#allocation2 + $0x118] sm:$0xff] %vm328_vm0, %v1321_v20  ;;  %v1338_v27 = vld [vmem:[%s1859_s26 + $0x62] sm:$0xff]  ;;  %967 = vmatpush.bf16.msra.mxu0 %v1525_v25  ;;  %v1339_v32 = vld [vmem:[%s1859_s26 + $0x6a] sm:$0xff]  ;;  %v1540_v49 = vld [vmem:[%s2282_s1 + $0x98] sm:$0xff] }
  0x25   : > { %367 = vrot.lane.b32.xlu1 %v1874_v3, %s1746_s27  ;;  %359 = vrot.lane.b32.xlu0 %v340_v4, %s1746_s27  ;;  %334 = vst.msk [vmem:[#allocation2 + $0xc8] sm:$0xff] %vm328_vm0, %v1319_v14  ;;  %v1323_v29 = vld [vmem:[%s1859_s26 + $0x68] sm:$0xff]  ;;  %v1322_v30 = vld [vmem:[%s1859_s26 + $0x60] sm:$0xff] }
  0x26   : > { %363 = vrot.lane.b32.xlu2 %v1878_v5, %s1746_s27  ;;  %332 = vst.msk [vmem:[#allocation2 + $0x78] sm:$0xff] %vm328_vm0, %v1317_v10  ;;  %v1357_v34 = vld [vmem:[%s1859_s26 + $0x81] sm:$0xff]  ;;  %1054 = vmatpush.bf16.msra.mxu3 %v1549_v43  ;;  %v1548_v50 = vld [vmem:[%s2282_s1 + $0xd8] sm:$0xff]  ;;  %v1539_v52 = vld [vmem:[%s2282_s1 + $0x90] sm:$0xff] }
  0x27   : > { %529 = vst.msk [vmem:[#allocation2 + $0x40] sm:$0xff] %vm328_vm0, %v1319_v14  ;;  %1567 = vmatpush.bf16.msra.mxu2 %v1524_v26  ;;  %1566 = vmatpush.bf16.msra.mxu1 %v1524_v26  ;;  %v321_v45 = vld [vmem:[%s1859_s26 + $0x8] sm:$0xff]  ;;  %v320_v46 = vld [vmem:[%s1859_s26] sm:$0xff]  ;;  %v1547_v53 = vld [vmem:[%s2282_s1 + $0xd0] sm:$0xff] }
  0x28   : > { %528 = vst.msk [vmem:[#allocation2 + $0x18] sm:$0xff] %vm328_vm0, %v1318_v15  ;;  %968 = vmatpush.bf16.msra.mxu0 %v1524_v26  ;;  %v1534_v55 = vld [vmem:[%s2282_s1 + $0x68] sm:$0xff]  ;;  %v1533_v58 = vld [vmem:[%s2282_s1 + $0x60] sm:$0xff]  ;;  %v1556_v1 = vld [vmem:[%s2282_s1 + $0x118] sm:$0xff] }
  0x29   : > { %531 = vst.msk [vmem:[#allocation2 + $0x90] sm:$0xff] %vm328_vm0, %v1321_v20  ;;  %v1538_v56 = vld [vmem:[%s2282_s1 + $0x88] sm:$0xff]  ;;  %v1537_v59 = vld [vmem:[%s2282_s1 + $0x80] sm:$0xff]  ;;  %v1555_v4 = vld [vmem:[%s2282_s1 + $0x110] sm:$0xff] }
  0x2a   : > { %530 = vst.msk [vmem:[#allocation2 + $0x68] sm:$0xff] %vm328_vm0, %v1320_v17  ;;  %1055 = vmatpush.bf16.msra.mxu3 %v1548_v50  ;;  %v1546_v57 = vld [vmem:[%s2282_s1 + $0xc8] sm:$0xff]  ;;  %v1545_v61 = vld [vmem:[%s2282_s1 + $0xc0] sm:$0xff] }
  0x2b   : > { %465 = vst.msk [vmem:[#allocation2 + $0xb0] sm:$0xff] %vm328_vm0, %v1862_v0  ;;  %1569 = vmatpush.bf16.msra.mxu2 %v1523_v28  ;;  %1568 = vmatpush.bf16.msra.mxu1 %v1523_v28  ;;  %v387_v60 = vld [vmem:[%s1859_s26 + $0xa] sm:$0xff] }
  0x2c   : > { %397 = vst.msk [vmem:[#allocation2 + $0x80] sm:$0xff] %vm328_vm0, %v1895_v9  ;;  %969 = vmatpush.bf16.msra.mxu0 %v1523_v28 }
  0x2d   : > { %355 = vrot.lane.b32.xlu1 %v338_v6, %s1746_s27  ;;  %353 = vrot.lane.b32.xlu0 %v337_v7, %s1746_s27  ;;  %396 = vst.msk [vmem:[#allocation2 + $0x58] sm:$0xff] %vm328_vm0, %v1888_v8 }
  0x2e   : > { %485 = vrot.lane.b32.xlu2 %v1888_v8, %s1746_s27  ;;  %592 = vst.msk [vmem:[#allocation2 + $0x20] sm:$0xff] %vm328_vm0, %v1906_v12  ;;  %1056 = vmatpush.bf16.msra.mxu3 %v1547_v53  ;;  %v1554_v8 = vld [vmem:[%s2282_s1 + $0x108] sm:$0xff] }
  0x2f   : > { %593 = vst.msk [vmem:[#allocation2 + $0x48] sm:$0xff] %vm328_vm0, %v1913_v13  ;;  %1571 = vmatpush.bf16.msra.mxu2 %v1522_v33  ;;  %1570 = vmatpush.bf16.msra.mxu1 %v1522_v33 }
  0x30   : > { %533 = vst.msk [vmem:[#allocation2 + $0xe0] sm:$0xff] %vm328_vm0, %v1323_v29  ;;  %970 = vmatpush.bf16.msra.mxu0 %v1522_v33 }
  0x31   : > { %532 = vst.msk [vmem:[#allocation2 + $0xb8] sm:$0xff] %vm328_vm0, %v1322_v30 }
  0x32   : > { %466 = vst.msk [vmem:[#allocation2 + $0xd8] sm:$0xff] %vm328_vm0, %v1874_v3  ;;  %1057 = vmatpush.bf16.msra.mxu3 %v1546_v57 }
  0x33   : > { %467 = vst.msk [vmem:[#allocation2 + $0x100] sm:$0xff] %vm328_vm0, %v1354_v21  ;;  %1573 = vmatpush.bf16.msra.mxu2 %v1521_v35  ;;  %1572 = vmatpush.bf16.msra.mxu1 %v1521_v35 }
  0x34   : > { %399 = vst.msk [vmem:[#allocation2 + $0xd0] sm:$0xff] %vm328_vm0, %v1913_v13  ;;  %971 = vmatpush.bf16.msra.mxu0 %v1521_v35 }
  0x35   : > { %552 = vrot.lane.b32.xlu1 %v1869_v2, %s1746_s27  ;;  %487 = vrot.lane.b32.xlu0 %v1895_v9, %s1746_s27  ;;  %398 = vst.msk [vmem:[#allocation2 + $0xa8] sm:$0xff] %vm328_vm0, %v1906_v12  ;;  %v604_v42 = vld [vmem:[#allocation2 + $0x20] sm:$0xff] }
  0x36   : > { %554 = vrot.lane.b32.xlu2 %v1878_v5, %s1746_s27  ;;  %594 = vst.msk [vmem:[#allocation2 + $0x70] sm:$0xff] %vm328_vm0, %v1924_v16  ;;  %1058 = vmatpush.bf16.msra.mxu3 %v1545_v61  ;;  %v1531_v5 = vld [vmem:[%s2282_s1 + $0x50] sm:$0xff]  ;;  %v609_v43 = vld [vmem:[#allocation2 + $0x48] sm:$0xff] }
  0x37   : > { %595 = vst.msk [vmem:[#allocation2 + $0x98] sm:$0xff] %vm328_vm0, %v1944_v22  ;;  %1022 = vmatpush.bf16.msrb.mxu2 %v1544_v36  ;;  %993 = vmatpush.bf16.msrb.mxu1 %v1536_v48  ;;  %v1365_v61 = vld [vmem:[%s1859_s26 + $0x82] sm:$0xff] }
  0x38   : > { %468 = vst.msk [vmem:[#allocation2 + $0x128] sm:$0xff] %vm328_vm0, %v1355_v24  ;;  %1084 = vmatpush.bf16.msrb.mxu0 %v1556_v1 }
  0x39   : > { %596 = vst.msk [vmem:[#allocation2 + $0xc0] sm:$0xff] %vm328_vm0, %v1338_v27 }
  0x3a   : > { %597 = vst.msk [vmem:[#allocation2 + $0xe8] sm:$0xff] %vm328_vm0, %v1339_v32 }
  0x3b   : > { %401 = vst.msk [vmem:[#allocation2 + $0x120] sm:$0xff] %vm328_vm0, %v1944_v22  ;;  %1023 = vmatpush.bf16.msrb.mxu2 %v1543_v39  ;;  %994 = vmatpush.bf16.msrb.mxu1 %v1535_v51 }
  0x3c   : > { %400 = vst.msk [vmem:[#allocation2 + $0xf8] sm:$0xff] %vm328_vm0, %v1924_v16  ;;  %1085 = vmatpush.bf16.msrb.mxu0 %v1555_v4 }
  0x3d   : > { %423 = vrot.lane.b32.xlu1 %v1317_v10, %s1746_s27  ;;  %421 = vrot.lane.b32.xlu0 %v1316_v11, %s1746_s27  ;;  %330 = vst.msk [vmem:[#allocation2 + $0x28] sm:$0xff] %vm328_vm0, %v321_v45  ;;  %v1530_v10 = vld [vmem:[%s2282_s1 + $0x48] sm:$0xff]  ;;  %v1553_v11 = vld [vmem:[%s2282_s1 + $0x100] sm:$0xff] }
  0x3e   : > { %489 = vrot.lane.b32.xlu2 %v1906_v12, %s1746_s27  ;;  %329 = vst.msk [vmem:[#allocation2] sm:$0xff] %vm328_vm0, %v320_v46  ;;  %v1529_v12 = vld [vmem:[%s2282_s1 + $0x40] sm:$0xff]  ;;  %v644_v46 = vpack.c.bf16 %v609_v43, %v604_v42 }
  0x3f   : > { %1024 = vmatpush.bf16.msrb.mxu2 %v1542_v41  ;;  %995 = vmatpush.bf16.msrb.mxu1 %v1534_v55  ;;  %395 = vst.msk [vmem:[#allocation2 + $0x30] sm:$0xff] %vm328_vm0, %v387_v60  ;;  %v1348_v41 = vld [vmem:[%s1859_s26 + $0x78] sm:$0xff] }
  0x40   : > { %1086 = vmatpush.bf16.msrb.mxu0 %v1554_v8  ;;  %534 = vst.msk [vmem:[#allocation2 + $0x108] sm:$0xff] %vm328_vm0, %v1348_v41  ;;  %v1364_v60 = vld [vmem:[%s1859_s26 + $0x7a] sm:$0xff] }
  0x41   : > { %598 = vst.msk [vmem:[#allocation2 + $0x110] sm:$0xff] %vm328_vm0, %v1364_v60 }
  0x42   : > { %599 = vst.msk [vmem:[#allocation2 + $0x138] sm:$0xff] %vm328_vm0, %v1365_v61 }
  0x43   : > { %1025 = vmatpush.bf16.msrb.mxu2 %v1541_v44  ;;  %996 = vmatpush.bf16.msrb.mxu1 %v1533_v58 }
  0x44   : > { %1087 = vmatpush.bf16.msrb.mxu0 %v1553_v11 }
  0x45   : > { %556 = vrot.lane.b32.xlu1 %v1862_v0, %s1746_s27  ;;  %491 = vrot.lane.b32.xlu0 %v1913_v13, %s1746_s27  ;;  %v386_v0 = vld [vmem:[%s1859_s26 + $0x2] sm:$0xff] }
  0x46   : > { %558 = vrot.lane.b32.xlu2 %v1874_v3, %s1746_s27  ;;  %v1532_v3 = vld [vmem:[%s2282_s1 + $0x58] sm:$0xff]  ;;  %394 = vst.msk [vmem:[#allocation2 + $0x8] sm:$0xff] %vm328_vm0, %v386_v0 }
  0x47   : > { %1026 = vmatpush.bf16.msrb.mxu2 %v1540_v49  ;;  %997 = vmatpush.bf16.msrb.mxu1 %v1532_v3 }
  0x4b   : > { %1027 = vmatpush.bf16.msrb.mxu2 %v1539_v52  ;;  %998 = vmatpush.bf16.msrb.mxu1 %v1531_v5 }
  0x4d   : > { %427 = vrot.lane.b32.xlu1 %v1319_v14, %s1746_s27  ;;  %425 = vrot.lane.b32.xlu0 %v1318_v15, %s1746_s27 }
  0x4e   : > { %493 = vrot.lane.b32.xlu2 %v1924_v16, %s1746_s27 }
  0x4f   : > { %1028 = vmatpush.bf16.msrb.mxu2 %v1538_v56  ;;  %999 = vmatpush.bf16.msrb.mxu1 %v1530_v10 }
  0x53   : > { %1029 = vmatpush.bf16.msrb.mxu2 %v1537_v59  ;;  %1000 = vmatpush.bf16.msrb.mxu1 %v1529_v12 }
  0x55   : > { %560 = vrot.lane.b32.xlu1 %v1354_v21, %s1746_s27  ;;  %495 = vrot.lane.b32.xlu0 %v1944_v22, %s1746_s27 }
  0x56   : > { %562 = vrot.lane.b32.xlu2 %v1355_v24, %s1746_s27 }
  0x5d   : > { %431 = vrot.lane.b32.xlu1 %v1321_v20, %s1746_s27  ;;  %429 = vrot.lane.b32.xlu0 %v1320_v17, %s1746_s27 }
  0x5e   : > { %497 = vrot.lane.b32.xlu2 %v1338_v27, %s1746_s27 }
  0x65   : > { %564 = vrot.lane.b32.xlu1 %v1356_v31, %s1746_s27  ;;  %499 = vrot.lane.b32.xlu0 %v1339_v32, %s1746_s27 }
  0x66   : > { %566 = vrot.lane.b32.xlu2 %v1357_v34, %s1746_s27 }
  0x6d   : > { %435 = vrot.lane.b32.xlu1 %v1323_v29, %s1746_s27  ;;  %433 = vrot.lane.b32.xlu0 %v1322_v30, %s1746_s27 }
  0x78   : > { %v362_v40 = vpop.permute.xlu2 %361 }
  0x79   : > { %382 = vst.msk [vmem:[#allocation2 + $0xa0] sm:$0xff] %vm377_vm1, %v362_v40  ;;  %v1349_v40 = vld [vmem:[%s1859_s26 + $0x80] sm:$0xff]  ;;  %s1304_s26 = sshll.u32 %s1728_s21, 2 }
  0x7a   : > { %535 = vst.msk [vmem:[#allocation2 + $0x130] sm:$0xff] %vm328_vm0, %v1349_v40  ;;  %p296_p13 = scmp.lt.s32.totalorder %s1304_s26, 15 }
  0x7c   : > { %s2303_s26 = smov (!%p296_p13, %s1304_s26), 15 }
  0x7d   : > { %s1305_s27 = sshll.u32 %s2303_s26, 1 }
  0x7e   : > { %s300_s16 = sadd.s32 %s1306_s13, %s1305_s27  ;;  %s1302_s13 = sshll.u32 %s285_s12, 6 }
  0x7f   : > { %s1307_s17 = sshll.u32 %s300_s16, 3  ;;  %s2193_s14 = scalar_lea.vmem [#allocation3], %s1302_s13 }
  0x80   : > { %v364_v47 = vpop.permute.xlu2 %363  ;;  %v620_v29 = vld [vmem:[#allocation2 + $0xa0] sm:$0xff]  ;;  %s2180_s9 = scalar_lea.vmem %s2284_s3, %s1307_s17  ;;  %s2186_s27 = scalar_lea.vmem %s2285_s4, %s1307_s17 }
  0x81   : > { %383 = vst.msk [vmem:[#allocation2 + $0xc8] sm:$0xff] %vm377_vm1, %v364_v47  ;;  %s1517_s16 = sshll.u32 %s1732_s22, 5  ;;  %s1166_s10 = sshll.u32 %s2193_s14, 4  ;;  %s1167_s10 = int_to_ptr.vmem [resolvable:$true] %s1166_s10 }
  0x82   : > { %s1163_s17 = sadd.s32 %s1557_s15, %s1517_s16  ;;  %s1151_s13 = scalar_lea.sflag [#allocation4], %s285_s12 }
  0x83   : > { %s1518_s21 = sshll.u32 %s1163_s17, 3 }
  0x84   : > { %s1165_s8 = scalar_lea.hbm %s2286_s5, %s1518_s21  ;;  %s1670_s21 = scalar_lea.hbm %s2286_s5, 512 }
  0x85   : > { %s1168_s26 = sshll.u32 %s1165_s8, 4  ;;  %s1169_s26 = int_to_ptr.hbm [resolvable:$true] %s1168_s26 }
  0x86   : > { %s1664_s15 = sshra.s32 %s1169_s26, 4  ;;  %s1665_s15 = int_to_ptr.hbm [resolvable:$true] %s1664_s15 }
  0x87   : > { %s1666_s16 = scalar_lea.hbm %s1665_s15, 64  ;;  %p1671_p4 = scmp.lt.s32.totalorder %s1665_s15, %s2286_s5 }
  0x88   : > { %v486_v54 = vpop.permute.xlu2 %485  ;;  %v625_v30 = vld [vmem:[#allocation2 + $0xc8] sm:$0xff]  ;;  %p1667_p0 = scmp.ne.s32.totalorder %s1665_s15, %s1666_s16  ;;  %p1672_p5 = scmp.lt.s32.totalorder %s1670_s21, %s1666_s16 }
  0x89   : > { %509 = vst.msk [vmem:[#allocation2 + $0x10] sm:$0xff] %vm377_vm1, %v486_v54  ;;  %v650_v37 = vpack.c.bf16 %v625_v30, %v620_v29  ;;  %v634_v30 = vld [vmem:[#allocation2 + $0x110] sm:$0xff] }
  0x8a   : > { %p1668_p1 = pnand %p1667_p0, %p1830_p3  ;;  %p1673_p6 = por %p1672_p5, %p1671_p4 }
  0x8c   : > { %p1669_p2 = pneg %p1668_p1 }
  0x8e   : > { %p1674_p7 = pnand %p1673_p6, %p1669_p2 }
  0x8f   : > { %v366_v62 = vpop.permute.xlu1 %365  ;;  %v358_v63 = vpop.permute.xlu0 %357 }
  0x90   : > { %384 = vst.msk [vmem:[#allocation2 + $0xf0] sm:$0xff] %vm377_vm1, %v366_v62  ;;  %v555_v2 = vpop.permute.xlu2 %554  ;;  %v602_v31 = vld [vmem:[#allocation2 + $0x10] sm:$0xff] }
  0x91   : > { %380 = vst.msk [vmem:[#allocation2 + $0x50] sm:$0xff] %vm377_vm1, %v358_v63  ;;  %v614_v62 = vld [vmem:[#allocation2 + $0x70] sm:$0xff]  ;;  %v619_v63 = vld [vmem:[#allocation2 + $0x98] sm:$0xff] }
  0x92   : > { %577 = vst.msk [vmem:[#allocation2 + $0x40] sm:$0xff] %vm377_vm1, %v555_v2  ;;  %v649_v2 = vpack.c.bf16 %v619_v63, %v614_v62 }
  0x97   : > { %v368_v6 = vpop.permute.xlu1 %367  ;;  %v360_v7 = vpop.permute.xlu0 %359  ;;  %v630_v13 = vld [vmem:[#allocation2 + $0xf0] sm:$0xff] }
  0x98   : > { %385 = vst.msk [vmem:[#allocation2 + $0x118] sm:$0xff] %vm377_vm1, %v368_v6  ;;  %v490_v9 = vpop.permute.xlu2 %489  ;;  %v610_v17 = vld [vmem:[#allocation2 + $0x50] sm:$0xff] }
  0x99   : > { %381 = vst.msk [vmem:[#allocation2 + $0x78] sm:$0xff] %vm377_vm1, %v360_v7  ;;  %v608_v28 = vld [vmem:[#allocation2 + $0x40] sm:$0xff] }
  0x9a   : > { %511 = vst.msk [vmem:[#allocation2 + $0x60] sm:$0xff] %vm377_vm1, %v490_v9 }
  0x9f   : > { %v356_v14 = vpop.permute.xlu1 %355  ;;  %v354_v15 = vpop.permute.xlu0 %353  ;;  %v635_v16 = vld [vmem:[#allocation2 + $0x118] sm:$0xff] }
  0xa0   : > { %379 = vst.msk [vmem:[#allocation2 + $0x28] sm:$0xff] %vm377_vm1, %v356_v14  ;;  %v615_v18 = vld [vmem:[#allocation2 + $0x78] sm:$0xff]  ;;  %v655_v19 = vpack.c.bf16 %v635_v16, %v630_v13  ;;  %v559_v21 = vpop.permute.xlu2 %558  ;;  %v624_v14 = vld [vmem:[#allocation2 + $0xc0] sm:$0xff] }
  0xa1   : > { %378 = vst.msk [vmem:[#allocation2] sm:$0xff] %vm377_vm1, %v354_v15  ;;  %v645_v20 = vpack.c.bf16 %v615_v18, %v610_v17  ;;  %v612_v51 = vld [vmem:[#allocation2 + $0x60] sm:$0xff]  ;;  %v629_v15 = vld [vmem:[#allocation2 + $0xe8] sm:$0xff] }
  0xa2   : > { %987 = vmatmul.bf16.vlgmr.msra.gmra.mxu2 %v655_v19  ;;  %579 = vst.msk [vmem:[#allocation2 + $0x90] sm:$0xff] %vm377_vm1, %v559_v21  ;;  %v654_v18 = vpack.c.bf16 %v629_v15, %v624_v14 }
  0xa3   : > { %977 = vmatmul.bf16.vlgmr.msra.gmra.mxu1 %v645_v20 }
  0xa7   : > { %v553_v22 = vpop.permute.xlu1 %552  ;;  %v488_v23 = vpop.permute.xlu0 %487  ;;  %v605_v24 = vld [vmem:[#allocation2 + $0x28] sm:$0xff] }
  0xa8   : > { %576 = vst.msk [vmem:[#allocation2 + $0x18] sm:$0xff] %vm377_vm1, %v553_v22  ;;  %v600_v25 = vld [vmem:[#allocation2] sm:$0xff]  ;;  %v494_v27 = vpop.permute.xlu2 %493 }
  0xa9   : > { %510 = vst.msk [vmem:[#allocation2 + $0x38] sm:$0xff] %vm377_vm1, %v488_v23  ;;  %v640_v26 = vpack.c.bf16 %v605_v24, %v600_v25  ;;  %v618_v50 = vld [vmem:[#allocation2 + $0x90] sm:$0xff] }
  0xaa   : > { %513 = vst.msk [vmem:[#allocation2 + $0xb0] sm:$0xff] %vm377_vm1, %v494_v27 }
  0xab   : > { %972 = vmatmul.bf16.vlgmr.msra.gmra.mxu0 %v640_v26 }
  0xaf   : > { %v424_v32 = vpop.permute.xlu1 %423  ;;  %v422_v33 = vpop.permute.xlu0 %421  ;;  %v603_v34 = vld [vmem:[#allocation2 + $0x18] sm:$0xff] }
  0xb0   : > { %446 = vst.msk [vmem:[#allocation2 + $0x30] sm:$0xff] %vm377_vm1, %v424_v32  ;;  %v607_v35 = vld [vmem:[#allocation2 + $0x38] sm:$0xff]  ;;  %v643_v36 = vpack.c.bf16 %v608_v28, %v603_v34  ;;  %v563_v39 = vpop.permute.xlu2 %562 }
  0xb1   : > { %445 = vst.msk [vmem:[#allocation2 + $0x8] sm:$0xff] %vm377_vm1, %v422_v33  ;;  %v642_v38 = vpack.c.bf16 %v607_v35, %v602_v31  ;;  %v622_v6 = vld [vmem:[#allocation2 + $0xb0] sm:$0xff]  ;;  %v639_v31 = vld [vmem:[#allocation2 + $0x138] sm:$0xff] }
  0xb2   : > { %1059 = vmatmul.bf16.vlgmr.msra.gmra.mxu3 %v643_v36  ;;  %581 = vst.msk [vmem:[#allocation2 + $0xe0] sm:$0xff] %vm377_vm1, %v563_v39  ;;  %v659_v32 = vpack.c.bf16 %v639_v31, %v634_v30  ;;  %v1112_v30 = vld [vmem:[%s2180_s9 + $0x18] sm:$0xff] }
  0xb3   : > { %982 = vmatmul.bf16.gmra.mxu1 %v650_v37  ;;  %1030 = vmatmul.bf16.vlgmr.msrb.gmra.mxu2 %v642_v38 }
  0xb7   : > { %v557_v44 = vpop.permute.xlu1 %556  ;;  %v492_v45 = vpop.permute.xlu0 %491  ;;  %v606_v49 = vld [vmem:[#allocation2 + $0x30] sm:$0xff] }
  0xb8   : > { %578 = vst.msk [vmem:[#allocation2 + $0x68] sm:$0xff] %vm377_vm1, %v557_v44  ;;  %v498_v47 = vpop.permute.xlu2 %497  ;;  %v601_v48 = vld [vmem:[#allocation2 + $0x8] sm:$0xff] }
  0xb9   : > { %512 = vst.msk [vmem:[#allocation2 + $0x88] sm:$0xff] %vm377_vm1, %v492_v45  ;;  %v641_v54 = vpack.c.bf16 %v606_v49, %v601_v48  ;;  %v628_v5 = vld [vmem:[#allocation2 + $0xe0] sm:$0xff] }
  0xba   : > { %515 = vst.msk [vmem:[#allocation2 + $0x100] sm:$0xff] %vm377_vm1, %v498_v47  ;;  %v2174_v47 = vld [vmem:[%s2283_s2] ss:$0 sm:$0xff] }
  0xbb   : > { %1510 = vmatmul.msk.bf16.vlgmr.msrb.gmra.mxu0 %vm328_vm0, %v644_v46 }
  0xbf   : > { %v428_v52 = vpop.permute.xlu1 %427  ;;  %v426_v53 = vpop.permute.xlu0 %425  ;;  %v613_v55 = vld [vmem:[#allocation2 + $0x68] sm:$0xff] }
  0xc0   : > { %448 = vst.msk [vmem:[#allocation2 + $0x80] sm:$0xff] %vm377_vm1, %v428_v52  ;;  %v617_v56 = vld [vmem:[#allocation2 + $0x88] sm:$0xff]  ;;  %v648_v57 = vpack.c.bf16 %v618_v50, %v613_v55  ;;  %v567_v59 = vpop.permute.xlu2 %566 }
  0xc1   : > { %447 = vst.msk [vmem:[#allocation2 + $0x58] sm:$0xff] %vm377_vm1, %v426_v53  ;;  %v647_v58 = vpack.c.bf16 %v617_v56, %v612_v51  ;;  %v632_v22 = vld [vmem:[#allocation2 + $0x100] sm:$0xff] }
  0xc2   : > { %1064 = vmatmul.bf16.gmra.mxu3 %v648_v57  ;;  %583 = vst.msk [vmem:[#allocation2 + $0x130] sm:$0xff] %vm377_vm1, %v567_v59  ;;  %v1109_v56 = vld [vmem:[%s2180_s9] sm:$0xff] }
  0xc3   : > { %1001 = vmatmul.bf16.vlgmr.msrb.gmra.mxu1 %v641_v54  ;;  %1035 = vmatmul.bf16.gmra.mxu2 %v647_v58  ;;  %v1125_v59 = vld [vmem:[%s2186_s27] sm:$0xff] }
  0xc7   : > { %v561_v0 = vpop.permute.xlu1 %560  ;;  %v496_v1 = vpop.permute.xlu0 %495  ;;  %v616_v4 = vld [vmem:[#allocation2 + $0x80] sm:$0xff] }
  0xc8   : > { %580 = vst.msk [vmem:[#allocation2 + $0xb8] sm:$0xff] %vm377_vm1, %v561_v0  ;;  %v611_v3 = vld [vmem:[#allocation2 + $0x58] sm:$0xff] }
  0xc9   : > { %514 = vst.msk [vmem:[#allocation2 + $0xd8] sm:$0xff] %vm377_vm1, %v496_v1  ;;  %v646_v9 = vpack.c.bf16 %v616_v4, %v611_v3  ;;  %v638_v21 = vld [vmem:[#allocation2 + $0x130] sm:$0xff] }
  0xcb   : > { %1511 = vmatmul.msk.bf16.gmra.mxu0 %vm328_vm0, %v649_v2 }
  0xcf   : > { %v432_v7 = vpop.permute.xlu1 %431  ;;  %v430_v8 = vpop.permute.xlu0 %429  ;;  %v623_v10 = vld [vmem:[#allocation2 + $0xb8] sm:$0xff] }
  0xd0   : > { %450 = vst.msk [vmem:[#allocation2 + $0xd0] sm:$0xff] %vm377_vm1, %v432_v7  ;;  %v627_v11 = vld [vmem:[#allocation2 + $0xd8] sm:$0xff]  ;;  %v653_v12 = vpack.c.bf16 %v628_v5, %v623_v10  ;;  %v1110_v5 = vld [vmem:[%s2180_s9 + $0x8] sm:$0xff] }
  0xd1   : > { %449 = vst.msk [vmem:[#allocation2 + $0xa8] sm:$0xff] %vm377_vm1, %v430_v8  ;;  %v652_v13 = vpack.c.bf16 %v627_v11, %v622_v6  ;;  %v1126_v8 = vld [vmem:[%s2186_s27 + $0x8] sm:$0xff] }
  0xd2   : > { %1069 = vmatmul.bf16.gmra.mxu3 %v653_v12 }
  0xd3   : > { %1006 = vmatmul.bf16.gmra.mxu1 %v646_v9  ;;  %1040 = vmatmul.bf16.gmra.mxu2 %v652_v13 }
  0xd7   : > { %v565_v16 = vpop.permute.xlu1 %564  ;;  %v500_v17 = vpop.permute.xlu0 %499  ;;  %v626_v20 = vld [vmem:[#allocation2 + $0xd0] sm:$0xff] }
  0xd8   : > { %582 = vst.msk [vmem:[#allocation2 + $0x108] sm:$0xff] %vm377_vm1, %v565_v16  ;;  %v621_v19 = vld [vmem:[#allocation2 + $0xa8] sm:$0xff] }
  0xd9   : > { %516 = vst.msk [vmem:[#allocation2 + $0x128] sm:$0xff] %vm377_vm1, %v500_v17  ;;  %v651_v23 = vpack.c.bf16 %v626_v20, %v621_v19  ;;  %v1111_v17 = vld [vmem:[%s2180_s9 + $0x10] sm:$0xff] }
  0xdb   : > { %1512 = vmatmul.msk.bf16.gmra.mxu0 %vm328_vm0, %v654_v18 }
  0xdf   : > { %v633_v24 = vld [vmem:[#allocation2 + $0x108] sm:$0xff]  ;;  %v436_v25 = vpop.permute.xlu1 %435  ;;  %v434_v26 = vpop.permute.xlu0 %433 }
  0xe0   : > { %v637_v27 = vld [vmem:[#allocation2 + $0x128] sm:$0xff]  ;;  %v658_v28 = vpack.c.bf16 %v638_v21, %v633_v24  ;;  %452 = vst.msk [vmem:[#allocation2 + $0x120] sm:$0xff] %vm377_vm1, %v436_v25  ;;  %v1127_v21 = vld [vmem:[%s2186_s27 + $0x10] sm:$0xff] }
  0xe1   : > { %v657_v29 = vpack.c.bf16 %v637_v27, %v632_v22  ;;  %451 = vst.msk [vmem:[#allocation2 + $0xf8] sm:$0xff] %vm377_vm1, %v434_v26 }
  0xe2   : > { %1074 = vmatmul.bf16.gmra.mxu3 %v658_v28 }
  0xe3   : > { %1011 = vmatmul.bf16.gmra.mxu1 %v651_v23  ;;  %1045 = vmatmul.bf16.gmra.mxu2 %v657_v29 }
  0xe7   : > { %v636_v34 = vld [vmem:[#allocation2 + $0x120] sm:$0xff] }
  0xe8   : > { %v631_v33 = vld [vmem:[#allocation2 + $0xf8] sm:$0xff] }
  0xe9   : > { %v656_v35 = vpack.c.bf16 %v636_v34, %v631_v33  ;;  %v1128_v33 = vld [vmem:[%s2186_s27 + $0x18] sm:$0xff] }
  0xeb   : > { %1513 = vmatmul.msk.bf16.gmra.mxu0 %vm328_vm0, %v659_v32 }
  0xf3   : > { %1016 = vmatmul.bf16.gmra.mxu1 %v656_v35 }
 0x120   : > { %v978_v36 = vpop.f32.mrf.mxu1 }
 0x121   : > { %v979_v6 = vadd.f32 %v2174_v47, %v978_v36 }
 0x125   : > { %v2161_v37 = vpop.f32.mrf.mxu2 }
 0x128   : > { %v973_v38 = vpop.f32.mrf.mxu0  ;;  %v980_v39 = vpop.f32.mrf.mxu1 }
 0x129   : > { %v974_v49 = vadd.f32 %v2174_v47, %v973_v38  ;;  %v981_v19 = vadd.f32 %v2174_v47, %v980_v39 }
 0x12d   : > { %v2163_v40 = vpop.f32.mrf.mxu2 }
 0x130   : > { %v975_v41 = vpop.f32.mrf.mxu0  ;;  %v2166_v42 = vpop.f32.mrf.mxu1 }
 0x131   : > { %v976_v57 = vadd.f32 %v2174_v47, %v975_v41  ;;  %v984_v31 = vadd.f32 %v2174_v47, %v2166_v42 }
 0x135   : > { %v1060_v44 = vpop.f32.mrf.mxu3 }
 0x136   : > { %v1031_v43 = vpop.f32.mrf.mxu2 }
 0x138   : > { %v2168_v45 = vpop.f32.mrf.mxu1  ;;  %v1089_v46 = vpop.f32.mrf.mxu0 }
 0x13d   : > { %v1062_v50 = vpop.f32.mrf.mxu3 }
 0x13e   : > { %v1033_v48 = vpop.f32.mrf.mxu2 }
 0x140   : > { %v1002_v51 = vpop.f32.mrf.mxu1  ;;  %v1091_v53 = vpop.f32.mrf.mxu0 }
 0x141   : > { %v1003_v52 = vadd.f32 %v1002_v51, %v974_v49 }
 0x143   : > { %v1032_v54 = vadd.f32 %v1031_v43, %v1003_v52 }
 0x145   : > { %v1061_v55 = vadd.f32 %v1060_v44, %v1032_v54  ;;  %v1065_v0 = vpop.f32.mrf.mxu3 }
 0x146   : > { %v1036_v60 = vpop.f32.mrf.mxu2 }
 0x147   : > { %v1090_v58 = vadd.f32 %v1089_v46, %v1061_v55  ;;  %v1113_v46 = vld [vmem:[%s2180_s9 + $0x20] sm:$0xff] }
 0x148   : > { %v1004_v61 = vpop.f32.mrf.mxu1  ;;  %v1094_v3 = vpop.f32.mrf.mxu0 }
 0x149   : > { %v1117_v62 = vmul.f32 %v1109_v56, %v1090_v58  ;;  %v1005_v63 = vadd.f32 %v1004_v61, %v976_v57  ;;  %v1114_v58 = vld [vmem:[%s2180_s9 + $0x28] sm:$0xff] }
 0x14a   : > { %v1130_v61 = vld [vmem:[%s2186_s27 + $0x28] sm:$0xff] }
 0x14b   : > { %v1133_v1 = vadd.f32 %v1125_v59, %v1117_v62  ;;  %v1034_v2 = vadd.f32 %v1033_v48, %v1005_v63  ;;  %v986_v48 = vadd.f32 %v2174_v47, %v2168_v45  ;;  %v989_v45 = vadd.f32 %v2174_v47, %v2161_v37 }
 0x14c   : > { %v991_v37 = vadd.f32 %v2174_v47, %v2163_v40 }
 0x14d   : > { %1142 = vst.msk [vmem:[%s2193_s14] sm:$0xff] %vm1141_vm2, %v1133_v1  ;;  %v1063_v4 = vadd.f32 %v1062_v50, %v1034_v2  ;;  %v1067_v15 = vpop.f32.mrf.mxu3  ;;  %v1129_v50 = vld [vmem:[%s2186_s27 + $0x20] sm:$0xff] }
 0x14e   : > { %v1038_v12 = vpop.f32.mrf.mxu2 }
 0x14f   : > { %v1092_v7 = vadd.f32 %v1091_v53, %v1063_v4 }
 0x150   : > { %v1007_v9 = vpop.f32.mrf.mxu1  ;;  %v1096_v18 = vpop.f32.mrf.mxu0 }
 0x151   : > { %v1118_v10 = vmul.f32 %v1110_v5, %v1092_v7  ;;  %v1008_v11 = vadd.f32 %v1007_v9, %v979_v6  ;;  %v1115_v6 = vld [vmem:[%s2180_s9 + $0x30] sm:$0xff] }
 0x153   : > { %v1134_v13 = vadd.f32 %v1126_v8, %v1118_v10  ;;  %v1037_v14 = vadd.f32 %v1036_v60, %v1008_v11  ;;  %v1131_v8 = vld [vmem:[%s2186_s27 + $0x30] sm:$0xff] }
 0x155   : > { %1143 = vst.msk [vmem:[%s2193_s14 + $0x8] sm:$0xff] %vm1141_vm2, %v1134_v13  ;;  %v1066_v16 = vadd.f32 %v1065_v0, %v1037_v14  ;;  %v1070_v29 = vpop.f32.mrf.mxu3 }
 0x156   : > { %v1041_v27 = vpop.f32.mrf.mxu2 }
 0x157   : > { %v1095_v20 = vadd.f32 %v1094_v3, %v1066_v16  ;;  %v1116_v16 = vld [vmem:[%s2180_s9 + $0x38] sm:$0xff] }
 0x158   : > { %v1009_v22 = vpop.f32.mrf.mxu1  ;;  %v1099_v34 = vpop.f32.mrf.mxu0 }
 0x159   : > { %v1119_v23 = vmul.f32 %v1111_v17, %v1095_v20  ;;  %v1010_v24 = vadd.f32 %v1009_v22, %v981_v19 }
 0x15b   : > { %v1135_v25 = vadd.f32 %v1127_v21, %v1119_v23  ;;  %v1039_v26 = vadd.f32 %v1038_v12, %v1010_v24 }
 0x15d   : > { %1144 = vst.msk [vmem:[%s2193_s14 + $0x10] sm:$0xff] %vm1141_vm2, %v1135_v25  ;;  %v1068_v28 = vadd.f32 %v1067_v15, %v1039_v26  ;;  %v1072_v49 = vpop.f32.mrf.mxu3 }
 0x15e   : > { %v1043_v44 = vpop.f32.mrf.mxu2 }
 0x15f   : > { %v1097_v32 = vadd.f32 %v1096_v18, %v1068_v28  ;;  %v1132_v18 = vld [vmem:[%s2186_s27 + $0x38] sm:$0xff] }
 0x160   : > { %v1012_v35 = vpop.f32.mrf.mxu1  ;;  %v1101_v54 = vpop.f32.mrf.mxu0 }
 0x161   : > { %v1120_v36 = vmul.f32 %v1112_v30, %v1097_v32  ;;  %v1013_v38 = vadd.f32 %v1012_v35, %v984_v31 }
 0x163   : > { %v1136_v39 = vadd.f32 %v1128_v33, %v1120_v36  ;;  %v1042_v41 = vadd.f32 %v1041_v27, %v1013_v38 }
 0x165   : > { %1145 = vst.msk [vmem:[%s2193_s14 + $0x18] sm:$0xff] %vm1141_vm2, %v1136_v39  ;;  %v1071_v43 = vadd.f32 %v1070_v29, %v1042_v41  ;;  %v1075_v1 = vpop.f32.mrf.mxu3 }
 0x166   : > { %v1046_v60 = vpop.f32.mrf.mxu2 }
 0x167   : > { %v1100_v42 = vadd.f32 %v1099_v34, %v1071_v43 }
 0x168   : > { %v1014_v51 = vpop.f32.mrf.mxu1  ;;  %v1104_v4 = vpop.f32.mrf.mxu0 }
 0x169   : > { %v1121_v52 = vmul.f32 %v1113_v46, %v1100_v42  ;;  %v1015_v53 = vadd.f32 %v1014_v51, %v986_v48 }
 0x16b   : > { %v1137_v55 = vadd.f32 %v1129_v50, %v1121_v52  ;;  %v1044_v56 = vadd.f32 %v1043_v44, %v1015_v53 }
 0x16d   : > { %1146 = vst.msk [vmem:[%s2193_s14 + $0x20] sm:$0xff] %vm1141_vm2, %v1137_v55  ;;  %v1073_v57 = vadd.f32 %v1072_v49, %v1044_v56  ;;  %v1077_v15 = vpop.f32.mrf.mxu3 }
 0x16e   : > { %v1048_v12 = vpop.f32.mrf.mxu2 }
 0x16f   : > { %v1102_v59 = vadd.f32 %v1101_v54, %v1073_v57 }
 0x170   : > { %v1017_v62 = vpop.f32.mrf.mxu1  ;;  %v1106_v47 = vpop.f32.mrf.mxu0 }
 0x171   : > { %v1122_v63 = vmul.f32 %v1114_v58, %v1102_v59  ;;  %v1018_v0 = vadd.f32 %v1017_v62, %v989_v45 }
 0x173   : > { %v1138_v2 = vadd.f32 %v1130_v61, %v1122_v63  ;;  %v1047_v3 = vadd.f32 %v1046_v60, %v1018_v0 }
 0x175   : > { %1147 = vst.msk [vmem:[%s2193_s14 + $0x28] sm:$0xff] %vm1141_vm2, %v1138_v2  ;;  %v1076_v5 = vadd.f32 %v1075_v1, %v1047_v3 }
 0x177   : > { %v1105_v7 = vadd.f32 %v1104_v4, %v1076_v5 }
 0x178   : > { %v1019_v9 = vpop.f32.mrf.mxu1 }
 0x179   : > { %v1123_v10 = vmul.f32 %v1115_v6, %v1105_v7  ;;  %v1020_v11 = vadd.f32 %v1019_v9, %v991_v37 }
 0x17b   : > { %v1139_v13 = vadd.f32 %v1131_v8, %v1123_v10  ;;  %v1049_v14 = vadd.f32 %v1048_v12, %v1020_v11 }
 0x17d   : > { %1148 = vst.msk [vmem:[%s2193_s14 + $0x30] sm:$0xff] %vm1141_vm2, %v1139_v13  ;;  %v1078_v40 = vadd.f32 %v1077_v15, %v1049_v14 }
 0x17f   : > { %v1107_v17 = vadd.f32 %v1106_v47, %v1078_v40 }
 0x181   : > { %v1124_v19 = vmul.f32 %v1116_v16, %v1107_v17 }
 0x183   : > { %v1140_v20 = vadd.f32 %v1132_v18, %v1124_v19 }
 0x185   : > { %1149 = vst.msk [vmem:[%s2193_s14 + $0x38] sm:$0xff] %vm1141_vm2, %v1140_v20 }
 0x186   : > { %1677 = shalt.err (!%p1674_p7)
}
 0x187   : > { %s1747_s12 = smov 128   ;;  %s1748_s14 = smov 8  }
 0x188   : > { %1575 = dma.vmem_to_hbm [thread:$0]  (%p1830_p3), %s1167_s10, 1024, %s1169_s26, %s1151_s13, %s1747_s12, %s1747_s12, %s1748_s14  }
 0x189 PF: > { %p1581_p9 = scmp.ge.s32.totalorder %s1744_s25, 2  ;;  %s1183_s30 = sand.u32 1, %s1716_s18  }
 0x18a   : > { %s1184_s8 = scalar_lea.sflag [#allocation4], %s1183_s30 }
 0x18b   : > { %p1578_p10 = pnand %p1581_p9, %p1839_p8 }
 0x18d   : > { %p1579_p11 = pneg %p1578_p10 }
 0x18f   : > { %1711 = dma.done.wait (%p1579_p11), %s1184_s8, 1024  }
 0x190   : > { %1713 = vsyncadd (%p1579_p11), %s1184_s8, 4294966272  ;;  %s18_s25 = sadd.s32 1, %s1744_s25   ;;  %s2289_s18 = smov %s1720_s19 }
 0x191   : > { %p15_p12 = scmp.ge.s32.totalorder %s18_s25, 10   ;;  %s2290_s19 = smov %s1724_s20 }
 0x192   : > { %s2291_s20 = smov %s1848_s11  ;;  %s2292_s21 = smov %s1736_s23 }
 0x193   : > { %s2293_s22 = smov %s1740_s24  ;;  %s2294_s23 = smov %s2297_s28 }
 0x194   : > { %s2295_s24 = smov %s2301_s29  ;;  %17 = sbr.rel (!%p15_p12) target bundleno = 5 (0x5), region = 84 }
 0x199   :  { %1190 = vsyncpa [#allocation4], 1 }
 0x19a   :  { %1192 = vsyncpa [#allocation4 + $0x1], 1 }

</bundles_post_ra>
